<compile_context>
chip_gen: v6e
topology: v6e:2x2x1
jax: 0.10.0
libtpu: 0.0.40
codegen_flags: <defaults>
</compile_context>

<pallas_src>
import functools
import math

import jax
import jax.numpy as jnp
from jax.experimental import pallas as pl
from jax.experimental.pallas import tpu as pltpu

NEG_INF = -1e9  # matches the PyTorch masked_fill value


def _cosine_norm_f32(x):
    """x / max(||x||_2, 1e-6) along the last axis, computed in f32."""
    ss = jnp.sum(x * x, axis=-1, keepdims=True)
    # max(sqrt(ss), 1e-6) == sqrt(max(ss, 1e-12)) for ss >= 0
    return x * jax.lax.rsqrt(jnp.maximum(ss, 1e-12))


# ----------------------------------------------------------------------------------
# Kernel A: fused QKV projection + cosine-norm q/k + flash attention (online softmax)
# ----------------------------------------------------------------------------------
def _attn_kernel(xq_ref, xkv_ref, wq_ref, wk_ref, wv_ref, sqk_ref, mask_ref,
                 ctx_ref, q_sc, m_sc, l_sc, acc_sc, *, qk_scale):
    kv = pl.program_id(3)
    cdt = xkv_ref.dtype  # compute dtype for MXU operands (bf16 in the demo)

    @pl.when(kv == 0)
    def _init():
        xq = xq_ref[0]                                                        # (tq, D)
        q = jnp.dot(xq, wq_ref[...], preferred_element_type=jnp.float32)      # (tq, Dh) f32
        q = _cosine_norm_f32(q) * sqk_ref[0].astype(jnp.float32)              # cos-norm + s_qk
        q_sc[...] = (q * qk_scale).astype(cdt)                                # fold sqrt(head_dim)
        m_sc[...] = jnp.full(m_sc.shape, -jnp.inf, m_sc.dtype)
        l_sc[...] = jnp.zeros(l_sc.shape, l_sc.dtype)
        acc_sc[...] = jnp.zeros(acc_sc.shape, acc_sc.dtype)

    # K / V projection for this kv tile (cosine-norm K in f32, cast back for the MXU).
    xkv = xkv_ref[0]                                                          # (tk, D)
    k = jnp.dot(xkv, wk_ref[...], preferred_element_type=jnp.float32)
    k = (_cosine_norm_f32(k) * sqk_ref[0].astype(jnp.float32)).astype(cdt)    # (tk, Dh)
    v = jnp.dot(xkv, wv_ref[...], preferred_element_type=jnp.float32).astype(cdt)

    # Scores (tq, tk) in f32; contraction over head_dim of both operands (no transpose).
    s = jax.lax.dot_general(q_sc[...], k, (((1,), (1,)), ((), ())),
                            preferred_element_type=jnp.float32)
    masked = mask_ref[0] != 0                                                 # (1, tk)
    s = jnp.where(masked, NEG_INF, s)                                         # fill BEFORE max

    # Online softmax update (all f32, resident in scratch across the kv axis).
    m_prev = m_sc[...]
    m_new = jnp.maximum(m_prev, jnp.max(s, axis=-1, keepdims=True))
    alpha = jnp.exp(m_prev - m_new)
    p = jnp.exp(s - m_new)
    l_sc[...] = alpha * l_sc[...] + jnp.sum(p, axis=-1, keepdims=True)
    acc_sc[...] = alpha * acc_sc[...] + jnp.dot(p.astype(cdt), v,
                                                preferred_element_type=jnp.float32)
    m_sc[...] = m_new

    @pl.when(kv == pl.num_programs(3) - 1)
    def _finalize():
        inv_l = pl.reciprocal(jnp.maximum(l_sc[...], 1e-30), approx=True)
        ctx_ref[0] = (acc_sc[...] * inv_l).astype(ctx_ref.dtype)


# ----------------------------------------------------------------------------------
# Kernel B: Wo projection + cosine_norm + residual lerp + cosine_norm
# ----------------------------------------------------------------------------------
def _attn_out_residual_kernel(ctx_ref, h_ref, wo_ref, alpha_ref, out_ref):
    ctx = ctx_ref[0]                                                          # (tq, H*Dh)
    attn_out = jnp.dot(ctx, wo_ref[...], preferred_element_type=jnp.float32)  # (tq, D)
    h_a = _cosine_norm_f32(attn_out)
    h = h_ref[0].astype(jnp.float32)
    a = alpha_ref[...].astype(jnp.float32)                                    # (1, D)
    out_ref[0] = _cosine_norm_f32(h + a * (h_a - h)).astype(out_ref.dtype)


# ----------------------------------------------------------------------------------
# Kernel C: gated MLP + cosine_norm + residual lerp + cosine_norm
# ----------------------------------------------------------------------------------
def _mlp_residual_kernel(h_ref, wup_ref, wgate_ref, wdown_ref, su_ref, sv_ref,
                         alpha_ref, out_ref, *, mlp_scale):
    cdt = h_ref.dtype
    h = h_ref[0]                                                              # (tq, D)
    u = jnp.dot(h, wup_ref[...], preferred_element_type=jnp.float32)
    g = jnp.dot(h, wgate_ref[...], preferred_element_type=jnp.float32)
    u = u * su_ref[...].astype(jnp.float32)
    g = g * (sv_ref[...].astype(jnp.float32) * mlp_scale)
    sig = 1.0 / (1.0 + jnp.exp(-g))                                           # silu via EUP exp
    hidden = (u * g * sig).astype(cdt)
    mlp_out = jnp.dot(hidden, wdown_ref[...], preferred_element_type=jnp.float32)
    h_m = _cosine_norm_f32(mlp_out)
    hf = h.astype(jnp.float32)
    a = alpha_ref[...].astype(jnp.float32)
    out_ref[0] = _cosine_norm_f32(hf + a * (h_m - hf)).astype(out_ref.dtype)


# ----------------------------------------------------------------------------------
# Wrapper: the full Layer forward (attention block + MLP block)
# ----------------------------------------------------------------------------------
def ngpt_layer_forward(h, mask, params, *, num_heads, block_q=128, block_kv=128,
                       vmem_limit_bytes=48 * 1024 * 1024, interpret=False):
    B, S, D = h.shape
    Dh = D // num_heads
    HD = num_heads * Dh
    Hd = params["wup"].shape[1]
    assert S % block_q == 0 and S % block_kv == 0, "seq_len must be divisible by tiles"
    assert Dh % 128 == 0 and D % 128 == 0 and Hd % 128 == 0, "dims must be 128-aligned"

    f32 = jnp.float32
    sqrt_dim = math.sqrt(D)
    # Scale.forward(): s * (init / scale)
    s_qk_eff = (params["s_qk"].astype(f32) * sqrt_dim).reshape(num_heads, 1, Dh)
    alpha_a_eff = (params["alpha_a"].astype(f32) * (0.05 * sqrt_dim)).reshape(1, D)
    alpha_m_eff = (params["alpha_m"].astype(f32) * (0.05 * sqrt_dim)).reshape(1, D)
    s_u_eff = params["s_u"].astype(f32).reshape(1, Hd)
    s_v_eff = params["s_v"].astype(f32).reshape(1, Hd)

    mask3 = mask.reshape(B, 1, S).astype(jnp.int32)   # thin (B, 1, S) key mask

    nq, nk = S // block_q, S // block_kv

    attn_cp = pltpu.CompilerParams(
        dimension_semantics=("parallel", "parallel", "parallel", "arbitrary"),
        vmem_limit_bytes=vmem_limit_bytes)
    ew_cp = pltpu.CompilerParams(
        dimension_semantics=("parallel", "parallel"),
        vmem_limit_bytes=vmem_limit_bytes)

    # ---- Kernel A: fused flash attention, per-head context -> (B, S, H*Dh) ----
    ctx = pl.pallas_call(
        functools.partial(_attn_kernel, qk_scale=math.sqrt(Dh)),
        out_shape=jax.ShapeDtypeStruct((B, S, HD), h.dtype),
        grid_spec=pltpu.PrefetchScalarGridSpec(
            num_scalar_prefetch=0,
            grid=(B, num_heads, nq, nk),
            in_specs=[
                pl.BlockSpec((1, block_q, D),  lambda b, hh, qi, ki: (b, qi, 0)),  # x (queries)
                pl.BlockSpec((1, block_kv, D), lambda b, hh, qi, ki: (b, ki, 0)),  # x (keys/vals)
                pl.BlockSpec((D, Dh),          lambda b, hh, qi, ki: (0, hh)),     # Wq head slice
                pl.BlockSpec((D, Dh),          lambda b, hh, qi, ki: (0, hh)),     # Wk head slice
                pl.BlockSpec((D, Dh),          lambda b, hh, qi, ki: (0, hh)),     # Wv head slice
                pl.BlockSpec((1, 1, Dh),       lambda b, hh, qi, ki: (hh, 0, 0)),  # s_qk (eff.)
                pl.BlockSpec((1, 1, block_kv), lambda b, hh, qi, ki: (b, 0, ki)),  # key mask
            ],
            out_specs=pl.BlockSpec((1, block_q, Dh), lambda b, hh, qi, ki: (b, qi, hh)),
            scratch_shapes=[
                pltpu.VMEM((block_q, Dh), h.dtype),      # normalized+scaled q (resident)
                pltpu.VMEM((block_q, 1), jnp.float32),   # running max m
                pltpu.VMEM((block_q, 1), jnp.float32),   # running sum l
                pltpu.VMEM((block_q, Dh), jnp.float32),  # f32 output accumulator
            ]),
        compiler_params=attn_cp,
        interpret=interpret,
    )(h, h, params["wq"], params["wk"], params["wv"], s_qk_eff, mask3)

    # ---- Kernel B: Wo + cosine_norm + residual lerp + cosine_norm ----
    h1 = pl.pallas_call(
        _attn_out_residual_kernel,
        out_shape=jax.ShapeDtypeStruct((B, S, D), h.dtype),
        grid_spec=pltpu.PrefetchScalarGridSpec(
            num_scalar_prefetch=0,
            grid=(B, nq),
            in_specs=[
                pl.BlockSpec((1, block_q, HD), lambda b, qi: (b, qi, 0)),
                pl.BlockSpec((1, block_q, D),  lambda b, qi: (b, qi, 0)),
                pl.BlockSpec((HD, D),          lambda b, qi: (0, 0)),
                pl.BlockSpec((1, D),           lambda b, qi: (0, 0)),
            ],
            out_specs=pl.BlockSpec((1, block_q, D), lambda b, qi: (b, qi, 0))),
        compiler_params=ew_cp,
        interpret=interpret,
    )(ctx, h, params["wo"], alpha_a_eff)

    # ---- Kernel C: gated MLP + cosine_norm + residual lerp + cosine_norm ----
    out = pl.pallas_call(
        functools.partial(_mlp_residual_kernel, mlp_scale=math.sqrt(D)),
        out_shape=jax.ShapeDtypeStruct((B, S, D), h.dtype),
        grid_spec=pltpu.PrefetchScalarGridSpec(
            num_scalar_prefetch=0,
            grid=(B, nq),
            in_specs=[
                pl.BlockSpec((1, block_q, D), lambda b, qi: (b, qi, 0)),
                pl.BlockSpec((D, Hd),         lambda b, qi: (0, 0)),
                pl.BlockSpec((D, Hd),         lambda b, qi: (0, 0)),
                pl.BlockSpec((Hd, D),         lambda b, qi: (0, 0)),
                pl.BlockSpec((1, Hd),         lambda b, qi: (0, 0)),
                pl.BlockSpec((1, Hd),         lambda b, qi: (0, 0)),
                pl.BlockSpec((1, D),          lambda b, qi: (0, 0)),
            ],
            out_specs=pl.BlockSpec((1, block_q, D), lambda b, qi: (b, qi, 0))),
        compiler_params=ew_cp,
        interpret=interpret,
    )(h1, params["wup"], params["wgate"], params["wdown"], s_u_eff, s_v_eff, alpha_m_eff)

    return out


# ----------------------------------------------------------------------------------
# Pure-JAX reference (mirrors the PyTorch module, f32 math) for a sanity check
# ----------------------------------------------------------------------------------
def _reference_layer(h, mask, params, *, num_heads):
    f32 = jnp.float32
    x = h.astype(f32)
    B, S, D = x.shape
    Dh = D // num_heads

    def cos_norm(v):
        n = jnp.sqrt(jnp.sum(v * v, axis=-1, keepdims=True))
        return v / jnp.maximum(n, 1e-6)

    q = (x @ params["wq"].astype(f32)).reshape(B, S, num_heads, Dh)
    k = (x @ params["wk"].astype(f32)).reshape(B, S, num_heads, Dh)
    v = (x @ params["wv"].astype(f32)).reshape(B, S, num_heads, Dh)
    sqk = params["s_qk"].astype(f32) * math.sqrt(D)                 # (H, Dh)
    q = cos_norm(q) * sqk[None, None]
    k = cos_norm(k) * sqk[None, None]
    q, k, v = (t.transpose(0, 2, 1, 3) for t in (q, k, v))          # (B, H, S, Dh)
    logits = jnp.einsum("bhqd,bhkd->bhqk", q, k) * math.sqrt(Dh)
    logits = jnp.where(mask[:, None, None, :] != 0, NEG_INF, logits)
    ctx = jnp.einsum("bhqk,bhkd->bhqd", jax.nn.softmax(logits, axis=-1), v)
    ctx = ctx.transpose(0, 2, 1, 3).reshape(B, S, num_heads * Dh)
    h_a = cos_norm(ctx @ params["wo"].astype(f32))
    alpha_a = params["alpha_a"].astype(f32) * (0.05 * math.sqrt(D))
    h1 = cos_norm(x + alpha_a * (h_a - x))
    u = (h1 @ params["wup"].astype(f32)) * params["s_u"].astype(f32)
    g = (h1 @ params["wgate"].astype(f32)) * params["s_v"].astype(f32) * math.sqrt(D)
    hidden = u * jax.nn.silu(g)
    h_m = cos_norm(hidden @ params["wdown"].astype(f32))
    alpha_m = params["alpha_m"].astype(f32) * (0.05 * math.sqrt(D))
    return cos_norm(h1 + alpha_m * (h_m - h1))


if __name__ == "__main__":
    key = jax.random.PRNGKey(0)
    B, S, D, H = 2, 256, 256, 2
    Dh = D // H
    mlp_hidden_mult = 3
    Hd = int(D * mlp_hidden_mult * 2 / 3)       # 512

    keys = jax.random.split(key, 14)
    dt = jnp.bfloat16

    def w(k, shape, scale):
        return (jax.random.normal(k, shape, jnp.float32) * scale).astype(dt)

    init = 1.0 / math.sqrt(D)
    params = dict(
        # Linear weights, pre-transposed to (in_dim, out_dim): y = x @ W
        wq=w(keys[0], (D, H * Dh), init),
        wk=w(keys[1], (D, H * Dh), init),
        wv=w(keys[2], (D, H * Dh), init),
        wo=w(keys[3], (H * Dh, D), init),
        wup=w(keys[4], (D, Hd), init),
        wgate=w(keys[5], (D, Hd), init),
        wdown=w(keys[6], (Hd, D), 1.0 / math.sqrt(Hd)),
        # raw Scale.s parameters; Scale.forward() is applied in the wrapper
        s_qk=(1.0 / math.sqrt(D)) * (1.0 + 0.1 * jax.random.normal(keys[7], (H, Dh), jnp.float32)),
        alpha_a=(1.0 / math.sqrt(D)) * (1.0 + 0.1 * jax.random.normal(keys[8], (1, D), jnp.float32)),
        alpha_m=(1.0 / math.sqrt(D)) * (1.0 + 0.1 * jax.random.normal(keys[9], (1, D), jnp.float32)),
        s_u=1.0 + 0.1 * jax.random.normal(keys[10], (1, Hd), jnp.float32),
        s_v=1.0 + 0.1 * jax.random.normal(keys[11], (1, Hd), jnp.float32),
    )

    # nGPT keeps hidden states on the unit hypersphere: start from normalized input.
    x = jax.random.normal(keys[12], (B, S, D), jnp.float32)
    x = (x / jnp.linalg.norm(x, axis=-1, keepdims=True)).astype(dt)

    # Key-padding mask: nonzero == masked key (matches PyTorch masked_fill semantics).
    lengths = jnp.array([S, S - 64], jnp.int32)
    mask = (jnp.arange(S)[None, :] >= lengths[:, None]).astype(jnp.int32)    # (B, S)

    fwd = jax.jit(functools.partial(ngpt_layer_forward, num_heads=H))
    out = jax.block_until_ready(fwd(x, mask, params))

    ref = _reference_layer(x, mask, params, num_heads=H)
    out_f32 = out.astype(jnp.float32)
    err = float(jnp.max(jnp.abs(out_f32 - ref)))
    assert out.shape == (B, S, D)
    assert not bool(jnp.any(jnp.isnan(out_f32))), "NaN in kernel output"
    assert err < 3e-2, f"max abs error vs reference too large: {err}"
    print("KERNEL_OK")
</pallas_src>

<mosaic_0001>
module attributes {stable_mosaic.version = 11 : i64} {
  func.func @_attn_kernel(%arg0: i32, %arg1: i32, %arg2: i32, %arg3: i32, %arg4: memref<1x128x256xbf16, #tpu.memory_space<vmem>>, %arg5: memref<1x128x256xbf16, #tpu.memory_space<vmem>>, %arg6: memref<256x128xbf16, #tpu.memory_space<vmem>>, %arg7: memref<256x128xbf16, #tpu.memory_space<vmem>>, %arg8: memref<256x128xbf16, #tpu.memory_space<vmem>>, %arg9: memref<1x1x128xf32, #tpu.memory_space<vmem>>, %arg10: memref<1x1x128xi32, #tpu.memory_space<vmem>>, %arg11: memref<1x128x128xbf16, #tpu.memory_space<vmem>>, %arg12: memref<128x128xbf16, #tpu.memory_space<vmem>>, %arg13: memref<128x1xf32, #tpu.memory_space<vmem>>, %arg14: memref<128x1xf32, #tpu.memory_space<vmem>>, %arg15: memref<128x128xf32, #tpu.memory_space<vmem>>) attributes {dimension_semantics = [#tpu.dimension_semantics<parallel>, #tpu.dimension_semantics<parallel>, #tpu.dimension_semantics<parallel>, #tpu.dimension_semantics<arbitrary>], iteration_bounds = array<i64: 2, 2, 2, 2>, scalar_prefetch = 0 : i64, scratch_operands = 4 : i64, tpu.core_type = #tpu.core_type<tc>, window_params = [{transform_indices = @transform_0, window_bounds = array<i64: 1, 128, 256>}, {transform_indices = @transform_1, window_bounds = array<i64: 1, 128, 256>}, {transform_indices = @transform_2, window_bounds = array<i64: 256, 128>}, {transform_indices = @transform_3, window_bounds = array<i64: 256, 128>}, {transform_indices = @transform_4, window_bounds = array<i64: 256, 128>}, {transform_indices = @transform_5, window_bounds = array<i64: 1, 1, 128>}, {transform_indices = @transform_6, window_bounds = array<i64: 1, 1, 128>}, {transform_indices = @transform_7, window_bounds = array<i64: 1, 128, 128>}]} {
    %c0_i32 = arith.constant 0 : i32
    %0 = arith.cmpi eq, %arg3, %c0_i32 : i32
    %1 = arith.extui %0 : i1 to i32
    %c0_i32_0 = arith.constant 0 : i32
    %2 = arith.cmpi ne, %1, %c0_i32_0 : i32
    scf.if %2 {
      %c0_37 = arith.constant 0 : index
      %c0_38 = arith.constant 0 : index
      %c0_39 = arith.constant 0 : index
      %59 = vector.load %arg4[%c0_37, %c0_38, %c0_39] : memref<1x128x256xbf16, #tpu.memory_space<vmem>>, vector<1x128x256xbf16>
      %60 = vector.shape_cast %59 : vector<1x128x256xbf16> to vector<128x256xbf16>
      %c0_40 = arith.constant 0 : index
      %c0_41 = arith.constant 0 : index
      %61 = vector.load %arg6[%c0_40, %c0_41] : memref<256x128xbf16, #tpu.memory_space<vmem>>, vector<256x128xbf16>
      %cst_42 = arith.constant dense<0.000000e+00> : vector<128x128xf32>
      %62 = tpu.matmul %60, %61, %cst_42 {dimension_numbers = #tpu.dot_dimension_numbers<[1], [0], [0], [1], [0, 0, 1, 1], [], []>} : vector<128x256xbf16>, vector<256x128xbf16>, vector<128x128xf32> -> vector<128x128xf32>
      %63 = arith.mulf %62, %62 : vector<128x128xf32>
      %cst_43 = arith.constant dense<0.000000e+00> : vector<128xf32>
      %64 = vector.multi_reduction <add>, %63, %cst_43 [1] : vector<128x128xf32> to vector<128xf32>
      %65 = vector.shape_cast %64 : vector<128xf32> to vector<128x1xf32>
      %cst_44 = arith.constant 9.99999996E-13 : f32
      %66 = vector.broadcast %cst_44 : f32 to vector<128x1xf32>
      %67 = arith.maximumf %65, %66 : vector<128x1xf32>
      %68 = math.rsqrt %67 : vector<128x1xf32>
      %69 = vector.broadcast %68 : vector<128x1xf32> to vector<128x128xf32>
      %70 = arith.mulf %62, %69 : vector<128x128xf32>
      %c0_45 = arith.constant 0 : index
      %c0_46 = arith.constant 0 : index
      %c0_47 = arith.constant 0 : index
      %71 = vector.load %arg9[%c0_45, %c0_46, %c0_47] : memref<1x1x128xf32, #tpu.memory_space<vmem>>, vector<1x1x128xf32>
      %72 = vector.shape_cast %71 : vector<1x1x128xf32> to vector<1x128xf32>
      %73 = vector.broadcast %72 : vector<1x128xf32> to vector<128x128xf32>
      %74 = arith.mulf %70, %73 : vector<128x128xf32>
      %cst_48 = arith.constant 11.3137083 : f32
      %75 = vector.broadcast %cst_48 : f32 to vector<128x128xf32>
      %76 = arith.mulf %74, %75 : vector<128x128xf32>
      %77 = arith.truncf %76 : vector<128x128xf32> to vector<128x128xbf16>
      %c0_49 = arith.constant 0 : index
      %c0_50 = arith.constant 0 : index
      %78 = vector.load %arg12[%c0_49, %c0_50] : memref<128x128xbf16, #tpu.memory_space<vmem>>, vector<128x128xbf16>
      tpu.vector_store %arg12[%c0_49, %c0_50], %77 {strides = array<i32>} : memref<128x128xbf16, #tpu.memory_space<vmem>>, vector<128x128xbf16>,
      %cst_51 = arith.constant 0xFF800000 : f32
      %79 = vector.broadcast %cst_51 : f32 to vector<128x1xf32>
      %c0_52 = arith.constant 0 : index
      %c0_53 = arith.constant 0 : index
      %80 = vector.load %arg13[%c0_52, %c0_53] : memref<128x1xf32, #tpu.memory_space<vmem>>, vector<128x1xf32>
      tpu.vector_store %arg13[%c0_52, %c0_53], %79 {strides = array<i32>} : memref<128x1xf32, #tpu.memory_space<vmem>>, vector<128x1xf32>,
      %cst_54 = arith.constant 0.000000e+00 : f32
      %81 = vector.broadcast %cst_54 : f32 to vector<128x1xf32>
      %c0_55 = arith.constant 0 : index
      %c0_56 = arith.constant 0 : index
      %82 = vector.load %arg14[%c0_55, %c0_56] : memref<128x1xf32, #tpu.memory_space<vmem>>, vector<128x1xf32>
      tpu.vector_store %arg14[%c0_55, %c0_56], %81 {strides = array<i32>} : memref<128x1xf32, #tpu.memory_space<vmem>>, vector<128x1xf32>,
      %cst_57 = arith.constant 0.000000e+00 : f32
      %83 = vector.broadcast %cst_57 : f32 to vector<128x128xf32>
      %c0_58 = arith.constant 0 : index
      %c0_59 = arith.constant 0 : index
      %84 = vector.load %arg15[%c0_58, %c0_59] : memref<128x128xf32, #tpu.memory_space<vmem>>, vector<128x128xf32>
      tpu.vector_store %arg15[%c0_58, %c0_59], %83 {strides = array<i32>} : memref<128x128xf32, #tpu.memory_space<vmem>>, vector<128x128xf32>,
    } else {
    }
    %c0 = arith.constant 0 : index
    %c0_1 = arith.constant 0 : index
    %c0_2 = arith.constant 0 : index
    %3 = vector.load %arg5[%c0, %c0_1, %c0_2] : memref<1x128x256xbf16, #tpu.memory_space<vmem>>, vector<1x128x256xbf16>
    %4 = vector.shape_cast %3 : vector<1x128x256xbf16> to vector<128x256xbf16>
    %c0_3 = arith.constant 0 : index
    %c0_4 = arith.constant 0 : index
    %5 = vector.load %arg7[%c0_3, %c0_4] : memref<256x128xbf16, #tpu.memory_space<vmem>>, vector<256x128xbf16>
    %cst = arith.constant dense<0.000000e+00> : vector<128x128xf32>
    %6 = tpu.matmul %4, %5, %cst {dimension_numbers = #tpu.dot_dimension_numbers<[1], [0], [0], [1], [0, 0, 1, 1], [], []>} : vector<128x256xbf16>, vector<256x128xbf16>, vector<128x128xf32> -> vector<128x128xf32>
    %7 = arith.mulf %6, %6 : vector<128x128xf32>
    %cst_5 = arith.constant dense<0.000000e+00> : vector<128xf32>
    %8 = vector.multi_reduction <add>, %7, %cst_5 [1] : vector<128x128xf32> to vector<128xf32>
    %9 = vector.shape_cast %8 : vector<128xf32> to vector<128x1xf32>
    %cst_6 = arith.constant 9.99999996E-13 : f32
    %10 = vector.broadcast %cst_6 : f32 to vector<128x1xf32>
    %11 = arith.maximumf %9, %10 : vector<128x1xf32>
    %12 = math.rsqrt %11 : vector<128x1xf32>
    %13 = vector.broadcast %12 : vector<128x1xf32> to vector<128x128xf32>
    %14 = arith.mulf %6, %13 : vector<128x128xf32>
    %c0_7 = arith.constant 0 : index
    %c0_8 = arith.constant 0 : index
    %c0_9 = arith.constant 0 : index
    %15 = vector.load %arg9[%c0_7, %c0_8, %c0_9] : memref<1x1x128xf32, #tpu.memory_space<vmem>>, vector<1x1x128xf32>
    %16 = vector.shape_cast %15 : vector<1x1x128xf32> to vector<1x128xf32>
    %17 = vector.broadcast %16 : vector<1x128xf32> to vector<128x128xf32>
    %18 = arith.mulf %14, %17 : vector<128x128xf32>
    %19 = arith.truncf %18 : vector<128x128xf32> to vector<128x128xbf16>
    %c0_10 = arith.constant 0 : index
    %c0_11 = arith.constant 0 : index
    %20 = vector.load %arg8[%c0_10, %c0_11] : memref<256x128xbf16, #tpu.memory_space<vmem>>, vector<256x128xbf16>
    %cst_12 = arith.constant dense<0.000000e+00> : vector<128x128xf32>
    %21 = tpu.matmul %4, %20, %cst_12 {dimension_numbers = #tpu.dot_dimension_numbers<[1], [0], [0], [1], [0, 0, 1, 1], [], []>} : vector<128x256xbf16>, vector<256x128xbf16>, vector<128x128xf32> -> vector<128x128xf32>
    %22 = arith.truncf %21 : vector<128x128xf32> to vector<128x128xbf16>
    %c0_13 = arith.constant 0 : index
    %c0_14 = arith.constant 0 : index
    %23 = vector.load %arg12[%c0_13, %c0_14] : memref<128x128xbf16, #tpu.memory_space<vmem>>, vector<128x128xbf16>
    %cst_15 = arith.constant dense<0.000000e+00> : vector<128x128xf32>
    %24 = tpu.matmul %23, %19, %cst_15 {dimension_numbers = #tpu.dot_dimension_numbers<[1], [1], [0], [0], [0, 0, 1, 0], [], []>} : vector<128x128xbf16>, vector<128x128xbf16>, vector<128x128xf32> -> vector<128x128xf32>
    %c0_16 = arith.constant 0 : index
    %c0_17 = arith.constant 0 : index
    %c0_18 = arith.constant 0 : index
    %25 = vector.load %arg10[%c0_16, %c0_17, %c0_18] : memref<1x1x128xi32, #tpu.memory_space<vmem>>, vector<1x1x128xi32>
    %26 = vector.shape_cast %25 : vector<1x1x128xi32> to vector<1x128xi32>
    %c0_i32_19 = arith.constant 0 : i32
    %27 = vector.broadcast %c0_i32_19 : i32 to vector<1x128xi32>
    %28 = arith.cmpi ne, %26, %27 : vector<1x128xi32>
    %cst_20 = arith.constant -1.000000e+09 : f32
    %29 = vector.shape_cast %28 : vector<1x128xi1> to vector<1x128xi1>
    %30 = vector.broadcast %29 : vector<1x128xi1> to vector<128x128xi1>
    %31 = vector.broadcast %cst_20 : f32 to vector<128x128xf32>
    %32 = arith.select %30, %31, %24 : vector<128x128xi1>, vector<128x128xf32>
    %c0_21 = arith.constant 0 : index
    %c0_22 = arith.constant 0 : index
    %33 = vector.load %arg13[%c0_21, %c0_22] : memref<128x1xf32, #tpu.memory_space<vmem>>, vector<128x1xf32>
    %cst_23 = arith.constant dense<0xFF800000> : vector<128xf32>
    %34 = vector.multi_reduction <maximumf>, %32, %cst_23 [1] : vector<128x128xf32> to vector<128xf32>
    %35 = vector.shape_cast %34 : vector<128xf32> to vector<128x1xf32>
    %36 = arith.maximumf %33, %35 : vector<128x1xf32>
    %37 = arith.subf %33, %36 : vector<128x1xf32>
    %38 = math.exp %37 : vector<128x1xf32>
    %39 = vector.broadcast %36 : vector<128x1xf32> to vector<128x128xf32>
    %40 = arith.subf %32, %39 : vector<128x128xf32>
    %41 = math.exp %40 : vector<128x128xf32>
    %c0_24 = arith.constant 0 : index
    %c0_25 = arith.constant 0 : index
    %42 = vector.load %arg14[%c0_24, %c0_25] : memref<128x1xf32, #tpu.memory_space<vmem>>, vector<128x1xf32>
    %43 = arith.mulf %38, %42 : vector<128x1xf32>
    %cst_26 = arith.constant dense<0.000000e+00> : vector<128xf32>
    %44 = vector.multi_reduction <add>, %41, %cst_26 [1] : vector<128x128xf32> to vector<128xf32>
    %45 = vector.shape_cast %44 : vector<128xf32> to vector<128x1xf32>
    %46 = arith.addf %43, %45 : vector<128x1xf32>
    %c0_27 = arith.constant 0 : index
    %c0_28 = arith.constant 0 : index
    %47 = vector.load %arg14[%c0_27, %c0_28] : memref<128x1xf32, #tpu.memory_space<vmem>>, vector<128x1xf32>
    tpu.vector_store %arg14[%c0_27, %c0_28], %46 {strides = array<i32>} : memref<128x1xf32, #tpu.memory_space<vmem>>, vector<128x1xf32>,
    %c0_29 = arith.constant 0 : index
    %c0_30 = arith.constant 0 : index
    %48 = vector.load %arg15[%c0_29, %c0_30] : memref<128x128xf32, #tpu.memory_space<vmem>>, vector<128x128xf32>
    %49 = vector.broadcast %38 : vector<128x1xf32> to vector<128x128xf32>
    %50 = arith.mulf %49, %48 : vector<128x128xf32>
    %51 = arith.truncf %41 : vector<128x128xf32> to vector<128x128xbf16>
    %cst_31 = arith.constant dense<0.000000e+00> : vector<128x128xf32>
    %52 = tpu.matmul %51, %22, %cst_31 {dimension_numbers = #tpu.dot_dimension_numbers<[1], [0], [0], [1], [0, 0, 1, 1], [], []>} : vector<128x128xbf16>, vector<128x128xbf16>, vector<128x128xf32> -> vector<128x128xf32>
    %53 = arith.addf %50, %52 : vector<128x128xf32>
    %c0_32 = arith.constant 0 : index
    %c0_33 = arith.constant 0 : index
    %54 = vector.load %arg15[%c0_32, %c0_33] : memref<128x128xf32, #tpu.memory_space<vmem>>, vector<128x128xf32>
    tpu.vector_store %arg15[%c0_32, %c0_33], %53 {strides = array<i32>} : memref<128x128xf32, #tpu.memory_space<vmem>>, vector<128x128xf32>,
    %c0_34 = arith.constant 0 : index
    %c0_35 = arith.constant 0 : index
    %55 = vector.load %arg13[%c0_34, %c0_35] : memref<128x1xf32, #tpu.memory_space<vmem>>, vector<128x1xf32>
    tpu.vector_store %arg13[%c0_34, %c0_35], %36 {strides = array<i32>} : memref<128x1xf32, #tpu.memory_space<vmem>>, vector<128x1xf32>,
    %c1_i32 = arith.constant 1 : i32
    %56 = arith.cmpi eq, %arg3, %c1_i32 : i32
    %57 = arith.extui %56 : i1 to i32
    %c0_i32_36 = arith.constant 0 : i32
    %58 = arith.cmpi ne, %57, %c0_i32_36 : i32
    scf.if %58 {
      %c0_37 = arith.constant 0 : index
      %c0_38 = arith.constant 0 : index
      %59 = vector.load %arg14[%c0_37, %c0_38] : memref<128x1xf32, #tpu.memory_space<vmem>>, vector<128x1xf32>
      %cst_39 = arith.constant 1.000000e-30 : f32
      %60 = vector.broadcast %cst_39 : f32 to vector<128x1xf32>
      %61 = arith.maximumf %59, %60 : vector<128x1xf32>
      %62 = tpu.reciprocal %61 {approx = true} : vector<128x1xf32> -> vector<128x1xf32>
      %c0_40 = arith.constant 0 : index
      %c0_41 = arith.constant 0 : index
      %63 = vector.load %arg15[%c0_40, %c0_41] : memref<128x128xf32, #tpu.memory_space<vmem>>, vector<128x128xf32>
      %64 = vector.broadcast %62 : vector<128x1xf32> to vector<128x128xf32>
      %65 = arith.mulf %63, %64 : vector<128x128xf32>
      %66 = arith.truncf %65 : vector<128x128xf32> to vector<128x128xbf16>
      %c0_42 = arith.constant 0 : index
      %c0_43 = arith.constant 0 : index
      %c0_44 = arith.constant 0 : index
      %67 = vector.load %arg11[%c0_42, %c0_43, %c0_44] : memref<1x128x128xbf16, #tpu.memory_space<vmem>>, vector<1x128x128xbf16>
      %68 = vector.shape_cast %67 : vector<1x128x128xbf16> to vector<128x128xbf16>
      %69 = vector.shape_cast %66 : vector<128x128xbf16> to vector<1x128x128xbf16>
      tpu.vector_store %arg11[%c0_42, %c0_43, %c0_44], %69 {strides = array<i32>} : memref<1x128x128xbf16, #tpu.memory_space<vmem>>, vector<1x128x128xbf16>,
    } else {
    }
    return
  }
  func.func @transform_0(%arg0: i32, %arg1: i32, %arg2: i32, %arg3: i32) -> (i32, i32, i32) {
    %c0_i32 = arith.constant 0 : i32
    %c0_i32_0 = arith.constant 0 : i32
    return %arg0, %arg2, %c0_i32 : i32, i32, i32
  }
  func.func @transform_1(%arg0: i32, %arg1: i32, %arg2: i32, %arg3: i32) -> (i32, i32, i32) {
    %c0_i32 = arith.constant 0 : i32
    %c0_i32_0 = arith.constant 0 : i32
    return %arg0, %arg3, %c0_i32 : i32, i32, i32
  }
  func.func @transform_2(%arg0: i32, %arg1: i32, %arg2: i32, %arg3: i32) -> (i32, i32) {
    %c0_i32 = arith.constant 0 : i32
    %c0_i32_0 = arith.constant 0 : i32
    return %c0_i32, %arg1 : i32, i32
  }
  func.func @transform_3(%arg0: i32, %arg1: i32, %arg2: i32, %arg3: i32) -> (i32, i32) {
    %c0_i32 = arith.constant 0 : i32
    %c0_i32_0 = arith.constant 0 : i32
    return %c0_i32, %arg1 : i32, i32
  }
  func.func @transform_4(%arg0: i32, %arg1: i32, %arg2: i32, %arg3: i32) -> (i32, i32) {
    %c0_i32 = arith.constant 0 : i32
    %c0_i32_0 = arith.constant 0 : i32
    return %c0_i32, %arg1 : i32, i32
  }
  func.func @transform_5(%arg0: i32, %arg1: i32, %arg2: i32, %arg3: i32) -> (i32, i32, i32) {
    %c0_i32 = arith.constant 0 : i32
    %c0_i32_0 = arith.constant 0 : i32
    %c0_i32_1 = arith.constant 0 : i32
    return %arg1, %c0_i32, %c0_i32_0 : i32, i32, i32
  }
  func.func @transform_6(%arg0: i32, %arg1: i32, %arg2: i32, %arg3: i32) -> (i32, i32, i32) {
    %c0_i32 = arith.constant 0 : i32
    %c0_i32_0 = arith.constant 0 : i32
    return %arg0, %c0_i32, %arg3 : i32, i32, i32
  }
  func.func @transform_7(%arg0: i32, %arg1: i32, %arg2: i32, %arg3: i32) -> (i32, i32, i32) {
    %c0_i32 = arith.constant 0 : i32
    return %arg0, %arg2, %arg1 : i32, i32, i32
  }
}

module attributes {stable_mosaic.version = 11 : i64} {
  func.func @_attn_out_residual_kernel(%arg0: i32, %arg1: i32, %arg2: memref<1x128x256xbf16, #tpu.memory_space<vmem>>, %arg3: memref<1x128x256xbf16, #tpu.memory_space<vmem>>, %arg4: memref<256x256xbf16, #tpu.memory_space<vmem>>, %arg5: memref<1x256xf32, #tpu.memory_space<vmem>>, %arg6: memref<1x128x256xbf16, #tpu.memory_space<vmem>>) attributes {dimension_semantics = [#tpu.dimension_semantics<parallel>, #tpu.dimension_semantics<parallel>], iteration_bounds = array<i64: 2, 2>, scalar_prefetch = 0 : i64, scratch_operands = 0 : i64, tpu.core_type = #tpu.core_type<tc>, window_params = [{transform_indices = @transform_0, window_bounds = array<i64: 1, 128, 256>}, {transform_indices = @transform_1, window_bounds = array<i64: 1, 128, 256>}, {pipeline_mode = #tpu.pipeline_mode<synchronous>, transform_indices = @transform_2, window_bounds = array<i64: 256, 256>}, {pipeline_mode = #tpu.pipeline_mode<synchronous>, transform_indices = @transform_3, window_bounds = array<i64: 1, 256>}, {transform_indices = @transform_4, window_bounds = array<i64: 1, 128, 256>}]} {
    %c0 = arith.constant 0 : index
    %c0_0 = arith.constant 0 : index
    %c0_1 = arith.constant 0 : index
    %0 = vector.load %arg2[%c0, %c0_0, %c0_1] : memref<1x128x256xbf16, #tpu.memory_space<vmem>>, vector<1x128x256xbf16>
    %1 = vector.shape_cast %0 : vector<1x128x256xbf16> to vector<128x256xbf16>
    %c0_2 = arith.constant 0 : index
    %c0_3 = arith.constant 0 : index
    %2 = vector.load %arg4[%c0_2, %c0_3] : memref<256x256xbf16, #tpu.memory_space<vmem>>, vector<256x256xbf16>
    %cst = arith.constant dense<0.000000e+00> : vector<128x256xf32>
    %3 = tpu.matmul %1, %2, %cst {dimension_numbers = #tpu.dot_dimension_numbers<[1], [0], [0], [1], [0, 0, 1, 1], [], []>} : vector<128x256xbf16>, vector<256x256xbf16>, vector<128x256xf32> -> vector<128x256xf32>
    %4 = arith.mulf %3, %3 : vector<128x256xf32>
    %cst_4 = arith.constant dense<0.000000e+00> : vector<128xf32>
    %5 = vector.multi_reduction <add>, %4, %cst_4 [1] : vector<128x256xf32> to vector<128xf32>
    %6 = vector.shape_cast %5 : vector<128xf32> to vector<128x1xf32>
    %cst_5 = arith.constant 9.99999996E-13 : f32
    %7 = vector.broadcast %cst_5 : f32 to vector<128x1xf32>
    %8 = arith.maximumf %6, %7 : vector<128x1xf32>
    %9 = math.rsqrt %8 : vector<128x1xf32>
    %10 = vector.broadcast %9 : vector<128x1xf32> to vector<128x256xf32>
    %11 = arith.mulf %3, %10 : vector<128x256xf32>
    %c0_6 = arith.constant 0 : index
    %c0_7 = arith.constant 0 : index
    %c0_8 = arith.constant 0 : index
    %12 = vector.load %arg3[%c0_6, %c0_7, %c0_8] : memref<1x128x256xbf16, #tpu.memory_space<vmem>>, vector<1x128x256xbf16>
    %13 = vector.shape_cast %12 : vector<1x128x256xbf16> to vector<128x256xbf16>
    %14 = arith.extf %13 : vector<128x256xbf16> to vector<128x256xf32>
    %c0_9 = arith.constant 0 : index
    %c0_10 = arith.constant 0 : index
    %15 = vector.load %arg5[%c0_9, %c0_10] : memref<1x256xf32, #tpu.memory_space<vmem>>, vector<1x256xf32>
    %16 = arith.subf %11, %14 : vector<128x256xf32>
    %17 = vector.broadcast %15 : vector<1x256xf32> to vector<128x256xf32>
    %18 = arith.mulf %17, %16 : vector<128x256xf32>
    %19 = arith.addf %14, %18 : vector<128x256xf32>
    %20 = arith.mulf %19, %19 : vector<128x256xf32>
    %cst_11 = arith.constant dense<0.000000e+00> : vector<128xf32>
    %21 = vector.multi_reduction <add>, %20, %cst_11 [1] : vector<128x256xf32> to vector<128xf32>
    %22 = vector.shape_cast %21 : vector<128xf32> to vector<128x1xf32>
    %cst_12 = arith.constant 9.99999996E-13 : f32
    %23 = vector.broadcast %cst_12 : f32 to vector<128x1xf32>
    %24 = arith.maximumf %22, %23 : vector<128x1xf32>
    %25 = math.rsqrt %24 : vector<128x1xf32>
    %26 = vector.broadcast %25 : vector<128x1xf32> to vector<128x256xf32>
    %27 = arith.mulf %19, %26 : vector<128x256xf32>
    %28 = arith.truncf %27 : vector<128x256xf32> to vector<128x256xbf16>
    %c0_13 = arith.constant 0 : index
    %c0_14 = arith.constant 0 : index
    %c0_15 = arith.constant 0 : index
    %29 = vector.load %arg6[%c0_13, %c0_14, %c0_15] : memref<1x128x256xbf16, #tpu.memory_space<vmem>>, vector<1x128x256xbf16>
    %30 = vector.shape_cast %29 : vector<1x128x256xbf16> to vector<128x256xbf16>
    %31 = vector.shape_cast %28 : vector<128x256xbf16> to vector<1x128x256xbf16>
    tpu.vector_store %arg6[%c0_13, %c0_14, %c0_15], %31 {strides = array<i32>} : memref<1x128x256xbf16, #tpu.memory_space<vmem>>, vector<1x128x256xbf16>,
    return
  }
  func.func @transform_0(%arg0: i32, %arg1: i32) -> (i32, i32, i32) {
    %c0_i32 = arith.constant 0 : i32
    %c0_i32_0 = arith.constant 0 : i32
    return %arg0, %arg1, %c0_i32 : i32, i32, i32
  }
  func.func @transform_1(%arg0: i32, %arg1: i32) -> (i32, i32, i32) {
    %c0_i32 = arith.constant 0 : i32
    %c0_i32_0 = arith.constant 0 : i32
    return %arg0, %arg1, %c0_i32 : i32, i32, i32
  }
  func.func @transform_2(%arg0: i32, %arg1: i32) -> (i32, i32) {
    %c0_i32 = arith.constant 0 : i32
    %c0_i32_0 = arith.constant 0 : i32
    %c0_i32_1 = arith.constant 0 : i32
    return %c0_i32, %c0_i32_0 : i32, i32
  }
  func.func @transform_3(%arg0: i32, %arg1: i32) -> (i32, i32) {
    %c0_i32 = arith.constant 0 : i32
    %c0_i32_0 = arith.constant 0 : i32
    %c0_i32_1 = arith.constant 0 : i32
    return %c0_i32, %c0_i32_0 : i32, i32
  }
  func.func @transform_4(%arg0: i32, %arg1: i32) -> (i32, i32, i32) {
    %c0_i32 = arith.constant 0 : i32
    %c0_i32_0 = arith.constant 0 : i32
    return %arg0, %arg1, %c0_i32 : i32, i32, i32
  }
}

module attributes {stable_mosaic.version = 11 : i64} {
  func.func @_mlp_residual_kernel(%arg0: i32, %arg1: i32, %arg2: memref<1x128x256xbf16, #tpu.memory_space<vmem>>, %arg3: memref<256x512xbf16, #tpu.memory_space<vmem>>, %arg4: memref<256x512xbf16, #tpu.memory_space<vmem>>, %arg5: memref<512x256xbf16, #tpu.memory_space<vmem>>, %arg6: memref<1x512xf32, #tpu.memory_space<vmem>>, %arg7: memref<1x512xf32, #tpu.memory_space<vmem>>, %arg8: memref<1x256xf32, #tpu.memory_space<vmem>>, %arg9: memref<1x128x256xbf16, #tpu.memory_space<vmem>>) attributes {dimension_semantics = [#tpu.dimension_semantics<parallel>, #tpu.dimension_semantics<parallel>], iteration_bounds = array<i64: 2, 2>, scalar_prefetch = 0 : i64, scratch_operands = 0 : i64, tpu.core_type = #tpu.core_type<tc>, window_params = [{transform_indices = @transform_0, window_bounds = array<i64: 1, 128, 256>}, {pipeline_mode = #tpu.pipeline_mode<synchronous>, transform_indices = @transform_1, window_bounds = array<i64: 256, 512>}, {pipeline_mode = #tpu.pipeline_mode<synchronous>, transform_indices = @transform_2, window_bounds = array<i64: 256, 512>}, {pipeline_mode = #tpu.pipeline_mode<synchronous>, transform_indices = @transform_3, window_bounds = array<i64: 512, 256>}, {pipeline_mode = #tpu.pipeline_mode<synchronous>, transform_indices = @transform_4, window_bounds = array<i64: 1, 512>}, {pipeline_mode = #tpu.pipeline_mode<synchronous>, transform_indices = @transform_5, window_bounds = array<i64: 1, 512>}, {pipeline_mode = #tpu.pipeline_mode<synchronous>, transform_indices = @transform_6, window_bounds = array<i64: 1, 256>}, {transform_indices = @transform_7, window_bounds = array<i64: 1, 128, 256>}]} {
    %c0 = arith.constant 0 : index
    %c0_0 = arith.constant 0 : index
    %c0_1 = arith.constant 0 : index
    %0 = vector.load %arg2[%c0, %c0_0, %c0_1] : memref<1x128x256xbf16, #tpu.memory_space<vmem>>, vector<1x128x256xbf16>
    %1 = vector.shape_cast %0 : vector<1x128x256xbf16> to vector<128x256xbf16>
    %c0_2 = arith.constant 0 : index
    %c0_3 = arith.constant 0 : index
    %2 = vector.load %arg3[%c0_2, %c0_3] : memref<256x512xbf16, #tpu.memory_space<vmem>>, vector<256x512xbf16>
    %cst = arith.constant dense<0.000000e+00> : vector<128x512xf32>
    %3 = tpu.matmul %1, %2, %cst {dimension_numbers = #tpu.dot_dimension_numbers<[1], [0], [0], [1], [0, 0, 1, 1], [], []>} : vector<128x256xbf16>, vector<256x512xbf16>, vector<128x512xf32> -> vector<128x512xf32>
    %c0_4 = arith.constant 0 : index
    %c0_5 = arith.constant 0 : index
    %4 = vector.load %arg4[%c0_4, %c0_5] : memref<256x512xbf16, #tpu.memory_space<vmem>>, vector<256x512xbf16>
    %cst_6 = arith.constant dense<0.000000e+00> : vector<128x512xf32>
    %5 = tpu.matmul %1, %4, %cst_6 {dimension_numbers = #tpu.dot_dimension_numbers<[1], [0], [0], [1], [0, 0, 1, 1], [], []>} : vector<128x256xbf16>, vector<256x512xbf16>, vector<128x512xf32> -> vector<128x512xf32>
    %c0_7 = arith.constant 0 : index
    %c0_8 = arith.constant 0 : index
    %6 = vector.load %arg6[%c0_7, %c0_8] : memref<1x512xf32, #tpu.memory_space<vmem>>, vector<1x512xf32>
    %7 = vector.broadcast %6 : vector<1x512xf32> to vector<128x512xf32>
    %8 = arith.mulf %3, %7 : vector<128x512xf32>
    %c0_9 = arith.constant 0 : index
    %c0_10 = arith.constant 0 : index
    %9 = vector.load %arg7[%c0_9, %c0_10] : memref<1x512xf32, #tpu.memory_space<vmem>>, vector<1x512xf32>
    %cst_11 = arith.constant 1.600000e+01 : f32
    %10 = vector.broadcast %cst_11 : f32 to vector<1x512xf32>
    %11 = arith.mulf %9, %10 : vector<1x512xf32>
    %12 = vector.broadcast %11 : vector<1x512xf32> to vector<128x512xf32>
    %13 = arith.mulf %5, %12 : vector<128x512xf32>
    %cst_12 = arith.constant 0.000000e+00 : f32
    %14 = vector.broadcast %cst_12 : f32 to vector<128x512xf32>
    %15 = arith.subf %14, %13 : vector<128x512xf32>
    %16 = math.exp %15 : vector<128x512xf32>
    %cst_13 = arith.constant 1.000000e+00 : f32
    %17 = vector.broadcast %cst_13 : f32 to vector<128x512xf32>
    %18 = arith.addf %17, %16 : vector<128x512xf32>
    %cst_14 = arith.constant 1.000000e+00 : f32
    %19 = vector.broadcast %cst_14 : f32 to vector<128x512xf32>
    %20 = arith.divf %19, %18 : vector<128x512xf32>
    %21 = arith.mulf %8, %13 : vector<128x512xf32>
    %22 = arith.mulf %21, %20 : vector<128x512xf32>
    %23 = arith.truncf %22 : vector<128x512xf32> to vector<128x512xbf16>
    %c0_15 = arith.constant 0 : index
    %c0_16 = arith.constant 0 : index
    %24 = vector.load %arg5[%c0_15, %c0_16] : memref<512x256xbf16, #tpu.memory_space<vmem>>, vector<512x256xbf16>
    %cst_17 = arith.constant dense<0.000000e+00> : vector<128x256xf32>
    %25 = tpu.matmul %23, %24, %cst_17 {dimension_numbers = #tpu.dot_dimension_numbers<[1], [0], [0], [1], [0, 0, 1, 1], [], []>} : vector<128x512xbf16>, vector<512x256xbf16>, vector<128x256xf32> -> vector<128x256xf32>
    %26 = arith.mulf %25, %25 : vector<128x256xf32>
    %cst_18 = arith.constant dense<0.000000e+00> : vector<128xf32>
    %27 = vector.multi_reduction <add>, %26, %cst_18 [1] : vector<128x256xf32> to vector<128xf32>
    %28 = vector.shape_cast %27 : vector<128xf32> to vector<128x1xf32>
    %cst_19 = arith.constant 9.99999996E-13 : f32
    %29 = vector.broadcast %cst_19 : f32 to vector<128x1xf32>
    %30 = arith.maximumf %28, %29 : vector<128x1xf32>
    %31 = math.rsqrt %30 : vector<128x1xf32>
    %32 = vector.broadcast %31 : vector<128x1xf32> to vector<128x256xf32>
    %33 = arith.mulf %25, %32 : vector<128x256xf32>
    %34 = arith.extf %1 : vector<128x256xbf16> to vector<128x256xf32>
    %c0_20 = arith.constant 0 : index
    %c0_21 = arith.constant 0 : index
    %35 = vector.load %arg8[%c0_20, %c0_21] : memref<1x256xf32, #tpu.memory_space<vmem>>, vector<1x256xf32>
    %36 = arith.subf %33, %34 : vector<128x256xf32>
    %37 = vector.broadcast %35 : vector<1x256xf32> to vector<128x256xf32>
    %38 = arith.mulf %37, %36 : vector<128x256xf32>
    %39 = arith.addf %34, %38 : vector<128x256xf32>
    %40 = arith.mulf %39, %39 : vector<128x256xf32>
    %cst_22 = arith.constant dense<0.000000e+00> : vector<128xf32>
    %41 = vector.multi_reduction <add>, %40, %cst_22 [1] : vector<128x256xf32> to vector<128xf32>
    %42 = vector.shape_cast %41 : vector<128xf32> to vector<128x1xf32>
    %cst_23 = arith.constant 9.99999996E-13 : f32
    %43 = vector.broadcast %cst_23 : f32 to vector<128x1xf32>
    %44 = arith.maximumf %42, %43 : vector<128x1xf32>
    %45 = math.rsqrt %44 : vector<128x1xf32>
    %46 = vector.broadcast %45 : vector<128x1xf32> to vector<128x256xf32>
    %47 = arith.mulf %39, %46 : vector<128x256xf32>
    %48 = arith.truncf %47 : vector<128x256xf32> to vector<128x256xbf16>
    %c0_24 = arith.constant 0 : index
    %c0_25 = arith.constant 0 : index
    %c0_26 = arith.constant 0 : index
    %49 = vector.load %arg9[%c0_24, %c0_25, %c0_26] : memref<1x128x256xbf16, #tpu.memory_space<vmem>>, vector<1x128x256xbf16>
    %50 = vector.shape_cast %49 : vector<1x128x256xbf16> to vector<128x256xbf16>
    %51 = vector.shape_cast %48 : vector<128x256xbf16> to vector<1x128x256xbf16>
    tpu.vector_store %arg9[%c0_24, %c0_25, %c0_26], %51 {strides = array<i32>} : memref<1x128x256xbf16, #tpu.memory_space<vmem>>, vector<1x128x256xbf16>,
    return
  }
  func.func @transform_0(%arg0: i32, %arg1: i32) -> (i32, i32, i32) {
    %c0_i32 = arith.constant 0 : i32
    %c0_i32_0 = arith.constant 0 : i32
    return %arg0, %arg1, %c0_i32 : i32, i32, i32
  }
  func.func @transform_1(%arg0: i32, %arg1: i32) -> (i32, i32) {
    %c0_i32 = arith.constant 0 : i32
    %c0_i32_0 = arith.constant 0 : i32
    %c0_i32_1 = arith.constant 0 : i32
    return %c0_i32, %c0_i32_0 : i32, i32
  }
  func.func @transform_2(%arg0: i32, %arg1: i32) -> (i32, i32) {
    %c0_i32 = arith.constant 0 : i32
    %c0_i32_0 = arith.constant 0 : i32
    %c0_i32_1 = arith.constant 0 : i32
    return %c0_i32, %c0_i32_0 : i32, i32
  }
  func.func @transform_3(%arg0: i32, %arg1: i32) -> (i32, i32) {
    %c0_i32 = arith.constant 0 : i32
    %c0_i32_0 = arith.constant 0 : i32
    %c0_i32_1 = arith.constant 0 : i32
    return %c0_i32, %c0_i32_0 : i32, i32
  }
  func.func @transform_4(%arg0: i32, %arg1: i32) -> (i32, i32) {
    %c0_i32 = arith.constant 0 : i32
    %c0_i32_0 = arith.constant 0 : i32
    %c0_i32_1 = arith.constant 0 : i32
    return %c0_i32, %c0_i32_0 : i32, i32
  }
  func.func @transform_5(%arg0: i32, %arg1: i32) -> (i32, i32) {
    %c0_i32 = arith.constant 0 : i32
    %c0_i32_0 = arith.constant 0 : i32
    %c0_i32_1 = arith.constant 0 : i32
    return %c0_i32, %c0_i32_0 : i32, i32
  }
  func.func @transform_6(%arg0: i32, %arg1: i32) -> (i32, i32) {
    %c0_i32 = arith.constant 0 : i32
    %c0_i32_0 = arith.constant 0 : i32
    %c0_i32_1 = arith.constant 0 : i32
    return %c0_i32, %c0_i32_0 : i32, i32
  }
  func.func @transform_7(%arg0: i32, %arg1: i32) -> (i32, i32, i32) {
    %c0_i32 = arith.constant 0 : i32
    %c0_i32_0 = arith.constant 0 : i32
    return %arg0, %arg1, %c0_i32 : i32, i32, i32
  }
}

</mosaic_0001>

<bundles_post_ra>
// kernel: ngpt_layer_forward.4
= control target key start
LH: loop header
LB: loop body
LE: loop exit
PB: predicated region body
PF: predicated region fallthrough
CT: control target
= control target key end

     0   :  { %s1730_s15 = smov 0   ;;  %s1732_s16 = smov 0   ;;  %s2509_s0 = inlined_call_operand.vmem [shape: bf16[2,256,256], index: 0, kind: input, shape index: {}]   ;;  %s2510_s1 = inlined_call_operand.vmem [shape: bf16[2,256,256], index: 1, kind: input, shape index: {}]   ;;  %s2511_s2 = inlined_call_operand.vmem [shape: bf16[256,256], index: 2, kind: input, shape index: {}]   ;;  %s2512_s3 = inlined_call_operand.vmem [shape: f32[1,256], index: 3, kind: input, shape index: {}]   ;;  %s2513_s4 = inlined_call_operand.vmem [shape: bf16[2,256,256], index: 4, kind: output, shape index: {}]  }
   0x1   :  { %s1734_s17 = smov 0   ;;  %s1736_s18 = smov 0  }
   0x2   :  { %s1738_s19 = smov 0  }
   0x3 LB: > { %s23_s20 = sadd.s32 1, %s1695_s17  ;;  %s26_s21 = sadd.s32 1, %s1699_s18  ;;  %s1703_s19 = sphi %s1738_s19, %s14_s19   ;;  %s1699_s18 = sphi %s1736_s18, %s2590_s18   ;;  %s1695_s17 = sphi %s1734_s17, %s2589_s17   ;;  %s1691_s16 = sphi %s1732_s16, %s2588_s16   ;;  %s1687_s15 = sphi %s1730_s15, %s2587_s15  }
   0x4   : > { %p24_p0 = scmp.ge.s32.totalorder %s23_s20, 2  ;;  %p1362_p1 = scmp.ge.s32.totalorder %s1703_s19, 1 }
   0x5   : > { %p202_p2 = scmp.lt.s32.totalorder %s1703_s19, 5 }
   0x6   : > { %s2592_s20 = smov (%p24_p0, %s23_s20), 0  ;;  %s2594_s21 = smov (!%p24_p0, %s26_s21), %s1699_s18 }
   0x7   : > { %p203_p3 = pnand %p1362_p1, %p202_p2  ;;  %p28_p4 = scmp.ge.s32.totalorder %s2594_s21, 2 }
   0x9   : > { %s2596_s21 = smov (%p28_p4, %s2594_s21), 0  ;;  %206 = sbr.rel (%p203_p3) target bundleno = 664 (0x298), region = 36 }
   0xe   : > { %v1529_v0 = vld [vmem:[%s2511_s2 + $0x74] ss:$8 sps:$4 sm:$0xff]   ;;  %s1363_s24 = sshll.u32 %s1687_s15, 4  ;;  %v1531_v1 = vld [vmem:[%s2511_s2 + $0x70] ss:$8 sps:$4 sm:$0xff]   ;;  %p249_p5 = scmp.lt.s32.totalorder %s1691_s16, 1 }
   0xf   : > { %569 = vmatprep.subr.bf16.mxu0 %v1529_v0  ;;  %1457 = vmatprep.subr.bf16.mxu1 %v1529_v0  ;;  %v1532_v2 = vld [vmem:[%s2511_s2 + $0x64] ss:$8 sps:$4 sm:$0xff]   ;;  %p251_p6 = scmp.lt.s32.totalorder %s1363_s24, 31  ;;  %v1534_v3 = vld [vmem:[%s2511_s2 + $0x60] ss:$8 sps:$4 sm:$0xff]  }
  0x10   : > { %570 = vmatpush1.bf16.msra.mxu0 %v1531_v1  ;;  %1473 = vmatpush1.bf16.msra.mxu1 %v1531_v1  ;;  %v1535_v4 = vld [vmem:[%s2511_s2 + $0x54] ss:$8 sps:$4 sm:$0xff]   ;;  %s2598_s16 = smov (!%p249_p5, %s1691_s16), 1  ;;  %v1537_v5 = vld [vmem:[%s2511_s2 + $0x50] ss:$8 sps:$4 sm:$0xff]  }
  0x11   : > { %571 = vmatprep.subr.bf16.mxu0 %v1532_v2  ;;  %1458 = vmatprep.subr.bf16.mxu1 %v1532_v2  ;;  %s2600_s24 = smov (!%p251_p6, %s1363_s24), 31  ;;  %v1538_v6 = vld [vmem:[%s2511_s2 + $0x44] ss:$8 sps:$4 sm:$0xff]   ;;  %s1365_s12 = sshll.u32 %s2598_s16, 6  ;;  %v1540_v7 = vld [vmem:[%s2511_s2 + $0x40] ss:$8 sps:$4 sm:$0xff]  }
  0x12   : > { %s1364_s11 = sshll.u32 %s2600_s24, 1  ;;  %v1541_v8 = vld [vmem:[%s2511_s2 + $0x34] ss:$8 sps:$4 sm:$0xff]   ;;  %v1543_v9 = vld [vmem:[%s2511_s2 + $0x30] ss:$8 sps:$4 sm:$0xff]  }
  0x13   : > { %s255_s23 = sadd.s32 %s1365_s12, %s1364_s11  ;;  %v1544_v10 = vld [vmem:[%s2511_s2 + $0x24] ss:$8 sps:$4 sm:$0xff]   ;;  %v1546_v11 = vld [vmem:[%s2511_s2 + $0x20] ss:$8 sps:$4 sm:$0xff]   ;;  %v1547_v12 = vld [vmem:[%s2511_s2 + $0x14] ss:$8 sps:$4 sm:$0xff]  }
  0x14   : > { %572 = vmatpush1.bf16.msra.mxu0 %v1534_v3  ;;  %1474 = vmatpush1.bf16.msra.mxu1 %v1534_v3  ;;  %s1796_s27 = sshll.u32 %s255_s23, 2  ;;  %v1549_v14 = vld [vmem:[%s2511_s2 + $0x10] ss:$8 sps:$4 sm:$0xff]   ;;  %v1550_v16 = vld [vmem:[%s2511_s2 + $0x4] ss:$8 sps:$4 sm:$0xff]  }
  0x15   : > { %573 = vmatprep.subr.bf16.mxu0 %v1535_v4  ;;  %1459 = vmatprep.subr.bf16.mxu1 %v1535_v4  ;;  %s1805_s6 = scalar_lea.vmem %s2509_s0, %s1796_s27  ;;  %v1552_v17 = vld [vmem:[%s2511_s2] ss:$8 sps:$4 sm:$0xff]   ;;  %v1553_v18 = vld [vmem:[%s2511_s2 + $0xf4] ss:$8 sps:$4 sm:$0xff]   ;;  %v1555_v19 = vld [vmem:[%s2511_s2 + $0xf0] ss:$8 sps:$4 sm:$0xff]   ;;  %s2015_s10 = scalar_lea.vmem %s2510_s1, %s1796_s27 }
  0x16   : > { %v1579_v13 = vld [vmem:[%s1805_s6 + $0x4] ss:$8 sps:$4 sm:$0xff]   ;;  %v1558_v21 = vld [vmem:[%s2511_s2 + $0xe0] ss:$8 sps:$4 sm:$0xff]   ;;  %v1559_v22 = vld [vmem:[%s2511_s2 + $0xd4] ss:$8 sps:$4 sm:$0xff]   ;;  %s2446_s15 = scalar_lea.vmem %s2513_s4, %s1796_s27 }
  0x17   : > { %v1582_v15 = vld [vmem:[%s1805_s6 + $0x44] ss:$8 sps:$4 sm:$0xff]   ;;  %601 = vmatprep.mubr.bf16.mxu0 %v1579_v13  ;;  %v1561_v23 = vld [vmem:[%s2511_s2 + $0xd0] ss:$8 sps:$4 sm:$0xff]   ;;  %v1564_v25 = vld [vmem:[%s2511_s2 + $0xc0] ss:$8 sps:$4 sm:$0xff]  }
  0x18   : > { %574 = vmatpush1.bf16.msra.mxu0 %v1537_v5  ;;  %1475 = vmatpush1.bf16.msra.mxu1 %v1537_v5  ;;  %v1556_v20 = vld [vmem:[%s2511_s2 + $0xe4] ss:$8 sps:$4 sm:$0xff]   ;;  %v1565_v26 = vld [vmem:[%s2511_s2 + $0xb4] ss:$8 sps:$4 sm:$0xff]   ;;  %v1567_v27 = vld [vmem:[%s2511_s2 + $0xb0] ss:$8 sps:$4 sm:$0xff]  }
  0x19   : > { %575 = vmatprep.subr.bf16.mxu0 %v1538_v6  ;;  %1460 = vmatprep.subr.bf16.mxu1 %v1538_v6  ;;  %v1562_v24 = vld [vmem:[%s2511_s2 + $0xc4] ss:$8 sps:$4 sm:$0xff]   ;;  %v1570_v29 = vld [vmem:[%s2511_s2 + $0xa0] ss:$8 sps:$4 sm:$0xff]   ;;  %v1571_v30 = vld [vmem:[%s2511_s2 + $0x94] ss:$8 sps:$4 sm:$0xff]  }
  0x1a   : > { %641 = vmatprep.mubr.bf16.mxu1 %v1582_v15  ;;  %v1568_v28 = vld [vmem:[%s2511_s2 + $0xa4] ss:$8 sps:$4 sm:$0xff]   ;;  %v1573_v31 = vld [vmem:[%s2511_s2 + $0x90] ss:$8 sps:$4 sm:$0xff]   ;;  %v1576_v33 = vld [vmem:[%s2511_s2 + $0x80] ss:$8 sps:$4 sm:$0xff]  }
  0x1b   : > { %v1574_v32 = vld [vmem:[%s2511_s2 + $0x84] ss:$8 sps:$4 sm:$0xff]   ;;  %v1577_v34 = vld [vmem:[%s1805_s6] ss:$8 sps:$4 sm:$0xff]   ;;  %v1583_v36 = vld [vmem:[%s1805_s6 + $0x14] ss:$8 sps:$4 sm:$0xff]  }
  0x1c   : > { %576 = vmatpush1.bf16.msra.mxu0 %v1540_v7  ;;  %1476 = vmatpush1.bf16.msra.mxu1 %v1540_v7  ;;  %v1580_v35 = vld [vmem:[%s1805_s6 + $0x40] ss:$8 sps:$4 sm:$0xff]   ;;  %v1586_v37 = vld [vmem:[%s1805_s6 + $0x54] ss:$8 sps:$4 sm:$0xff]   ;;  %v1585_v38 = vld [vmem:[%s1805_s6 + $0x10] ss:$8 sps:$4 sm:$0xff]  }
  0x1d   : > { %577 = vmatprep.subr.bf16.mxu0 %v1541_v8  ;;  %1461 = vmatprep.subr.bf16.mxu1 %v1541_v8  ;;  %v1588_v39 = vld [vmem:[%s1805_s6 + $0x50] ss:$8 sps:$4 sm:$0xff]   ;;  %v1589_v40 = vld [vmem:[%s1805_s6 + $0x24] ss:$8 sps:$4 sm:$0xff]   ;;  %v1591_v42 = vld [vmem:[%s1805_s6 + $0x20] ss:$8 sps:$4 sm:$0xff]  }
  0x1e   : > { %v1592_v41 = vld [vmem:[%s1805_s6 + $0x64] ss:$8 sps:$4 sm:$0xff]   ;;  %v1594_v43 = vld [vmem:[%s1805_s6 + $0x60] ss:$8 sps:$4 sm:$0xff]   ;;  %v1595_v44 = vld [vmem:[%s1805_s6 + $0x34] ss:$8 sps:$4 sm:$0xff]  }
  0x1f   : > { %v1598_v45 = vld [vmem:[%s1805_s6 + $0x74] ss:$8 sps:$4 sm:$0xff]   ;;  %v1597_v46 = vld [vmem:[%s1805_s6 + $0x30] ss:$8 sps:$4 sm:$0xff]  }
  0x20   : > { %578 = vmatpush1.bf16.msra.mxu0 %v1543_v9  ;;  %1477 = vmatpush1.bf16.msra.mxu1 %v1543_v9  ;;  %v1600_v47 = vld [vmem:[%s1805_s6 + $0x70] ss:$8 sps:$4 sm:$0xff]  }
  0x21   : > { %579 = vmatprep.subr.bf16.mxu0 %v1544_v10  ;;  %1462 = vmatprep.subr.bf16.mxu1 %v1544_v10 }
  0x24   : > { %580 = vmatpush1.bf16.msra.mxu0 %v1546_v11  ;;  %1478 = vmatpush1.bf16.msra.mxu1 %v1546_v11 }
  0x25   : > { %581 = vmatprep.subr.bf16.mxu0 %v1547_v12  ;;  %1463 = vmatprep.subr.bf16.mxu1 %v1547_v12 }
  0x28   : > { %582 = vmatpush1.bf16.msra.mxu0 %v1549_v14  ;;  %1479 = vmatpush1.bf16.msra.mxu1 %v1549_v14 }
  0x29   : > { %583 = vmatprep.subr.bf16.mxu0 %v1550_v16  ;;  %1464 = vmatprep.subr.bf16.mxu1 %v1550_v16 }
  0x2c   : > { %584 = vmatpush1.bf16.msra.mxu0 %v1552_v17  ;;  %1480 = vmatpush1.bf16.msra.mxu1 %v1552_v17 }
  0x2d   : > { %585 = vmatprep.subr.bf16.mxu0 %v1553_v18  ;;  %1465 = vmatprep.subr.bf16.mxu1 %v1553_v18 }
  0x30   : > { %586 = vmatpush2.bf16.msra.mxu0 %v1555_v19  ;;  %1481 = vmatpush2.bf16.msra.mxu1 %v1555_v19 }
  0x31   : > { %587 = vmatprep.subr.bf16.mxu0 %v1556_v20  ;;  %1466 = vmatprep.subr.bf16.mxu1 %v1556_v20 }
  0x34   : > { %588 = vmatpush2.bf16.msra.mxu0 %v1558_v21  ;;  %1482 = vmatpush2.bf16.msra.mxu1 %v1558_v21 }
  0x35   : > { %589 = vmatprep.subr.bf16.mxu0 %v1559_v22  ;;  %1467 = vmatprep.subr.bf16.mxu1 %v1559_v22 }
  0x38   : > { %590 = vmatpush2.bf16.msra.mxu0 %v1561_v23  ;;  %1483 = vmatpush2.bf16.msra.mxu1 %v1561_v23 }
  0x39   : > { %591 = vmatprep.subr.bf16.mxu0 %v1562_v24  ;;  %1468 = vmatprep.subr.bf16.mxu1 %v1562_v24 }
  0x3c   : > { %592 = vmatpush2.bf16.msra.mxu0 %v1564_v25  ;;  %1484 = vmatpush2.bf16.msra.mxu1 %v1564_v25 }
  0x3d   : > { %593 = vmatprep.subr.bf16.mxu0 %v1565_v26  ;;  %1469 = vmatprep.subr.bf16.mxu1 %v1565_v26 }
  0x40   : > { %594 = vmatpush2.bf16.msra.mxu0 %v1567_v27  ;;  %1485 = vmatpush2.bf16.msra.mxu1 %v1567_v27 }
  0x41   : > { %595 = vmatprep.subr.bf16.mxu0 %v1568_v28  ;;  %1470 = vmatprep.subr.bf16.mxu1 %v1568_v28 }
  0x44   : > { %596 = vmatpush2.bf16.msra.mxu0 %v1570_v29  ;;  %1486 = vmatpush2.bf16.msra.mxu1 %v1570_v29 }
  0x45   : > { %597 = vmatprep.subr.bf16.mxu0 %v1571_v30  ;;  %1471 = vmatprep.subr.bf16.mxu1 %v1571_v30 }
  0x48   : > { %598 = vmatpush2.bf16.msra.mxu0 %v1573_v31  ;;  %1487 = vmatpush2.bf16.msra.mxu1 %v1573_v31 }
  0x49   : > { %599 = vmatprep.subr.bf16.mxu0 %v1574_v32  ;;  %1472 = vmatprep.subr.bf16.mxu1 %v1574_v32 }
  0x4c   : > { %600 = vmatpush2.bf16.msra.mxu0 %v1576_v33  ;;  %1488 = vmatpush2.bf16.msra.mxu1 %v1576_v33 }
  0x4f   : > { %602 = vmatmul.mubr.bf16.vlgmr.msra.gmra.mxu0 %v1577_v34  ;;  %642 = vmatmul.mubr.bf16.vlgmr.msra.gmra.mxu1 %v1580_v35 }
  0x50   : > { %611 = vmatprep.mubr.bf16.mxu0 %v1583_v36  ;;  %651 = vmatprep.mubr.bf16.mxu1 %v1586_v37 }
  0x57   : > { %612 = vmatmul.mubr.bf16.gmra.mxu0 %v1585_v38  ;;  %652 = vmatmul.mubr.bf16.gmra.mxu1 %v1588_v39 }
  0x58   : > { %621 = vmatprep.mubr.bf16.mxu0 %v1589_v40  ;;  %661 = vmatprep.mubr.bf16.mxu1 %v1592_v41 }
  0x5f   : > { %622 = vmatmul.mubr.bf16.gmra.mxu0 %v1591_v42  ;;  %662 = vmatmul.mubr.bf16.gmra.mxu1 %v1594_v43 }
  0x60   : > { %631 = vmatprep.mubr.bf16.mxu0 %v1595_v44  ;;  %671 = vmatprep.mubr.bf16.mxu1 %v1598_v45 }
  0x67   : > { %632 = vmatmul.mubr.bf16.gmra.mxu0 %v1597_v46  ;;  %672 = vmatmul.mubr.bf16.gmra.mxu1 %v1600_v47 }
 0x10f   : > { %v1883_v48 = vpop.f32.mrf.mxu0  ;;  %v1885_v49 = vpop.f32.mrf.mxu1 }
 0x110   : > { %v682_v52 = vmul.f32 %v1883_v48, %v1883_v48  ;;  %v698_v56 = vmul.f32 %v1885_v49, %v1885_v49 }
 0x111   : > { %v1887_v50 = vpop.f32.mrf.mxu0  ;;  %v1889_v51 = vpop.f32.mrf.mxu1 }
 0x112   : > { %v683_v53 = vmul.f32 %v1887_v50, %v1887_v50  ;;  %v699_v57 = vmul.f32 %v1889_v51, %v1889_v51 }
 0x113   : > { %v1895_v54 = vpop.f32.mrf.mxu0  ;;  %v1897_v55 = vpop.f32.mrf.mxu1 }
 0x114   : > { %v714_v58 = vadd.f32 %v683_v53, %v682_v52  ;;  %v700_v61 = vmul.f32 %v1897_v55, %v1897_v55  ;;  %v738_v4 = vadd.f32 %v699_v57, %v698_v56  ;;  %v684_v5 = vmul.f32 %v1895_v54, %v1895_v54 }
 0x115   : > { %v1903_v59 = vpop.f32.mrf.mxu0  ;;  %v1905_v60 = vpop.f32.mrf.mxu1 }
 0x116   : > { %v701_v62 = vmul.f32 %v1905_v60, %v1905_v60  ;;  %715 = vadd.xlane.f32.xlu0 %v714_v58  ;;  %v685_v1 = vmul.f32 %v1903_v59, %v1903_v59 }
 0x117   : > { %v1911_v63 = vpop.f32.mrf.mxu0  ;;  %v1913_v0 = vpop.f32.mrf.mxu1 }
 0x118   : > { %v686_v2 = vmul.f32 %v1911_v63, %v1911_v63  ;;  %v741_v3 = vadd.f32 %v701_v62, %v700_v61  ;;  %v702_v9 = vmul.f32 %v1913_v0, %v1913_v0  ;;  %v717_v13 = vadd.f32 %v685_v1, %v684_v5 }
 0x119   : > { %v1921_v6 = vpop.f32.mrf.mxu0  ;;  %v1923_v7 = vpop.f32.mrf.mxu1 }
 0x11a   : > { %v687_v8 = vmul.f32 %v1921_v6, %v1921_v6  ;;  %742 = vadd.xlane.f32.xlu1 %v741_v3  ;;  %739 = vadd.xlane.f32.xlu0 %v738_v4  ;;  %v703_v10 = vmul.f32 %v1923_v7, %v1923_v7 }
 0x11b   : > { %v1931_v11 = vpop.f32.mrf.mxu0  ;;  %v1933_v12 = vpop.f32.mrf.mxu1 }
 0x11c   : > { %v720_v14 = vadd.f32 %v687_v8, %v686_v2  ;;  %v688_v17 = vmul.f32 %v1931_v11, %v1931_v11  ;;  %v744_v19 = vadd.f32 %v703_v10, %v702_v9  ;;  %v704_v22 = vmul.f32 %v1933_v12, %v1933_v12 }
 0x11d   : > { %v1935_v15 = vpop.f32.mrf.mxu0  ;;  %v1937_v16 = vpop.f32.mrf.mxu1 }
 0x11e   : > { %v689_v18 = vmul.f32 %v1935_v15, %v1935_v15  ;;  %718 = vadd.xlane.f32.xlu0 %v717_v13  ;;  %721 = vadd.xlane.f32.xlu1 %v720_v14  ;;  %v705_v24 = vmul.f32 %v1937_v16, %v1937_v16  ;;  %v908_v14 = vlaneseq }
 0x11f   : > { %v1943_v20 = vpop.f32.mrf.mxu0  ;;  %v1945_v21 = vpop.f32.mrf.mxu1 }
 0x120   : > { %v690_v23 = vmul.f32 %v1943_v20, %v1943_v20  ;;  %v723_v25 = vadd.f32 %v689_v18, %v688_v17  ;;  %v706_v29 = vmul.f32 %v1945_v21, %v1945_v21  ;;  %v747_v33 = vadd.f32 %v705_v24, %v704_v22 }
 0x121   : > { %v1953_v26 = vpop.f32.mrf.mxu0  ;;  %v1955_v27 = vpop.f32.mrf.mxu1 }
 0x122   : > { %v691_v28 = vmul.f32 %v1953_v26, %v1953_v26  ;;  %745 = vadd.xlane.f32.xlu0 %v744_v19  ;;  %724 = vadd.xlane.f32.xlu1 %v723_v25  ;;  %v707_v30 = vmul.f32 %v1955_v27, %v1955_v27  ;;  %v909_v19 = vshrl.u32 %v908_v14, 7  ;;  %v2054_v14 = vld [vmem:[%s2015_s10 + $0x20] sm:$0xff] }
 0x123   : > { %v1963_v31 = vpop.f32.mrf.mxu0  ;;  %v1965_v32 = vpop.f32.mrf.mxu1 }
 0x124   : > { %v726_v34 = vadd.f32 %v691_v28, %v690_v23  ;;  %v692_v37 = vmul.f32 %v1963_v31, %v1963_v31  ;;  %v750_v39 = vadd.f32 %v707_v30, %v706_v29  ;;  %v708_v42 = vmul.f32 %v1965_v32, %v1965_v32  ;;  %v2018_v28 = vld [vmem:[%s2015_s10] sm:$0xff] }
 0x125   : > { %v1967_v35 = vpop.f32.mrf.mxu0  ;;  %v1969_v36 = vpop.f32.mrf.mxu1  ;;  %v910_v29 = vsub.s32 0, %v909_v19  ;;  %v874_v30 = vld [vmem:[%s2512_s3] sm:$0x3] }
 0x126   : > { %v693_v38 = vmul.f32 %v1967_v35, %v1967_v35  ;;  %748 = vadd.xlane.f32.xlu1 %v747_v33  ;;  %727 = vadd.xlane.f32.xlu0 %v726_v34  ;;  %v709_v44 = vmul.f32 %v1969_v36, %v1969_v36  ;;  %v914_v33 = vsub.s32 1, %v909_v19  ;;  %v2024_v34 = vld [vmem:[%s2015_s10 + $0x40] sm:$0xff] }
 0x127   : > { %v1975_v40 = vpop.f32.mrf.mxu0  ;;  %v1977_v41 = vpop.f32.mrf.mxu1 }
 0x128   : > { %v694_v43 = vmul.f32 %v1975_v40, %v1975_v40  ;;  %v729_v45 = vadd.f32 %v693_v38, %v692_v37  ;;  %v710_v53 = vmul.f32 %v1977_v41, %v1977_v41  ;;  %v753_v61 = vadd.f32 %v709_v44, %v708_v42  ;;  %v2027_v37 = vld [vmem:[%s2015_s10 + $0x48] sm:$0xff] }
 0x129   : > { %v1985_v46 = vpop.f32.mrf.mxu0  ;;  %v1987_v47 = vpop.f32.mrf.mxu1  ;;  %v2516_v42 = vunpack.c.l.bf16 %v2018_v28 }
 0x12a   : > { %v695_v52 = vmul.f32 %v1985_v46, %v1985_v46  ;;  %751 = vadd.xlane.f32.xlu0 %v750_v39  ;;  %730 = vadd.xlane.f32.xlu1 %v729_v45  ;;  %v711_v56 = vmul.f32 %v1987_v47, %v1987_v47 }
 0x12b   : > { %v1995_v57 = vpop.f32.mrf.mxu0  ;;  %v1997_v58 = vpop.f32.mrf.mxu1 }
 0x12c   : > { %2518 = vst [vmem:[#allocation2_spill] sm:$0xff] %v1997_v58  ;;  %v732_v62 = vadd.f32 %v695_v52, %v694_v43  ;;  %v696_v3 = vmul.f32 %v1995_v57, %v1995_v57  ;;  %v756_v5 = vadd.f32 %v711_v56, %v710_v53  ;;  %v712_v8 = vmul.f32 %v1997_v58, %v1997_v58  ;;  %v2031_v43 = vld [vmem:[%s2015_s10 + $0x10] sm:$0xff]  ;;  %v2037_v56 = vld [vmem:[%s2015_s10 + $0x8] sm:$0xff] }
 0x12d   : > { %v1999_v1 = vpop.f32.mrf.mxu0  ;;  %v2001_v2 = vpop.f32.mrf.mxu1  ;;  %v2034_v53 = vrot.slane %v874_v30, %v910_v29 }
 0x12e   : > { %2519 = vst [vmem:[#allocation3_spill] sm:$0xff] %v2001_v2  ;;  %v697_v4 = vmul.f32 %v1999_v1, %v1999_v1  ;;  %754 = vadd.xlane.f32.xlu1 %v753_v61  ;;  %733 = vadd.xlane.f32.xlu0 %v732_v62  ;;  %v713_v9 = vmul.f32 %v2001_v2, %v2001_v2  ;;  %v2040_v61 = vld [vmem:[%s2015_s10 + $0x50] sm:$0xff] }
 0x12f   : > { %v2042_v62 = vrot.slane %v874_v30, %v914_v33 }
 0x130   : > { %v735_v10 = vadd.f32 %v697_v4, %v696_v3  ;;  %v759_v13 = vadd.f32 %v713_v9, %v712_v8  ;;  %v2048_v8 = vld [vmem:[%s2015_s10 + $0x18] sm:$0xff] }
 0x131   : > { %v2097_v3 = vld [vmem:[%s2015_s10 + $0x78] sm:$0xff] }
 0x132   : > { %757 = vadd.xlane.f32.xlu0 %v756_v5  ;;  %736 = vadd.xlane.f32.xlu1 %v735_v10 }
 0x136   : > { %760 = vadd.xlane.f32.xlu1 %v759_v13 }
 0x19f   : > { %v716_v17 = vpop.xlane.xlu0 %715 }
 0x1a0   : > { %v762_v18 = vmax.f32 %v716_v17, 1e-12  ;;  %v2057_v17 = vld [vmem:[%s2015_s10 + $0x58] sm:$0xff] }
 0x1a2   : > { %1601 = vrsqrt.f32 %v762_v18 }
 0x1a3   : > { %v743_v22 = vpop.xlane.xlu1 %742  ;;  %v740_v23 = vpop.xlane.xlu0 %739 }
 0x1a4   : > { %v771_v24 = vmax.f32 %v743_v22, 1e-12  ;;  %v770_v25 = vmax.f32 %v740_v23, 1e-12  ;;  %v2084_v22 = vld [vmem:[%s2015_s10 + $0x70] sm:$0xff] }
 0x1a6   : > { %1603 = vrsqrt.f32 %v771_v24  ;;  %v2522_v24 = vunpack.c.h.bf16 %v2018_v28 }
 0x1a7   : > { %1605 = vrsqrt.f32 %v770_v25  ;;  %v719_v38 = vpop.xlane.xlu0 %718  ;;  %v722_v39 = vpop.xlane.xlu1 %721  ;;  %v2063_v25 = vld [vmem:[%s2015_s10 + $0x60] sm:$0xff] }
 0x1a8   : > { %v763_v44 = vmax.f32 %v719_v38, 1e-12  ;;  %v764_v45 = vmax.f32 %v722_v39, 1e-12  ;;  %v2069_v39 = vld [vmem:[%s2015_s10 + $0x30] sm:$0xff] }
 0x1aa   : > { %1607 = vrsqrt.f32 %v763_v44  ;;  %v2072_v44 = vld [vmem:[%s2015_s10 + $0x28] sm:$0xff] }
 0x1ab   : > { %1609 = vrsqrt.f32 %v764_v45  ;;  %v746_v18 = vpop.xlane.xlu0 %745  ;;  %v725_v19 = vpop.xlane.xlu1 %724 }
 0x1ac   : > { %v772_v29 = vmax.f32 %v746_v18, 1e-12  ;;  %v2079_v18 = vld [vmem:[%s2015_s10 + $0x68] sm:$0xff]  ;;  %v765_v30 = vmax.f32 %v725_v19, 1e-12 }
 0x1ae   : > { %1611 = vrsqrt.f32 %v772_v29  ;;  %v2091_v29 = vld [vmem:[%s2015_s10 + $0x38] sm:$0xff] }
 0x1af   : > { %v1602_v10 = vpop.eup %1601  ;;  %v749_v45 = vpop.xlane.xlu1 %748  ;;  %1613 = vrsqrt.f32 %v765_v30 }
 0x1b0   : > { %v728_v9 = vpop.xlane.xlu0 %727  ;;  %v794_v38 = vmul.f32 %v1602_v10, %v1883_v48  ;;  %v795_v33 = vmul.f32 %v1602_v10, %v1887_v50  ;;  %v773_v52 = vmax.f32 %v749_v45, 1e-12  ;;  %v2521_v45 = vunpack.c.l.bf16 %v2018_v28 }
 0x1b1   : > { %v766_v19 = vmax.f32 %v728_v9, 1e-12  ;;  %v2520_v9 = vunpack.c.h.bf16 %v2018_v28 }
 0x1b2   : > { %v875_v5 = vsub.f32 %v794_v38, %v2516_v42 }
 0x1b3   : > { %v876_v48 = vsub.f32 %v795_v33, %v2520_v9  ;;  %v1604_v10 = vpop.eup %1603  ;;  %1615 = vrsqrt.f32 %v766_v19  ;;  %v731_v2 = vpop.xlane.xlu1 %730 }
 0x1b4   : > { %v752_v4 = vpop.xlane.xlu0 %751  ;;  %v1606_v23 = vpop.eup %1605  ;;  %v767_v58 = vmax.f32 %v731_v2, 1e-12  ;;  %v918_v38 = vmul.f32 %v2034_v53, %v875_v5  ;;  %1617 = vrsqrt.f32 %v773_v52  ;;  %v812_v9 = vmul.f32 %v1604_v10, %v1897_v55 }
 0x1b5   : > { %v774_v30 = vmax.f32 %v752_v4, 1e-12  ;;  %v919_v42 = vmul.f32 %v2042_v62, %v876_v48  ;;  %v810_v33 = vmul.f32 %v1606_v23, %v1885_v49  ;;  %v811_v19 = vmul.f32 %v1606_v23, %v1889_v51 }
 0x1b6   : > { %v2117_v13 = vadd.f32 %v918_v38, %v2521_v45  ;;  %v813_v2 = vmul.f32 %v1604_v10, %v1905_v60  ;;  %v2524_v49 = vunpack.c.l.bf16 %v2024_v34  ;;  %v2525_v55 = vunpack.c.h.bf16 %v2024_v34 }
 0x1b7   : > { %1619 = vrsqrt.f32 %v774_v30  ;;  %v2121_v4 = vadd.f32 %v919_v42, %v2522_v24  ;;  %v1608_v5 = vpop.eup %1607  ;;  %v755_v52 = vpop.xlane.xlu1 %754  ;;  %v2526_v30 = vunpack.c.l.bf16 %v2027_v37 }
 0x1b8   : > { %1621 = vrsqrt.f32 %v767_v58  ;;  %v734_v48 = vpop.xlane.xlu0 %733  ;;  %v891_v51 = vsub.f32 %v810_v33, %v2524_v49  ;;  %v892_v23 = vsub.f32 %v811_v19, %v2525_v55  ;;  %v1610_v38 = vpop.eup %1609  ;;  %v775_v50 = vmax.f32 %v755_v52, 1e-12 }
 0x1b9   : > { %2523 = vst [vmem:[#allocation4_spill] sm:$0xff] %v2121_v4  ;;  %v893_v45 = vsub.f32 %v812_v9, %v2526_v30  ;;  %v768_v28 = vmax.f32 %v734_v48, 1e-12  ;;  %v982_v42 = vmul.f32 %v2117_v13, %v2117_v13  ;;  %v983_v60 = vmul.f32 %v2121_v4, %v2121_v4 }
 0x1ba   : > { %v934_v58 = vmul.f32 %v2034_v53, %v891_v51  ;;  %v935_v24 = vmul.f32 %v2042_v62, %v892_v23  ;;  %v798_v10 = vmul.f32 %v1610_v38, %v1911_v63  ;;  %v799_v33 = vmul.f32 %v1610_v38, %v1921_v6 }
 0x1bb   : > { %1623 = vrsqrt.f32 %v775_v50  ;;  %v1014_v19 = vadd.f32 %v983_v60, %v982_v42  ;;  %v796_v9 = vmul.f32 %v1608_v5, %v1895_v54  ;;  %v797_v52 = vmul.f32 %v1608_v5, %v1903_v59  ;;  %v1612_v48 = vpop.eup %1611  ;;  %v737_v55 = vpop.xlane.xlu1 %736 }
 0x1bc   : > { %1625 = vrsqrt.f32 %v768_v28  ;;  %v758_v49 = vpop.xlane.xlu0 %757  ;;  %v2527_v30 = vunpack.c.l.bf16 %v2024_v34  ;;  %v2528_v51 = vunpack.c.h.bf16 %v2024_v34  ;;  %v2529_v63 = vunpack.c.l.bf16 %v2031_v43 }
 0x1bd   : > { %v776_v50 = vmax.f32 %v758_v49, 1e-12  ;;  %v769_v38 = vmax.f32 %v737_v55, 1e-12  ;;  %1015 = vadd.xlane.f32.xlu0 %v1014_v19  ;;  %v2530_v54 = vunpack.c.h.bf16 %v2031_v43  ;;  %v2531_v5 = vunpack.c.l.bf16 %v2037_v56  ;;  %v1614_v49 = vpop.eup %1613 }
 0x1be   : > { %v2142_v4 = vadd.f32 %v934_v58, %v2527_v30  ;;  %v2146_v23 = vadd.f32 %v935_v24, %v2528_v51  ;;  %v879_v6 = vsub.f32 %v798_v10, %v2529_v63  ;;  %v2532_v58 = vunpack.c.h.bf16 %v2037_v56 }
 0x1bf   : > { %v880_v59 = vsub.f32 %v799_v33, %v2530_v54  ;;  %v877_v28 = vsub.f32 %v796_v9, %v2531_v5  ;;  %1627 = vrsqrt.f32 %v776_v50  ;;  %v814_v33 = vmul.f32 %v1612_v48, %v1913_v0  ;;  %v761_v9 = vpop.xlane.xlu1 %760 }
 0x1c0   : > { %v998_v42 = vmul.f32 %v2142_v4, %v2142_v4  ;;  %v999_v34 = vmul.f32 %v2146_v23, %v2146_v23  ;;  %v922_v60 = vmul.f32 %v2034_v53, %v879_v6  ;;  %v878_v24 = vsub.f32 %v797_v52, %v2532_v58  ;;  %v1616_v6 = vpop.eup %1615 }
 0x1c1   : > { %v923_v10 = vmul.f32 %v2042_v62, %v880_v59  ;;  %v920_v19 = vmul.f32 %v2034_v53, %v877_v28  ;;  %1629 = vrsqrt.f32 %v769_v38  ;;  %v2533_v30 = vmov %v2529_v63 }
 0x1c2   : > { %v1038_v55 = vadd.f32 %v999_v34, %v998_v42  ;;  %v2166_v51 = vadd.f32 %v922_v60, %v2533_v30  ;;  %v921_v63 = vmul.f32 %v2042_v62, %v878_v24  ;;  %v777_v54 = vmax.f32 %v761_v9, 1e-12  ;;  %v1618_v24 = vpop.eup %1617 }
 0x1c3   : > { %v2534_v52 = vunpack.c.h.bf16 %v2031_v43  ;;  %v2535_v59 = vmov %v2531_v5  ;;  %v815_v0 = vmul.f32 %v1612_v48, %v1923_v7  ;;  %v2536_v28 = vmov %v2532_v58 }
 0x1c4   : > { %v2175_v5 = vadd.f32 %v920_v19, %v2535_v59  ;;  %1039 = vadd.xlane.f32.xlu0 %v1038_v55  ;;  %v986_v38 = vmul.f32 %v2166_v51, %v2166_v51  ;;  %v2182_v42 = vadd.f32 %v921_v63, %v2536_v28  ;;  %v2537_v34 = vunpack.c.l.bf16 %v2040_v61  ;;  %v1620_v56 = vpop.eup %1619 }
 0x1c5   : > { %v2171_v50 = vadd.f32 %v923_v10, %v2534_v52  ;;  %v2538_v43 = vunpack.c.h.bf16 %v2027_v37  ;;  %1631 = vrsqrt.f32 %v777_v54  ;;  %v2539_v48 = vunpack.c.h.bf16 %v2040_v61  ;;  %v2199_v30 = vpop.eup %1621 }
 0x1c6   : > { %v895_v60 = vsub.f32 %v814_v33, %v2537_v34  ;;  %v984_v7 = vmul.f32 %v2175_v5, %v2175_v5  ;;  %v985_v9 = vmul.f32 %v2182_v42, %v2182_v42  ;;  %v936_v55 = vmul.f32 %v2034_v53, %v893_v45 }
 0x1c7   : > { %v894_v58 = vsub.f32 %v813_v2, %v2538_v43  ;;  %v987_v10 = vmul.f32 %v2171_v50, %v2171_v50  ;;  %v896_v19 = vsub.f32 %v815_v0, %v2539_v48  ;;  %v802_v52 = vmul.f32 %v1616_v6, %v1943_v20 }
 0x1c8   : > { %v938_v33 = vmul.f32 %v2034_v53, %v895_v60  ;;  %v803_v59 = vmul.f32 %v1616_v6, %v1953_v26  ;;  %v1017_v0 = vadd.f32 %v985_v9, %v984_v7  ;;  %v2540_v28 = vmov %v2537_v34 }
 0x1c9   : > { %v937_v2 = vmul.f32 %v2042_v62, %v894_v58  ;;  %v1020_v63 = vadd.f32 %v987_v10, %v986_v38  ;;  %v939_v54 = vmul.f32 %v2042_v62, %v896_v19  ;;  %v2541_v60 = vunpack.c.l.bf16 %v2027_v37  ;;  %v2225_v19 = vpop.eup %1623 }
 0x1ca   : > { %v2206_v34 = vadd.f32 %v938_v33, %v2540_v28  ;;  %v2542_v45 = vunpack.c.h.bf16 %v2027_v37  ;;  %v2543_v38 = vmov %v2539_v48  ;;  %v2544_v20 = vunpack.c.l.bf16 %v2054_v14  ;;  %1018 = vadd.xlane.f32.xlu1 %v1017_v0 }
 0x1cb   : > { %v2210_v43 = vadd.f32 %v936_v55, %v2541_v60  ;;  %1021 = vadd.xlane.f32.xlu0 %v1020_v63  ;;  %v2218_v10 = vadd.f32 %v939_v54, %v2543_v38  ;;  %v2545_v6 = vunpack.c.h.bf16 %v2054_v14  ;;  %v800_v48 = vmul.f32 %v1614_v49, %v1931_v11  ;;  %v1626_v55 = vpop.eup %1625 }
 0x1cc   : > { %v2214_v58 = vadd.f32 %v937_v2, %v2542_v45  ;;  %v883_v26 = vsub.f32 %v802_v52, %v2544_v20  ;;  %v1002_v37 = vmul.f32 %v2206_v34, %v2206_v34  ;;  %v801_v33 = vmul.f32 %v1614_v49, %v1935_v15 }
 0x1cd   : > { %v884_v7 = vsub.f32 %v803_v59, %v2545_v6  ;;  %v1000_v9 = vmul.f32 %v2210_v43, %v2210_v43  ;;  %v1003_v2 = vmul.f32 %v2218_v10, %v2218_v10  ;;  %v2546_v54 = vunpack.c.l.bf16 %v2048_v8 }
 0x1ce   : > { %v1001_v61 = vmul.f32 %v2214_v58, %v2214_v58  ;;  %v926_v11 = vmul.f32 %v2034_v53, %v883_v26  ;;  %v2547_v0 = vunpack.c.h.bf16 %v2048_v8  ;;  %v818_v60 = vmul.f32 %v1620_v56, %v1945_v21 }
 0x1cf   : > { %v927_v63 = vmul.f32 %v2042_v62, %v884_v7  ;;  %v881_v52 = vsub.f32 %v800_v48, %v2546_v54  ;;  %v819_v45 = vmul.f32 %v1620_v56, %v1955_v27  ;;  %v1044_v15 = vadd.f32 %v1003_v2, %v1002_v37  ;;  %v1628_v7 = vpop.eup %1627 }
 0x1d0   : > { %v1041_v59 = vadd.f32 %v1001_v61, %v1000_v9  ;;  %v882_v28 = vsub.f32 %v801_v33, %v2547_v0  ;;  %v2548_v49 = vmov %v2544_v20  ;;  %v2549_v20 = vmov %v2545_v6  ;;  %v2259_v61 = vpop.eup %1629 }
 0x1d1   : > { %v2246_v38 = vadd.f32 %v926_v11, %v2548_v49  ;;  %v2250_v26 = vadd.f32 %v927_v63, %v2549_v20  ;;  %v924_v6 = vmul.f32 %v2034_v53, %v881_v52  ;;  %v2550_v9 = vunpack.c.l.bf16 %v2063_v25  ;;  %1045 = vadd.xlane.f32.xlu0 %v1044_v15 }
 0x1d2   : > { %1042 = vadd.xlane.f32.xlu1 %v1041_v59  ;;  %v925_v48 = vmul.f32 %v2042_v62, %v882_v28  ;;  %v2551_v27 = vunpack.c.h.bf16 %v2063_v25  ;;  %v816_v37 = vmul.f32 %v1618_v24, %v1933_v12  ;;  %v2552_v2 = vmov %v2546_v54 }
 0x1d3   : > { %v899_v21 = vsub.f32 %v818_v60, %v2550_v9  ;;  %v990_v14 = vmul.f32 %v2246_v38, %v2246_v38  ;;  %v991_v33 = vmul.f32 %v2250_v26, %v2250_v26  ;;  %v2267_v11 = vadd.f32 %v924_v6, %v2552_v2 }
 0x1d4   : > { %v900_v56 = vsub.f32 %v819_v45, %v2551_v27  ;;  %v817_v63 = vmul.f32 %v1618_v24, %v1937_v16  ;;  %v2553_v54 = vmov %v2547_v0  ;;  %v2554_v0 = vunpack.c.l.bf16 %v2057_v17  ;;  %v2283_v24 = vpop.eup %1631 }
 0x1d5   : > { %v2272_v52 = vadd.f32 %v925_v48, %v2553_v54  ;;  %v942_v12 = vmul.f32 %v2034_v53, %v899_v21  ;;  %v1026_v60 = vadd.f32 %v991_v33, %v990_v14  ;;  %v988_v45 = vmul.f32 %v2267_v11, %v2267_v11 }
 0x1d6   : > { %v943_v59 = vmul.f32 %v2042_v62, %v900_v56  ;;  %v897_v28 = vsub.f32 %v816_v37, %v2554_v0  ;;  %v2555_v15 = vunpack.c.h.bf16 %v2057_v17  ;;  %v806_v16 = vmul.f32 %v1626_v55, %v1975_v40 }
 0x1d7   : > { %v989_v8 = vmul.f32 %v2272_v52, %v2272_v52  ;;  %v2556_v20 = vmov %v2550_v9  ;;  %v2557_v48 = vmov %v2551_v27  ;;  %1027 = vadd.xlane.f32.xlu0 %v1026_v60  ;;  %v807_v40 = vmul.f32 %v1626_v55, %v1985_v46 }
 0x1d8   : > { %v898_v49 = vsub.f32 %v817_v63, %v2555_v15  ;;  %v2289_v6 = vadd.f32 %v942_v12, %v2556_v20  ;;  %v2293_v9 = vadd.f32 %v943_v59, %v2557_v48  ;;  %v940_v21 = vmul.f32 %v2034_v53, %v897_v28 }
 0x1d9   : > { %v2558_v56 = vunpack.c.l.bf16 %v2069_v39  ;;  %v804_v14 = vmul.f32 %v2199_v30, %v1963_v31  ;;  %v1023_v33 = vadd.f32 %v989_v8, %v988_v45  ;;  %v2559_v63 = vmov %v2554_v0 }
 0x1da   : > { %v941_v27 = vmul.f32 %v2042_v62, %v898_v49  ;;  %v1006_v2 = vmul.f32 %v2289_v6, %v2289_v6  ;;  %v1007_v25 = vmul.f32 %v2293_v9, %v2293_v9  ;;  %v2308_v54 = vadd.f32 %v940_v21, %v2559_v63 }
 0x1db   : > { %v887_v37 = vsub.f32 %v806_v16, %v2558_v56  ;;  %v2560_v12 = vmov %v2555_v15  ;;  %v2561_v55 = vunpack.c.h.bf16 %v2069_v39  ;;  %v805_v0 = vmul.f32 %v2199_v30, %v1967_v35  ;;  %1024 = vadd.xlane.f32.xlu1 %v1023_v33 }
 0x1dc   : > { %v2312_v46 = vadd.f32 %v941_v27, %v2560_v12  ;;  %v1050_v28 = vadd.f32 %v1007_v25, %v1006_v2  ;;  %v1004_v60 = vmul.f32 %v2308_v54, %v2308_v54  ;;  %v2562_v45 = vunpack.c.l.bf16 %v2072_v44 }
 0x1dd   : > { %v888_v59 = vsub.f32 %v807_v40, %v2561_v55  ;;  %v930_v31 = vmul.f32 %v2034_v53, %v887_v37  ;;  %v822_v17 = vmul.f32 %v1628_v7, %v1977_v41  ;;  %v2563_v8 = vmov %v2558_v56 }
 0x1de   : > { %v885_v15 = vsub.f32 %v804_v14, %v2562_v45  ;;  %v1005_v49 = vmul.f32 %v2312_v46, %v2312_v46  ;;  %v2564_v35 = vunpack.c.h.bf16 %v2072_v44  ;;  %1051 = vadd.xlane.f32.xlu0 %v1050_v28  ;;  %v823_v21 = vmul.f32 %v1628_v7, %v1987_v47 }
 0x1df   : > { %v931_v16 = vmul.f32 %v2042_v62, %v888_v59  ;;  %v2329_v20 = vadd.f32 %v930_v31, %v2563_v8  ;;  %v2565_v27 = vunpack.c.l.bf16 %v2084_v22  ;;  %v820_v40 = vmul.f32 %v2225_v19, %v1965_v32 }
 0x1e0   : > { %v886_v30 = vsub.f32 %v805_v0, %v2564_v35  ;;  %v928_v48 = vmul.f32 %v2034_v53, %v885_v15  ;;  %v1047_v56 = vadd.f32 %v1005_v49, %v1004_v60  ;;  %v2566_v37 = vmov %v2561_v55 }
 0x1e1   : > { %v903_v41 = vsub.f32 %v822_v17, %v2565_v27  ;;  %v2341_v14 = vadd.f32 %v931_v16, %v2566_v37  ;;  %v994_v33 = vmul.f32 %v2329_v20, %v2329_v20  ;;  %v2567_v25 = vmov %v2562_v45 }
 0x1e2   : > { %v929_v2 = vmul.f32 %v2042_v62, %v886_v30  ;;  %v2348_v63 = vadd.f32 %v928_v48, %v2567_v25  ;;  %v2568_v47 = vunpack.c.h.bf16 %v2084_v22  ;;  %v821_v32 = vmul.f32 %v2225_v19, %v1969_v36  ;;  %1048 = vadd.xlane.f32.xlu1 %v1047_v56  ;;  %v2577_v22 = vld [vmem:[#allocation2_spill] sm:$0xff] }
 0x1e3   : > { %v946_v12 = vmul.f32 %v2034_v53, %v903_v41  ;;  %v995_v39 = vmul.f32 %v2341_v14, %v2341_v14  ;;  %v2569_v55 = vmov %v2564_v35  ;;  %v2570_v31 = vunpack.c.l.bf16 %v2079_v18 }
 0x1e4   : > { %v904_v7 = vsub.f32 %v823_v21, %v2568_v47  ;;  %v2359_v59 = vadd.f32 %v929_v2, %v2569_v55  ;;  %v808_v28 = vmul.f32 %v2259_v61, %v1995_v57  ;;  %v992_v60 = vmul.f32 %v2348_v63, %v2348_v63 }
 0x1e5   : > { %v901_v0 = vsub.f32 %v820_v40, %v2570_v31  ;;  %v2571_v36 = vmov %v2565_v27  ;;  %v2572_v15 = vunpack.c.h.bf16 %v2079_v18  ;;  %v1032_v17 = vadd.f32 %v995_v39, %v994_v33 }
 0x1e6   : > { %v947_v45 = vmul.f32 %v2042_v62, %v904_v7  ;;  %v2370_v19 = vadd.f32 %v946_v12, %v2571_v36  ;;  %v993_v49 = vmul.f32 %v2359_v59, %v2359_v59  ;;  %v809_v57 = vmul.f32 %v2259_v61, %v1999_v1  ;;  %v2579_v7 = vld [vmem:[#allocation3_spill] sm:$0xff] }
 0x1e7   : > { %v902_v44 = vsub.f32 %v821_v32, %v2572_v15  ;;  %v944_v16 = vmul.f32 %v2034_v53, %v901_v0  ;;  %v2573_v8 = vmov %v2568_v47  ;;  %v2574_v21 = vunpack.c.l.bf16 %v2091_v29  ;;  %1033 = vadd.xlane.f32.xlu0 %v1032_v17 }
 0x1e8   : > { %v2381_v35 = vadd.f32 %v947_v45, %v2573_v8  ;;  %v1010_v30 = vmul.f32 %v2370_v19, %v2370_v19  ;;  %v1029_v41 = vadd.f32 %v993_v49, %v992_v60  ;;  %v2575_v40 = vmov %v2570_v31 }
 0x1e9   : > { %v945_v48 = vmul.f32 %v2042_v62, %v902_v44  ;;  %v889_v27 = vsub.f32 %v808_v28, %v2574_v21  ;;  %v2390_v56 = vadd.f32 %v944_v16, %v2575_v40  ;;  %v2576_v1 = vunpack.c.h.bf16 %v2091_v29 }
 0x1ea   : > { %v824_v37 = vmul.f32 %v2283_v24, %v2577_v22  ;;  %v1011_v33 = vmul.f32 %v2381_v35, %v2381_v35  ;;  %v2578_v2 = vmov %v2572_v15  ;;  %v825_v12 = vmul.f32 %v2283_v24, %v2579_v7  ;;  %1030 = vadd.xlane.f32.xlu1 %v1029_v41 }
 0x1eb   : > { %v890_v61 = vsub.f32 %v809_v57, %v2576_v1  ;;  %v2400_v25 = vadd.f32 %v945_v48, %v2578_v2  ;;  %v932_v47 = vmul.f32 %v2034_v53, %v889_v27  ;;  %v1008_v32 = vmul.f32 %v2390_v56, %v2390_v56 }
 0x1ec   : > { %v2580_v55 = vunpack.c.l.bf16 %v2097_v3  ;;  %v1056_v0 = vadd.f32 %v1011_v33, %v1010_v30  ;;  %v2581_v28 = vmov %v2574_v21  ;;  %v2582_v45 = vunpack.c.h.bf16 %v2097_v3 }
 0x1ed   : > { %v933_v39 = vmul.f32 %v2042_v62, %v890_v61  ;;  %v1009_v18 = vmul.f32 %v2400_v25, %v2400_v25  ;;  %v2414_v60 = vadd.f32 %v932_v47, %v2581_v28  ;;  %v2583_v36 = vmov %v2576_v1 }
 0x1ee   : > { %v905_v31 = vsub.f32 %v824_v37, %v2580_v55  ;;  %v906_v24 = vsub.f32 %v825_v12, %v2582_v45  ;;  %1057 = vadd.xlane.f32.xlu0 %v1056_v0  ;;  %v2584_v8 = vmov %v2580_v55  ;;  %v2585_v29 = vmov %v2582_v45 }
 0x1ef   : > { %v2420_v15 = vadd.f32 %v933_v39, %v2583_v36  ;;  %v1053_v17 = vadd.f32 %v1009_v18, %v1008_v32  ;;  %v996_v49 = vmul.f32 %v2414_v60, %v2414_v60  ;;  %v2586_v39 = vld [vmem:[#allocation4_spill] sm:$0xff] }
 0x1f0   : > { %v948_v44 = vmul.f32 %v2034_v53, %v905_v31  ;;  %v949_v16 = vmul.f32 %v2042_v62, %v906_v24 }
 0x1f1   : > { %v997_v57 = vmul.f32 %v2420_v15, %v2420_v15  ;;  %1054 = vadd.xlane.f32.xlu1 %v1053_v17 }
 0x1f2   : > { %v2430_v30 = vadd.f32 %v948_v44, %v2584_v8  ;;  %v2434_v48 = vadd.f32 %v949_v16, %v2585_v29 }
 0x1f3   : > { %v1035_v53 = vadd.f32 %v997_v57, %v996_v49 }
 0x1f4   : > { %v1012_v21 = vmul.f32 %v2430_v30, %v2430_v30  ;;  %v1013_v27 = vmul.f32 %v2434_v48, %v2434_v48 }
 0x1f5   : > { %1036 = vadd.xlane.f32.xlu1 %v1035_v53 }
 0x1f6   : > { %v1059_v62 = vadd.f32 %v1013_v27, %v1012_v21 }
 0x1f9   : > { %1060 = vadd.xlane.f32.xlu1 %v1059_v62 }
 0x246   : > { %v1016_v41 = vpop.xlane.xlu0 %1015 }
 0x247   : > { %v1062_v40 = vmax.f32 %v1016_v41, 1e-12 }
 0x249   : > { %1633 = vrsqrt.f32 %v1062_v40 }
 0x24d   : > { %v1040_v1 = vpop.xlane.xlu0 %1039 }
 0x24e   : > { %v1070_v61 = vmax.f32 %v1040_v1, 1e-12 }
 0x250   : > { %1635 = vrsqrt.f32 %v1070_v61 }
 0x253   : > { %v1019_v37 = vpop.xlane.xlu1 %1018 }
 0x254   : > { %v1022_v3 = vpop.xlane.xlu0 %1021  ;;  %v1063_v33 = vmax.f32 %v1019_v37, 1e-12 }
 0x255   : > { %v1064_v22 = vmax.f32 %v1022_v3, 1e-12 }
 0x256   : > { %v1634_v47 = vpop.eup %1633 }
 0x257   : > { %1637 = vrsqrt.f32 %v1064_v22  ;;  %v1094_v32 = vmul.f32 %v1634_v47, %v2117_v13  ;;  %v1095_v55 = vmul.f32 %v1634_v47, %v2586_v39 }
 0x258   : > { %1639 = vrsqrt.f32 %v1063_v33 }
 0x259   : > { %v1441_v0 = vpack.c.bf16 %v1095_v55, %v1094_v32 }
 0x25a   : > { %v1046_v7 = vpop.xlane.xlu0 %1045 }
 0x25b   : > { %v1043_v2 = vpop.xlane.xlu1 %1042  ;;  %v1072_v31 = vmax.f32 %v1046_v7, 1e-12  ;;  %1222 = vst [vmem:[%s2446_s15] sm:$0xff] %v1441_v0 }
 0x25c   : > { %v1071_v12 = vmax.f32 %v1043_v2, 1e-12 }
 0x25d   : > { %v1636_v28 = vpop.eup %1635 }
 0x25e   : > { %1641 = vrsqrt.f32 %v1071_v12  ;;  %v1110_v24 = vmul.f32 %v1636_v28, %v2142_v4  ;;  %v1111_v13 = vmul.f32 %v1636_v28, %v2146_v23 }
 0x25f   : > { %1643 = vrsqrt.f32 %v1072_v31 }
 0x260   : > { %v1028_v18 = vpop.xlane.xlu0 %1027  ;;  %v1449_v44 = vpack.c.bf16 %v1111_v13, %v1110_v24 }
 0x261   : > { %v1066_v45 = vmax.f32 %v1028_v18, 1e-12 }
 0x262   : > { %1230 = vst [vmem:[%s2446_s15 + $0x40] sm:$0xff] %v1449_v44 }
 0x263   : > { %1645 = vrsqrt.f32 %v1066_v45 }
 0x264   : > { %v1025_v36 = vpop.xlane.xlu1 %1024  ;;  %v1638_v16 = vpop.eup %1637 }
 0x265   : > { %v1065_v17 = vmax.f32 %v1025_v36, 1e-12  ;;  %v1640_v8 = vpop.eup %1639  ;;  %v1098_v29 = vmul.f32 %v1638_v16, %v2166_v51  ;;  %v1099_v53 = vmul.f32 %v1638_v16, %v2171_v50 }
 0x266   : > { %v1096_v4 = vmul.f32 %v1640_v8, %v2175_v5  ;;  %v1097_v23 = vmul.f32 %v1640_v8, %v2182_v42 }
 0x267   : > { %v1052_v49 = vpop.xlane.xlu0 %1051  ;;  %1647 = vrsqrt.f32 %v1065_v17  ;;  %v1443_v27 = vpack.c.bf16 %v1099_v53, %v1098_v29 }
 0x268   : > { %v1074_v57 = vmax.f32 %v1052_v49, 1e-12  ;;  %v1442_v41 = vpack.c.bf16 %v1097_v23, %v1096_v4 }
 0x269   : > { %1224 = vst [vmem:[%s2446_s15 + $0x10] sm:$0xff] %v1443_v27 }
 0x26a   : > { %1649 = vrsqrt.f32 %v1074_v57  ;;  %1223 = vst [vmem:[%s2446_s15 + $0x8] sm:$0xff] %v1442_v41 }
 0x26b   : > { %v1049_v21 = vpop.xlane.xlu1 %1048  ;;  %v1642_v40 = vpop.eup %1641 }
 0x26c   : > { %v1073_v62 = vmax.f32 %v1049_v21, 1e-12  ;;  %v1644_v1 = vpop.eup %1643  ;;  %v1112_v51 = vmul.f32 %v1642_v40, %v2210_v43  ;;  %v1113_v50 = vmul.f32 %v1642_v40, %v2214_v58 }
 0x26d   : > { %v1114_v5 = vmul.f32 %v1644_v1, %v2206_v34  ;;  %v1115_v42 = vmul.f32 %v1644_v1, %v2218_v10 }
 0x26e   : > { %1651 = vrsqrt.f32 %v1073_v62  ;;  %v1450_v22 = vpack.c.bf16 %v1113_v50, %v1112_v51 }
 0x26f   : > { %v1451_v33 = vpack.c.bf16 %v1115_v42, %v1114_v5 }
 0x270   : > { %v1034_v61 = vpop.xlane.xlu0 %1033  ;;  %v1646_v47 = vpop.eup %1645  ;;  %1231 = vst [vmem:[%s2446_s15 + $0x48] sm:$0xff] %v1450_v22 }
 0x271   : > { %v1068_v3 = vmax.f32 %v1034_v61, 1e-12  ;;  %1232 = vst [vmem:[%s2446_s15 + $0x50] sm:$0xff] %v1451_v33  ;;  %v1102_v7 = vmul.f32 %v1646_v47, %v2246_v38  ;;  %v1103_v43 = vmul.f32 %v1646_v47, %v2250_v26 }
 0x273   : > { %v1031_v37 = vpop.xlane.xlu1 %1030  ;;  %1653 = vrsqrt.f32 %v1068_v3  ;;  %v1445_v10 = vpack.c.bf16 %v1103_v43, %v1102_v7 }
 0x274   : > { %v1067_v2 = vmax.f32 %v1031_v37, 1e-12  ;;  %v1648_v34 = vpop.eup %1647 }
 0x275   : > { %v1100_v39 = vmul.f32 %v1648_v34, %v2267_v11  ;;  %v1101_v55 = vmul.f32 %v1648_v34, %v2272_v52  ;;  %1226 = vst [vmem:[%s2446_s15 + $0x20] sm:$0xff] %v1445_v10 }
 0x276   : > { %1655 = vrsqrt.f32 %v1067_v2 }
 0x277   : > { %v1058_v58 = vpop.xlane.xlu0 %1057  ;;  %v1650_v0 = vpop.eup %1649  ;;  %v1444_v18 = vpack.c.bf16 %v1101_v55, %v1100_v39 }
 0x278   : > { %v1076_v12 = vmax.f32 %v1058_v58, 1e-12  ;;  %v1118_v38 = vmul.f32 %v1650_v0, %v2289_v6  ;;  %v1119_v26 = vmul.f32 %v1650_v0, %v2293_v9 }
 0x279   : > { %1225 = vst [vmem:[%s2446_s15 + $0x18] sm:$0xff] %v1444_v18 }
 0x27a   : > { %v1055_v32 = vpop.xlane.xlu1 %1054  ;;  %1657 = vrsqrt.f32 %v1076_v12  ;;  %v1453_v24 = vpack.c.bf16 %v1119_v26, %v1118_v38 }
 0x27b   : > { %v1075_v31 = vmax.f32 %v1055_v32, 1e-12  ;;  %v1652_v45 = vpop.eup %1651 }
 0x27c   : > { %v1116_v11 = vmul.f32 %v1652_v45, %v2308_v54  ;;  %v1117_v52 = vmul.f32 %v1652_v45, %v2312_v46  ;;  %1234 = vst [vmem:[%s2446_s15 + $0x60] sm:$0xff] %v1453_v24 }
 0x27d   : > { %1659 = vrsqrt.f32 %v1075_v31 }
 0x27e   : > { %v1037_v28 = vpop.xlane.xlu1 %1036  ;;  %v1452_v36 = vpack.c.bf16 %v1117_v52, %v1116_v11 }
 0x27f   : > { %v1069_v13 = vmax.f32 %v1037_v28, 1e-12 }
 0x280   : > { %v1654_v17 = vpop.eup %1653  ;;  %1233 = vst [vmem:[%s2446_s15 + $0x58] sm:$0xff] %v1452_v36 }
 0x281   : > { %1661 = vrsqrt.f32 %v1069_v13  ;;  %v1106_v9 = vmul.f32 %v1654_v17, %v2329_v20  ;;  %v1107_v49 = vmul.f32 %v1654_v17, %v2341_v14 }
 0x282   : > { %v1061_v44 = vpop.xlane.xlu1 %1060 }
 0x283   : > { %v1077_v6 = vmax.f32 %v1061_v44, 1e-12  ;;  %v1656_v16 = vpop.eup %1655  ;;  %v1447_v57 = vpack.c.bf16 %v1107_v49, %v1106_v9 }
 0x284   : > { %v1104_v54 = vmul.f32 %v1656_v16, %v2348_v63  ;;  %v1105_v46 = vmul.f32 %v1656_v16, %v2359_v59 }
 0x285   : > { %1663 = vrsqrt.f32 %v1077_v6  ;;  %1228 = vst [vmem:[%s2446_s15 + $0x30] sm:$0xff] %v1447_v57 }
 0x286   : > { %v1446_v29 = vpack.c.bf16 %v1105_v46, %v1104_v54 }
 0x287   : > { %v1658_v8 = vpop.eup %1657 }
 0x288   : > { %v1122_v53 = vmul.f32 %v1658_v8, %v2370_v19  ;;  %v1123_v4 = vmul.f32 %v1658_v8, %v2381_v35  ;;  %1227 = vst [vmem:[%s2446_s15 + $0x28] sm:$0xff] %v1446_v29 }
 0x28a   : > { %v1660_v20 = vpop.eup %1659  ;;  %v1455_v14 = vpack.c.bf16 %v1123_v4, %v1122_v53 }
 0x28b   : > { %v1120_v23 = vmul.f32 %v1660_v20, %v2390_v56  ;;  %v1121_v21 = vmul.f32 %v1660_v20, %v2400_v25 }
 0x28c   : > { %1236 = vst [vmem:[%s2446_s15 + $0x70] sm:$0xff] %v1455_v14 }
 0x28d   : > { %v1454_v63 = vpack.c.bf16 %v1121_v21, %v1120_v23 }
 0x28e   : > { %v1662_v27 = vpop.eup %1661 }
 0x28f   : > { %1235 = vst [vmem:[%s2446_s15 + $0x68] sm:$0xff] %v1454_v63  ;;  %v1108_v59 = vmul.f32 %v1662_v27, %v2414_v60  ;;  %v1109_v62 = vmul.f32 %v1662_v27, %v2420_v15 }
 0x291   : > { %v1448_v41 = vpack.c.bf16 %v1109_v62, %v1108_v59 }
 0x292   : > { %v1664_v19 = vpop.eup %1663 }
 0x293   : > { %1229 = vst [vmem:[%s2446_s15 + $0x38] sm:$0xff] %v1448_v41  ;;  %v1124_v35 = vmul.f32 %v1664_v19, %v2430_v30  ;;  %v1125_v40 = vmul.f32 %v1664_v19, %v2434_v48 }
 0x295   : > { %v1456_v1 = vpack.c.bf16 %v1125_v40, %v1124_v35 }
 0x297   : > { %1237 = vst [vmem:[%s2446_s15 + $0x78] sm:$0xff] %v1456_v1 }
 0x298 PF: > { %s14_s19 = sadd.s32 1, %s1703_s19   ;;  %s2587_s15 = smov %s1695_s17 }
 0x299   : > { %p11_p7 = scmp.ge.s32.totalorder %s14_s19, 6   ;;  %s2588_s16 = smov %s1699_s18 }
 0x29a   : > { %s2589_s17 = smov %s2592_s20  ;;  %s2590_s18 = smov %s2596_s21 }
 0x29b   :  { %13 = sbr.rel (!%p11_p7) target bundleno = 3 (0x3), region = 69 }

// kernel: ngpt_layer_forward.3
= control target key start
LH: loop header
LB: loop body
LE: loop exit
PB: predicated region body
PF: predicated region fallthrough
CT: control target
= control target key end

     0   :  { %s5817_s0 = inlined_call_operand.hbm [shape: bf16[2,256,256], index: 0, kind: input, shape index: {}, may-alias: {0,1}]   ;;  %s5818_s1 = inlined_call_operand.hbm [shape: bf16[2,256,256], index: 1, kind: input, shape index: {}, may-alias: {0,1}]   ;;  %s5819_s2 = inlined_call_operand.hbm [shape: bf16[256,256], index: 2, kind: input, shape index: {}]   ;;  %s5820_s3 = inlined_call_operand.hbm [shape: bf16[256,256], index: 3, kind: input, shape index: {}]   ;;  %s5821_s4 = inlined_call_operand.hbm [shape: bf16[256,256], index: 4, kind: input, shape index: {}]   ;;  %s5822_s5 = inlined_call_operand.vmem [shape: f32[2,1,128], index: 5, kind: input, shape index: {}]   ;;  %s5823_s6 = inlined_call_operand.vmem [shape: s32[2,1,256], index: 6, kind: input, shape index: {}]   ;;  %s5824_s7 = inlined_call_operand.vmem [shape: bf16[2,256,256], index: 7, kind: output, shape index: {}]  }
   0x1   :  { %5867 = sst [smem:[#allocation46_spill]] %s5817_s0 }
   0x2   :  { %5868 = sst [smem:[#allocation47_spill]] %s5818_s1 }
   0x3   :  { %5869 = sst [smem:[#allocation48_spill]] %s5819_s2 }
   0x4   :  { %5870 = sst [smem:[#allocation49_spill]] %s5820_s3 }
   0x5   :  { %5871 = sst [smem:[#allocation50_spill]] %s5821_s4 }
   0x6   :  { %5872 = sst [smem:[#allocation51_spill]] %s5822_s5 }
   0x7   :  { %5873 = sst [smem:[#allocation52_spill]] %s5823_s6 }
   0x8   :  { %5874 = sst [smem:[#allocation53_spill]] %s5824_s7 }
   0x9   :  { %12 = vsyncpa [#allocation7], 0 }
   0xa   :  { %14 = vsyncpa [#allocation7 + $0x1], 0 }
   0xb   :  { %15 = vsyncpa [#allocation9], 0 }
   0xc   :  { %17 = vsyncpa [#allocation9 + $0x1], 0 }
   0xd   :  { %18 = vsyncpa [#allocation12], 0 }
   0xe   :  { %20 = vsyncpa [#allocation12 + $0x1], 0  ;;  %s4575_s24 = smov 0   ;;  %s4577_s25 = smov 0  }
   0xf   :  { %s4579_s26 = smov 0   ;;  %s4581_s27 = smov 0  }
  0x10   :  { %s4583_s28 = smov 0   ;;  %s4585_s29 = smov 0  }
  0x11   :  { %s4587_s30 = smov 0   ;;  %s4589_s8 = smov 0  }
  0x12   :  { %s4591_s9 = smov 0   ;;  %s4593_s10 = smov 0  }
  0x13   :  { %s4595_s11 = smov 0   ;;  %s4597_s12 = smov 0  }
  0x14   :  { %s4599_s13 = smov 0   ;;  %s4601_s14 = smov 0  }
  0x15   :  { %s4603_s15 = smov 0   ;;  %s4605_s16 = smov 0  }
  0x16   :  { %s4607_s17 = smov 0   ;;  %s4609_s18 = smov 0  }
  0x17   :  { %s4611_s19 = smov 0   ;;  %s4613_s20 = smov 0  }
  0x18 LB: > { %5875 = sst [smem:[#allocation19_spill]] %s4444_s24  ;;  %s4674_s21 = sadd.s32 4294967295, %s4520_s20   ;;  %s4520_s20 = sphi %s4613_s20, %s26_s20   ;;  %s4516_s19 = sphi %s4611_s19, %s5984_s19   ;;  %s4512_s18 = sphi %s4609_s18, %s5982_s18   ;;  %s4508_s17 = sphi %s4607_s17, %s5992_s17   ;;  %s4504_s16 = sphi %s4605_s16, %s5991_s16   ;;  %s4500_s15 = sphi %s4603_s15, %s5977_s15   ;;  %s4496_s14 = sphi %s4601_s14, %s5976_s14   ;;  %s4492_s13 = sphi %s4599_s13, %s5990_s13   ;;  %s4488_s12 = sphi %s4597_s12, %s5989_s12   ;;  %s4484_s11 = sphi %s4595_s11, %s5988_s11   ;;  %s4480_s10 = sphi %s4593_s10, %s5987_s10   ;;  %s4476_s9 = sphi %s4591_s9, %s5973_s9   ;;  %s4472_s8 = sphi %s4589_s8, %s5986_s8   ;;  %s4468_s30 = sphi %s4587_s30, %s5985_s30   ;;  %s4464_s29 = sphi %s4585_s29, %s5972_s29   ;;  %s4460_s28 = sphi %s4583_s28, %s5971_s28   ;;  %s4456_s27 = sphi %s4581_s27, %s5970_s27   ;;  %s4452_s26 = sphi %s4579_s26, %s5983_s26   ;;  %s4448_s25 = sphi %s4577_s25, %s5981_s25   ;;  %s4444_s24 = sphi %s4575_s24, %s5979_s24  }
  0x19   : > { %5876 = sst [smem:[#allocation20_spill]] %s4456_s27  ;;  %s41_s22 = sadd.s32 1, %s4504_s16 }
  0x1a   : > { %5877 = sst [smem:[#allocation21_spill]] %s4460_s28  ;;  %p4677_p0 = scmp.ge.s32.totalorder %s41_s22, 2 }
  0x1b   : > { %5878 = sst [smem:[#allocation22_spill]] %s4468_s30  ;;  %p69_p1 = scmp.eq.s32.totalorder %s4520_s20, 0 }
  0x1c   : > { %5879 = sst [smem:[#allocation23_spill]] %s4480_s10  ;;  %p5834_p2 = scmp.eq.s32.totalorder %s4674_s21, 0 }
  0x1d   : > { %5880 = sst [smem:[#allocation24_spill]] %s4488_s12  ;;  %s5994_s22 = smov (%p4677_p0, %s41_s22), 0 }
  0x1e   : > { %5881 = sst [smem:[#allocation25_spill]] %s4492_s13  ;;  %p96_p3 = scmp.ne.s32.totalorder %s4472_s8, %s4468_s30 }
  0x1f   : > { %5882 = sst [smem:[#allocation26_spill]] %s4496_s14  ;;  %p102_p4 = scmp.ne.s32.totalorder %s4468_s30, %s4464_s29 }
  0x20   : > { %5883 = sst [smem:[#allocation27_spill]] %s4500_s15  ;;  %p4696_p5 = por %p96_p3, %p69_p1 }
  0x21   : > { %5884 = sst [smem:[#allocation28_spill]] %s4508_s17  ;;  %p4703_p7 = por %p102_p4, %p5834_p2 }
  0x22   : > { %5885 = sst [smem:[#allocation29_spill]] %s4512_s18  ;;  %p5833_p8 = scmp.lt.s32.totalorder %s4520_s20, 16 }
  0x23   : > { %5886 = sst [smem:[#allocation30_spill]] %s4516_s19  ;;  %s5836_s13 = sshll.u32 %s4516_s19, 6 }
  0x24   : > { %5887 = sst [smem:[#allocation31_spill]] %s4674_s21  ;;  %s312_s6 = sand.u32 1, %s4520_s20  }
  0x25   : > { %5889 = sst [smem:[#allocation32_spill]] %s5994_s22  ;;  %s314_s29 = sand.u32 1, %s4472_s8  }
  0x26   : > { %s5891_s7 = scalar_select %p4703_p7, 1, 0 }
  0x27   : > { %s3160_s12 = sshll.u32 %s314_s29, 7  ;;  %s3311_s15 = sshll.u32 %s4504_s16, 5 }
  0x28   : > { %5892 = sst [smem:[#allocation33_spill]] %s5891_s7  ;;  %s323_s14 = sadd.s32 %s3311_s15, %s5836_s13 }
  0x29   : > { %s316_s30 = scalar_lea.vmem [#allocation8], %s3160_s12  ;;  %s3164_s2 = sshll.u32 %s323_s14, 6 }
  0x2a   : > { %s326_s4 = sshll.u32 %s316_s30, 4  ;;  %s5893_s1 = sld [smem:[#allocation47_spill]]  ;;  %s327_s4 = int_to_ptr.vmem [resolvable:$true] %s326_s4 }
  0x2b   : > { %p4721_p9 = pnand %p5833_p8, %p4696_p5  ;;  %p3171_p10 = scmp.ge.s32.totalorder %s4520_s20, 1 }
  0x2c   : > { %p410_p11 = scmp.lt.s32.totalorder %s4520_s20, 17  ;;  %s4729_s29 = scalar_lea.sflag [#allocation9], %s312_s6 }
  0x2d   : > { %5895 = sst [smem:[#allocation34_spill]] %s4729_s29  ;;  %p4208_p12 = pneg %p4721_p9 }
  0x2e   : > { %s4219_s30 = scalar_lea.vmem %s327_s4, 2048  ;;  %s4522_s0 = smov [#allocation8]  }
  0x2f   : > { %p4220_p13 = scmp.ne.s32.totalorder %s327_s4, %s4219_s30 }
  0x30   : > { %s325_s24 = scalar_lea.hbm %s5893_s1, %s3164_s2  ;;  %s4224_s2 = sshll.u32 %s4522_s0, 4  ;;  %s4225_s2 = int_to_ptr.vmem [resolvable:$false] %s4224_s2 }
  0x31   : > { %p4222_p3 = pnand %p4220_p13, %p4208_p12  ;;  %s4226_s5 = scalar_lea.vmem %s4225_s2, 4096 }
  0x32   : > { %p4227_p5 = scmp.lt.s32.totalorder %s327_s4, %s4225_s2  ;;  %p4228_p6 = scmp.lt.s32.totalorder %s4226_s5, %s4219_s30 }
  0x33   : > { %p4223_p4 = pneg %p4222_p3 }
  0x34   : > { %p4229_p8 = por %p4228_p6, %p4227_p5 }
  0x36   : > { %p4230_p2 = pnand %p4229_p8, %p4223_p4 }
  0x38   : > { %4233 = shalt.err (!%p4230_p2)
}
  0x39   : > { %s5837_s12 = smov 128   ;;  %s5835_s14 = smov 8  }
  0x3a   : > { %3759 = dma.hbm_to_vmem [thread:$0]  (!%p4721_p9), %s325_s24, 2048, %s327_s4, %s4729_s29, %s5837_s12, %s5837_s12, %s5835_s14  }
  0x3b   : > { %p4743_p2 = pnand %p3171_p10, %p410_p11  ;;  %p122_p6 = scmp.ne.s32.totalorder %s4460_s28, %s4456_s27 }
  0x3c   : > { %p128_p8 = scmp.ne.s32.totalorder %s4456_s27, %s4452_s26  ;;  %s338_s0 = sand.u32 1, %s4460_s28  }
  0x3d   : > { %s5896_s15 = scalar_select %p4743_p2, 1, 0 }
  0x3e   : > { %p124_p12 = por %p122_p6, %p69_p1  ;;  %s4756_s2 = sshll.u32 %s338_s0, 7 }
  0x3f   : > { %5897 = sst [smem:[#allocation35_spill]] %s5896_s15  ;;  %p5899_p13 = scmp.eq.s32.totalorder %s4674_s21, 0 }
  0x40   : > { %5898 = sst [smem:[#allocation36_spill]] %s4756_s2  ;;  %s4765_s7 = sshll.u32 %s4512_s18, 6 }
  0x41   : > { %p4760_p3 = por %p128_p8, %p5899_p13  ;;  %p5902_p9 = scmp.lt.s32.totalorder %s4520_s20, 16 }
  0x42   : > { %s5905_s3 = sld [smem:[#allocation49_spill]]  ;;  %s360_s14 = scalar_lea.vmem [#allocation11], %s4756_s2 }
  0x43   : > { %s5900_s4 = scalar_select %p4760_p3, 1, 0 }
  0x44   : > { %p4769_p10 = pnand %p5902_p9, %p124_p12  ;;  %s366_s13 = sshll.u32 %s360_s14, 4  ;;  %s367_s13 = int_to_ptr.vmem [resolvable:$true] %s366_s13 }
  0x45   : > { %5901 = sst [smem:[#allocation37_spill]] %s5900_s4  ;;  %s4780_s30 = scalar_lea.sflag [#allocation12], %s312_s6 }
  0x46   : > { %s5903_s24 = scalar_select %p4769_p10, 1, 0 }
  0x47   : > { %5906 = sst [smem:[#allocation39_spill]] %s4780_s30  ;;  %p5865_p11 = pneg %p4769_p10 }
  0x48   : > { %5904 = sst [smem:[#allocation38_spill]] %s5903_s24  ;;  %s365_s0 = scalar_lea.hbm %s5905_s3, %s4765_s7 }
  0x49   : > { %s4247_s22 = scalar_lea.vmem %s367_s13, 2048  ;;  %s4525_s12 = smov [#allocation11]  }
  0x4a   : > { %p4248_p4 = scmp.ne.s32.totalorder %s367_s13, %s4247_s22  ;;  %s4252_s1 = sshll.u32 %s4525_s12, 4  ;;  %s4253_s1 = int_to_ptr.vmem [resolvable:$false] %s4252_s1 }
  0x4b   : > { %s4254_s26 = scalar_lea.vmem %s4253_s1, 4096  ;;  %p4255_p8 = scmp.lt.s32.totalorder %s367_s13, %s4253_s1 }
  0x4c   : > { %p4250_p5 = pnand %p4248_p4, %p5865_p11  ;;  %p4256_p12 = scmp.lt.s32.totalorder %s4254_s26, %s4247_s22 }
  0x4e   : > { %p4251_p6 = pneg %p4250_p5  ;;  %p4257_p13 = por %p4256_p12, %p4255_p8 }
  0x50   : > { %p4258_p9 = pnand %p4257_p13, %p4251_p6 }
  0x52   : > { %4261 = shalt.err (!%p4258_p9)
}
  0x53   : > { %s5839_s14 = smov 64   ;;  %s5907_s1 = sld [smem:[#allocation19_spill]] }
  0x54   : > { %s5841_s6 = smov 4   ;;  %s5908_s12 = smov 128  }
  0x55   : > { %3765 = dma.hbm_to_vmem [thread:$0]  (!%p4769_p10), %s365_s0, 2048, %s367_s13, %s4780_s30, %s5908_s12, %s5839_s14, %s5841_s6  }
  0x56   : > { %s44_s22 = sadd.s32 1, %s4508_s17  ;;  %p68_p4 = scmp.ne.s32.totalorder %s4484_s11, %s4480_s10 }
  0x57   : > { %s5996_s22 = smov (!%p4677_p0, %s44_s22), %s4508_s17  ;;  %p74_p5 = scmp.ne.s32.totalorder %s4480_s10, %s4476_s9 }
  0x58   : > { %p46_p6 = scmp.ge.s32.totalorder %s5996_s22, 2  ;;  %p4805_p8 = por %p69_p1, %p68_p4 }
  0x59   : > { %p5910_p12 = scmp.eq.s32.totalorder %s4674_s21, 0  ;;  %s5914_s23 = sadd.s32 1, %s4512_s18 }
  0x5a   : > { %s5998_s22 = smov (%p46_p6, %s5996_s22), 0  ;;  %s6000_s23 = smov (!%p46_p6, %s5914_s23), %s4512_s18 }
  0x5b   : > { %p4811_p13 = por %p5910_p12, %p74_p5  ;;  %5913 = sst [smem:[#allocation41_spill]] %s5998_s22 }
  0x5c   : > { %s57_s9 = ssub.s32 %s4508_s17, %s5998_s22  ;;  %p261_p0 = scmp.ne.s32.totalorder %s4448_s25, %s5907_s1 }
  0x5d   : > { %s5911_s13 = scalar_select %p4811_p13, 1, 0 }
  0x5e   : > { %s5915_s0 = sld [smem:[#allocation32_spill]]  ;;  %p50_p1 = scmp.ge.s32.totalorder %s6000_s23, 2 }
  0x5f   : > { %5912 = sst [smem:[#allocation40_spill]] %s5911_s13  ;;  %s288_s14 = sand.u32 1, %s4484_s11  }
  0x60   : > { %p5916_p9 = scmp.eq.s32.totalorder %s4674_s21, 15  ;;  %s6002_s23 = smov (%p50_p1, %s6000_s23), 0 }
  0x61   : > { %5919 = sst [smem:[#allocation43_spill]] %s6002_s23  ;;  %s5920_s26 = sadd.s32 1, %s4516_s19 }
  0x62   : > { %p4827_p4 = por %p5916_p9, %p261_p0  ;;  %s6004_s26 = smov (!%p50_p1, %s5920_s26), %s4516_s19 }
  0x63   : > { %s112_s5 = ssub.s32 %s4512_s18, %s6002_s23  ;;  %s3155_s1 = sshll.u32 %s288_s14, 7 }
  0x64   : > { %s5917_s6 = scalar_select %p4827_p4, 1, 0 }
  0x65   : > { %p54_p5 = scmp.ge.s32.totalorder %s6004_s26, 2  ;;  %p113_p6 = scmp.eq.s32.totalorder %s112_s5, 0 }
  0x66   : > { %5918 = sst [smem:[#allocation42_spill]] %s5917_s6  ;;  %s3310_s22 = sshll.u32 %s4508_s17, 5 }
  0x67   : > { %s6006_s26 = smov (%p54_p5, %s6004_s26), 0  ;;  %s5923_s27 = sadd.s32 1, %s4460_s28 }
  0x68   : > { %5921 = sst [smem:[#allocation44_spill]] %s6006_s26  ;;  %s5922_s4 = smov %s6006_s26 }
  0x69   : > { %s4844_s6 = scalar_select %p113_p6, %s4460_s28, %s5923_s27  }
  0x6a   : > { %s56_s21 = ssub.s32 %s4516_s19, %s5922_s4  ;;  %s5925_s13 = sshll.u32 %s4516_s19, 6 }
  0x6b   : > { %5924 = sst [smem:[#allocation45_spill]] %s4844_s6  ;;  %s299_s10 = sadd.s32 %s3310_s22, %s5925_s13 }
  0x6c   : > { %s58_s23 = sor.u32 %s57_s9, %s56_s21  ;;  %s5926_s18 = ssub.s32 %s4504_s16, %s5915_s0 }
  0x6d   : > { %s86_s15 = sor.u32 %s5926_s18, %s56_s21  ;;  %p59_p12 = scmp.eq.s32.totalorder %s58_s23, 0 }
  0x6e   : > { %p87_p0 = scmp.eq.s32.totalorder %s86_s15, 0  ;;  %s248_s30 = sor.u32 %s112_s5, %s58_s23 }
  0x6f   : > { %s3159_s17 = sshll.u32 %s299_s10, 6  ;;  %s5927_s29 = sadd.s32 1, %s4484_s11 }
  0x70   : > { %s4856_s26 = scalar_select %p59_p12, %s4484_s11, %s5927_s29  }
  0x71   : > { %s5928_s24 = sadd.s32 1, %s4472_s8  ;;  %p249_p1 = scmp.eq.s32.totalorder %s248_s30, 0 }
  0x72   : > { %s4861_s2 = scalar_select %p87_p0, %s4472_s8, %s5928_s24  }
  0x73   : > { %s5929_s28 = sld [smem:[#allocation46_spill]]  ;;  %s292_s19 = scalar_lea.vmem [#allocation6], %s3155_s1 }
  0x74   : > { %s302_s22 = sshll.u32 %s292_s19, 4  ;;  %p5930_p9 = scmp.lt.s32.totalorder %s4520_s20, 16  ;;  %s303_s22 = int_to_ptr.vmem [resolvable:$true] %s302_s22 }
  0x75   : > { %s5932_s10 = sadd.s32 1, %s4448_s25  ;;  %s289_s29 = scalar_lea.sflag [#allocation7], %s288_s14 }
  0x76   : > { %p4870_p5 = pnand %p5930_p9, %p4805_p8  ;;  %s4275_s15 = scalar_lea.vmem %s303_s22, 2048 }
  0x77   : > { %s4877_s21 = scalar_select %p249_p1, %s4448_s25, %s5932_s10  }
  0x78   : > { %p4264_p6 = pneg %p4870_p5  ;;  %p4276_p12 = scmp.ne.s32.totalorder %s303_s22, %s4275_s15 }
  0x79   : > { %s301_s4 = scalar_lea.hbm %s5929_s28, %s3159_s17  ;;  %s4528_s28 = smov [#allocation6]  }
  0x7a   : > { %p4278_p0 = pnand %p4276_p12, %p4264_p6  ;;  %s4280_s17 = sshll.u32 %s4528_s28, 4  ;;  %s4281_s17 = int_to_ptr.vmem [resolvable:$false] %s4280_s17 }
  0x7b   : > { %s4282_s3 = scalar_lea.vmem %s4281_s17, 4096  ;;  %p4283_p8 = scmp.lt.s32.totalorder %s303_s22, %s4281_s17 }
  0x7c   : > { %p4279_p11 = pneg %p4278_p0  ;;  %p4284_p9 = scmp.lt.s32.totalorder %s4282_s3, %s4275_s15 }
  0x7e   : > { %p4285_p4 = por %p4284_p9, %p4283_p8 }
  0x80   : > { %p4286_p3 = pnand %p4285_p4, %p4279_p11 }
  0x82   : > { %4289 = shalt.err (!%p4286_p3)
}
  0x83   : > { %s5933_s19 = smov 8   ;;  %s5934_s30 = sld [smem:[#allocation36_spill]] }
  0x84   : > { %3756 = dma.hbm_to_vmem [thread:$0]  (!%p4870_p5), %s301_s4, 2048, %s303_s22, %s289_s29, %s5908_s12, %s5908_s12, %s5933_s19  }
  0x85   : > { %s5936_s5 = sld [smem:[#allocation48_spill]]  ;;  %p5939_p11 = pneg %p4769_p10 }
  0x86   : > { %s5937_s27 = sld [smem:[#allocation50_spill]]  ;;  %s4529_s15 = smov [#allocation10]  }
  0x87   : > { %s4308_s28 = sshll.u32 %s4529_s15, 4  ;;  %s4309_s28 = int_to_ptr.vmem [resolvable:$false] %s4308_s28 }
  0x88   : > { %s4310_s4 = scalar_lea.vmem %s4309_s28, 4096 }
  0x89   : > { %s340_s23 = scalar_lea.vmem [#allocation10], %s5934_s30 }
  0x8a   : > { %s346_s9 = sshll.u32 %s340_s23, 4  ;;  %s347_s9 = int_to_ptr.vmem [resolvable:$true] %s346_s9 }
  0x8b   : > { %s345_s13 = scalar_lea.hbm %s5936_s5, %s4765_s7  ;;  %s4303_s18 = scalar_lea.vmem %s347_s9, 2048 }
  0x8c   : > { %s385_s10 = scalar_lea.hbm %s5937_s27, %s4765_s7  ;;  %p4304_p3 = scmp.ne.s32.totalorder %s347_s9, %s4303_s18 }
  0x8d   : > { %p4311_p5 = scmp.lt.s32.totalorder %s347_s9, %s4309_s28  ;;  %p4312_p6 = scmp.lt.s32.totalorder %s4310_s4, %s4303_s18 }
  0x8e   : > { %p4306_p4 = pnand %p4304_p3, %p5939_p11 }
  0x8f   : > { %p4313_p12 = por %p4312_p6, %p4311_p5 }
  0x90   : > { %p4307_p1 = pneg %p4306_p4 }
  0x92   : > { %p4314_p0 = pnand %p4313_p12, %p4307_p1 }
  0x94   : > { %4317 = shalt.err (!%p4314_p0)
}
  0x95   : > { %s5940_s22 = smov 4   ;;  %s5941_s29 = smov 64  }
  0x96   : > { %s5942_s17 = sld [smem:[#allocation34_spill]]  ;;  %s380_s19 = scalar_lea.vmem [#allocation13], %s5934_s30 }
  0x97   : > { %s386_s14 = sshll.u32 %s380_s19, 4  ;;  %p5943_p9 = pmov %p5939_p11  ;;  %s387_s14 = int_to_ptr.vmem [resolvable:$true] %s386_s14 }
  0x98   : > { %s4331_s6 = scalar_lea.vmem %s387_s14, 2048  ;;  %s4530_s5 = smov [#allocation13]  }
  0x99   : > { %p4332_p8 = scmp.ne.s32.totalorder %s387_s14, %s4331_s6  ;;  %s4336_s23 = sshll.u32 %s4530_s5, 4  ;;  %s4337_s23 = int_to_ptr.vmem [resolvable:$false] %s4336_s23 }
  0x9a   : > { %s4338_s0 = scalar_lea.vmem %s4337_s23, 4096  ;;  %p4339_p4 = scmp.lt.s32.totalorder %s387_s14, %s4337_s23 }
  0x9b   : > { %p4334_p3 = pnand %p4332_p8, %p5943_p9  ;;  %p4340_p1 = scmp.lt.s32.totalorder %s4338_s0, %s4331_s6 }
  0x9c   : > { %3762 = dma.hbm_to_vmem [thread:$0]  (!%p4769_p10), %s345_s13, 2048, %s347_s9, %s5942_s17, %s5908_s12, %s5941_s29, %s5940_s22  }
  0x9d   : > { %p4335_p11 = pneg %p4334_p3  ;;  %p4341_p5 = por %p4340_p1, %p4339_p4 }
  0x9f   : > { %p4342_p6 = pnand %p4341_p5, %p4335_p11 }
  0xa1   : > { %4345 = shalt.err (!%p4342_p6)
}
  0xa2   : > { %s5944_s30 = sld [smem:[#allocation39_spill]] }
  0xa3   : > { %s5946_s27 = sld [smem:[#allocation23_spill]] (!%p4743_p2) }
  0xa4   : > { %414 = sbr.rel (%p4743_p2) target bundleno = 2085 (0x825), region = 48 }
  0xa8   : > { %3768 = dma.hbm_to_vmem [thread:$0]  (!%p4769_p10), %s385_s10, 2048, %s387_s14, %s5944_s30, %s5908_s12, %s5941_s29, %s5940_s22  }
  0xa9   : > { %s416_s15 = sand.u32 1, %s5946_s27  }
  0xaa   : > { %s3172_s28 = sshll.u32 %s416_s15, 7  ;;  %s417_s4 = scalar_lea.sflag [#allocation7], %s416_s15 }
  0xab   : > { %s4922_s17 = scalar_lea.vmem [#allocation6], %s3172_s28 }
  0xac   : > { %4427 = dma.done.wait (%p4811_p13), %s417_s4, 2048  }
  0xad   : > { %4429 = vsyncadd (%p4811_p13), %s417_s4, 4294965248  ;;  %s5948_s24 = sld [smem:[#allocation31_spill]] }
  0xae   : > { %s5949_s19 = sld [smem:[#allocation22_spill]] }
  0xb3   : > { %s425_s7 = sand.u32 1, %s5948_s24  }
  0xb4   : > { %s427_s12 = sand.u32 1, %s5949_s19   ;;  %s426_s22 = scalar_lea.sflag [#allocation9], %s425_s7 }
  0xb5   : > { %s3173_s10 = sshll.u32 %s427_s12, 7 }
  0xb6   : > { %s4930_s29 = scalar_lea.vmem [#allocation8], %s3173_s10 }
  0xb7   : > { %4431 = dma.done.wait (%p4703_p7), %s426_s22, 2048  }
  0xb8   : > { %4433 = vsyncadd (%p4703_p7), %s426_s22, 4294965248  ;;  %s5951_s14 = sld [smem:[#allocation20_spill]] }
  0xb9   : > { %s5952_s5 = sld [smem:[#allocation37_spill]] }
  0xbe   : > { %s436_s23 = sand.u32 1, %s5951_s14  }
  0xbf   : > { %s3174_s0 = sshll.u32 %s436_s23, 7  ;;  %p5953_p2 = scmp.ne.s32.totalorder %s5952_s5, 0 }
  0xc0   : > { %s4937_s30 = scalar_lea.vmem [#allocation10], %s3174_s0 }
  0xc1   : > { %4435 = dma.done.wait (%p5953_p2), %s426_s22, 2048  }
  0xc2   : > { %4437 = vsyncadd (%p5953_p2), %s426_s22, 4294965248  ;;  %s444_s13 = scalar_lea.sflag [#allocation12], %s425_s7  ;;  %s4943_s9 = scalar_lea.vmem [#allocation11], %s3174_s0 }
  0xc3   : > { %4439 = dma.done.wait (%p5953_p2), %s444_s13, 4096  }
  0xc4   : > { %4441 = vsyncadd (%p5953_p2), %s444_s13, 4294963200  ;;  %s5954_s1 = sld [smem:[#allocation19_spill]] }
  0xc5   : > { %s5955_s27 = sld [smem:[#allocation26_spill]] }
  0xc6   : > { %s5956_s18 = sld [smem:[#allocation27_spill]] }
  0xc7   : > { %s5957_s15 = sld [smem:[#allocation24_spill]] }
  0xc8   : > { %s5958_s6 = sld [smem:[#allocation51_spill]] }
  0xc9   : > { %s5959_s23 = sld [smem:[#allocation52_spill]] }
  0xca   : > { %s513_s28 = sand.u32 1, %s5954_s1   ;;  %s4967_s1 = scalar_lea.vmem [#allocation13], %s3174_s0 }
  0xcb   : > { %s3177_s4 = sshll.u32 %s513_s28, 6  ;;  %p518_p7 = scmp.lt.s32.totalorder %s5955_s27, 1 }
  0xcc   : > { %p521_p10 = scmp.lt.s32.totalorder %s5956_s18, 1  ;;  %s4969_s28 = scalar_lea.vmem [#allocation14], %s3177_s4 }
  0xcd   : > { %s6008_s27 = smov (!%p518_p7, %s5955_s27), 1  ;;  %p523_p13 = scmp.lt.s32.totalorder %s5957_s15, 1 }
  0xce   : > { %s6010_s18 = smov (!%p521_p10, %s5956_s18), 1  ;;  %s4957_s7 = scalar_lea.vmem %s5958_s6, %s6008_s27 }
  0xcf   : > { %s3178_s12 = sshll.u32 %s6010_s18, 1  ;;  %p3179_p12 = scmp.ne.s32.totalorder %s5957_s15, 0 }
  0xd0   : > { %s524_s10 = scalar_select %p523_p13, %s5957_s15, 1 }
  0xd1   : > { %533 = sbr.rel (%p3179_p12) target bundleno = 641 (0x281), region = 72 }
  0xd2   : > { %s4961_s22 = sadd.s32 %s3178_s12, %s524_s10 }
  0xd3   : > { %s527_s13 = scalar_lea.vmem %s5959_s23, %s4961_s22 }
  0xd6   : > { %v3938_v0 = vld [vmem:[%s4937_s30 + $0x78] sm:$0xff]   ;;  %v3940_v2 = vld [vmem:[%s4937_s30 + $0x70] sm:$0xff]   ;;  %v3942_v4 = vld [vmem:[%s4937_s30 + $0x68] sm:$0xff]   ;;  %vm1070_vm0 = vcmask 7168  }
  0xd7   : > { %v3939_v1 = vld [vmem:[%s4937_s30 + $0x38] sm:$0xff]   ;;  %3439 = vmatprep.subr.bf16.mxu0 %v3938_v0  ;;  %3727 = vmatprep.subr.bf16.mxu1 %v3938_v0  ;;  %v3941_v3 = vld [vmem:[%s4937_s30 + $0x30] sm:$0xff]   ;;  %v3943_v5 = vld [vmem:[%s4937_s30 + $0x28] sm:$0xff]  }
  0xd8   : > { %3440 = vmatpush3.bf16.msra.mxu0 %v3939_v1  ;;  %3735 = vmatpush3.bf16.msra.mxu1 %v3939_v1  ;;  %v3944_v6 = vld [vmem:[%s4937_s30 + $0x60] sm:$0xff]   ;;  %v3946_v8 = vld [vmem:[%s4937_s30 + $0x58] sm:$0xff]   ;;  %v3948_v10 = vld [vmem:[%s4937_s30 + $0x50] sm:$0xff]  }
  0xd9   : > { %3441 = vmatprep.subr.bf16.mxu0 %v3940_v2  ;;  %3728 = vmatprep.subr.bf16.mxu1 %v3940_v2  ;;  %v3945_v7 = vld [vmem:[%s4937_s30 + $0x20] sm:$0xff]   ;;  %v3947_v9 = vld [vmem:[%s4937_s30 + $0x18] sm:$0xff]   ;;  %v3949_v13 = vld [vmem:[%s4937_s30 + $0x10] sm:$0xff]  }
  0xda   : > { %v3956_v11 = vld [vmem:[%s4922_s17 + $0x4] ss:$8 sps:$4 sm:$0xff]   ;;  %v3954_v18 = vld [vmem:[%s4922_s17] ss:$8 sps:$4 sm:$0xff]   ;;  %v3960_v20 = vld [vmem:[%s4922_s17 + $0x14] ss:$8 sps:$4 sm:$0xff]  }
  0xdb   : > { %v3959_v12 = vld [vmem:[%s4922_s17 + $0x44] ss:$8 sps:$4 sm:$0xff]   ;;  %790 = vmatprep.mubr.bf16.mxu0 %v3956_v11  ;;  %v3957_v19 = vld [vmem:[%s4922_s17 + $0x40] ss:$8 sps:$4 sm:$0xff]   ;;  %v3962_v21 = vld [vmem:[%s4922_s17 + $0x54] ss:$8 sps:$4 sm:$0xff]  }
  0xdc   : > { %3442 = vmatpush3.bf16.msra.mxu0 %v3941_v3  ;;  %3736 = vmatpush3.bf16.msra.mxu1 %v3941_v3  ;;  %v3950_v14 = vld [vmem:[%s4937_s30 + $0x48] sm:$0xff]   ;;  %v3952_v16 = vld [vmem:[%s4937_s30 + $0x40] sm:$0xff]   ;;  %v3964_v22 = vld [vmem:[%s4922_s17 + $0x10] ss:$8 sps:$4 sm:$0xff]  }
  0xdd   : > { %3443 = vmatprep.subr.bf16.mxu0 %v3942_v4  ;;  %3729 = vmatprep.subr.bf16.mxu1 %v3942_v4  ;;  %v3951_v15 = vld [vmem:[%s4937_s30 + $0x8] sm:$0xff]   ;;  %v3953_v17 = vld [vmem:[%s4937_s30] sm:$0xff]   ;;  %v3965_v23 = vld [vmem:[%s4922_s17 + $0x50] ss:$8 sps:$4 sm:$0xff]  }
  0xde   : > { %822 = vmatprep.mubr.bf16.mxu1 %v3959_v12  ;;  %v3966_v24 = vld [vmem:[%s4922_s17 + $0x24] ss:$8 sps:$4 sm:$0xff]   ;;  %v3970_v26 = vld [vmem:[%s4922_s17 + $0x20] ss:$8 sps:$4 sm:$0xff]   ;;  %v3972_v28 = vld [vmem:[%s4922_s17 + $0x34] ss:$8 sps:$4 sm:$0xff]  }
  0xdf   : > { %v3968_v25 = vld [vmem:[%s4922_s17 + $0x64] ss:$8 sps:$4 sm:$0xff]   ;;  %v3971_v27 = vld [vmem:[%s4922_s17 + $0x60] ss:$8 sps:$4 sm:$0xff]   ;;  %v3974_v29 = vld [vmem:[%s4922_s17 + $0x74] ss:$8 sps:$4 sm:$0xff]  }
  0xe0   : > { %3444 = vmatpush3.bf16.msra.mxu0 %v3943_v5  ;;  %3737 = vmatpush3.bf16.msra.mxu1 %v3943_v5  ;;  %v3976_v30 = vld [vmem:[%s4922_s17 + $0x30] ss:$8 sps:$4 sm:$0xff]  }
  0xe1   : > { %3445 = vmatprep.subr.bf16.mxu0 %v3944_v6  ;;  %3730 = vmatprep.subr.bf16.mxu1 %v3944_v6  ;;  %v3977_v31 = vld [vmem:[%s4922_s17 + $0x70] ss:$8 sps:$4 sm:$0xff]  }
  0xe4   : > { %3446 = vmatpush3.bf16.msra.mxu0 %v3945_v7  ;;  %3738 = vmatpush3.bf16.msra.mxu1 %v3945_v7 }
  0xe5   : > { %3447 = vmatprep.subr.bf16.mxu0 %v3946_v8  ;;  %3731 = vmatprep.subr.bf16.mxu1 %v3946_v8 }
  0xe8   : > { %3448 = vmatpush3.bf16.msra.mxu0 %v3947_v9  ;;  %3739 = vmatpush3.bf16.msra.mxu1 %v3947_v9 }
  0xe9   : > { %3449 = vmatprep.subr.bf16.mxu0 %v3948_v10  ;;  %3732 = vmatprep.subr.bf16.mxu1 %v3948_v10 }
  0xec   : > { %3450 = vmatpush3.bf16.msra.mxu0 %v3949_v13  ;;  %3740 = vmatpush3.bf16.msra.mxu1 %v3949_v13 }
  0xed   : > { %3451 = vmatprep.subr.bf16.mxu0 %v3950_v14  ;;  %3733 = vmatprep.subr.bf16.mxu1 %v3950_v14 }
  0xf0   : > { %3452 = vmatpush3.bf16.msra.mxu0 %v3951_v15  ;;  %3741 = vmatpush3.bf16.msra.mxu1 %v3951_v15 }
  0xf1   : > { %3453 = vmatprep.subr.bf16.mxu0 %v3952_v16  ;;  %3734 = vmatprep.subr.bf16.mxu1 %v3952_v16 }
  0xf4   : > { %3454 = vmatpush3.bf16.msra.mxu0 %v3953_v17  ;;  %3742 = vmatpush3.bf16.msra.mxu1 %v3953_v17 }
  0xf7   : > { %791 = vmatmul.mubr.bf16.vlgmr.msra.gmra.mxu0 %v3954_v18  ;;  %823 = vmatmul.mubr.bf16.vlgmr.msra.gmra.mxu1 %v3957_v19 }
  0xf8   : > { %798 = vmatprep.mubr.bf16.mxu0 %v3960_v20  ;;  %830 = vmatprep.mubr.bf16.mxu1 %v3962_v21 }
  0xff   : > { %799 = vmatmul.mubr.bf16.gmra.mxu0 %v3964_v22  ;;  %831 = vmatmul.mubr.bf16.gmra.mxu1 %v3965_v23 }
 0x100   : > { %806 = vmatprep.mubr.bf16.mxu0 %v3966_v24  ;;  %838 = vmatprep.mubr.bf16.mxu1 %v3968_v25 }
 0x107   : > { %807 = vmatmul.mubr.bf16.gmra.mxu0 %v3970_v26  ;;  %839 = vmatmul.mubr.bf16.gmra.mxu1 %v3971_v27 }
 0x108   : > { %814 = vmatprep.mubr.bf16.mxu0 %v3972_v28  ;;  %846 = vmatprep.mubr.bf16.mxu1 %v3974_v29 }
 0x10f   : > { %815 = vmatmul.mubr.bf16.gmra.mxu0 %v3976_v30  ;;  %847 = vmatmul.mubr.bf16.gmra.mxu1 %v3977_v31 }
 0x1b7   : > { %v3455_v32 = vpop.f32.mrf.mxu0  ;;  %v3479_v33 = vpop.f32.mrf.mxu1 }
 0x1b9   : > { %v3456_v34 = vpop.f32.mrf.mxu0  ;;  %v3480_v35 = vpop.f32.mrf.mxu1 }
 0x1ba   : > { %v5004_v36 = vadd.f32 %v3456_v34, %v3455_v32  ;;  %v5006_v39 = vadd.f32 %v3480_v35, %v3479_v33  ;;  %v4531_v32 = vmov -inf   ;;  %v4532_v33 = vmov 0.0  }
 0x1bb   : > { %v3458_v37 = vpop.f32.mrf.mxu0  ;;  %v3482_v38 = vpop.f32.mrf.mxu1  ;;  %1071 = vst.msk [vmem:[#allocation3] sm:$0xff] %vm1070_vm0, %v4531_v32  ;;  %1072 = vst.msk [vmem:[#allocation3 + $0x8] sm:$0xff] %vm1070_vm0, %v4531_v32 }
 0x1bc   : > { %v855_v40 = vmul.f32 %v5004_v36, %v5004_v36  ;;  %v863_v48 = vmul.f32 %v5006_v39, %v5006_v39  ;;  %1073 = vst.msk [vmem:[#allocation3 + $0x10] sm:$0xff] %vm1070_vm0, %v4531_v32  ;;  %1074 = vst.msk [vmem:[#allocation3 + $0x18] sm:$0xff] %vm1070_vm0, %v4531_v32 }
 0x1bd   : > { %v3459_v41 = vpop.f32.mrf.mxu0  ;;  %v3483_v42 = vpop.f32.mrf.mxu1  ;;  %1075 = vst.msk [vmem:[#allocation3 + $0x20] sm:$0xff] %vm1070_vm0, %v4531_v32  ;;  %1076 = vst.msk [vmem:[#allocation3 + $0x28] sm:$0xff] %vm1070_vm0, %v4531_v32 }
 0x1be   : > { %v5010_v43 = vadd.f32 %v3483_v42, %v3482_v38  ;;  %871 = vadd.xlane.f32.xlu0 %v855_v40  ;;  %v5012_v46 = vadd.f32 %v3459_v41, %v3458_v37  ;;  %1077 = vst.msk [vmem:[#allocation3 + $0x30] sm:$0xff] %vm1070_vm0, %v4531_v32  ;;  %1078 = vst.msk [vmem:[#allocation3 + $0x38] sm:$0xff] %vm1070_vm0, %v4531_v32 }
 0x1bf   : > { %v3461_v44 = vpop.f32.mrf.mxu0  ;;  %v3485_v45 = vpop.f32.mrf.mxu1  ;;  %1079 = vst.msk [vmem:[#allocation3 + $0x40] sm:$0xff] %vm1070_vm0, %v4531_v32  ;;  %1080 = vst.msk [vmem:[#allocation3 + $0x48] sm:$0xff] %vm1070_vm0, %v4531_v32 }
 0x1c0   : > { %v864_v47 = vmul.f32 %v5010_v43, %v5010_v43  ;;  %v856_v56 = vmul.f32 %v5012_v46, %v5012_v46  ;;  %1081 = vst.msk [vmem:[#allocation3 + $0x50] sm:$0xff] %vm1070_vm0, %v4531_v32  ;;  %1082 = vst.msk [vmem:[#allocation3 + $0x58] sm:$0xff] %vm1070_vm0, %v4531_v32 }
 0x1c1   : > { %v3462_v49 = vpop.f32.mrf.mxu0  ;;  %v3486_v50 = vpop.f32.mrf.mxu1  ;;  %1083 = vst.msk [vmem:[#allocation3 + $0x60] sm:$0xff] %vm1070_vm0, %v4531_v32  ;;  %1084 = vst.msk [vmem:[#allocation3 + $0x68] sm:$0xff] %vm1070_vm0, %v4531_v32 }
 0x1c2   : > { %v5018_v51 = vadd.f32 %v3462_v49, %v3461_v44  ;;  %889 = vadd.xlane.f32.xlu1 %v864_v47  ;;  %887 = vadd.xlane.f32.xlu0 %v863_v48  ;;  %v5020_v54 = vadd.f32 %v3486_v50, %v3485_v45  ;;  %1085 = vst.msk [vmem:[#allocation3 + $0x70] sm:$0xff] %vm1070_vm0, %v4531_v32  ;;  %1086 = vst.msk [vmem:[#allocation3 + $0x78] sm:$0xff] %vm1070_vm0, %v4531_v32 }
 0x1c3   : > { %v3464_v52 = vpop.f32.mrf.mxu0  ;;  %v3488_v53 = vpop.f32.mrf.mxu1  ;;  %1087 = vst.msk [vmem:[#allocation4] sm:$0xff] %vm1070_vm0, %v4532_v33  ;;  %1088 = vst.msk [vmem:[#allocation4 + $0x8] sm:$0xff] %vm1070_vm0, %v4532_v33 }
 0x1c4   : > { %v857_v55 = vmul.f32 %v5018_v51, %v5018_v51  ;;  %v865_v0 = vmul.f32 %v5020_v54, %v5020_v54  ;;  %1089 = vst.msk [vmem:[#allocation4 + $0x10] sm:$0xff] %vm1070_vm0, %v4532_v33  ;;  %1090 = vst.msk [vmem:[#allocation4 + $0x18] sm:$0xff] %vm1070_vm0, %v4532_v33 }
 0x1c5   : > { %v3465_v57 = vpop.f32.mrf.mxu0  ;;  %v3489_v58 = vpop.f32.mrf.mxu1  ;;  %1091 = vst.msk [vmem:[#allocation4 + $0x20] sm:$0xff] %vm1070_vm0, %v4532_v33  ;;  %1092 = vst.msk [vmem:[#allocation4 + $0x28] sm:$0xff] %vm1070_vm0, %v4532_v33 }
 0x1c6   : > { %v5026_v59 = vadd.f32 %v3465_v57, %v3464_v52  ;;  %875 = vadd.xlane.f32.xlu1 %v857_v55  ;;  %873 = vadd.xlane.f32.xlu0 %v856_v56  ;;  %v5028_v62 = vadd.f32 %v3489_v58, %v3488_v53  ;;  %1093 = vst.msk [vmem:[#allocation4 + $0x30] sm:$0xff] %vm1070_vm0, %v4532_v33  ;;  %1094 = vst.msk [vmem:[#allocation4 + $0x38] sm:$0xff] %vm1070_vm0, %v4532_v33 }
 0x1c7   : > { %v3467_v60 = vpop.f32.mrf.mxu0  ;;  %v3491_v61 = vpop.f32.mrf.mxu1  ;;  %1095 = vst.msk [vmem:[#allocation4 + $0x40] sm:$0xff] %vm1070_vm0, %v4532_v33  ;;  %1096 = vst.msk [vmem:[#allocation4 + $0x48] sm:$0xff] %vm1070_vm0, %v4532_v33 }
 0x1c8   : > { %v858_v63 = vmul.f32 %v5026_v59, %v5026_v59  ;;  %v866_v7 = vmul.f32 %v5028_v62, %v5028_v62  ;;  %1097 = vst.msk [vmem:[#allocation4 + $0x50] sm:$0xff] %vm1070_vm0, %v4532_v33  ;;  %1098 = vst.msk [vmem:[#allocation4 + $0x58] sm:$0xff] %vm1070_vm0, %v4532_v33 }
 0x1c9   : > { %v3468_v1 = vpop.f32.mrf.mxu0  ;;  %v3492_v2 = vpop.f32.mrf.mxu1  ;;  %1099 = vst.msk [vmem:[#allocation4 + $0x60] sm:$0xff] %vm1070_vm0, %v4532_v33  ;;  %1100 = vst.msk [vmem:[#allocation4 + $0x68] sm:$0xff] %vm1070_vm0, %v4532_v33 }
 0x1ca   : > { %v5034_v3 = vadd.f32 %v3468_v1, %v3467_v60  ;;  %877 = vadd.xlane.f32.xlu1 %v858_v63  ;;  %891 = vadd.xlane.f32.xlu0 %v865_v0  ;;  %v5036_v6 = vadd.f32 %v3492_v2, %v3491_v61  ;;  %1101 = vst.msk [vmem:[#allocation4 + $0x70] sm:$0xff] %vm1070_vm0, %v4532_v33  ;;  %1102 = vst.msk [vmem:[#allocation4 + $0x78] sm:$0xff] %vm1070_vm0, %v4532_v33 }
 0x1cb   : > { %v3470_v4 = vpop.f32.mrf.mxu0  ;;  %v3494_v5 = vpop.f32.mrf.mxu1  ;;  %1103 = vst [vmem:[#allocation5 + $0x30] sm:$0xff] %v4532_v33  ;;  %1104 = vst [vmem:[#allocation5] sm:$0xff] %v4532_v33 }
 0x1cc   : > { %v859_v8 = vmul.f32 %v5034_v3, %v5034_v3  ;;  %v867_v16 = vmul.f32 %v5036_v6, %v5036_v6  ;;  %1105 = vst [vmem:[#allocation5 + $0x58] sm:$0xff] %v4532_v33  ;;  %1106 = vst [vmem:[#allocation5 + $0x18] sm:$0xff] %v4532_v33 }
 0x1cd   : > { %v3471_v9 = vpop.f32.mrf.mxu0  ;;  %v3495_v10 = vpop.f32.mrf.mxu1  ;;  %1107 = vst [vmem:[#allocation5 + $0x50] sm:$0xff] %v4532_v33  ;;  %1108 = vst [vmem:[#allocation5 + $0x68] sm:$0xff] %v4532_v33 }
 0x1ce   : > { %v5042_v11 = vadd.f32 %v3471_v9, %v3470_v4  ;;  %893 = vadd.xlane.f32.xlu1 %v866_v7  ;;  %879 = vadd.xlane.f32.xlu0 %v859_v8  ;;  %v5044_v14 = vadd.f32 %v3495_v10, %v3494_v5  ;;  %1109 = vst [vmem:[#allocation5 + $0x8] sm:$0xff] %v4532_v33  ;;  %1110 = vst [vmem:[#allocation5 + $0x48] sm:$0xff] %v4532_v33  ;;  %v5102_v5 = vld [vmem:[%s4957_s7] ss:$0 sm:$0xff] }
 0x1cf   : > { %v3473_v12 = vpop.f32.mrf.mxu0  ;;  %v3497_v13 = vpop.f32.mrf.mxu1  ;;  %1111 = vst [vmem:[#allocation5 + $0x40] sm:$0xff] %v4532_v33  ;;  %1112 = vst [vmem:[#allocation5 + $0x20] sm:$0xff] %v4532_v33 }
 0x1d0   : > { %v860_v15 = vmul.f32 %v5042_v11, %v5042_v11  ;;  %v868_v23 = vmul.f32 %v5044_v14, %v5044_v14  ;;  %1113 = vst [vmem:[#allocation5 + $0x10] sm:$0xff] %v4532_v33  ;;  %1114 = vst [vmem:[#allocation5 + $0x38] sm:$0xff] %v4532_v33 }
 0x1d1   : > { %v3474_v17 = vpop.f32.mrf.mxu0  ;;  %v3498_v18 = vpop.f32.mrf.mxu1  ;;  %1115 = vst [vmem:[#allocation5 + $0x60] sm:$0xff] %v4532_v33  ;;  %1116 = vst [vmem:[#allocation5 + $0x70] sm:$0xff] %v4532_v33 }
 0x1d2   : > { %v5050_v19 = vadd.f32 %v3474_v17, %v3473_v12  ;;  %881 = vadd.xlane.f32.xlu1 %v860_v15  ;;  %895 = vadd.xlane.f32.xlu0 %v867_v16  ;;  %v5052_v22 = vadd.f32 %v3498_v18, %v3497_v13  ;;  %1117 = vst [vmem:[#allocation5 + $0x78] sm:$0xff] %v4532_v33  ;;  %1118 = vst [vmem:[#allocation5 + $0x28] sm:$0xff] %v4532_v33 }
 0x1d3   : > { %v3476_v20 = vpop.f32.mrf.mxu0  ;;  %v3500_v21 = vpop.f32.mrf.mxu1 }
 0x1d4   : > { %v861_v24 = vmul.f32 %v5050_v19, %v5050_v19  ;;  %v869_v30 = vmul.f32 %v5052_v22, %v5052_v22 }
 0x1d5   : > { %v3477_v25 = vpop.f32.mrf.mxu0  ;;  %v3501_v26 = vpop.f32.mrf.mxu1 }
 0x1d6   : > { %v5058_v27 = vadd.f32 %v3477_v25, %v3476_v20  ;;  %897 = vadd.xlane.f32.xlu1 %v868_v23  ;;  %883 = vadd.xlane.f32.xlu0 %v861_v24  ;;  %v5060_v28 = vadd.f32 %v3501_v26, %v3500_v21 }
 0x1d8   : > { %v862_v29 = vmul.f32 %v5058_v27, %v5058_v27  ;;  %v870_v31 = vmul.f32 %v5060_v28, %v5060_v28 }
 0x1da   : > { %885 = vadd.xlane.f32.xlu1 %v862_v29  ;;  %899 = vadd.xlane.f32.xlu0 %v869_v30 }
 0x1de   : > { %901 = vadd.xlane.f32.xlu1 %v870_v31 }
 0x247   : > { %v872_v34 = vpop.xlane.xlu0 %871 }
 0x248   : > { %v903_v35 = vmax.f32 %v872_v34, 1e-12 }
 0x24a   : > { %3978 = vrsqrt.f32 %v903_v35 }
 0x24b   : > { %v890_v37 = vpop.xlane.xlu1 %889  ;;  %v888_v38 = vpop.xlane.xlu0 %887 }
 0x24c   : > { %v912_v40 = vmax.f32 %v890_v37, 1e-12  ;;  %v911_v41 = vmax.f32 %v888_v38, 1e-12 }
 0x24e   : > { %3980 = vrsqrt.f32 %v912_v40 }
 0x24f   : > { %3982 = vrsqrt.f32 %v911_v41  ;;  %v876_v42 = vpop.xlane.xlu1 %875  ;;  %v874_v44 = vpop.xlane.xlu0 %873 }
 0x250   : > { %v905_v45 = vmax.f32 %v876_v42, 1e-12  ;;  %v904_v47 = vmax.f32 %v874_v44, 1e-12 }
 0x252   : > { %3984 = vrsqrt.f32 %v905_v45 }
 0x253   : > { %3986 = vrsqrt.f32 %v904_v47  ;;  %v878_v48 = vpop.xlane.xlu1 %877  ;;  %v892_v49 = vpop.xlane.xlu0 %891 }
 0x254   : > { %v906_v50 = vmax.f32 %v878_v48, 1e-12  ;;  %v913_v52 = vmax.f32 %v892_v49, 1e-12 }
 0x256   : > { %3988 = vrsqrt.f32 %v906_v50 }
 0x257   : > { %3990 = vrsqrt.f32 %v913_v52  ;;  %v894_v53 = vpop.xlane.xlu1 %893  ;;  %v880_v55 = vpop.xlane.xlu0 %879 }
 0x258   : > { %v914_v56 = vmax.f32 %v894_v53, 1e-12  ;;  %v907_v57 = vmax.f32 %v880_v55, 1e-12  ;;  %v3979_v58 = vpop.eup %3978 }
 0x259   : > { %v935_v7 = vmul.f32 %v3979_v58, %v5004_v36 }
 0x25a   : > { %3992 = vrsqrt.f32 %v914_v56 }
 0x25b   : > { %v3981_v60 = vpop.eup %3980  ;;  %3994 = vrsqrt.f32 %v907_v57  ;;  %v882_v61 = vpop.xlane.xlu1 %881  ;;  %v958_v21 = vmul.f32 %v5102_v5, %v935_v7 }
 0x25c   : > { %v896_v63 = vpop.xlane.xlu0 %895  ;;  %v3983_v0 = vpop.eup %3982  ;;  %v944_v1 = vmul.f32 %v3981_v60, %v5010_v43  ;;  %v908_v2 = vmax.f32 %v882_v61, 1e-12 }
 0x25d   : > { %v915_v4 = vmax.f32 %v896_v63, 1e-12  ;;  %v943_v8 = vmul.f32 %v3983_v0, %v5006_v39  ;;  %v974_v34 = vmul.f32 11.313708, %v958_v21 }
 0x25e   : > { %v967_v9 = vmul.f32 %v5102_v5, %v944_v1  ;;  %3996 = vrsqrt.f32 %v908_v2 }
 0x25f   : > { %v3985_v10 = vpop.eup %3984  ;;  %v966_v12 = vmul.f32 %v5102_v5, %v943_v8  ;;  %3998 = vrsqrt.f32 %v915_v4  ;;  %v898_v13 = vpop.xlane.xlu1 %897 }
 0x260   : > { %v884_v15 = vpop.xlane.xlu0 %883  ;;  %v3987_v16 = vpop.eup %3986  ;;  %v983_v17 = vmul.f32 11.313708, %v967_v9  ;;  %v937_v43 = vmul.f32 %v3985_v10, %v5018_v51  ;;  %v916_v18 = vmax.f32 %v898_v13, 1e-12 }
 0x261   : > { %v909_v20 = vmax.f32 %v884_v15, 1e-12  ;;  %v982_v36 = vmul.f32 11.313708, %v966_v12  ;;  %v936_v39 = vmul.f32 %v3987_v16, %v5012_v46 }
 0x262   : > { %4000 = vrsqrt.f32 %v916_v18  ;;  %v960_v25 = vmul.f32 %v5102_v5, %v937_v43 }
 0x263   : > { %v3989_v23 = vpop.eup %3988  ;;  %v3368_v24 = vpack.c.bf16 %v983_v17, %v982_v36  ;;  %v959_v26 = vmul.f32 %v5102_v5, %v936_v39  ;;  %4002 = vrsqrt.f32 %v909_v20  ;;  %v886_v29 = vpop.xlane.xlu1 %885 }
 0x264   : > { %v900_v30 = vpop.xlane.xlu0 %899  ;;  %v3991_v31 = vpop.eup %3990  ;;  %v938_v51 = vmul.f32 %v3989_v23, %v5026_v59  ;;  %v910_v32 = vmax.f32 %v886_v29, 1e-12  ;;  %v976_v40 = vmul.f32 11.313708, %v960_v25 }
 0x265   : > { %v917_v33 = vmax.f32 %v900_v30, 1e-12  ;;  %3428 = vst [vmem:[#allocation2 + $0x20] sm:$0xff] %v3368_v24   ;;  %v975_v35 = vmul.f32 11.313708, %v959_v26  ;;  %v945_v46 = vmul.f32 %v3991_v31, %v5020_v54 }
 0x266   : > { %v961_v37 = vmul.f32 %v5102_v5, %v938_v51  ;;  %4004 = vrsqrt.f32 %v910_v32 }
 0x267   : > { %v3993_v38 = vpop.eup %3992  ;;  %v3348_v41 = vpack.c.bf16 %v975_v35, %v974_v34  ;;  %4006 = vrsqrt.f32 %v917_v33  ;;  %v902_v42 = vpop.xlane.xlu1 %901  ;;  %v968_v47 = vmul.f32 %v5102_v5, %v945_v46 }
 0x268   : > { %v3995_v44 = vpop.eup %3994  ;;  %v977_v45 = vmul.f32 11.313708, %v961_v37  ;;  %v946_v59 = vmul.f32 %v3993_v38, %v5028_v62  ;;  %v918_v48 = vmax.f32 %v902_v42, 1e-12 }
 0x269   : > { %3349 = vst [vmem:[#allocation2] sm:$0xff] %v3348_v41   ;;  %v939_v49 = vmul.f32 %v3995_v44, %v5034_v3  ;;  %v984_v55 = vmul.f32 11.313708, %v968_v47 }
 0x26a   : > { %v3353_v50 = vpack.c.bf16 %v977_v45, %v976_v40  ;;  %v969_v54 = vmul.f32 %v5102_v5, %v946_v59  ;;  %4008 = vrsqrt.f32 %v918_v48 }
 0x26b   : > { %v3997_v52 = vpop.eup %3996  ;;  %v962_v57 = vmul.f32 %v5102_v5, %v939_v49 }
 0x26c   : > { %v3999_v53 = vpop.eup %3998  ;;  %3425 = vst [vmem:[#allocation2 + $0x8] sm:$0xff] %v3353_v50   ;;  %v985_v56 = vmul.f32 11.313708, %v969_v54  ;;  %v940_v58 = vmul.f32 %v3997_v52, %v5042_v11 }
 0x26d   : > { %v947_v60 = vmul.f32 %v3999_v53, %v5036_v6  ;;  %v978_v0 = vmul.f32 11.313708, %v962_v57 }
 0x26e   : > { %v3373_v62 = vpack.c.bf16 %v985_v56, %v984_v55  ;;  %v963_v61 = vmul.f32 %v5102_v5, %v940_v58 }
 0x26f   : > { %v4001_v63 = vpop.eup %4000  ;;  %v970_v2 = vmul.f32 %v5102_v5, %v947_v60 }
 0x270   : > { %v4003_v3 = vpop.eup %4002  ;;  %3429 = vst [vmem:[#allocation2 + $0x28] sm:$0xff] %v3373_v62   ;;  %v979_v1 = vmul.f32 11.313708, %v963_v61  ;;  %v948_v4 = vmul.f32 %v4001_v63, %v5044_v14 }
 0x271   : > { %v941_v7 = vmul.f32 %v4003_v3, %v5050_v19  ;;  %v986_v6 = vmul.f32 11.313708, %v970_v2 }
 0x272   : > { %v3358_v8 = vpack.c.bf16 %v979_v1, %v978_v0  ;;  %v971_v9 = vmul.f32 %v5102_v5, %v948_v4 }
 0x273   : > { %v4005_v11 = vpop.eup %4004  ;;  %v964_v13 = vmul.f32 %v5102_v5, %v941_v7 }
 0x274   : > { %v4007_v10 = vpop.eup %4006  ;;  %3426 = vst [vmem:[#allocation2 + $0x10] sm:$0xff] %v3358_v8   ;;  %v987_v12 = vmul.f32 11.313708, %v971_v9  ;;  %v942_v15 = vmul.f32 %v4005_v11, %v5058_v27 }
 0x275   : > { %v949_v16 = vmul.f32 %v4007_v10, %v5052_v22  ;;  %v980_v19 = vmul.f32 11.313708, %v964_v13 }
 0x276   : > { %v3378_v17 = vpack.c.bf16 %v987_v12, %v986_v6  ;;  %v965_v43 = vmul.f32 %v5102_v5, %v942_v15 }
 0x277   : > { %v4009_v14 = vpop.eup %4008  ;;  %v972_v20 = vmul.f32 %v5102_v5, %v949_v16 }
 0x278   : > { %3430 = vst [vmem:[#allocation2 + $0x30] sm:$0xff] %v3378_v17   ;;  %v981_v18 = vmul.f32 11.313708, %v965_v43  ;;  %v950_v21 = vmul.f32 %v4009_v14, %v5060_v28 }
 0x279   : > { %v988_v23 = vmul.f32 11.313708, %v972_v20 }
 0x27a   : > { %v3363_v36 = vpack.c.bf16 %v981_v18, %v980_v19  ;;  %v973_v39 = vmul.f32 %v5102_v5, %v950_v21 }
 0x27c   : > { %3427 = vst [vmem:[#allocation2 + $0x18] sm:$0xff] %v3363_v36   ;;  %v989_v24 = vmul.f32 11.313708, %v973_v39 }
 0x27e   : > { %v3383_v27 = vpack.c.bf16 %v989_v24, %v988_v23 }
 0x280   : > { %3431 = vst [vmem:[#allocation2 + $0x38] sm:$0xff] %v3383_v27  }
 0x281 PF: > { %v4012_v22 = vld [vmem:[%s4943_s9 + $0x78] sm:$0xff]   ;;  %v4014_v5 = vld [vmem:[%s4943_s9 + $0x70] sm:$0xff]   ;;  %v4016_v26 = vld [vmem:[%s4943_s9 + $0x68] sm:$0xff]   ;;  %vm2305_vm3 = vcmask 7168   ;;  %s5961_s30 = sld [smem:[#allocation24_spill]] }
 0x282   : > { %v4013_v28 = vld [vmem:[%s4943_s9 + $0x38] sm:$0xff]   ;;  %3503 = vmatprep.subr.bf16.mxu0 %v4012_v22  ;;  %v4015_v25 = vld [vmem:[%s4943_s9 + $0x30] sm:$0xff]   ;;  %v4017_v29 = vld [vmem:[%s4943_s9 + $0x28] sm:$0xff]  }
 0x283   : > { %3504 = vmatpush3.bf16.msra.mxu0 %v4013_v28  ;;  %v4018_v30 = vld [vmem:[%s4943_s9 + $0x60] sm:$0xff]   ;;  %v4020_v51 = vld [vmem:[%s4943_s9 + $0x58] sm:$0xff]   ;;  %v4022_v33 = vld [vmem:[%s4943_s9 + $0x50] sm:$0xff]  }
 0x284   : > { %3505 = vmatprep.subr.bf16.mxu0 %v4014_v5  ;;  %v4019_v31 = vld [vmem:[%s4943_s9 + $0x20] sm:$0xff]   ;;  %v4021_v32 = vld [vmem:[%s4943_s9 + $0x18] sm:$0xff]   ;;  %v4023_v35 = vld [vmem:[%s4943_s9 + $0x10] sm:$0xff]  }
 0x285   : > { %v4030_v34 = vld [vmem:[%s4930_s29 + $0x4] ss:$8 sps:$4 sm:$0xff]   ;;  %v5153_v41 = vld [vmem:[%s4930_s29] ss:$8 sps:$4 sm:$0xff]   ;;  %v5156_v42 = vld [vmem:[%s4930_s29 + $0x14] ss:$8 sps:$4 sm:$0xff]  }
 0x286   : > { %1375 = vmatprep.mubr.bf16.mxu0 %v4030_v34  ;;  %v4024_v46 = vld [vmem:[%s4943_s9 + $0x48] sm:$0xff]   ;;  %1727 = vmatprep.mubr.bf16.mxu1 %v4030_v34  ;;  %v4026_v38 = vld [vmem:[%s4943_s9 + $0x40] sm:$0xff]   ;;  %v5161_v44 = vld [vmem:[%s4930_s29 + $0x10] ss:$8 sps:$4 sm:$0xff]  }
 0x287   : > { %3506 = vmatpush3.bf16.msra.mxu0 %v4015_v25  ;;  %v4025_v37 = vld [vmem:[%s4943_s9 + $0x8] sm:$0xff]   ;;  %v4027_v40 = vld [vmem:[%s4943_s9] sm:$0xff]   ;;  %v5172_v59 = vld [vmem:[%s4930_s29 + $0x34] ss:$8 sps:$4 sm:$0xff]   ;;  %p3286_p0 = scmp.ne.s32.totalorder %s5961_s30, 1 }
 0x288   : > { %3507 = vmatprep.subr.bf16.mxu0 %v4016_v26  ;;  %v5164_v45 = vld [vmem:[%s4930_s29 + $0x24] ss:$8 sps:$4 sm:$0xff]   ;;  %v5169_v47 = vld [vmem:[%s4930_s29 + $0x20] ss:$8 sps:$4 sm:$0xff]   ;;  %v5177_v48 = vld [vmem:[%s4930_s29 + $0x30] ss:$8 sps:$4 sm:$0xff]  }
 0x289   : > { %v5180_v49 = vld [vmem:[%s4930_s29 + $0x44] ss:$8 sps:$4 sm:$0xff]   ;;  %v5185_v50 = vld [vmem:[%s4930_s29 + $0x40] ss:$8 sps:$4 sm:$0xff]   ;;  %v5188_v54 = vld [vmem:[%s4930_s29 + $0x54] ss:$8 sps:$4 sm:$0xff]  }
 0x28a   : > { %v5193_v52 = vld [vmem:[%s4930_s29 + $0x50] ss:$8 sps:$4 sm:$0xff]   ;;  %v5196_v53 = vld [vmem:[%s4930_s29 + $0x64] ss:$8 sps:$4 sm:$0xff]   ;;  %v5201_v55 = vld [vmem:[%s4930_s29 + $0x60] ss:$8 sps:$4 sm:$0xff]  }
 0x28b   : > { %3508 = vmatpush3.bf16.msra.mxu0 %v4017_v29  ;;  %v5204_v56 = vld [vmem:[%s4930_s29 + $0x74] ss:$8 sps:$4 sm:$0xff]   ;;  %v5209_v57 = vld [vmem:[%s4930_s29 + $0x70] ss:$8 sps:$4 sm:$0xff]  }
 0x28c   : > { %3509 = vmatprep.subr.bf16.mxu0 %v4018_v30 }
 0x28f   : > { %3510 = vmatpush3.bf16.msra.mxu0 %v4019_v31 }
 0x290   : > { %3511 = vmatprep.subr.bf16.mxu0 %v4020_v51 }
 0x293   : > { %3512 = vmatpush3.bf16.msra.mxu0 %v4021_v32 }
 0x294   : > { %3513 = vmatprep.subr.bf16.mxu0 %v4022_v33 }
 0x297   : > { %3514 = vmatpush3.bf16.msra.mxu0 %v4023_v35 }
 0x298   : > { %3515 = vmatprep.subr.bf16.mxu0 %v4024_v46 }
 0x29b   : > { %3516 = vmatpush3.bf16.msra.mxu0 %v4025_v37 }
 0x29c   : > { %3517 = vmatprep.subr.bf16.mxu0 %v4026_v38 }
 0x29f   : > { %3518 = vmatpush3.bf16.msra.mxu0 %v4027_v40 }
 0x2a2   : > { %1376 = vmatmul.mubr.bf16.vlgmr.msra.gmra.mxu0 %v5153_v41 }
 0x2a3   : > { %1383 = vmatprep.mubr.bf16.mxu0 %v5156_v42 }
 0x2aa   : > { %1384 = vmatmul.mubr.bf16.gmra.mxu0 %v5161_v44 }
 0x2ab   : > { %1391 = vmatprep.mubr.bf16.mxu0 %v5164_v45 }
 0x2b2   : > { %1392 = vmatmul.mubr.bf16.gmra.mxu0 %v5169_v47 }
 0x2b3   : > { %1399 = vmatprep.mubr.bf16.mxu0 %v5172_v59 }
 0x2ba   : > { %1400 = vmatmul.mubr.bf16.gmra.mxu0 %v5177_v48 }
 0x2bb   : > { %1407 = vmatprep.mubr.bf16.mxu0 %v5180_v49 }
 0x2c2   : > { %1408 = vmatmul.mubr.bf16.gmra.mxu0 %v5185_v50 }
 0x2c3   : > { %1415 = vmatprep.mubr.bf16.mxu0 %v5188_v54 }
 0x2ca   : > { %1416 = vmatmul.mubr.bf16.gmra.mxu0 %v5193_v52 }
 0x2cb   : > { %1423 = vmatprep.mubr.bf16.mxu0 %v5196_v53 }
 0x2d2   : > { %1424 = vmatmul.mubr.bf16.gmra.mxu0 %v5201_v55 }
 0x2d3   : > { %1431 = vmatprep.mubr.bf16.mxu0 %v5204_v56 }
 0x2da   : > { %1432 = vmatmul.mubr.bf16.gmra.mxu0 %v5209_v57 }
 0x362   : > { %v3519_v58 = vpop.f32.mrf.mxu0 }
 0x364   : > { %v3520_v60 = vpop.f32.mrf.mxu0 }
 0x365   : > { %v5212_v62 = vadd.f32 %v3520_v60, %v3519_v58 }
 0x366   : > { %v3522_v61 = vpop.f32.mrf.mxu0 }
 0x368   : > { %v3523_v63 = vpop.f32.mrf.mxu0 }
 0x369   : > { %v5214_v3 = vadd.f32 %v3523_v63, %v3522_v61 }
 0x36a   : > { %v3525_v0 = vpop.f32.mrf.mxu0 }
 0x36c   : > { %v3526_v1 = vpop.f32.mrf.mxu0 }
 0x36d   : > { %v5216_v2 = vadd.f32 %v3526_v1, %v3525_v0 }
 0x36e   : > { %v3528_v4 = vpop.f32.mrf.mxu0 }
 0x370   : > { %v3529_v7 = vpop.f32.mrf.mxu0 }
 0x371   : > { %v5254_v0 = vadd.f32 %v3529_v7, %v3528_v4 }
 0x372   : > { %v3531_v8 = vpop.f32.mrf.mxu0 }
 0x373   : > { %v1443_v4 = vmul.f32 %v5254_v0, %v5254_v0 }
 0x374   : > { %v3532_v9 = vpop.f32.mrf.mxu0 }
 0x376   : > { %v3534_v11 = vpop.f32.mrf.mxu0 }
 0x378   : > { %v3535_v10 = vpop.f32.mrf.mxu0 }
 0x379   : > { %v5246_v58 = vadd.f32 %v3535_v10, %v3534_v11  ;;  %v5262_v10 = vadd.f32 %v3532_v9, %v3531_v8  ;;  %v1442_v8 = vmul.f32 %v5216_v2, %v5216_v2  ;;  %v1440_v9 = vmul.f32 %v5212_v62, %v5212_v62 }
 0x37a   : > { %v3537_v6 = vpop.f32.mrf.mxu0 }
 0x37b   : > { %v1445_v11 = vmul.f32 %v5246_v58, %v5246_v58  ;;  %v1444_v7 = vmul.f32 %v5262_v10, %v5262_v10 }
 0x37c   : > { %v3538_v12 = vpop.f32.mrf.mxu0 }
 0x37d   : > { %v5256_v1 = vadd.f32 %v3538_v12, %v3537_v6  ;;  %v1441_v6 = vmul.f32 %v5214_v3, %v5214_v3  ;;  %v4052_v12 = vld [vmem:[#allocation2] sm:$0xff]  }
 0x37e   : > { %v3540_v13 = vpop.f32.mrf.mxu0  ;;  %3679 = vmatprep.mubr.bf16.mxu0 %v4052_v12 }
 0x380   : > { %v3541_v15 = vpop.f32.mrf.mxu0 }
 0x381   : > { %v5238_v46 = vadd.f32 %v3541_v15, %v3540_v13  ;;  %v1446_v15 = vmul.f32 %v5256_v1, %v5256_v1 }
 0x382   : > { %v3543_v16 = vpop.f32.mrf.mxu0 }
 0x383   : > { %v1447_v63 = vmul.f32 %v5238_v46, %v5238_v46 }
 0x384   : > { %v3544_v17 = vpop.f32.mrf.mxu0 }
 0x385   : > { %v5248_v60 = vadd.f32 %v3544_v17, %v3543_v16  ;;  %v4060_v16 = vld [vmem:[%s4967_s1 + $0x78] sm:$0xff]  }
 0x386   : > { %v3546_v43 = vpop.f32.mrf.mxu0  ;;  %v4061_v17 = vld [vmem:[%s4967_s1 + $0x38] sm:$0xff]   ;;  %3567 = vmatprep.subr.bf16.mxu1 %v4060_v16 }
 0x387   : > { %v1448_v13 = vmul.f32 %v5248_v60, %v5248_v60  ;;  %3568 = vmatpush3.bf16.msra.mxu1 %v4061_v17 }
 0x388   : > { %v3547_v14 = vpop.f32.mrf.mxu0 }
 0x389   : > { %v5230_v51 = vadd.f32 %v3547_v14, %v3546_v43  ;;  %v4062_v43 = vld [vmem:[%s4967_s1 + $0x70] sm:$0xff]  }
 0x38a   : > { %v3549_v19 = vpop.f32.mrf.mxu0  ;;  %v4063_v14 = vld [vmem:[%s4967_s1 + $0x30] sm:$0xff]   ;;  %3569 = vmatprep.subr.bf16.mxu1 %v4062_v43 }
 0x38b   : > { %v1449_v40 = vmul.f32 %v5230_v51, %v5230_v51  ;;  %3570 = vmatpush3.bf16.msra.mxu1 %v4063_v14 }
 0x38c   : > { %v3550_v18 = vpop.f32.mrf.mxu0 }
 0x38d   : > { %v5240_v37 = vadd.f32 %v3550_v18, %v3549_v19  ;;  %v4064_v19 = vld [vmem:[%s4967_s1 + $0x68] sm:$0xff]  }
 0x38e   : > { %v3552_v20 = vpop.f32.mrf.mxu0  ;;  %3571 = vmatprep.subr.bf16.mxu1 %v4064_v19 }
 0x38f   : > { %v1450_v61 = vmul.f32 %v5240_v37, %v5240_v37 }
 0x390   : > { %v3553_v21 = vpop.f32.mrf.mxu0 }
 0x391   : > { %v5224_v25 = vadd.f32 %v3553_v21, %v3552_v20  ;;  %v4065_v20 = vld [vmem:[%s4967_s1 + $0x28] sm:$0xff]   ;;  %v4066_v21 = vld [vmem:[%s4967_s1 + $0x60] sm:$0xff]  }
 0x392   : > { %v3555_v36 = vpop.f32.mrf.mxu0  ;;  %3572 = vmatpush3.bf16.msra.mxu1 %v4065_v20 }
 0x393   : > { %v1451_v33 = vmul.f32 %v5224_v25, %v5224_v25  ;;  %3573 = vmatprep.subr.bf16.mxu1 %v4066_v21 }
 0x394   : > { %v3556_v39 = vpop.f32.mrf.mxu0 }
 0x395   : > { %v5218_v23 = vadd.f32 %v3556_v39, %v3555_v36 }
 0x396   : > { %v3558_v24 = vpop.f32.mrf.mxu0 }
 0x397   : > { %v1452_v27 = vmul.f32 %v5218_v23, %v5218_v23 }
 0x398   : > { %v3559_v22 = vpop.f32.mrf.mxu0 }
 0x399   : > { %v5222_v28 = vadd.f32 %v3559_v22, %v3558_v24  ;;  %1480 = vadd.xlane.f32.xlu1 %v1452_v27  ;;  %v4067_v24 = vld [vmem:[%s4967_s1 + $0x20] sm:$0xff]   ;;  %v4068_v27 = vld [vmem:[%s4967_s1 + $0x58] sm:$0xff]  }
 0x39a   : > { %v3561_v5 = vpop.f32.mrf.mxu0  ;;  %3574 = vmatpush3.bf16.msra.mxu1 %v4067_v24 }
 0x39b   : > { %v1453_v26 = vmul.f32 %v5222_v28, %v5222_v28  ;;  %3575 = vmatprep.subr.bf16.mxu1 %v4068_v27 }
 0x39c   : > { %v3562_v29 = vpop.f32.mrf.mxu0 }
 0x39d   : > { %v5228_v30 = vadd.f32 %v3562_v29, %v3561_v5  ;;  %1482 = vadd.xlane.f32.xlu1 %v1453_v26  ;;  %v4069_v29 = vld [vmem:[%s4967_s1 + $0x18] sm:$0xff]  }
 0x39e   : > { %v3564_v31 = vpop.f32.mrf.mxu0  ;;  %3576 = vmatpush3.bf16.msra.mxu1 %v4069_v29 }
 0x39f   : > { %v1454_v32 = vmul.f32 %v5228_v30, %v5228_v30 }
 0x3a0   : > { %v3565_v34 = vpop.f32.mrf.mxu0 }
 0x3a1   : > { %v5236_v35 = vadd.f32 %v3565_v34, %v3564_v31  ;;  %1484 = vadd.xlane.f32.xlu0 %v1454_v32  ;;  %1478 = vadd.xlane.f32.xlu1 %v1451_v33  ;;  %v4070_v31 = vld [vmem:[%s4967_s1 + $0x50] sm:$0xff]  }
 0x3a2   : > { %3577 = vmatprep.subr.bf16.mxu1 %v4070_v31 }
 0x3a3   : > { %v1455_v38 = vmul.f32 %v5236_v35, %v5236_v35 }
 0x3a5   : > { %1486 = vadd.xlane.f32.xlu0 %v1455_v38  ;;  %1474 = vadd.xlane.f32.xlu1 %v1449_v40  ;;  %v4071_v38 = vld [vmem:[%s4967_s1 + $0x10] sm:$0xff]   ;;  %v4072_v40 = vld [vmem:[%s4967_s1 + $0x48] sm:$0xff]  }
 0x3a6   : > { %3578 = vmatpush3.bf16.msra.mxu1 %v4071_v38 }
 0x3a7   : > { %3579 = vmatprep.subr.bf16.mxu1 %v4072_v40 }
 0x3a9   : > { %1476 = vadd.xlane.f32.xlu0 %v1450_v61  ;;  %1470 = vadd.xlane.f32.xlu1 %v1447_v63 }
 0x3ad   : > { %1472 = vadd.xlane.f32.xlu0 %v1448_v13  ;;  %1466 = vadd.xlane.f32.xlu1 %v1445_v11  ;;  %v4073_v11 = vld [vmem:[%s4967_s1 + $0x8] sm:$0xff]  }
 0x3ae   : > { %3580 = vmatpush3.bf16.msra.mxu1 %v4073_v11 }
 0x3b1   : > { %1468 = vadd.xlane.f32.xlu0 %v1446_v15  ;;  %1462 = vadd.xlane.f32.xlu1 %v1443_v4  ;;  %v4074_v15 = vld [vmem:[%s4967_s1 + $0x40] sm:$0xff]  }
 0x3b2   : > { %3581 = vmatprep.subr.bf16.mxu1 %v4074_v15 }
 0x3b5   : > { %1464 = vadd.xlane.f32.xlu0 %v1444_v7  ;;  %1458 = vadd.xlane.f32.xlu1 %v1441_v6  ;;  %v4075_v6 = vld [vmem:[%s4967_s1] sm:$0xff]  }
 0x3b6   : > { %3582 = vmatpush3.bf16.msra.mxu1 %v4075_v6 }
 0x3b9   : > { %1460 = vadd.xlane.f32.xlu0 %v1442_v8  ;;  %1728 = vmatmul.mubr.bf16.vlgmr.msra.gmra.mxu1 %v5153_v41 }
 0x3ba   : > { %1735 = vmatprep.mubr.bf16.mxu1 %v5156_v42 }
 0x3bd   : > { %1456 = vadd.xlane.f32.xlu0 %v1440_v9 }
 0x3c1   : > { %1736 = vmatmul.mubr.bf16.gmra.mxu1 %v5161_v44 }
 0x3c2   : > { %1743 = vmatprep.mubr.bf16.mxu1 %v5164_v45 }
 0x3c9   : > { %1744 = vmatmul.mubr.bf16.gmra.mxu1 %v5169_v47 }
 0x3ca   : > { %1751 = vmatprep.mubr.bf16.mxu1 %v5172_v59 }
 0x3d1   : > { %1752 = vmatmul.mubr.bf16.gmra.mxu1 %v5177_v48 }
 0x3d2   : > { %1759 = vmatprep.mubr.bf16.mxu1 %v5180_v49 }
 0x3d9   : > { %1760 = vmatmul.mubr.bf16.gmra.mxu1 %v5185_v50 }
 0x3da   : > { %1767 = vmatprep.mubr.bf16.mxu1 %v5188_v54 }
 0x3e1   : > { %1768 = vmatmul.mubr.bf16.gmra.mxu1 %v5193_v52 }
 0x3e2   : > { %1775 = vmatprep.mubr.bf16.mxu1 %v5196_v53 }
 0x3e9   : > { %1776 = vmatmul.mubr.bf16.gmra.mxu1 %v5201_v55  ;;  %v4057_v55 = vld [vmem:[#allocation2 + $0x28] sm:$0xff]  }
 0x3ea   : > { %1783 = vmatprep.mubr.bf16.mxu1 %v5204_v56  ;;  %v4058_v56 = vld [vmem:[#allocation2 + $0x30] sm:$0xff]  }
 0x3f1   : > { %1784 = vmatmul.mubr.bf16.gmra.mxu1 %v5209_v57 }
 0x422   : > { %v1481_v18 = vpop.xlane.xlu1 %1480 }
 0x423   : > { %v1500_v5 = vmax.f32 %v1481_v18, 1e-12 }
 0x426   : > { %v1483_v36 = vpop.xlane.xlu1 %1482 }
 0x427   : > { %v1501_v39 = vmax.f32 %v1483_v36, 1e-12 }
 0x429   : > { %4076 = vrsqrt.f32 %v1501_v39  ;;  %v5298_v39 = vld [vmem:[%s4957_s7] ss:$0 sm:$0xff] }
 0x42a   : > { %v1485_v22 = vpop.xlane.xlu0 %1484  ;;  %v1479_v34 = vpop.xlane.xlu1 %1478 }
 0x42b   : > { %v1502_v26 = vmax.f32 %v1485_v22, 1e-12  ;;  %v1499_v63 = vmax.f32 %v1479_v34, 1e-12 }
 0x42d   : > { %4078 = vrsqrt.f32 %v1502_v26 }
 0x42e   : > { %v1487_v32 = vpop.xlane.xlu0 %1486  ;;  %4080 = vrsqrt.f32 %v1500_v5  ;;  %v1475_v7 = vpop.xlane.xlu1 %1474 }
 0x42f   : > { %v1503_v33 = vmax.f32 %v1487_v32, 1e-12  ;;  %v1497_v16 = vmax.f32 %v1475_v7, 1e-12 }
 0x431   : > { %4082 = vrsqrt.f32 %v1503_v33 }
 0x432   : > { %v1477_v61 = vpop.xlane.xlu0 %1476  ;;  %v1471_v36 = vpop.xlane.xlu1 %1470 }
 0x433   : > { %v1498_v13 = vmax.f32 %v1477_v61, 1e-12  ;;  %v1495_v5 = vmax.f32 %v1471_v36, 1e-12 }
 0x435   : > { %4084 = vrsqrt.f32 %v1498_v13 }
 0x436   : > { %v1473_v4 = vpop.xlane.xlu0 %1472  ;;  %4086 = vrsqrt.f32 %v1499_v63  ;;  %v4077_v8 = vpop.eup %4076 }
 0x437   : > { %v1496_v9 = vmax.f32 %v1473_v4, 1e-12  ;;  %v1533_v14 = vmul.f32 %v4077_v8, %v5222_v28  ;;  %v1467_v32 = vpop.xlane.xlu1 %1466 }
 0x438   : > { %v1493_v40 = vmax.f32 %v1467_v32, 1e-12 }
 0x439   : > { %4088 = vrsqrt.f32 %v1496_v9  ;;  %v1556_v28 = vmul.f32 %v5298_v39, %v1533_v14 }
 0x43a   : > { %v4079_v12 = vpop.eup %4078  ;;  %v1469_v18 = vpop.xlane.xlu0 %1468  ;;  %4090 = vrsqrt.f32 %v1497_v16 }
 0x43b   : > { %v4081_v17 = vpop.eup %4080  ;;  %v1534_v43 = vmul.f32 %v4079_v12, %v5228_v30  ;;  %v1494_v24 = vmax.f32 %v1469_v18, 1e-12  ;;  %v1463_v45 = vpop.xlane.xlu1 %1462 }
 0x43c   : > { %v1532_v21 = vmul.f32 %v4081_v17, %v5218_v23  ;;  %v1491_v7 = vmax.f32 %v1463_v45, 1e-12 }
 0x43d   : > { %v1557_v27 = vmul.f32 %v5298_v39, %v1534_v43  ;;  %4092 = vrsqrt.f32 %v1494_v24 }
 0x43e   : > { %v4083_v19 = vpop.eup %4082  ;;  %v1465_v31 = vpop.xlane.xlu0 %1464  ;;  %4094 = vrsqrt.f32 %v1495_v5  ;;  %v4055_v5 = vld [vmem:[#allocation2 + $0x18] sm:$0xff]  }
 0x43f   : > { %v1535_v20 = vmul.f32 %v4083_v19, %v5236_v35  ;;  %v1555_v35 = vmul.f32 %v5298_v39, %v1532_v21  ;;  %v1492_v33 = vmax.f32 %v1465_v31, 1e-12  ;;  %v1459_v59 = vpop.xlane.xlu1 %1458 }
 0x440   : > { %v1489_v43 = vmax.f32 %v1459_v59, 1e-12 }
 0x441   : > { %v1558_v30 = vmul.f32 %v5298_v39, %v1535_v20  ;;  %v1565_v41 = vpack.c.bf16 %v1556_v28, %v1555_v35  ;;  %4096 = vrsqrt.f32 %v1492_v33 }
 0x442   : > { %v4085_v22 = vpop.eup %4084  ;;  %v1461_v11 = vpop.xlane.xlu0 %1460  ;;  %4098 = vrsqrt.f32 %v1493_v40 }
 0x443   : > { %v1566_v26 = vpack.c.bf16 %v1558_v30, %v1557_v27  ;;  %v4087_v23 = vpop.eup %4086  ;;  %v1530_v29 = vmul.f32 %v4085_v22, %v5240_v37  ;;  %v4053_v22 = vld [vmem:[#allocation2 + $0x8] sm:$0xff]  }
 0x444   : > { %v1531_v42 = vmul.f32 %v4087_v23, %v5224_v25  ;;  %v1490_v25 = vmax.f32 %v1461_v11, 1e-12 }
 0x445   : > { %3663 = vmatprep.subr.bf16.mxu0 %v1566_v26  ;;  %v1553_v34 = vmul.f32 %v5298_v39, %v1530_v29 }
 0x446   : > { %3664 = vmatpush3.bf16.xpose.msra.mxu0 %v1566_v26  ;;  %v4089_v38 = vpop.eup %4088  ;;  %v1554_v61 = vmul.f32 %v5298_v39, %v1531_v42  ;;  %4100 = vrsqrt.f32 %v1490_v25  ;;  %v1457_v12 = vpop.xlane.xlu0 %1456  ;;  %v4059_v26 = vld [vmem:[#allocation2 + $0x38] sm:$0xff]  }
 0x447   : > { %3665 = vmatprep.subr.bf16.mxu0 %v1565_v41  ;;  %v4091_v63 = vpop.eup %4090  ;;  %v1528_v13 = vmul.f32 %v4089_v38, %v5248_v60  ;;  %4102 = vrsqrt.f32 %v1491_v7 }
 0x448   : > { %v1564_v37 = vpack.c.bf16 %v1554_v61, %v1553_v34  ;;  %v1529_v44 = vmul.f32 %v4091_v63, %v5230_v51  ;;  %v1488_v51 = vmax.f32 %v1457_v12, 1e-12 }
 0x449   : > { %v1551_v15 = vmul.f32 %v5298_v39, %v1528_v13 }
 0x44a   : > { %v4093_v4 = vpop.eup %4092  ;;  %v1552_v6 = vmul.f32 %v5298_v39, %v1529_v44  ;;  %4104 = vrsqrt.f32 %v1488_v51 }
 0x44b   : > { %v4095_v8 = vpop.eup %4094  ;;  %v1526_v9 = vmul.f32 %v4093_v4, %v5256_v1  ;;  %4106 = vrsqrt.f32 %v1489_v43 }
 0x44c   : > { %v1563_v60 = vpack.c.bf16 %v1552_v6, %v1551_v15  ;;  %v1527_v47 = vmul.f32 %v4095_v8, %v5238_v46 }
 0x44d   : > { %v1549_v16 = vmul.f32 %v5298_v39, %v1526_v9  ;;  %v1964_v9 = vlaneseq }
 0x44e   : > { %3666 = vmatpush3.bf16.xpose.msra.mxu0 %v1565_v41  ;;  %v4097_v17 = vpop.eup %4096  ;;  %v1550_v14 = vmul.f32 %v5298_v39, %v1527_v47  ;;  %v1961_v47 = vld [vmem:[%s527_s13] sm:$0x1] }
 0x44f   : > { %3667 = vmatprep.subr.bf16.mxu0 %v1564_v37  ;;  %v4099_v19 = vpop.eup %4098  ;;  %v1524_v18 = vmul.f32 %v4097_v17, %v5262_v10  ;;  %v1965_v59 = vshrl.u32 %v1964_v9, 7  ;;  %vm1962_vm1 = vcmp.ne.s32.totalorder %v1961_v47, 0 }
 0x450   : > { %v1562_v1 = vpack.c.bf16 %v1550_v14, %v1549_v16  ;;  %v1525_v48 = vmul.f32 %v4099_v19, %v5246_v58 }
 0x451   : > { %v1547_v49 = vmul.f32 %v5298_v39, %v1524_v18  ;;  %v1966_v16 = vsub.s32 0, %v1965_v59 }
 0x452   : > { %v1548_v20 = vmul.f32 %v5298_v39, %v1525_v48 }
 0x453   : > { %v4101_v46 = vpop.eup %4100 }
 0x454   : > { %v4103_v21 = vpop.eup %4102  ;;  %v1561_v36 = vpack.c.bf16 %v1548_v20, %v1547_v49  ;;  %v1522_v24 = vmul.f32 %v4101_v46, %v5216_v2 }
 0x455   : > { %v1523_v10 = vmul.f32 %v4103_v21, %v5254_v0 }
 0x456   : > { %3668 = vmatpush3.bf16.xpose.msra.mxu0 %v1564_v37  ;;  %v1545_v50 = vmul.f32 %v5298_v39, %v1522_v24 }
 0x457   : > { %3669 = vmatprep.subr.bf16.mxu0 %v1563_v60  ;;  %v4105_v54 = vpop.eup %4104  ;;  %v1546_v58 = vmul.f32 %v5298_v39, %v1523_v10 }
 0x458   : > { %v4107_v27 = vpop.eup %4106  ;;  %v1520_v28 = vmul.f32 %v4105_v54, %v5212_v62  ;;  %v4054_v62 = vld [vmem:[#allocation2 + $0x10] sm:$0xff]  }
 0x459   : > { %v1560_v30 = vpack.c.bf16 %v1546_v58, %v1545_v50  ;;  %v1521_v2 = vmul.f32 %v4107_v27, %v5214_v3  ;;  %v4056_v3 = vld [vmem:[#allocation2 + $0x20] sm:$0xff]  }
 0x45a   : > { %v1543_v52 = vmul.f32 %v5298_v39, %v1520_v28 }
 0x45b   : > { %v1544_v53 = vmul.f32 %v5298_v39, %v1521_v2  ;;  %v4533_v39 = vmov 0  }
 0x45c   : > { %4010 = vset.pattern.permute.xlu0 %v4533_v39  ;;  %4011 = vset.pattern.permute.xlu1 %v4533_v39  ;;  %v1963_v17 = vsel %vm1962_vm1, 1, %v4533_v39 }
 0x45d   : > { %v1559_v0 = vpack.c.bf16 %v1544_v53, %v1543_v52  ;;  %v5377_v14 = vrot.slane %v1963_v17, %v1966_v16 }
 0x45e   : > { %3670 = vmatpush3.bf16.xpose.msra.mxu0 %v1563_v60 }
 0x45f   : > { %3671 = vmatprep.subr.bf16.mxu0 %v1562_v1  ;;  %vm1968_vm2 = vcmp.eq.s32.totalorder %v5377_v14, 1 }
 0x466   : > { %3672 = vmatpush3.bf16.xpose.msra.mxu0 %v1562_v1 }
 0x467   : > { %3673 = vmatprep.subr.bf16.mxu0 %v1561_v36 }
 0x46e   : > { %3674 = vmatpush3.bf16.xpose.msra.mxu0 %v1561_v36 }
 0x46f   : > { %3675 = vmatprep.subr.bf16.mxu0 %v1560_v30 }
 0x476   : > { %3676 = vmatpush3.bf16.xpose.msra.mxu0 %v1560_v30 }
 0x477   : > { %3677 = vmatprep.subr.bf16.mxu0 %v1559_v0 }
 0x479   : > { %v3583_v35 = vpop.f32.mrf.mxu1 }
 0x47b   : > { %v3584_v57 = vpop.f32.mrf.mxu1 }
 0x47c   : > { %v3585_v23 = vadd.f32 %v3584_v57, %v3583_v35 }
 0x47d   : > { %v3586_v41 = vpop.f32.mrf.mxu1 }
 0x47e   : > { %3678 = vmatpush3.bf16.xpose.msra.mxu0 %v1559_v0 }
 0x47f   : > { %v3587_v29 = vpop.f32.mrf.mxu1 }
 0x480   : > { %v3588_v31 = vadd.f32 %v3587_v29, %v3586_v41 }
 0x481   : > { %v3589_v42 = vpop.f32.mrf.mxu1 }
 0x482   : > { %v5342_v32 = vpack.c.bf16 %v3588_v31, %v3585_v23 }
 0x483   : > { %v3590_v33 = vpop.f32.mrf.mxu1 }
 0x484   : > { %v3591_v34 = vadd.f32 %v3590_v33, %v3589_v42 }
 0x485   : > { %3680 = vmatmul.mubr.bf16.vlgmr.msra.gmra.mxu0 %v4053_v22  ;;  %v3592_v38 = vpop.f32.mrf.mxu1 }
 0x486   : > { %3683 = vmatprep.mubr.bf16.mxu0 %v4054_v62 }
 0x487   : > { %v3593_v40 = vpop.f32.mrf.mxu1 }
 0x488   : > { %v3594_v61 = vadd.f32 %v3593_v40, %v3592_v38 }
 0x489   : > { %v5344_v63 = vpop.f32.mrf.mxu1 }
 0x48a   : > { %v5346_v37 = vpack.c.bf16 %v3594_v61, %v3591_v34 }
 0x48b   : > { %v5348_v13 = vpop.f32.mrf.mxu1 }
 0x48d   : > { %3684 = vmatmul.mubr.bf16.gmra.mxu0 %v4055_v5  ;;  %v5350_v11 = vpop.f32.mrf.mxu1 }
 0x48e   : > { %3687 = vmatprep.mubr.bf16.mxu0 %v4056_v3 }
 0x48f   : > { %v5352_v44 = vpop.f32.mrf.mxu1 }
 0x491   : > { %v5354_v45 = vpop.f32.mrf.mxu1 }
 0x493   : > { %v5356_v25 = vpop.f32.mrf.mxu1 }
 0x494   : > { %v3603_v14 = vadd.f32 %v5356_v25, %v5354_v45  ;;  %v5477_v25 = vld [vmem:[#allocation3 + $0x10] sm:$0xff] }
 0x495   : > { %3688 = vmatmul.mubr.bf16.gmra.mxu0 %v4057_v55  ;;  %v5358_v15 = vpop.f32.mrf.mxu1 }
 0x496   : > { %3691 = vmatprep.mubr.bf16.mxu0 %v4058_v56 }
 0x497   : > { %v5360_v4 = vpop.f32.mrf.mxu1 }
 0x499   : > { %v5362_v7 = vpop.f32.mrf.mxu1 }
 0x49b   : > { %v5364_v6 = vpop.f32.mrf.mxu1 }
 0x49d   : > { %3692 = vmatmul.mubr.bf16.gmra.mxu0 %v4059_v26  ;;  %v5366_v8 = vpop.f32.mrf.mxu1 }
 0x49f   : > { %v5368_v60 = vpop.f32.mrf.mxu1 }
 0x4a1   : > { %v5370_v12 = vpop.f32.mrf.mxu1 }
 0x4a3   : > { %v3614_v51 = vpop.f32.mrf.mxu1 }
 0x4a4   : > { %v3615_v9 = vadd.f32 %v3614_v51, %v5370_v12  ;;  %v3609_v12 = vadd.f32 %v5364_v6, %v5362_v7  ;;  %v3612_v51 = vadd.f32 %v5368_v60, %v5366_v8  ;;  %v3597_v7 = vadd.f32 %v5348_v13, %v5344_v63  ;;  %v1985_v63 = vld [vmem:[#allocation3] sm:$0xff] }
 0x4a5   : > { %v3616_v43 = vpop.f32.mrf.mxu1  ;;  %v3600_v6 = vadd.f32 %v5352_v44, %v5350_v11  ;;  %v1988_v11 = vld [vmem:[#allocation3 + $0x18] sm:$0xff] }
 0x4a7   : > { %v3617_v1 = vpop.f32.mrf.mxu1  ;;  %v1794_v60 = vpack.c.bf16 %v3600_v6, %v3597_v7  ;;  %v5536_v6 = vld [vmem:[#allocation3 + $0x70] sm:$0xff] }
 0x4a8   : > { %v3618_v47 = vadd.f32 %v3617_v1, %v3616_v43  ;;  %v3606_v1 = vadd.f32 %v5360_v4, %v5358_v15 }
 0x4a9   : > { %v3619_v46 = vpop.f32.mrf.mxu1 }
 0x4aa   : > { %v1797_v43 = vpack.c.bf16 %v3618_v47, %v3615_v9  ;;  %v1795_v8 = vpack.c.bf16 %v3606_v1, %v3603_v14 }
 0x4ab   : > { %v3620_v10 = vpop.f32.mrf.mxu1 }
 0x4ac   : > { %v3621_v29 = vadd.f32 %v3620_v10, %v3619_v46  ;;  %v1796_v46 = vpack.c.bf16 %v3612_v51, %v3609_v12 }
 0x4ad   : > { %v3622_v30 = vpop.f32.mrf.mxu1 }
 0x4af   : > { %v3623_v0 = vpop.f32.mrf.mxu1 }
 0x4b0   : > { %v3624_v31 = vadd.f32 %v3623_v0, %v3622_v30 }
 0x4b1   : > { %v3625_v55 = vpop.f32.mrf.mxu1 }
 0x4b2   : > { %v1798_v17 = vpack.c.bf16 %v3624_v31, %v3621_v29 }
 0x4b3   : > { %v3626_v35 = vpop.f32.mrf.mxu1 }
 0x4b4   : > { %v3627_v42 = vadd.f32 %v3626_v35, %v3625_v55  ;;  %v5507_v35 = vld [vmem:[#allocation3 + $0x40] sm:$0xff] }
 0x4b5   : > { %v3628_v41 = vpop.f32.mrf.mxu1 }
 0x4b7   : > { %v3629_v34 = vpop.f32.mrf.mxu1 }
 0x4b8   : > { %v3630_v40 = vadd.f32 %v3629_v34, %v3628_v41  ;;  %v1996_v41 = vld [vmem:[#allocation3 + $0x58] sm:$0xff] }
 0x545   : > { %v3681_v19 = vpop.f32.mrf.mxu0 }
 0x546   : > { %v5392_v36 = vsel %vm1968_vm2, -1e+09, %v3681_v19  ;;  %v1799_v19 = vpack.c.bf16 %v3630_v40, %v3627_v42 }
 0x547   : > { %v1898_v18 = vpop.f32.mrf.mxu0 }
 0x548   : > { %v5382_v48 = vsel %vm1968_vm2, -1e+09, %v1898_v18  ;;  %3695 = vmatprep.subr.bf16.mxu1 %v1799_v19 }
 0x549   : > { %2001 = vmax.xlane.f32.xlu0 %v5382_v48  ;;  %v3682_v49 = vpop.f32.mrf.mxu0  ;;  %3696 = vmatpush3.bf16.msra.mxu1 %v1799_v19 }
 0x54a   : > { %v5387_v20 = vsel %vm1968_vm2, -1e+09, %v3682_v49  ;;  %3697 = vmatprep.subr.bf16.mxu1 %v1798_v17 }
 0x54b   : > { %2007 = vmax.xlane.f32.xlu1 %v5387_v20  ;;  %v1901_v21 = vpop.f32.mrf.mxu0 }
 0x54c   : > { %v5397_v50 = vsel %vm1968_vm2, -1e+09, %v1901_v21  ;;  %v5480_v21 = vld [vmem:[#allocation3 + $0x8] sm:$0xff] }
 0x54d   : > { %2005 = vmax.xlane.f32.xlu0 %v5392_v36  ;;  %v3685_v24 = vpop.f32.mrf.mxu0  ;;  %3698 = vmatpush3.bf16.msra.mxu1 %v1798_v17 }
 0x54e   : > { %v5412_v52 = vsel %vm1968_vm2, -1e+09, %v3685_v24  ;;  %3699 = vmatprep.subr.bf16.mxu1 %v1797_v43  ;;  %v5486_v24 = vld [vmem:[#allocation3 + $0x20] sm:$0xff] }
 0x54f   : > { %2003 = vmax.xlane.f32.xlu1 %v5397_v50  ;;  %v1914_v54 = vpop.f32.mrf.mxu0 }
 0x550   : > { %v5402_v58 = vsel %vm1968_vm2, -1e+09, %v1914_v54 }
 0x551   : > { %2009 = vmax.xlane.f32.xlu0 %v5402_v58  ;;  %v3686_v27 = vpop.f32.mrf.mxu0  ;;  %3700 = vmatpush3.bf16.msra.mxu1 %v1797_v43  ;;  %v5530_v43 = vld [vmem:[#allocation3 + $0x78] sm:$0xff] }
 0x552   : > { %v5407_v28 = vsel %vm1968_vm2, -1e+09, %v3686_v27  ;;  %3701 = vmatprep.subr.bf16.mxu1 %v1796_v46  ;;  %v1992_v27 = vld [vmem:[#allocation3 + $0x38] sm:$0xff] }
 0x553   : > { %2015 = vmax.xlane.f32.xlu1 %v5407_v28  ;;  %v1917_v2 = vpop.f32.mrf.mxu0 }
 0x554   : > { %v5417_v22 = vsel %vm1968_vm2, -1e+09, %v1917_v2 }
 0x555   : > { %2013 = vmax.xlane.f32.xlu0 %v5412_v52  ;;  %v3689_v53 = vpop.f32.mrf.mxu0  ;;  %3702 = vmatpush3.bf16.msra.mxu1 %v1796_v46 }
 0x556   : > { %v5431_v26 = vsel %vm1968_vm2, -1e+09, %v3689_v53  ;;  %3703 = vmatprep.subr.bf16.mxu1 %v1795_v8  ;;  %v5499_v53 = vld [vmem:[#allocation3 + $0x30] sm:$0xff] }
 0x557   : > { %2011 = vmax.xlane.f32.xlu1 %v5417_v22  ;;  %v1930_v62 = vpop.f32.mrf.mxu0 }
 0x558   : > { %v5422_v5 = vsel %vm1968_vm2, -1e+09, %v1930_v62 }
 0x559   : > { %v3690_v3 = vpop.f32.mrf.mxu0  ;;  %2017 = vmax.xlane.f32.xlu0 %v5422_v5  ;;  %3704 = vmatpush3.bf16.msra.mxu1 %v1795_v8 }
 0x55a   : > { %v5427_v56 = vsel %vm1968_vm2, -1e+09, %v3690_v3  ;;  %3705 = vmatprep.subr.bf16.mxu1 %v1794_v60  ;;  %v1990_v3 = vld [vmem:[#allocation3 + $0x28] sm:$0xff] }
 0x55b   : > { %2023 = vmax.xlane.f32.xlu1 %v5427_v56  ;;  %v1933_v39 = vpop.f32.mrf.mxu0 }
 0x55c   : > { %v5436_v57 = vsel %vm1968_vm2, -1e+09, %v1933_v39 }
 0x55d   : > { %v3693_v23 = vpop.f32.mrf.mxu0  ;;  %2021 = vmax.xlane.f32.xlu0 %v5431_v26  ;;  %3706 = vmatpush3.bf16.msra.mxu1 %v1794_v60 }
 0x55e   : > { %v5452_v16 = vsel %vm1968_vm2, -1e+09, %v3693_v23  ;;  %3707 = vmatprep.subr.bf16.mxu1 %v5346_v37 }
 0x55f   : > { %2019 = vmax.xlane.f32.xlu1 %v5436_v57  ;;  %v1946_v33 = vpop.f32.mrf.mxu0 }
 0x560   : > { %v5442_v38 = vsel %vm1968_vm2, -1e+09, %v1946_v33  ;;  %v5516_v33 = vld [vmem:[#allocation3 + $0x50] sm:$0xff] }
 0x561   : > { %v3694_v61 = vpop.f32.mrf.mxu0  ;;  %2025 = vmax.xlane.f32.xlu0 %v5442_v38  ;;  %3708 = vmatpush3.bf16.msra.mxu1 %v5346_v37 }
 0x562   : > { %v5448_v59 = vsel %vm1968_vm2, -1e+09, %v3694_v61  ;;  %3709 = vmatprep.subr.bf16.mxu1 %v5342_v32  ;;  %v1994_v61 = vld [vmem:[#allocation3 + $0x48] sm:$0xff] }
 0x563   : > { %2031 = vmax.xlane.f32.xlu1 %v5448_v59  ;;  %v1949_v18 = vpop.f32.mrf.mxu0 }
 0x564   : > { %v5457_v49 = vsel %vm1968_vm2, -1e+09, %v1949_v18  ;;  %v5525_v18 = vld [vmem:[#allocation3 + $0x60] sm:$0xff] }
 0x565   : > { %2029 = vmax.xlane.f32.xlu0 %v5452_v16  ;;  %3710 = vmatpush3.bf16.msra.mxu1 %v5342_v32 }
 0x567   : > { %2027 = vmax.xlane.f32.xlu1 %v5457_v49 }
 0x5d2   : > { %v2002_v13 = vpop.xlane.xlu0 %2001 }
 0x5d3   : > { %v2033_v44 = vmax.f32 %v1985_v63, %v2002_v13 }
 0x5d4   : > { %v2008_v45 = vpop.xlane.xlu1 %2007 }
 0x5d5   : > { %2571 = vst.msk [vmem:[#allocation3] sm:$0xff] %vm2305_vm3, %v2033_v44  ;;  %v2036_v15 = vmax.f32 %v1988_v11, %v2008_v45  ;;  %2099 = vperm.xlu0 %4010, %v2033_v44   ;;  %v2049_v34 = vsub.f32 %v1985_v63, %v2033_v44  ;;  %v1998_v63 = vld [vmem:[#allocation3 + $0x68] sm:$0xff] }
 0x5d6   : > { %v2006_v4 = vpop.xlane.xlu0 %2005 }
 0x5d7   : > { %2574 = vst.msk [vmem:[#allocation3 + $0x18] sm:$0xff] %vm2305_vm3, %v2036_v15  ;;  %v5484_v37 = vmax.f32 %v5477_v25, %v2006_v4  ;;  %v2052_v17 = vsub.f32 %v1988_v11, %v2036_v15  ;;  %v2065_v12 = vmul.f32 1.442695, %v2049_v34 }
 0x5d8   : > { %v2004_v32 = vpop.xlane.xlu1 %2003 }
 0x5d9   : > { %2573 = vst.msk [vmem:[#allocation3 + $0x10] sm:$0xff] %vm2305_vm3, %v5484_v37  ;;  %v5491_v10 = vmax.f32 %v5480_v21, %v2004_v32  ;;  %2109 = vperm.xlu1 %4011, %v5484_v37   ;;  %v2071_v46 = vmul.f32 1.442695, %v2052_v17  ;;  %4108 = vpow2.f32 %v2065_v12 }
 0x5da   : > { %v2010_v54 = vpop.xlane.xlu0 %2009 }
 0x5db   : > { %2572 = vst.msk [vmem:[#allocation3 + $0x8] sm:$0xff] %vm2305_vm3, %v5491_v10  ;;  %v5497_v30 = vmax.f32 %v5486_v24, %v2010_v54  ;;  %v2050_v11 = vsub.f32 %v5480_v21, %v5491_v10  ;;  %4110 = vpow2.f32 %v2071_v46  ;;  %v2051_v21 = vsub.f32 %v5477_v25, %v5484_v37 }
 0x5dc   : > { %v2016_v2 = vpop.xlane.xlu1 %2015 }
 0x5dd   : > { %2575 = vst.msk [vmem:[#allocation3 + $0x20] sm:$0xff] %vm2305_vm3, %v5497_v30  ;;  %v2040_v0 = vmax.f32 %v1992_v27, %v2016_v2  ;;  %2114 = vperm.xlu1 %4011, %v2036_v15  }
 0x5de   : > { %v2014_v62 = vpop.xlane.xlu0 %2013 }
 0x5df   : > { %2578 = vst.msk [vmem:[#allocation3 + $0x38] sm:$0xff] %vm2305_vm3, %v2040_v0  ;;  %v5505_v55 = vmax.f32 %v5499_v53, %v2014_v62  ;;  %v2056_v8 = vsub.f32 %v1992_v27, %v2040_v0 }
 0x5e0   : > { %v2012_v39 = vpop.xlane.xlu1 %2011 }
 0x5e1   : > { %2577 = vst.msk [vmem:[#allocation3 + $0x30] sm:$0xff] %vm2305_vm3, %v5505_v55  ;;  %v2038_v23 = vmax.f32 %v1990_v3, %v2012_v39  ;;  %2104 = vperm.xlu1 %4011, %v5491_v10   ;;  %v2079_v4 = vmul.f32 1.442695, %v2056_v8  ;;  %v2067_v10 = vmul.f32 1.442695, %v2050_v11 }
 0x5e2   : > { %v2018_v29 = vpop.xlane.xlu0 %2017 }
 0x5e3   : > { %2576 = vst.msk [vmem:[#allocation3 + $0x28] sm:$0xff] %vm2305_vm3, %v2038_v23  ;;  %v5514_v31 = vmax.f32 %v5507_v35, %v2018_v29  ;;  %v2054_v32 = vsub.f32 %v1990_v3, %v2038_v23  ;;  %4112 = vpow2.f32 %v2079_v4  ;;  %v2069_v3 = vmul.f32 1.442695, %v2051_v21 }
 0x5e4   : > { %v2024_v42 = vpop.xlane.xlu1 %2023  ;;  %4114 = vpow2.f32 %v2067_v10 }
 0x5e5   : > { %v2044_v40 = vmax.f32 %v1996_v41, %v2024_v42  ;;  %2129 = vperm.xlu1 %4011, %v5505_v55   ;;  %2579 = vst.msk [vmem:[#allocation3 + $0x40] sm:$0xff] %vm2305_vm3, %v5514_v31  ;;  %v2075_v2 = vmul.f32 1.442695, %v2054_v32 }
 0x5e6   : > { %v2022_v9 = vpop.xlane.xlu0 %2021  ;;  %v5564_v25 = vpop.eup %4108 }
 0x5e7   : > { %2582 = vst.msk [vmem:[#allocation3 + $0x58] sm:$0xff] %vm2305_vm3, %v2044_v40  ;;  %v5523_v47 = vmax.f32 %v5516_v33, %v2022_v9  ;;  %v2060_v62 = vsub.f32 %v1996_v41, %v2044_v40  ;;  %4116 = vpow2.f32 %v2075_v2  ;;  %v2055_v41 = vsub.f32 %v5499_v53, %v5505_v55 }
 0x5e8   : > { %v2020_v19 = vpop.xlane.xlu1 %2019  ;;  %4118 = vpow2.f32 %v2069_v3  ;;  %v5569_v29 = vpop.eup %4110  ;;  %v2057_v55 = vsub.f32 %v5507_v35, %v5514_v31 }
 0x5e9   : > { %v2042_v51 = vmax.f32 %v1994_v61, %v2020_v19  ;;  %2119 = vperm.xlu1 %4011, %v5497_v30   ;;  %2581 = vst.msk [vmem:[#allocation3 + $0x50] sm:$0xff] %vm2305_vm3, %v5523_v47  ;;  %v2087_v39 = vmul.f32 1.442695, %v2060_v62  ;;  %v2077_v42 = vmul.f32 1.442695, %v2055_v41  ;;  %v2059_v34 = vsub.f32 %v5516_v33, %v5523_v47 }
 0x5ea   : > { %v2026_v14 = vpop.xlane.xlu0 %2025 }
 0x5eb   : > { %2580 = vst.msk [vmem:[#allocation3 + $0x48] sm:$0xff] %vm2305_vm3, %v2042_v51  ;;  %2144 = vperm.xlu0 %4010, %v2042_v51   ;;  %v5534_v1 = vmax.f32 %v5525_v18, %v2026_v14  ;;  %4120 = vpow2.f32 %v2087_v39 }
 0x5ec   : > { %v2032_v7 = vpop.xlane.xlu1 %2031 }
 0x5ed   : > { %v5539_v60 = vmax.f32 %v5530_v43, %v2032_v7  ;;  %2124 = vperm.xlu1 %4011, %v2038_v23   ;;  %2583 = vst.msk [vmem:[#allocation3 + $0x60] sm:$0xff] %vm2305_vm3, %v5534_v1  ;;  %v2058_v23 = vsub.f32 %v1994_v61, %v2042_v51  ;;  %v2085_v61 = vmul.f32 1.442695, %v2059_v34  ;;  %v2061_v17 = vsub.f32 %v5525_v18, %v5534_v1 }
 0x5ee   : > { %v2030_v13 = vpop.xlane.xlu0 %2029 }
 0x5ef   : > { %v2064_v44 = vsub.f32 %v5530_v43, %v5539_v60  ;;  %2586 = vst.msk [vmem:[#allocation3 + $0x78] sm:$0xff] %vm2305_vm3, %v5539_v60  ;;  %2154 = vperm.xlu0 %4010, %v2044_v40   ;;  %v5550_v45 = vmax.f32 %v5536_v6, %v2030_v13 }
 0x5f0   : > { %v2028_v15 = vpop.xlane.xlu1 %2027  ;;  %v5576_v53 = vpop.eup %4112 }
 0x5f1   : > { %v2046_v54 = vmax.f32 %v1998_v63, %v2028_v15  ;;  %2134 = vperm.xlu1 %4011, %v2040_v0   ;;  %v2063_v27 = vsub.f32 %v5536_v6, %v5550_v45  ;;  %2585 = vst.msk [vmem:[#allocation3 + $0x70] sm:$0xff] %vm2305_vm3, %v5550_v45  ;;  %v2053_v0 = vsub.f32 %v5486_v24, %v5497_v30  ;;  %v2083_v24 = vmul.f32 1.442695, %v2058_v23  ;;  %v5581_v9 = vpop.eup %4114 }
 0x5f3   : > { %2584 = vst.msk [vmem:[#allocation3 + $0x68] sm:$0xff] %vm2305_vm3, %v2046_v54  ;;  %2164 = vperm.xlu0 %4010, %v2046_v54   ;;  %v2073_v37 = vmul.f32 1.442695, %v2053_v0  ;;  %v2062_v30 = vsub.f32 %v1998_v63, %v2046_v54 }
 0x5f4   : > { %v5584_v33 = vpop.eup %4116 }
 0x5f5   : > { %2139 = vperm.xlu1 %4011, %v5514_v31   ;;  %4122 = vpow2.f32 %v2073_v37  ;;  %v2091_v40 = vmul.f32 1.442695, %v2062_v30  ;;  %v5589_v19 = vpop.eup %4118  ;;  %v2089_v31 = vmul.f32 1.442695, %v2061_v17 }
 0x5f6   : > { %4124 = vpow2.f32 %v2083_v24 }
 0x5f7   : > { %2174 = vperm.xlu0 %4010, %v5539_v60   ;;  %4126 = vpow2.f32 %v2077_v42 }
 0x5f8   : > { %4128 = vpow2.f32 %v2091_v40  ;;  %v5592_v35 = vpop.eup %4120 }
 0x5f9   : > { %2149 = vperm.xlu1 %4011, %v5523_v47   ;;  %v2081_v47 = vmul.f32 1.442695, %v2057_v55  ;;  %4130 = vpow2.f32 %v2085_v61 }
 0x5fb   : > { %2340 = vperm.xlu0 %4010, %v5564_v25   ;;  %4132 = vpow2.f32 %v2081_v47 }
 0x5fc   : > { %4134 = vpow2.f32 %v2089_v31 }
 0x5fd   : > { %2159 = vperm.xlu1 %4011, %v5534_v1  }
 0x5ff   : > { %2355 = vperm.xlu0 %4010, %v5569_v29  }
 0x601   : > { %2169 = vperm.xlu1 %4011, %v5550_v45  }
 0x602   : > { %v5595_v12 = vpop.eup %4122 }
 0x603   : > { %2375 = vperm.xlu0 %4010, %v5576_v53   ;;  %v5598_v51 = vpop.eup %4124 }
 0x604   : > { %v5601_v18 = vpop.eup %4126 }
 0x605   : > { %2345 = vperm.xlu1 %4011, %v5581_v9   ;;  %v5604_v14 = vpop.eup %4128 }
 0x606   : > { %v5607_v1 = vpop.eup %4130 }
 0x607   : > { %2365 = vperm.xlu0 %4010, %v5584_v33  }
 0x608   : > { %v5610_v46 = vpop.eup %4132 }
 0x609   : > { %2350 = vperm.xlu1 %4011, %v5589_v19   ;;  %v5613_v7 = vpop.eup %4134 }
 0x60b   : > { %2395 = vperm.xlu0 %4010, %v5592_v35  }
 0x60d   : > { %2360 = vperm.xlu1 %4011, %v5595_v12  }
 0x60f   : > { %2385 = vperm.xlu0 %4010, %v5598_v51  }
 0x611   : > { %2370 = vperm.xlu1 %4011, %v5601_v18  }
 0x613   : > { %2405 = vperm.xlu0 %4010, %v5604_v14  }
 0x615   : > { %2390 = vperm.xlu1 %4011, %v5607_v1  }
 0x619   : > { %2380 = vperm.xlu1 %4011, %v5610_v46  }
 0x61d   : > { %2400 = vperm.xlu1 %4011, %v5613_v7  }
 0x650   : > { %v2100_v8 = vpop.permute.xlu0 %2099 }
 0x651   : > { %v2177_v63 = vsub.f32 %v5382_v48, %v2100_v8 }
 0x653   : > { %v2193_v13 = vmul.f32 1.442695, %v2177_v63 }
 0x654   : > { %v2110_v11 = vpop.permute.xlu1 %2109 }
 0x655   : > { %4136 = vpow2.f32 %v2193_v13  ;;  %v2179_v15 = vsub.f32 %v5392_v36, %v2110_v11 }
 0x657   : > { %v2197_v4 = vmul.f32 1.442695, %v2179_v15 }
 0x658   : > { %v2115_v32 = vpop.permute.xlu1 %2114 }
 0x659   : > { %4138 = vpow2.f32 %v2197_v4  ;;  %v2180_v54 = vsub.f32 %v5387_v20, %v2115_v32 }
 0x65b   : > { %v2199_v21 = vmul.f32 1.442695, %v2180_v54 }
 0x65c   : > { %v2105_v10 = vpop.permute.xlu1 %2104 }
 0x65d   : > { %4140 = vpow2.f32 %v2199_v21  ;;  %v2178_v2 = vsub.f32 %v5397_v50, %v2105_v10 }
 0x65f   : > { %v2195_v62 = vmul.f32 1.442695, %v2178_v2 }
 0x660   : > { %v2130_v3 = vpop.permute.xlu1 %2129 }
 0x661   : > { %4142 = vpow2.f32 %v2195_v62  ;;  %v2183_v48 = vsub.f32 %v5412_v52, %v2130_v3 }
 0x662   : > { %v4137_v0 = vpop.eup %4136 }
 0x663   : > { %v2205_v39 = vmul.f32 1.442695, %v2183_v48  ;;  %2257 = vadd.xlane.f32.xlu1 %v4137_v0 }
 0x664   : > { %v2120_v23 = vpop.permute.xlu1 %2119 }
 0x665   : > { %4144 = vpow2.f32 %v2205_v39  ;;  %v2181_v36 = vsub.f32 %v5402_v58, %v2120_v23 }
 0x666   : > { %v4139_v37 = vpop.eup %4138  ;;  %v2145_v41 = vpop.permute.xlu0 %2144 }
 0x667   : > { %v2201_v20 = vmul.f32 1.442695, %v2181_v36  ;;  %2261 = vadd.xlane.f32.xlu0 %v4139_v37  ;;  %v2186_v52 = vsub.f32 %v5436_v57, %v2145_v41 }
 0x668   : > { %v2125_v24 = vpop.permute.xlu1 %2124 }
 0x669   : > { %4146 = vpow2.f32 %v2201_v20  ;;  %v2182_v50 = vsub.f32 %v5417_v22, %v2125_v24  ;;  %v2211_v31 = vmul.f32 1.442695, %v2186_v52 }
 0x66a   : > { %v4141_v30 = vpop.eup %4140  ;;  %v2155_v42 = vpop.permute.xlu0 %2154 }
 0x66b   : > { %v2203_v34 = vmul.f32 1.442695, %v2182_v50  ;;  %2263 = vadd.xlane.f32.xlu1 %v4141_v30  ;;  %v2188_v8 = vsub.f32 %v5427_v56, %v2155_v42  ;;  %v2435_v22 = vpack.c.bf16 %v4141_v30, %v4139_v37 }
 0x66c   : > { %v2135_v40 = vpop.permute.xlu1 %2134 }
 0x66d   : > { %4148 = vpow2.f32 %v2203_v34  ;;  %v2184_v55 = vsub.f32 %v5407_v28, %v2135_v40  ;;  %v2215_v28 = vmul.f32 1.442695, %v2188_v8 }
 0x66e   : > { %v4143_v61 = vpop.eup %4142  ;;  %v2165_v47 = vpop.permute.xlu0 %2164 }
 0x66f   : > { %v2207_v58 = vmul.f32 1.442695, %v2184_v55  ;;  %2259 = vadd.xlane.f32.xlu0 %v4143_v61  ;;  %v2434_v17 = vpack.c.bf16 %v4143_v61, %v4137_v0  ;;  %v2190_v15 = vsub.f32 %v5457_v49, %v2165_v47  ;;  %v2093_v55 = vmul.f32 1.442695, %v2063_v27 }
 0x670   : > { %v2140_v63 = vpop.permute.xlu1 %2139  ;;  %v2095_v61 = vmul.f32 1.442695, %v2064_v44 }
 0x671   : > { %4150 = vpow2.f32 %v2207_v58  ;;  %v2185_v13 = vsub.f32 %v5422_v5, %v2140_v63  ;;  %3711 = vmatprep.mubr.bf16.mxu1 %v2434_v17  ;;  %v2219_v10 = vmul.f32 1.442695, %v2190_v15 }
 0x672   : > { %v4145_v11 = vpop.eup %4144  ;;  %3712 = vmatmul.mubr.bf16.vlgmr.msra.gmra.mxu1 %v2435_v22  ;;  %4152 = vpow2.f32 %v2211_v31  ;;  %v2175_v32 = vpop.permute.xlu0 %2174 }
 0x673   : > { %v2209_v57 = vmul.f32 1.442695, %v2185_v13  ;;  %2269 = vadd.xlane.f32.xlu0 %v4145_v11  ;;  %v2192_v5 = vsub.f32 %v5448_v59, %v2175_v32  ;;  %v2227_v32 = vld [vmem:[#allocation4 + $0x10] sm:$0xff] }
 0x674   : > { %v2150_v4 = vpop.permute.xlu1 %2149 }
 0x675   : > { %4154 = vpow2.f32 %v2209_v57  ;;  %v2187_v54 = vsub.f32 %v5431_v26, %v2150_v4  ;;  %v2223_v49 = vmul.f32 1.442695, %v2192_v5  ;;  %v2225_v57 = vld [vmem:[#allocation4] sm:$0xff] }
 0x676   : > { %v4147_v56 = vpop.eup %4146  ;;  %4156 = vpow2.f32 %v2215_v28  ;;  %v5646_v6 = vpop.permute.xlu0 %2340  ;;  %v2241_v28 = vmul.f32 %v5564_v25, %v2225_v57 }
 0x677   : > { %v2213_v21 = vmul.f32 1.442695, %v2187_v54  ;;  %2265 = vadd.xlane.f32.xlu0 %v4147_v56 }
 0x678   : > { %v2160_v2 = vpop.permute.xlu1 %2159 }
 0x679   : > { %4158 = vpow2.f32 %v2213_v21  ;;  %v2189_v62 = vsub.f32 %v5442_v38, %v2160_v2 }
 0x67a   : > { %v4149_v3 = vpop.eup %4148  ;;  %4160 = vpow2.f32 %v2219_v10  ;;  %v5650_v27 = vpop.permute.xlu0 %2355  ;;  %v2228_v10 = vld [vmem:[#allocation4 + $0x18] sm:$0xff] }
 0x67b   : > { %v2217_v48 = vmul.f32 1.442695, %v2189_v62  ;;  %v2436_v0 = vpack.c.bf16 %v4149_v3, %v4147_v56  ;;  %v2243_v56 = vmul.f32 %v5589_v19, %v2227_v32  ;;  %v2244_v2 = vmul.f32 %v5569_v29, %v2228_v10 }
 0x67c   : > { %v2170_v39 = vpop.permute.xlu1 %2169 }
 0x67d   : > { %4162 = vpow2.f32 %v2217_v48  ;;  %v2191_v26 = vsub.f32 %v5452_v16, %v2170_v39  ;;  %3715 = vmatprep.mubr.bf16.mxu1 %v2436_v0 }
 0x67e   : > { %v4151_v23 = vpop.eup %4150  ;;  %4164 = vpow2.f32 %v2223_v49  ;;  %v5654_v43 = vpop.permute.xlu0 %2375  ;;  %v2231_v49 = vld [vmem:[#allocation4 + $0x30] sm:$0xff] }
 0x67f   : > { %v2221_v36 = vmul.f32 1.442695, %v2191_v26  ;;  %2271 = vadd.xlane.f32.xlu1 %v4151_v23  ;;  %v2437_v37 = vpack.c.bf16 %v4151_v23, %v4145_v11  ;;  %v4153_v59 = vpop.eup %4152  ;;  %v2247_v19 = vmul.f32 %v5601_v18, %v2231_v49  ;;  %v2229_v23 = vld [vmem:[#allocation4 + $0x20] sm:$0xff] }
 0x680   : > { %v5644_v17 = vpop.permute.xlu1 %2345  ;;  %v2245_v29 = vmul.f32 %v5595_v12, %v2229_v23  ;;  %v2325_v23 = vld [vmem:[#allocation5 + $0x18] sm:$0xff] }
 0x681   : > { %4166 = vpow2.f32 %v2221_v36  ;;  %3716 = vmatmul.mubr.bf16.gmra.mxu1 %v2437_v37 }
 0x682   : > { %v4155_v41 = vpop.eup %4154  ;;  %4168 = vpow2.f32 %v2093_v55  ;;  %v5658_v44 = vpop.permute.xlu0 %2365  ;;  %v2234_v55 = vld [vmem:[#allocation4 + $0x48] sm:$0xff] }
 0x683   : > { %2267 = vadd.xlane.f32.xlu1 %v4149_v3  ;;  %v2438_v38 = vpack.c.bf16 %v4153_v59, %v4155_v41  ;;  %v4157_v20 = vpop.eup %4156  ;;  %4170 = vpow2.f32 %v2095_v61  ;;  %v2226_v3 = vld [vmem:[#allocation4 + $0x8] sm:$0xff] }
 0x684   : > { %v5648_v45 = vpop.permute.xlu1 %2350  ;;  %v2242_v25 = vmul.f32 %v5581_v9, %v2226_v3 }
 0x685   : > { %3719 = vmatprep.mubr.bf16.mxu1 %v2438_v38 }
 0x686   : > { %v4159_v24 = vpop.eup %4158  ;;  %v5662_v63 = vpop.permute.xlu0 %2395 }
 0x687   : > { %2279 = vadd.xlane.f32.xlu1 %v4157_v20  ;;  %2277 = vadd.xlane.f32.xlu0 %v4159_v24  ;;  %v2439_v50 = vpack.c.bf16 %v4157_v20, %v4159_v24  ;;  %v4161_v30 = vpop.eup %4160  ;;  %v2230_v20 = vld [vmem:[#allocation4 + $0x28] sm:$0xff] }
 0x688   : > { %v5652_v31 = vpop.permute.xlu1 %2360  ;;  %v2246_v18 = vmul.f32 %v5584_v33, %v2230_v20 }
 0x689   : > { %3720 = vmatmul.mubr.bf16.gmra.mxu1 %v2439_v50 }
 0x68a   : > { %v4163_v16 = vpop.eup %4162  ;;  %v5666_v13 = vpop.permute.xlu0 %2385 }
 0x68b   : > { %2275 = vadd.xlane.f32.xlu1 %v4153_v59  ;;  %2273 = vadd.xlane.f32.xlu0 %v4155_v41  ;;  %v2440_v42 = vpack.c.bf16 %v4161_v30, %v4163_v16  ;;  %v4165_v34 = vpop.eup %4164  ;;  %v2232_v41 = vld [vmem:[#allocation4 + $0x38] sm:$0xff] }
 0x68c   : > { %v5656_v60 = vpop.permute.xlu1 %2370  ;;  %v2248_v9 = vmul.f32 %v5576_v53, %v2232_v41  ;;  %v2233_v53 = vld [vmem:[#allocation4 + $0x40] sm:$0xff] }
 0x68d   : > { %3723 = vmatprep.mubr.bf16.mxu1 %v2440_v42  ;;  %v2249_v33 = vmul.f32 %v5610_v46, %v2233_v53  ;;  %v2238_v46 = vld [vmem:[#allocation4 + $0x68] sm:$0xff] }
 0x68e   : > { %v4167_v52 = vpop.eup %4166  ;;  %v5671_v15 = vpop.permute.xlu0 %2405 }
 0x68f   : > { %2287 = vadd.xlane.f32.xlu1 %v4165_v34  ;;  %2285 = vadd.xlane.f32.xlu0 %v4167_v52  ;;  %v2441_v40 = vpack.c.bf16 %v4165_v34, %v4167_v52  ;;  %v5638_v58 = vpop.eup %4168 }
 0x690   : > { %v5641_v47 = vpop.eup %4170  ;;  %v5660_v8 = vpop.permute.xlu1 %2390 }
 0x691   : > { %3724 = vmatmul.mubr.bf16.gmra.mxu1 %v2441_v40 }
 0x693   : > { %2283 = vadd.xlane.f32.xlu1 %v4161_v30  ;;  %2281 = vadd.xlane.f32.xlu0 %v4163_v16  ;;  %v2235_v30 = vld [vmem:[#allocation4 + $0x50] sm:$0xff]  ;;  %v2236_v16 = vld [vmem:[#allocation4 + $0x58] sm:$0xff] }
 0x694   : > { %v5664_v22 = vpop.permute.xlu1 %2380  ;;  %v2251_v12 = vmul.f32 %v5607_v1, %v2235_v30  ;;  %v2252_v34 = vmul.f32 %v5592_v35, %v2236_v16  ;;  %v2240_v1 = vld [vmem:[#allocation4 + $0x78] sm:$0xff]  ;;  %v2329_v30 = vld [vmem:[#allocation5 + $0x48] sm:$0xff] }
 0x695   : > { %v2256_v10 = vmul.f32 %v5641_v47, %v2240_v1 }
 0x698   : > { %v5668_v11 = vpop.permute.xlu1 %2400 }
 0x6a4   : > { %2410 = vperm.xlu1 %4011, %v5638_v58  }
 0x6a9   : > { %2415 = vperm.xlu0 %4010, %v5641_v47   ;;  %v2324_v47 = vld [vmem:[#allocation5 + $0x58] sm:$0xff] }
 0x6ec   : > { %v2258_v4 = vpop.xlane.xlu1 %2257 }
 0x6ed   : > { %v2289_v54 = vadd.f32 %v2258_v4, %v2241_v28  ;;  %v2250_v28 = vmul.f32 %v5598_v51, %v2234_v55 }
 0x6ef   : > { %2306 = vst.msk [vmem:[#allocation4] sm:$0xff] %vm2305_vm3, %v2289_v54  ;;  %v2239_v54 = vld [vmem:[#allocation4 + $0x70] sm:$0xff] }
 0x6f0   : > { %v2262_v21 = vpop.xlane.xlu0 %2261 }
 0x6f1   : > { %v2291_v5 = vadd.f32 %v2262_v21, %v2243_v56  ;;  %v2255_v21 = vmul.f32 %v5638_v58, %v2239_v54  ;;  %v2331_v54 = vld [vmem:[#allocation5 + $0x20] sm:$0xff] }
 0x6f3   : > { %2308 = vst.msk [vmem:[#allocation4 + $0x10] sm:$0xff] %vm2305_vm3, %v2291_v5 }
 0x6f4   : > { %v2264_v62 = vpop.xlane.xlu1 %2263 }
 0x6f5   : > { %v2292_v48 = vadd.f32 %v2264_v62, %v2244_v2  ;;  %v2237_v62 = vld [vmem:[#allocation4 + $0x60] sm:$0xff] }
 0x6f7   : > { %2309 = vst.msk [vmem:[#allocation4 + $0x18] sm:$0xff] %vm2305_vm3, %v2292_v48  ;;  %v2253_v48 = vmul.f32 %v5613_v7, %v2237_v62  ;;  %v2323_v7 = vld [vmem:[#allocation5] sm:$0xff] }
 0x6f8   : > { %v2260_v0 = vpop.xlane.xlu0 %2259 }
 0x6f9   : > { %v2290_v39 = vadd.f32 %v2260_v0, %v2242_v25  ;;  %v2254_v25 = vmul.f32 %v5604_v14, %v2238_v46  ;;  %v2421_v14 = vmul.f32 %v5650_v27, %v2325_v23 }
 0x6fb   : > { %2307 = vst.msk [vmem:[#allocation4 + $0x8] sm:$0xff] %vm2305_vm3, %v2290_v39 }
 0x6fc   : > { %v2270_v26 = vpop.xlane.xlu0 %2269 }
 0x6fd   : > { %v2295_v36 = vadd.f32 %v2270_v26, %v2247_v19  ;;  %v2322_v19 = vld [vmem:[#allocation5 + $0x30] sm:$0xff]  ;;  %v2420_v26 = vmul.f32 %v5648_v45, %v2324_v47  ;;  %v2328_v45 = vld [vmem:[#allocation5 + $0x8] sm:$0xff] }
 0x6ff   : > { %2312 = vst.msk [vmem:[#allocation4 + $0x30] sm:$0xff] %vm2305_vm3, %v2295_v36 }
 0x700   : > { %v2266_v37 = vpop.xlane.xlu0 %2265 }
 0x701   : > { %v2293_v59 = vadd.f32 %v2266_v37, %v2245_v29  ;;  %v2418_v29 = vmul.f32 %v5646_v6, %v2322_v19  ;;  %v2424_v6 = vmul.f32 %v5656_v60, %v2328_v45 }
 0x703   : > { %2310 = vst.msk [vmem:[#allocation4 + $0x20] sm:$0xff] %vm2305_vm3, %v2293_v59 }
 0x708   : > { %v2272_v38 = vpop.xlane.xlu1 %2271 }
 0x709   : > { %v2296_v24 = vadd.f32 %v2272_v38, %v2248_v9  ;;  %v2419_v38 = vmul.f32 %v5644_v17, %v2323_v7 }
 0x70b   : > { %2313 = vst.msk [vmem:[#allocation4 + $0x38] sm:$0xff] %vm2305_vm3, %v2296_v24 }
 0x70c   : > { %v2268_v50 = vpop.xlane.xlu1 %2267 }
 0x70d   : > { %v2294_v42 = vadd.f32 %v2268_v50, %v2246_v18  ;;  %v2326_v50 = vld [vmem:[#allocation5 + $0x50] sm:$0xff] }
 0x70f   : > { %2311 = vst.msk [vmem:[#allocation4 + $0x28] sm:$0xff] %vm2305_vm3, %v2294_v42  ;;  %v2422_v42 = vmul.f32 %v5652_v31, %v2326_v50  ;;  %v2333_v31 = vld [vmem:[#allocation5 + $0x38] sm:$0xff] }
 0x710   : > { %v2278_v52 = vpop.xlane.xlu0 %2277  ;;  %v2280_v40 = vpop.xlane.xlu1 %2279 }
 0x711   : > { %v2299_v61 = vadd.f32 %v2278_v52, %v2251_v12  ;;  %v2300_v57 = vadd.f32 %v2280_v40, %v2252_v34  ;;  %v2327_v12 = vld [vmem:[#allocation5 + $0x68] sm:$0xff]  ;;  %v2425_v52 = vmul.f32 %v5654_v43, %v2329_v30  ;;  %v2332_v40 = vld [vmem:[#allocation5 + $0x10] sm:$0xff] }
 0x712   : > { %v2423_v55 = vmul.f32 %v5658_v44, %v2327_v12  ;;  %v2428_v60 = vmul.f32 %v5660_v8, %v2332_v40 }
 0x713   : > { %2316 = vst.msk [vmem:[#allocation4 + $0x50] sm:$0xff] %vm2305_vm3, %v2299_v61  ;;  %2317 = vst.msk [vmem:[#allocation4 + $0x58] sm:$0xff] %vm2305_vm3, %v2300_v57  ;;  %v2330_v57 = vld [vmem:[#allocation5 + $0x40] sm:$0xff] }
 0x714   : > { %v2274_v4 = vpop.xlane.xlu0 %2273  ;;  %v2276_v32 = vpop.xlane.xlu1 %2275 }
 0x715   : > { %v2297_v56 = vadd.f32 %v2274_v4, %v2249_v33  ;;  %v2298_v35 = vadd.f32 %v2276_v32, %v2250_v28  ;;  %v2426_v32 = vmul.f32 %v5664_v22, %v2330_v57 }
 0x717   : > { %2314 = vst.msk [vmem:[#allocation4 + $0x40] sm:$0xff] %vm2305_vm3, %v2297_v56  ;;  %2315 = vst.msk [vmem:[#allocation4 + $0x48] sm:$0xff] %vm2305_vm3, %v2298_v35  ;;  %v2429_v56 = vmul.f32 %v5662_v63, %v2333_v31  ;;  %v2336_v35 = vld [vmem:[#allocation5 + $0x78] sm:$0xff] }
 0x718   : > { %v2286_v5 = vpop.xlane.xlu0 %2285  ;;  %v2288_v2 = vpop.xlane.xlu1 %2287 }
 0x719   : > { %v2303_v3 = vadd.f32 %v2286_v5, %v2255_v21  ;;  %v2304_v51 = vadd.f32 %v2288_v2, %v2256_v10  ;;  %v2427_v5 = vmul.f32 %v5666_v13, %v2331_v54  ;;  %v2334_v2 = vld [vmem:[#allocation5 + $0x60] sm:$0xff] }
 0x71b   : > { %2320 = vst.msk [vmem:[#allocation4 + $0x70] sm:$0xff] %vm2305_vm3, %v2303_v3  ;;  %2321 = vst.msk [vmem:[#allocation4 + $0x78] sm:$0xff] %vm2305_vm3, %v2304_v51  ;;  %v2337_v3 = vld [vmem:[#allocation5 + $0x28] sm:$0xff] }
 0x71c   : > { %v2282_v0 = vpop.xlane.xlu0 %2281  ;;  %v2284_v49 = vpop.xlane.xlu1 %2283 }
 0x71d   : > { %v2301_v39 = vadd.f32 %v2282_v0, %v2253_v48  ;;  %v2302_v58 = vadd.f32 %v2284_v49, %v2254_v25  ;;  %v2430_v25 = vmul.f32 %v5668_v11, %v2334_v2  ;;  %v2335_v0 = vld [vmem:[#allocation5 + $0x70] sm:$0xff] }
 0x71e   : > { %v2431_v47 = vmul.f32 %v5671_v15, %v2335_v0 }
 0x71f   : > { %2318 = vst.msk [vmem:[#allocation4 + $0x60] sm:$0xff] %vm2305_vm3, %v2301_v39  ;;  %2319 = vst.msk [vmem:[#allocation4 + $0x68] sm:$0xff] %vm2305_vm3, %v2302_v58 }
 0x720   : > { %v2411_v21 = vpop.permute.xlu1 %2410 }
 0x721   : > { %v2432_v46 = vmul.f32 %v2411_v21, %v2336_v35 }
 0x724   : > { %v2416_v51 = vpop.permute.xlu0 %2415 }
 0x725   : > { %v2433_v39 = vmul.f32 %v2416_v51, %v2337_v3 }
 0x732   : > { %v3713_v36 = vpop.f32.mrf.mxu1 }
 0x733   : > { %v2541_v37 = vadd.f32 %v3713_v36, %v2420_v26 }
 0x734   : > { %v2476_v59 = vpop.f32.mrf.mxu1 }
 0x735   : > { %2557 = vst [vmem:[#allocation5 + $0x58] sm:$0xff] %v2541_v37  ;;  %v2539_v41 = vadd.f32 %v2476_v59, %v2418_v29 }
 0x736   : > { %v3714_v9 = vpop.f32.mrf.mxu1 }
 0x737   : > { %2555 = vst [vmem:[#allocation5 + $0x30] sm:$0xff] %v2539_v41  ;;  %v2542_v20 = vadd.f32 %v3714_v9, %v2421_v14 }
 0x738   : > { %v2479_v24 = vpop.f32.mrf.mxu1 }
 0x739   : > { %2558 = vst [vmem:[#allocation5 + $0x18] sm:$0xff] %v2542_v20  ;;  %v2540_v18 = vadd.f32 %v2479_v24, %v2419_v38 }
 0x73b   : > { %2556 = vst [vmem:[#allocation5] sm:$0xff] %v2540_v18 }
 0x741   : > { %v3717_v16 = vpop.f32.mrf.mxu1 }
 0x742   : > { %v2545_v27 = vadd.f32 %v3717_v16, %v2424_v6 }
 0x743   : > { %v2492_v34 = vpop.f32.mrf.mxu1 }
 0x744   : > { %2561 = vst [vmem:[#allocation5 + $0x8] sm:$0xff] %v2545_v27  ;;  %v2543_v17 = vadd.f32 %v2492_v34, %v2422_v42 }
 0x745   : > { %v3718_v53 = vpop.f32.mrf.mxu1 }
 0x746   : > { %2559 = vst [vmem:[#allocation5 + $0x50] sm:$0xff] %v2543_v17  ;;  %v2546_v61 = vadd.f32 %v3718_v53, %v2425_v52 }
 0x747   : > { %v2495_v33 = vpop.f32.mrf.mxu1 }
 0x748   : > { %2562 = vst [vmem:[#allocation5 + $0x48] sm:$0xff] %v2546_v61  ;;  %v2544_v28 = vadd.f32 %v2495_v33, %v2423_v55 }
 0x749   : > { %v3721_v4 = vpop.f32.mrf.mxu1 }
 0x74a   : > { %2560 = vst [vmem:[#allocation5 + $0x68] sm:$0xff] %v2544_v28  ;;  %v2549_v43 = vadd.f32 %v3721_v4, %v2428_v60 }
 0x74b   : > { %v2508_v1 = vpop.f32.mrf.mxu1 }
 0x74c   : > { %2565 = vst [vmem:[#allocation5 + $0x10] sm:$0xff] %v2549_v43  ;;  %v2547_v44 = vadd.f32 %v2508_v1, %v2426_v32 }
 0x74d   : > { %v3722_v10 = vpop.f32.mrf.mxu1 }
 0x74e   : > { %2563 = vst [vmem:[#allocation5 + $0x40] sm:$0xff] %v2547_v44  ;;  %v2550_v8 = vadd.f32 %v3722_v10, %v2429_v56 }
 0x74f   : > { %v2511_v62 = vpop.f32.mrf.mxu1 }
 0x750   : > { %2566 = vst [vmem:[#allocation5 + $0x38] sm:$0xff] %v2550_v8  ;;  %v2548_v22 = vadd.f32 %v2511_v62, %v2427_v5 }
 0x751   : > { %v3725_v48 = vpop.f32.mrf.mxu1 }
 0x752   : > { %2564 = vst [vmem:[#allocation5 + $0x20] sm:$0xff] %v2548_v22  ;;  %v2553_v63 = vadd.f32 %v3725_v48, %v2432_v46 }
 0x753   : > { %v2524_v49 = vpop.f32.mrf.mxu1 }
 0x754   : > { %2569 = vst [vmem:[#allocation5 + $0x78] sm:$0xff] %v2553_v63  ;;  %v2551_v58 = vadd.f32 %v2524_v49, %v2430_v25 }
 0x755   : > { %v3726_v13 = vpop.f32.mrf.mxu1 }
 0x756   : > { %2567 = vst [vmem:[#allocation5 + $0x60] sm:$0xff] %v2551_v58  ;;  %v2554_v19 = vadd.f32 %v3726_v13, %v2433_v39  ;;  %2590 = sbr.rel (%p3286_p0) target bundleno = 2058 (0x80a), region = 76 }
 0x757   : > { %v2527_v26 = vpop.f32.mrf.mxu1 }
 0x758   : > { %2570 = vst [vmem:[#allocation5 + $0x28] sm:$0xff] %v2554_v19  ;;  %v2552_v23 = vadd.f32 %v2527_v26, %v2431_v47 }
 0x75a   : > { %2568 = vst [vmem:[#allocation5 + $0x70] sm:$0xff] %v2552_v23 }
 0x75b   : > { %v2593_v11 = vld [vmem:[#allocation4 + $0x10] sm:$0xff]  ;;  %v2591_v36 = vld [vmem:[#allocation4] sm:$0xff]  ;;  %v2594_v29 = vld [vmem:[#allocation4 + $0x18] sm:$0xff]  ;;  %v4534_v37 = vmov 0  }
 0x75c   : > { %4173 = vset.pattern.permute.xlu1 %v4534_v37  ;;  %4172 = vset.pattern.permute.xlu0 %v4534_v37  ;;  %v2609_v7 = vmax.f32 %v2593_v11, 1e-30  ;;  %v2607_v59 = vmax.f32 %v2591_v36, 1e-30  ;;  %v2610_v14 = vmax.f32 %v2594_v29, 1e-30 }
 0x75d   : > { %v2592_v41 = vld [vmem:[#allocation4 + $0x8] sm:$0xff]  ;;  %v2595_v38 = vld [vmem:[#allocation4 + $0x20] sm:$0xff]  ;;  %v2598_v18 = vld [vmem:[#allocation4 + $0x38] sm:$0xff] }
 0x75e   : > { %v2596_v15 = vld [vmem:[#allocation4 + $0x28] sm:$0xff]  ;;  %4174 = vrcp.f32 %v2609_v7  ;;  %v2608_v9 = vmax.f32 %v2592_v41, 1e-30  ;;  %v2611_v24 = vmax.f32 %v2595_v38, 1e-30  ;;  %v2597_v45 = vld [vmem:[#allocation4 + $0x30] sm:$0xff] }
 0x75f   : > { %4176 = vrcp.f32 %v2607_v59  ;;  %v2612_v20 = vmax.f32 %v2596_v15, 1e-30  ;;  %v2614_v50 = vmax.f32 %v2598_v18, 1e-30  ;;  %v2613_v6 = vmax.f32 %v2597_v45, 1e-30 }
 0x760   : > { %4178 = vrcp.f32 %v2610_v14  ;;  %v2600_v30 = vld [vmem:[#allocation4 + $0x48] sm:$0xff]  ;;  %v2599_v16 = vld [vmem:[#allocation4 + $0x40] sm:$0xff]  ;;  %v2602_v12 = vld [vmem:[#allocation4 + $0x58] sm:$0xff] }
 0x761   : > { %4180 = vrcp.f32 %v2608_v9  ;;  %v2616_v42 = vmax.f32 %v2600_v30, 1e-30  ;;  %v2615_v27 = vmax.f32 %v2599_v16, 1e-30  ;;  %v2601_v34 = vld [vmem:[#allocation4 + $0x50] sm:$0xff]  ;;  %v2604_v61 = vld [vmem:[#allocation4 + $0x68] sm:$0xff] }
 0x762   : > { %4182 = vrcp.f32 %v2612_v20  ;;  %v2618_v40 = vmax.f32 %v2602_v12, 1e-30  ;;  %v2617_v55 = vmax.f32 %v2601_v34, 1e-30  ;;  %v2603_v33 = vld [vmem:[#allocation4 + $0x60] sm:$0xff]  ;;  %v2606_v4 = vld [vmem:[#allocation4 + $0x78] sm:$0xff] }
 0x763   : > { %4184 = vrcp.f32 %v2611_v24  ;;  %v2620_v60 = vmax.f32 %v2604_v61, 1e-30  ;;  %v2619_v31 = vmax.f32 %v2603_v33, 1e-30  ;;  %v2605_v43 = vld [vmem:[#allocation4 + $0x70] sm:$0xff]  ;;  %v2641_v51 = vld [vmem:[#allocation5 + $0x58] sm:$0xff] }
 0x764   : > { %4186 = vrcp.f32 %v2614_v50  ;;  %v2622_v54 = vmax.f32 %v2606_v4, 1e-30  ;;  %v2621_v56 = vmax.f32 %v2605_v43, 1e-30  ;;  %v2642_v48 = vld [vmem:[#allocation5 + $0x18] sm:$0xff]  ;;  %v2639_v25 = vld [vmem:[#allocation5 + $0x30] sm:$0xff] }
 0x765   : > { %4188 = vrcp.f32 %v2613_v6  ;;  %v2640_v63 = vld [vmem:[#allocation5] sm:$0xff]  ;;  %v2644_v19 = vld [vmem:[#allocation5 + $0x68] sm:$0xff]  ;;  %v2643_v23 = vld [vmem:[#allocation5 + $0x50] sm:$0xff] }
 0x766   : > { %4190 = vrcp.f32 %v2616_v42  ;;  %v2646_v59 = vld [vmem:[#allocation5 + $0x48] sm:$0xff]  ;;  %v2648_v24 = vld [vmem:[#allocation5 + $0x20] sm:$0xff]  ;;  %v2650_v42 = vld [vmem:[#allocation5 + $0x38] sm:$0xff] }
 0x767   : > { %4192 = vrcp.f32 %v2615_v27  ;;  %v2645_v14 = vld [vmem:[#allocation5 + $0x8] sm:$0xff]  ;;  %v2647_v18 = vld [vmem:[#allocation5 + $0x40] sm:$0xff]  ;;  %v2649_v27 = vld [vmem:[#allocation5 + $0x10] sm:$0xff] }
 0x768   : > { %4194 = vrcp.f32 %v2618_v40  ;;  %v2653_v4 = vld [vmem:[#allocation5 + $0x78] sm:$0xff] }
 0x769   : > { %4196 = vrcp.f32 %v2617_v55  ;;  %v2651_v55 = vld [vmem:[#allocation5 + $0x60] sm:$0xff] }
 0x76a   : > { %4198 = vrcp.f32 %v2620_v60 }
 0x76b   : > { %v4175_v52 = vpop.eup %4174  ;;  %4200 = vrcp.f32 %v2619_v31  ;;  %v2654_v31 = vld [vmem:[#allocation5 + $0x28] sm:$0xff] }
 0x76c   : > { %v4177_v17 = vpop.eup %4176  ;;  %2667 = vperm.xlu1 %4173, %v4175_v52   ;;  %4202 = vrcp.f32 %v2622_v54 }
 0x76d   : > { %v4179_v53 = vpop.eup %4178  ;;  %2657 = vperm.xlu0 %4172, %v4177_v17   ;;  %4204 = vrcp.f32 %v2621_v56 }
 0x76e   : > { %v4181_v57 = vpop.eup %4180 }
 0x76f   : > { %v4183_v28 = vpop.eup %4182 }
 0x770   : > { %2672 = vperm.xlu1 %4173, %v4179_v53   ;;  %v4185_v32 = vpop.eup %4184  ;;  %v2652_v53 = vld [vmem:[#allocation5 + $0x70] sm:$0xff] }
 0x771   : > { %2662 = vperm.xlu0 %4172, %v4181_v57   ;;  %v4187_v1 = vpop.eup %4186 }
 0x772   : > { %v4189_v44 = vpop.eup %4188 }
 0x773   : > { %v4191_v35 = vpop.eup %4190 }
 0x774   : > { %2682 = vperm.xlu1 %4173, %v4183_v28   ;;  %v4193_v21 = vpop.eup %4192 }
 0x775   : > { %2677 = vperm.xlu0 %4172, %v4185_v32   ;;  %v4195_v10 = vpop.eup %4194 }
 0x776   : > { %v4197_v5 = vpop.eup %4196 }
 0x777   : > { %v4199_v8 = vpop.eup %4198 }
 0x778   : > { %2692 = vperm.xlu1 %4173, %v4187_v1   ;;  %v4201_v2 = vpop.eup %4200 }
 0x779   : > { %2687 = vperm.xlu0 %4172, %v4189_v44   ;;  %v4203_v62 = vpop.eup %4202 }
 0x77a   : > { %v4205_v46 = vpop.eup %4204 }
 0x77c   : > { %2702 = vperm.xlu1 %4173, %v4191_v35  }
 0x77d   : > { %2697 = vperm.xlu0 %4172, %v4193_v21  }
 0x780   : > { %2712 = vperm.xlu1 %4173, %v4195_v10  }
 0x781   : > { %2707 = vperm.xlu0 %4172, %v4197_v5  }
 0x784   : > { %2722 = vperm.xlu1 %4173, %v4199_v8  }
 0x785   : > { %2717 = vperm.xlu0 %4172, %v4201_v2  }
 0x788   : > { %2732 = vperm.xlu1 %4173, %v4203_v62  }
 0x789   : > { %2727 = vperm.xlu0 %4172, %v4205_v46  }
 0x7e7   : > { %v2668_v22 = vpop.permute.xlu1 %2667 }
 0x7e8   : > { %v2658_v3 = vpop.permute.xlu0 %2657  ;;  %v2737_v49 = vmul.f32 %v2668_v22, %v2641_v51 }
 0x7e9   : > { %v2735_v13 = vmul.f32 %v2658_v3, %v2639_v25 }
 0x7eb   : > { %v2673_v0 = vpop.permute.xlu1 %2672 }
 0x7ec   : > { %v2738_v39 = vmul.f32 %v2673_v0, %v2642_v48  ;;  %v2663_v58 = vpop.permute.xlu0 %2662 }
 0x7ed   : > { %v2736_v47 = vmul.f32 %v2663_v58, %v2640_v63 }
 0x7ee   : > { %v3393_v26 = vpack.c.bf16 %v2738_v39, %v2737_v49 }
 0x7ef   : > { %v3388_v11 = vpack.c.bf16 %v2736_v47, %v2735_v13  ;;  %v2683_v36 = vpop.permute.xlu1 %2682 }
 0x7f0   : > { %3432 = vst [vmem:[%s4969_s28 + $0x8] sm:$0xff] %v3393_v26   ;;  %v2740_v29 = vmul.f32 %v2683_v36, %v2644_v19  ;;  %v2678_v37 = vpop.permute.xlu0 %2677 }
 0x7f1   : > { %3389 = vst [vmem:[%s4969_s28] sm:$0xff] %v3388_v11   ;;  %v2739_v7 = vmul.f32 %v2678_v37, %v2643_v23 }
 0x7f3   : > { %v3398_v41 = vpack.c.bf16 %v2740_v29, %v2739_v7  ;;  %v2693_v15 = vpop.permute.xlu1 %2692 }
 0x7f4   : > { %v2742_v9 = vmul.f32 %v2693_v15, %v2646_v59  ;;  %v2688_v38 = vpop.permute.xlu0 %2687 }
 0x7f5   : > { %3433 = vst [vmem:[%s4969_s28 + $0x10] sm:$0xff] %v3398_v41   ;;  %v2741_v20 = vmul.f32 %v2688_v38, %v2645_v14 }
 0x7f7   : > { %v3403_v45 = vpack.c.bf16 %v2742_v9, %v2741_v20  ;;  %v2703_v50 = vpop.permute.xlu1 %2702 }
 0x7f8   : > { %v2744_v6 = vmul.f32 %v2703_v50, %v2648_v24  ;;  %v2698_v30 = vpop.permute.xlu0 %2697 }
 0x7f9   : > { %3434 = vst [vmem:[%s4969_s28 + $0x18] sm:$0xff] %v3403_v45   ;;  %v2743_v16 = vmul.f32 %v2698_v30, %v2647_v18 }
 0x7fb   : > { %v3408_v12 = vpack.c.bf16 %v2744_v6, %v2743_v16  ;;  %v2713_v34 = vpop.permute.xlu1 %2712 }
 0x7fc   : > { %v2746_v52 = vmul.f32 %v2713_v34, %v2650_v42  ;;  %v2708_v17 = vpop.permute.xlu0 %2707 }
 0x7fd   : > { %3435 = vst [vmem:[%s4969_s28 + $0x20] sm:$0xff] %v3408_v12   ;;  %v2745_v40 = vmul.f32 %v2708_v17, %v2649_v27 }
 0x7ff   : > { %v3413_v61 = vpack.c.bf16 %v2746_v52, %v2745_v40  ;;  %v2723_v57 = vpop.permute.xlu1 %2722 }
 0x800   : > { %v2748_v33 = vmul.f32 %v2723_v57, %v2652_v53  ;;  %v2718_v60 = vpop.permute.xlu0 %2717 }
 0x801   : > { %3436 = vst [vmem:[%s4969_s28 + $0x28] sm:$0xff] %v3413_v61   ;;  %v2747_v28 = vmul.f32 %v2718_v60, %v2651_v55 }
 0x803   : > { %v3418_v32 = vpack.c.bf16 %v2748_v33, %v2747_v28  ;;  %v2733_v43 = vpop.permute.xlu1 %2732 }
 0x804   : > { %v2750_v54 = vmul.f32 %v2733_v43, %v2654_v31  ;;  %v2728_v1 = vpop.permute.xlu0 %2727 }
 0x805   : > { %3437 = vst [vmem:[%s4969_s28 + $0x30] sm:$0xff] %v3418_v32   ;;  %v2749_v56 = vmul.f32 %v2728_v1, %v2653_v4 }
 0x807   : > { %v3423_v44 = vpack.c.bf16 %v2750_v54, %v2749_v56 }
 0x809   : > { %3438 = vst [vmem:[%s4969_s28 + $0x38] sm:$0xff] %v3423_v44  }
 0x80a PF: > { %s5962_s9 = sld [smem:[#allocation42_spill]] }
 0x810   : > { %p5963_p8 = scmp.ne.s32.totalorder %s5962_s9, 0 }
 0x811   : > { %s5964_s27 = sld [smem:[#allocation25_spill]] (%p5963_p8)  ;;  %v2861_v35 = vld [vmem:[%s4969_s28] sm:$0xf] (%p5963_p8)  ;;  %v2863_v21 = vld [vmem:[%s4969_s28 + $0x4] sm:$0xf] (%p5963_p8) }
 0x812   : > { %2837 = sbr.rel (!%p5963_p8) target bundleno = 2085 (0x825), region = 80  ;;  %s5965_s18 = sld [smem:[#allocation27_spill]] (%p5963_p8)  ;;  %v2865_v10 = vld [vmem:[%s4969_s28 + $0x8] sm:$0xf] (%p5963_p8)  ;;  %v2867_v5 = vld [vmem:[%s4969_s28 + $0xc] sm:$0xf] (%p5963_p8) }
 0x813   : > { %s5966_s15 = sld [smem:[#allocation26_spill]] (%p5963_p8)  ;;  %v2869_v8 = vld [vmem:[%s4969_s28 + $0x10] sm:$0xf] (%p5963_p8)  ;;  %v2871_v2 = vld [vmem:[%s4969_s28 + $0x14] sm:$0xf] (%p5963_p8) }
 0x814   : > { %v2873_v62 = vld [vmem:[%s4969_s28 + $0x18] sm:$0xf] (%p5963_p8)  ;;  %v2875_v46 = vld [vmem:[%s4969_s28 + $0x1c] sm:$0xf] (%p5963_p8)  ;;  %v2877_v22 = vld [vmem:[%s4969_s28 + $0x20] sm:$0xf] (%p5963_p8) }
 0x815   : > { %v2879_v3 = vld [vmem:[%s4969_s28 + $0x24] sm:$0xf] (%p5963_p8)  ;;  %s5967_s22 = sld [smem:[#allocation53_spill]] (%p5963_p8)  ;;  %v2881_v51 = vld [vmem:[%s4969_s28 + $0x28] sm:$0xf] (%p5963_p8) }
 0x816   : > { %v2883_v48 = vld [vmem:[%s4969_s28 + $0x2c] sm:$0xf] (%p5963_p8)  ;;  %v2885_v25 = vld [vmem:[%s4969_s28 + $0x30] sm:$0xf] (%p5963_p8)  ;;  %v2887_v63 = vld [vmem:[%s4969_s28 + $0x34] sm:$0xf] (%p5963_p8) }
 0x817   : > { %s3344_s4 = sshll.u32 %s5964_s27, 5  ;;  %v2889_v0 = vld [vmem:[%s4969_s28 + $0x38] sm:$0xf]  ;;  %v2891_v49 = vld [vmem:[%s4969_s28 + $0x3c] sm:$0xf] }
 0x818   : > { %s3306_s24 = sshll.u32 %s5965_s18, 6 }
 0x819   : > { %s2840_s19 = sadd.s32 %s5966_s15, %s3344_s4 }
 0x81a   : > { %s2842_s6 = sadd.s32 %s3306_s24, %s2840_s19 }
 0x81b   : > { %s3307_s7 = sshll.u32 %s2842_s6, 2 }
 0x81c   : > { %s2844_s14 = scalar_lea.vmem %s5967_s22, %s3307_s7 }
 0x81d   : > { %2862 = vst [vmem:[%s2844_s14] sm:$0xf] %v2861_v35  ;;  %2864 = vst [vmem:[%s2844_s14 + $0x8] sm:$0xf] %v2863_v21 }
 0x81e   : > { %2866 = vst [vmem:[%s2844_s14 + $0x10] sm:$0xf] %v2865_v10  ;;  %2868 = vst [vmem:[%s2844_s14 + $0x18] sm:$0xf] %v2867_v5 }
 0x81f   : > { %2870 = vst [vmem:[%s2844_s14 + $0x20] sm:$0xf] %v2869_v8  ;;  %2872 = vst [vmem:[%s2844_s14 + $0x28] sm:$0xf] %v2871_v2 }
 0x820   : > { %2874 = vst [vmem:[%s2844_s14 + $0x30] sm:$0xf] %v2873_v62  ;;  %2876 = vst [vmem:[%s2844_s14 + $0x38] sm:$0xf] %v2875_v46 }
 0x821   : > { %2878 = vst [vmem:[%s2844_s14 + $0x40] sm:$0xf] %v2877_v22  ;;  %2880 = vst [vmem:[%s2844_s14 + $0x48] sm:$0xf] %v2879_v3 }
 0x822   : > { %2882 = vst [vmem:[%s2844_s14 + $0x50] sm:$0xf] %v2881_v51  ;;  %2884 = vst [vmem:[%s2844_s14 + $0x58] sm:$0xf] %v2883_v48 }
 0x823   : > { %2886 = vst [vmem:[%s2844_s14 + $0x60] sm:$0xf] %v2885_v25  ;;  %2888 = vst [vmem:[%s2844_s14 + $0x68] sm:$0xf] %v2887_v63 }
 0x824   : > { %2890 = vst [vmem:[%s2844_s14 + $0x70] sm:$0xf] %v2889_v0  ;;  %2892 = vst [vmem:[%s2844_s14 + $0x78] sm:$0xf] %v2891_v49 }
 0x825 PF: > { %s26_s20 = sadd.s32 1, %s4520_s20   ;;  %s5969_s23 = sld [smem:[#allocation20_spill]] }
 0x826   : > { %p5752_p9 = scmp.ge.s32.totalorder %s26_s20, 18   ;;  %s5970_s27 = sld [smem:[#allocation21_spill]] }
 0x827   : > { %s5971_s28 = sld [smem:[#allocation45_spill]]  ;;  %s5974_s13 = smov %s4856_s26 }
 0x828   : > { %s5972_s29 = sld [smem:[#allocation22_spill]]  ;;  %s5979_s24 = smov %s4448_s25 }
 0x829   : > { %s5973_s9 = sld [smem:[#allocation23_spill]]  ;;  %s5981_s25 = smov %s4877_s21 }
 0x82a   : > { %s5975_s1 = sld [smem:[#allocation28_spill]]  ;;  %s5985_s30 = smov %s4472_s8 }
 0x82b   : > { %s5976_s14 = sld [smem:[#allocation29_spill]]  ;;  %s5983_s26 = smov %s5969_s23 }
 0x82c   : > { %s5977_s15 = sld [smem:[#allocation30_spill]]  ;;  %s5986_s8 = smov %s4861_s2 }
 0x82d   : > { %s5978_s17 = sld [smem:[#allocation32_spill]]  ;;  %s5987_s10 = smov %s4484_s11 }
 0x82e   : > { %s5980_s0 = sld [smem:[#allocation41_spill]]  ;;  %s5988_s11 = smov %s5974_s13 }
 0x82f   : > { %s5982_s18 = sld [smem:[#allocation43_spill]]  ;;  %s5989_s12 = smov %s4504_s16 }
 0x830   : > { %s5984_s19 = sld [smem:[#allocation44_spill]]  ;;  %s5990_s13 = smov %s5975_s1 }
 0x831   :  { %25 = sbr.rel (!%p5752_p9) target bundleno = 24 (0x18), region = 191 }
 0x833   : > { %s5991_s16 = smov %s5978_s17 }
 0x834   : > { %s5992_s17 = smov %s5980_s0 }
 0x836   :  { %2958 = vsyncpa [#allocation7], 1 }
 0x837   :  { %2960 = vsyncpa [#allocation7 + $0x1], 1 }
 0x838   :  { %2961 = vsyncpa [#allocation9], 1 }
 0x839   :  { %2963 = vsyncpa [#allocation9 + $0x1], 1 }
 0x83a   :  { %2964 = vsyncpa [#allocation12], 1 }
 0x83b   :  { %2966 = vsyncpa [#allocation12 + $0x1], 1 }

// kernel: ngpt_layer_forward.5
= control target key start
LH: loop header
LB: loop body
LE: loop exit
PB: predicated region body
PF: predicated region fallthrough
CT: control target
= control target key end

     0   :  { %12 = vsyncpa [#allocation3], 0  ;;  %s7048_s0 = inlined_call_operand.vmem [shape: bf16[2,256,256], index: 0, kind: input, shape index: {}]   ;;  %s7049_s1 = inlined_call_operand.vmem [shape: bf16[256,512], index: 1, kind: input, shape index: {}]   ;;  %s7050_s2 = inlined_call_operand.vmem [shape: bf16[256,512], index: 2, kind: input, shape index: {}]   ;;  %s7051_s3 = inlined_call_operand.vmem [shape: bf16[512,256], index: 3, kind: input, shape index: {}]   ;;  %s7052_s4 = inlined_call_operand.vmem [shape: f32[1,512], index: 4, kind: input, shape index: {}]   ;;  %s7053_s5 = inlined_call_operand.vmem [shape: f32[1,512], index: 5, kind: input, shape index: {}]   ;;  %s7054_s6 = inlined_call_operand.vmem [shape: f32[1,256], index: 6, kind: input, shape index: {}]   ;;  %s7055_s7 = inlined_call_operand.hbm [shape: bf16[2,256,256], index: 7, kind: output, shape index: {}]  }
   0x1   :  { %14 = vsyncpa [#allocation3 + $0x1], 0  ;;  %s4704_s24 = smov 0   ;;  %s4706_s25 = smov 0  }
   0x2   :  { %s4708_s26 = smov 0   ;;  %s4710_s27 = smov 0  }
   0x3   :  { %s4712_s28 = smov 0   ;;  %s4714_s29 = smov 0  }
   0x4   :  { %s4716_s30 = smov 0   ;;  %s4718_s8 = smov 0  }
   0x5 LB: > { %7073 = sst [smem:[#allocation5_spill]] %s4651_s29  ;;  %s3596_s9 = sadd.s32 4294967295, %s4659_s8   ;;  %s4659_s8 = sphi %s4718_s8, %s20_s8   ;;  %s4655_s30 = sphi %s4716_s30, %s7232_s30   ;;  %s4651_s29 = sphi %s4714_s29, %s7231_s29   ;;  %s4647_s28 = sphi %s4712_s28, %s7230_s28   ;;  %s4643_s27 = sphi %s4710_s27, %s7229_s27   ;;  %s4639_s26 = sphi %s4708_s26, %s7235_s26   ;;  %s4635_s25 = sphi %s4706_s25, %s7234_s25   ;;  %s4631_s24 = sphi %s4704_s24, %s7233_s24  }
   0x6   : > { %7074 = sst [smem:[#allocation6_spill]] %s4655_s30  ;;  %s3597_s10 = sadd.s32 4294967294, %s4659_s8  }
   0x7   : > { %s29_s11 = sadd.s32 1, %s4651_s29  ;;  %s32_s12 = sadd.s32 1, %s4655_s30 }
   0x8   : > { %p30_p0 = scmp.ge.s32.totalorder %s29_s11, 2  ;;  %p205_p1 = scmp.ne.s32.totalorder %s4639_s26, %s4635_s25 }
   0x9   : > { %p206_p2 = scmp.eq.s32.totalorder %s3596_s9, 3  ;;  %p211_p5 = scmp.ne.s32.totalorder %s4635_s25, %s4631_s24 }
   0xa   : > { %s7237_s11 = smov (%p30_p0, %s29_s11), 0  ;;  %s7239_s12 = smov (!%p30_p0, %s32_s12), %s4655_s30 }
   0xb   : > { %7075 = sst [smem:[#allocation7_spill]] %s7237_s11  ;;  %s191_s13 = ssub.s32 %s4651_s29, %s7237_s11 }
   0xc   : > { %p4755_p3 = por %p206_p2, %p205_p1  ;;  %p34_p4 = scmp.ge.s32.totalorder %s7239_s12, 2 }
   0xd   : > { %p212_p6 = scmp.eq.s32.totalorder %s3597_s10, 3  ;;  %p3600_p7 = scmp.ge.s32.totalorder %s4659_s8, 1 }
   0xe   : > { %s7241_s12 = smov (%p34_p4, %s7239_s12), 0  ;;  %p262_p9 = scmp.lt.s32.totalorder %s4659_s8, 5 }
   0xf   : > { %7077 = sst [smem:[#allocation8_spill]] %s7241_s12  ;;  %p4764_p8 = por %p212_p6, %p211_p5 }
  0x10   : > { %s190_s16 = ssub.s32 %s4655_s30, %s7241_s12  ;;  %s195_s17 = sadd.s32 1, %s4639_s26 }
  0x11   : > { %s192_s18 = sor.u32 %s191_s13, %s190_s16  ;;  %p263_p10 = pnand %p3600_p7, %p262_p9 }
  0x12   : > { %p193_p11 = scmp.eq.s32.totalorder %s192_s18, 0 }
  0x13   : > { %266 = sbr.rel (%p263_p10) target bundleno = 1053 (0x41d), region = 48 }
  0x14   : > { %s4773_s19 = scalar_select %p193_p11, %s4639_s26, %s195_s17  }
  0x18   : > { %v3927_v0 = vld [vmem:[%s7049_s1 + $0xe4] ss:$16 sps:$4 sm:$0xff]   ;;  %v3929_v1 = vld [vmem:[%s7049_s1 + $0xec] ss:$16 sps:$4 sm:$0xff]   ;;  %v3931_v2 = vld [vmem:[%s7049_s1 + $0xe0] ss:$16 sps:$4 sm:$0xff]  }
  0x19   : > { %791 = vmatprep.subr.bf16.mxu0 %v3927_v0  ;;  %v3932_v3 = vld [vmem:[%s7049_s1 + $0xe8] ss:$16 sps:$4 sm:$0xff]   ;;  %904 = vmatprep.subr.bf16.mxu1 %v3929_v1  ;;  %v3933_v4 = vld [vmem:[%s7049_s1 + $0xc4] ss:$16 sps:$4 sm:$0xff]   ;;  %v3935_v5 = vld [vmem:[%s7049_s1 + $0xcc] ss:$16 sps:$4 sm:$0xff]  }
  0x1a   : > { %792 = vmatpush1.bf16.msra.mxu0 %v3931_v2  ;;  %905 = vmatpush1.bf16.msra.mxu1 %v3932_v3  ;;  %v3937_v6 = vld [vmem:[%s7049_s1 + $0xc0] ss:$16 sps:$4 sm:$0xff]   ;;  %v3938_v7 = vld [vmem:[%s7049_s1 + $0xc8] ss:$16 sps:$4 sm:$0xff]   ;;  %v3939_v8 = vld [vmem:[%s7049_s1 + $0xa4] ss:$16 sps:$4 sm:$0xff]  }
  0x1b   : > { %793 = vmatprep.subr.bf16.mxu0 %v3933_v4  ;;  %906 = vmatprep.subr.bf16.mxu1 %v3935_v5  ;;  %v3941_v9 = vld [vmem:[%s7049_s1 + $0xac] ss:$16 sps:$4 sm:$0xff]   ;;  %v3943_v10 = vld [vmem:[%s7049_s1 + $0xa0] ss:$16 sps:$4 sm:$0xff]   ;;  %v3944_v11 = vld [vmem:[%s7049_s1 + $0xa8] ss:$16 sps:$4 sm:$0xff]  }
  0x1c   : > { %v3945_v12 = vld [vmem:[%s7049_s1 + $0x84] ss:$16 sps:$4 sm:$0xff]   ;;  %v3947_v13 = vld [vmem:[%s7049_s1 + $0x8c] ss:$16 sps:$4 sm:$0xff]   ;;  %v3949_v14 = vld [vmem:[%s7049_s1 + $0x80] ss:$16 sps:$4 sm:$0xff]  }
  0x1d   : > { %v3950_v15 = vld [vmem:[%s7049_s1 + $0x88] ss:$16 sps:$4 sm:$0xff]   ;;  %v3951_v16 = vld [vmem:[%s7049_s1 + $0x64] ss:$16 sps:$4 sm:$0xff]   ;;  %v3953_v17 = vld [vmem:[%s7049_s1 + $0x6c] ss:$16 sps:$4 sm:$0xff]  }
  0x1e   : > { %794 = vmatpush1.bf16.msra.mxu0 %v3937_v6  ;;  %907 = vmatpush1.bf16.msra.mxu1 %v3938_v7  ;;  %v3955_v18 = vld [vmem:[%s7049_s1 + $0x60] ss:$16 sps:$4 sm:$0xff]   ;;  %v3956_v19 = vld [vmem:[%s7049_s1 + $0x68] ss:$16 sps:$4 sm:$0xff]   ;;  %v3957_v20 = vld [vmem:[%s7049_s1 + $0x44] ss:$16 sps:$4 sm:$0xff]  }
  0x1f   : > { %795 = vmatprep.subr.bf16.mxu0 %v3939_v8  ;;  %908 = vmatprep.subr.bf16.mxu1 %v3941_v9  ;;  %v3959_v21 = vld [vmem:[%s7049_s1 + $0x4c] ss:$16 sps:$4 sm:$0xff]   ;;  %v3961_v22 = vld [vmem:[%s7049_s1 + $0x40] ss:$16 sps:$4 sm:$0xff]   ;;  %s3602_s22 = sshll.u32 %s4643_s27, 4  ;;  %p300_p12 = scmp.lt.s32.totalorder %s4647_s28, 1 }
  0x20   : > { %v3962_v23 = vld [vmem:[%s7049_s1 + $0x48] ss:$16 sps:$4 sm:$0xff]   ;;  %v3963_v24 = vld [vmem:[%s7049_s1 + $0x24] ss:$16 sps:$4 sm:$0xff]   ;;  %v3965_v25 = vld [vmem:[%s7049_s1 + $0x2c] ss:$16 sps:$4 sm:$0xff]  }
  0x21   : > { %p302_p13 = scmp.lt.s32.totalorder %s3602_s22, 31  ;;  %v3967_v26 = vld [vmem:[%s7049_s1 + $0x20] ss:$16 sps:$4 sm:$0xff]   ;;  %v3968_v27 = vld [vmem:[%s7049_s1 + $0x28] ss:$16 sps:$4 sm:$0xff]   ;;  %s3853_s18 = sshll.u32 %s4643_s27, 5 }
  0x22   : > { %796 = vmatpush1.bf16.msra.mxu0 %v3943_v10  ;;  %909 = vmatpush1.bf16.msra.mxu1 %v3944_v11  ;;  %v3969_v28 = vld [vmem:[%s7049_s1 + $0x4] ss:$16 sps:$4 sm:$0xff]   ;;  %v3971_v29 = vld [vmem:[%s7049_s1 + $0xc] ss:$16 sps:$4 sm:$0xff]   ;;  %s301_s13 = scalar_select %p300_p12, %s4647_s28, 1 }
  0x23   : > { %797 = vmatprep.subr.bf16.mxu0 %v3945_v12  ;;  %910 = vmatprep.subr.bf16.mxu1 %v3947_v13  ;;  %s7243_s22 = smov (!%p302_p13, %s3602_s22), 31  ;;  %v3973_v30 = vld [vmem:[%s7049_s1] ss:$16 sps:$4 sm:$0xff]   ;;  %v3974_v31 = vld [vmem:[%s7049_s1 + $0x8] ss:$16 sps:$4 sm:$0xff]   ;;  %s3833_s20 = sshll.u32 %s4647_s28, 6 }
  0x24   : > { %v3975_v32 = vld [vmem:[%s7049_s1 + $0x1e4] ss:$16 sps:$4 sm:$0xff]   ;;  %v3977_v33 = vld [vmem:[%s7049_s1 + $0x1ec] ss:$16 sps:$4 sm:$0xff]   ;;  %s3603_s10 = sshll.u32 %s7243_s22, 1  ;;  %s3604_s11 = sshll.u32 %s301_s13, 6 }
  0x25   : > { %v3979_v34 = vld [vmem:[%s7049_s1 + $0x1e0] ss:$16 sps:$4 sm:$0xff]   ;;  %v3980_v35 = vld [vmem:[%s7049_s1 + $0x1e8] ss:$16 sps:$4 sm:$0xff]   ;;  %v3981_v36 = vld [vmem:[%s7049_s1 + $0x1c4] ss:$16 sps:$4 sm:$0xff]   ;;  %s306_s22 = sadd.s32 %s3604_s11, %s3603_s10  ;;  %s3508_s11 = sadd.s32 %s3853_s18, %s3833_s20 }
  0x26   : > { %798 = vmatpush1.bf16.msra.mxu0 %v3949_v14  ;;  %911 = vmatpush1.bf16.msra.mxu1 %v3950_v15  ;;  %v3983_v37 = vld [vmem:[%s7049_s1 + $0x1cc] ss:$16 sps:$4 sm:$0xff]   ;;  %v3985_v38 = vld [vmem:[%s7049_s1 + $0x1c0] ss:$16 sps:$4 sm:$0xff]   ;;  %v3986_v39 = vld [vmem:[%s7049_s1 + $0x1c8] ss:$16 sps:$4 sm:$0xff]  }
  0x27   : > { %799 = vmatprep.subr.bf16.mxu0 %v3951_v16  ;;  %912 = vmatprep.subr.bf16.mxu1 %v3953_v17  ;;  %v3987_v40 = vld [vmem:[%s7049_s1 + $0x1a4] ss:$16 sps:$4 sm:$0xff]   ;;  %s3605_s17 = sshll.u32 %s306_s22, 2  ;;  %v3989_v41 = vld [vmem:[%s7049_s1 + $0x1ac] ss:$16 sps:$4 sm:$0xff]   ;;  %s3834_s10 = sshll.u32 %s3508_s11, 6 }
  0x28   : > { %v3991_v42 = vld [vmem:[%s7049_s1 + $0x1a0] ss:$16 sps:$4 sm:$0xff]   ;;  %v3992_v43 = vld [vmem:[%s7049_s1 + $0x1a8] ss:$16 sps:$4 sm:$0xff]   ;;  %s4913_s29 = scalar_lea.vmem %s7048_s0, %s3605_s17  ;;  %v3993_v44 = vld [vmem:[%s7049_s1 + $0x184] ss:$16 sps:$4 sm:$0xff]   ;;  %s6990_s23 = scalar_lea.hbm %s7055_s7, %s3834_s10 }
  0x29   : > { %v3995_v45 = vld [vmem:[%s7049_s1 + $0x18c] ss:$16 sps:$4 sm:$0xff]   ;;  %v311_v46 = vld [vmem:[%s4913_s29] sm:$0xff]  ;;  %v3998_v49 = vld [vmem:[%s7049_s1 + $0x188] ss:$16 sps:$4 sm:$0xff]   ;;  %s4661_s22 = smov [#allocation2]  }
  0x2a   : > { %800 = vmatpush1.bf16.msra.mxu0 %v3955_v18  ;;  %913 = vmatpush1.bf16.msra.mxu1 %v3956_v19  ;;  %v312_v47 = vld [vmem:[%s4913_s29 + $0x8] sm:$0xff]  ;;  %v3997_v48 = vld [vmem:[%s7049_s1 + $0x180] ss:$16 sps:$4 sm:$0xff]   ;;  %v3999_v51 = vld [vmem:[%s7049_s1 + $0x164] ss:$16 sps:$4 sm:$0xff]   ;;  %s4571_s30 = sshll.u32 %s4661_s22, 4  ;;  %s4572_s30 = int_to_ptr.vmem [resolvable:$false] %s4571_s30 }
  0x2b   : > { %801 = vmatprep.subr.bf16.mxu0 %v3957_v20  ;;  %914 = vmatprep.subr.bf16.mxu1 %v3959_v21  ;;  %v4929_v50 = vcombine.high %v311_v46, %v312_v47  ;;  %v4001_v52 = vld [vmem:[%s7049_s1 + $0x16c] ss:$16 sps:$4 sm:$0xff]   ;;  %v4003_v53 = vld [vmem:[%s7049_s1 + $0x160] ss:$16 sps:$4 sm:$0xff]   ;;  %v4004_v54 = vld [vmem:[%s7049_s1 + $0x168] ss:$16 sps:$4 sm:$0xff]   ;;  %v4993_v7 = vcombine.low %v311_v46, %v312_v47 }
  0x2c   : > { %v4005_v55 = vld [vmem:[%s7049_s1 + $0x144] ss:$16 sps:$4 sm:$0xff]   ;;  %v4007_v56 = vld [vmem:[%s7049_s1 + $0x14c] ss:$16 sps:$4 sm:$0xff]   ;;  %v4009_v57 = vld [vmem:[%s7049_s1 + $0x140] ss:$16 sps:$4 sm:$0xff]  }
  0x2d   : > { %823 = vmatprep.mubr.bf16.mxu0 %v4929_v50  ;;  %936 = vmatprep.mubr.bf16.mxu1 %v4929_v50  ;;  %v4010_v58 = vld [vmem:[%s7049_s1 + $0x148] ss:$16 sps:$4 sm:$0xff]   ;;  %v4011_v59 = vld [vmem:[%s7049_s1 + $0x124] ss:$16 sps:$4 sm:$0xff]   ;;  %v4013_v60 = vld [vmem:[%s7049_s1 + $0x12c] ss:$16 sps:$4 sm:$0xff]  }
  0x2e   : > { %802 = vmatpush1.bf16.msra.mxu0 %v3961_v22  ;;  %915 = vmatpush1.bf16.msra.mxu1 %v3962_v23  ;;  %v4015_v61 = vld [vmem:[%s7049_s1 + $0x120] ss:$16 sps:$4 sm:$0xff]   ;;  %v4016_v62 = vld [vmem:[%s7049_s1 + $0x128] ss:$16 sps:$4 sm:$0xff]   ;;  %v4017_v63 = vld [vmem:[%s7049_s1 + $0x104] ss:$16 sps:$4 sm:$0xff]  }
  0x2f   : > { %803 = vmatprep.subr.bf16.mxu0 %v3963_v24  ;;  %916 = vmatprep.subr.bf16.mxu1 %v3965_v25  ;;  %v4019_v0 = vld [vmem:[%s7049_s1 + $0x10c] ss:$16 sps:$4 sm:$0xff]   ;;  %v4021_v1 = vld [vmem:[%s7049_s1 + $0x100] ss:$16 sps:$4 sm:$0xff]   ;;  %v4022_v2 = vld [vmem:[%s7049_s1 + $0x108] ss:$16 sps:$4 sm:$0xff]  }
  0x30   : > { %v4027_v3 = vld [vmem:[%s7050_s2 + $0xe4] ss:$16 sps:$4 sm:$0xff]   ;;  %v4030_v4 = vld [vmem:[%s7050_s2 + $0xec] ss:$16 sps:$4 sm:$0xff]   ;;  %v4025_v5 = vld [vmem:[%s7050_s2 + $0xe0] ss:$16 sps:$4 sm:$0xff]  }
  0x31   : > { %v4028_v6 = vld [vmem:[%s7050_s2 + $0xe8] ss:$16 sps:$4 sm:$0xff]   ;;  %v313_v8 = vld [vmem:[%s4913_s29 + $0x10] sm:$0xff]  ;;  %v4036_v11 = vld [vmem:[%s7050_s2 + $0xcc] ss:$16 sps:$4 sm:$0xff]   ;;  %s4573_s12 = scalar_lea.vmem %s4572_s30, 4096 }
  0x32   : > { %804 = vmatpush1.bf16.msra.mxu0 %v3967_v26  ;;  %917 = vmatpush1.bf16.msra.mxu1 %v3968_v27  ;;  %v314_v9 = vld [vmem:[%s4913_s29 + $0x18] sm:$0xff]  ;;  %v4033_v10 = vld [vmem:[%s7050_s2 + $0xc4] ss:$16 sps:$4 sm:$0xff]   ;;  %v4031_v13 = vld [vmem:[%s7050_s2 + $0xc0] ss:$16 sps:$4 sm:$0xff]  }
  0x33   : > { %805 = vmatprep.subr.bf16.mxu0 %v3969_v28  ;;  %918 = vmatprep.subr.bf16.mxu1 %v3971_v29  ;;  %v5003_v12 = vcombine.high %v313_v8, %v314_v9  ;;  %v4034_v14 = vld [vmem:[%s7050_s2 + $0xc8] ss:$16 sps:$4 sm:$0xff]   ;;  %v4041_v15 = vld [vmem:[%s7050_s2 + $0xa4] ss:$16 sps:$4 sm:$0xff]   ;;  %v4044_v16 = vld [vmem:[%s7050_s2 + $0xac] ss:$16 sps:$4 sm:$0xff]   ;;  %v5022_v18 = vcombine.low %v313_v8, %v314_v9 }
  0x34   : > { %v315_v17 = vld [vmem:[%s4913_s29 + $0x20] sm:$0xff]  ;;  %v316_v19 = vld [vmem:[%s4913_s29 + $0x28] sm:$0xff]  ;;  %v317_v29 = vld [vmem:[%s4913_s29 + $0x30] sm:$0xff] }
  0x35   : > { %v4039_v20 = vld [vmem:[%s7050_s2 + $0xa0] ss:$16 sps:$4 sm:$0xff]   ;;  %v4042_v21 = vld [vmem:[%s7050_s2 + $0xa8] ss:$16 sps:$4 sm:$0xff]   ;;  %v4047_v22 = vld [vmem:[%s7050_s2 + $0x84] ss:$16 sps:$4 sm:$0xff]   ;;  %v5037_v24 = vcombine.high %v315_v17, %v316_v19 }
  0x36   : > { %806 = vmatpush1.bf16.msra.mxu0 %v3973_v30  ;;  %919 = vmatpush1.bf16.msra.mxu1 %v3974_v31  ;;  %v4050_v23 = vld [vmem:[%s7050_s2 + $0x8c] ss:$16 sps:$4 sm:$0xff]   ;;  %v4045_v25 = vld [vmem:[%s7050_s2 + $0x80] ss:$16 sps:$4 sm:$0xff]   ;;  %v4048_v26 = vld [vmem:[%s7050_s2 + $0x88] ss:$16 sps:$4 sm:$0xff]   ;;  %v5056_v30 = vcombine.low %v315_v17, %v316_v19 }
  0x37   : > { %807 = vmatprep.subr.bf16.mxu0 %v3975_v32  ;;  %920 = vmatprep.subr.bf16.mxu1 %v3977_v33  ;;  %v4055_v27 = vld [vmem:[%s7050_s2 + $0x64] ss:$16 sps:$4 sm:$0xff]   ;;  %v4058_v28 = vld [vmem:[%s7050_s2 + $0x6c] ss:$16 sps:$4 sm:$0xff]   ;;  %v4053_v32 = vld [vmem:[%s7050_s2 + $0x60] ss:$16 sps:$4 sm:$0xff]  }
  0x38   : > { %v318_v31 = vld [vmem:[%s4913_s29 + $0x38] sm:$0xff]  ;;  %v4075_v46 = vld [vmem:[%s7050_s2 + $0x4] ss:$16 sps:$4 sm:$0xff]  }
  0x39   : > { %v4056_v33 = vld [vmem:[%s7050_s2 + $0x68] ss:$16 sps:$4 sm:$0xff]   ;;  %v4078_v47 = vld [vmem:[%s7050_s2 + $0xc] ss:$16 sps:$4 sm:$0xff]   ;;  %v4103_v8 = vld [vmem:[%s7050_s2 + $0x184] ss:$16 sps:$4 sm:$0xff]  }
  0x3a   : > { %808 = vmatpush2.bf16.msra.mxu0 %v3979_v34  ;;  %921 = vmatpush2.bf16.msra.mxu1 %v3980_v35  ;;  %v4061_v34 = vld [vmem:[%s7050_s2 + $0x44] ss:$16 sps:$4 sm:$0xff]   ;;  %v4064_v35 = vld [vmem:[%s7050_s2 + $0x4c] ss:$16 sps:$4 sm:$0xff]  }
  0x3b   : > { %809 = vmatprep.subr.bf16.mxu0 %v3981_v36  ;;  %922 = vmatprep.subr.bf16.mxu1 %v3983_v37  ;;  %v5071_v36 = vcombine.high %v317_v29, %v318_v31  ;;  %v4059_v37 = vld [vmem:[%s7050_s2 + $0x40] ss:$16 sps:$4 sm:$0xff]   ;;  %v4106_v9 = vld [vmem:[%s7050_s2 + $0x18c] ss:$16 sps:$4 sm:$0xff]  }
  0x3c   : > { %v326_v17 = vld [vmem:[%s4913_s29 + $0x78] sm:$0xff] }
  0x3e   : > { %810 = vmatpush2.bf16.msra.mxu0 %v3985_v38  ;;  %923 = vmatpush2.bf16.msra.mxu1 %v3986_v39  ;;  %v4062_v38 = vld [vmem:[%s7050_s2 + $0x48] ss:$16 sps:$4 sm:$0xff]   ;;  %v4069_v39 = vld [vmem:[%s7050_s2 + $0x24] ss:$16 sps:$4 sm:$0xff]  }
  0x3f   : > { %811 = vmatprep.subr.bf16.mxu0 %v3987_v40  ;;  %924 = vmatprep.subr.bf16.mxu1 %v3989_v41  ;;  %v4072_v40 = vld [vmem:[%s7050_s2 + $0x2c] ss:$16 sps:$4 sm:$0xff]   ;;  %v4067_v41 = vld [vmem:[%s7050_s2 + $0x20] ss:$16 sps:$4 sm:$0xff]  }
  0x42   : > { %812 = vmatpush2.bf16.msra.mxu0 %v3991_v42  ;;  %925 = vmatpush2.bf16.msra.mxu1 %v3992_v43  ;;  %v4070_v42 = vld [vmem:[%s7050_s2 + $0x28] ss:$16 sps:$4 sm:$0xff]   ;;  %v5095_v43 = vcombine.low %v317_v29, %v318_v31  ;;  %v4128_v29 = vld [vmem:[%s7050_s2 + $0x12c] ss:$16 sps:$4 sm:$0xff]  }
  0x43   : > { %813 = vmatprep.subr.bf16.mxu0 %v3993_v44  ;;  %926 = vmatprep.subr.bf16.mxu1 %v3995_v45  ;;  %v319_v44 = vld [vmem:[%s4913_s29 + $0x40] sm:$0xff]  ;;  %v320_v45 = vld [vmem:[%s4913_s29 + $0x48] sm:$0xff] }
  0x46   : > { %814 = vmatpush2.bf16.msra.mxu0 %v3997_v48  ;;  %927 = vmatpush2.bf16.msra.mxu1 %v3998_v49  ;;  %v4073_v48 = vld [vmem:[%s7050_s2] ss:$16 sps:$4 sm:$0xff]   ;;  %v4076_v49 = vld [vmem:[%s7050_s2 + $0x8] ss:$16 sps:$4 sm:$0xff]  }
  0x47   : > { %815 = vmatprep.subr.bf16.mxu0 %v3999_v51  ;;  %928 = vmatprep.subr.bf16.mxu1 %v4001_v52  ;;  %v5111_v51 = vcombine.high %v319_v44, %v320_v45  ;;  %v4083_v52 = vld [vmem:[%s7050_s2 + $0x1e4] ss:$16 sps:$4 sm:$0xff]  }
  0x4a   : > { %816 = vmatpush2.bf16.msra.mxu0 %v4003_v53  ;;  %929 = vmatpush2.bf16.msra.mxu1 %v4004_v54  ;;  %v4086_v53 = vld [vmem:[%s7050_s2 + $0x1ec] ss:$16 sps:$4 sm:$0xff]   ;;  %v321_v54 = vld [vmem:[%s4913_s29 + $0x50] sm:$0xff] }
  0x4b   : > { %817 = vmatprep.subr.bf16.mxu0 %v4005_v55  ;;  %930 = vmatprep.subr.bf16.mxu1 %v4007_v56  ;;  %v322_v55 = vld [vmem:[%s4913_s29 + $0x58] sm:$0xff]  ;;  %v4081_v56 = vld [vmem:[%s7050_s2 + $0x1e0] ss:$16 sps:$4 sm:$0xff]  }
  0x4e   : > { %818 = vmatpush2.bf16.msra.mxu0 %v4009_v57  ;;  %931 = vmatpush2.bf16.msra.mxu1 %v4010_v58  ;;  %v4084_v57 = vld [vmem:[%s7050_s2 + $0x1e8] ss:$16 sps:$4 sm:$0xff]   ;;  %v5131_v58 = vcombine.low %v319_v44, %v320_v45  ;;  %v4155_v44 = vld [vmem:[%s7051_s3 + $0x44] ss:$8 sps:$4 sm:$0xff]  }
  0x4f   : > { %819 = vmatprep.subr.bf16.mxu0 %v4011_v59  ;;  %932 = vmatprep.subr.bf16.mxu1 %v4013_v60  ;;  %v4089_v59 = vld [vmem:[%s7050_s2 + $0x1c4] ss:$16 sps:$4 sm:$0xff]   ;;  %v4092_v60 = vld [vmem:[%s7050_s2 + $0x1cc] ss:$16 sps:$4 sm:$0xff]  }
  0x50   : > { %v4158_v45 = vld [vmem:[%s7051_s3 + $0x144] ss:$8 sps:$4 sm:$0xff]  }
  0x52   : > { %820 = vmatpush2.bf16.msra.mxu0 %v4015_v61  ;;  %933 = vmatpush2.bf16.msra.mxu1 %v4016_v62  ;;  %v4087_v61 = vld [vmem:[%s7050_s2 + $0x1c0] ss:$16 sps:$4 sm:$0xff]   ;;  %v4090_v62 = vld [vmem:[%s7050_s2 + $0x1c8] ss:$16 sps:$4 sm:$0xff]  }
  0x53   : > { %821 = vmatprep.subr.bf16.mxu0 %v4017_v63  ;;  %934 = vmatprep.subr.bf16.mxu1 %v4019_v0  ;;  %v5145_v63 = vcombine.high %v321_v54, %v322_v55  ;;  %v4097_v0 = vld [vmem:[%s7050_s2 + $0x1a4] ss:$16 sps:$4 sm:$0xff]  }
  0x56   : > { %822 = vmatpush2.bf16.msra.mxu0 %v4021_v1  ;;  %935 = vmatpush2.bf16.msra.mxu1 %v4022_v2  ;;  %v4100_v1 = vld [vmem:[%s7050_s2 + $0x1ac] ss:$16 sps:$4 sm:$0xff]   ;;  %v323_v2 = vld [vmem:[%s4913_s29 + $0x60] sm:$0xff] }
  0x57   : > { %1401 = vmatprep.subr.bf16.mxu0 %v4027_v3  ;;  %1514 = vmatprep.subr.bf16.mxu1 %v4030_v4  ;;  %v324_v3 = vld [vmem:[%s4913_s29 + $0x68] sm:$0xff]  ;;  %v4095_v4 = vld [vmem:[%s7050_s2 + $0x1a0] ss:$16 sps:$4 sm:$0xff]  }
  0x58   : > { %v5193_v19 = vcombine.low %v323_v2, %v324_v3 }
  0x59   : > { %824 = vmatmul.mubr.bf16.vlgmr.msra.gmra.mxu0 %v4993_v7  ;;  %937 = vmatmul.mubr.bf16.vlgmr.msra.gmra.mxu1 %v4993_v7 }
  0x5a   : > { %1402 = vmatpush1.bf16.msra.mxu0 %v4025_v5  ;;  %1515 = vmatpush1.bf16.msra.mxu1 %v4028_v6  ;;  %v4098_v5 = vld [vmem:[%s7050_s2 + $0x1a8] ss:$16 sps:$4 sm:$0xff]   ;;  %v5165_v6 = vcombine.low %v321_v54, %v322_v55  ;;  %v4170_v54 = vld [vmem:[%s7051_s3 + $0x124] ss:$8 sps:$4 sm:$0xff]  }
  0x5b   : > { %1403 = vmatprep.subr.bf16.mxu0 %v4033_v10  ;;  %1516 = vmatprep.subr.bf16.mxu1 %v4036_v11  ;;  %v4101_v10 = vld [vmem:[%s7050_s2 + $0x180] ss:$16 sps:$4 sm:$0xff]   ;;  %v4104_v11 = vld [vmem:[%s7050_s2 + $0x188] ss:$16 sps:$4 sm:$0xff]  }
  0x5c   : > { %833 = vmatprep.mubr.bf16.mxu0 %v5003_v12  ;;  %946 = vmatprep.mubr.bf16.mxu1 %v5003_v12  ;;  %v4165_v55 = vld [vmem:[%s7051_s3 + $0x20] ss:$8 sps:$4 sm:$0xff]  }
  0x5e   : > { %1404 = vmatpush1.bf16.msra.mxu0 %v4031_v13  ;;  %1517 = vmatpush1.bf16.msra.mxu1 %v4034_v14  ;;  %v5179_v13 = vcombine.high %v323_v2, %v324_v3  ;;  %v4111_v14 = vld [vmem:[%s7050_s2 + $0x164] ss:$16 sps:$4 sm:$0xff]   ;;  %v4183_v3 = vld [vmem:[%s7051_s3 + $0xf0] ss:$8 sps:$4 sm:$0xff]  }
  0x5f   : > { %1405 = vmatprep.subr.bf16.mxu0 %v4041_v15  ;;  %1518 = vmatprep.subr.bf16.mxu1 %v4044_v16  ;;  %v4114_v15 = vld [vmem:[%s7050_s2 + $0x16c] ss:$16 sps:$4 sm:$0xff]   ;;  %v325_v16 = vld [vmem:[%s4913_s29 + $0x70] sm:$0xff] }
  0x60   : > { %v5225_v31 = vcombine.low %v325_v16, %v326_v17  ;;  %v4188_v2 = vld [vmem:[%s7051_s3 + $0x1f4] ss:$8 sps:$4 sm:$0xff]  }
  0x61   : > { %834 = vmatmul.mubr.bf16.gmra.mxu0 %v5022_v18  ;;  %947 = vmatmul.mubr.bf16.gmra.mxu1 %v5022_v18 }
  0x62   : > { %1406 = vmatpush1.bf16.msra.mxu0 %v4039_v20  ;;  %1519 = vmatpush1.bf16.msra.mxu1 %v4042_v21  ;;  %v4109_v20 = vld [vmem:[%s7050_s2 + $0x160] ss:$16 sps:$4 sm:$0xff]   ;;  %v4112_v21 = vld [vmem:[%s7050_s2 + $0x168] ss:$16 sps:$4 sm:$0xff]  }
  0x63   : > { %1407 = vmatprep.subr.bf16.mxu0 %v4047_v22  ;;  %1520 = vmatprep.subr.bf16.mxu1 %v4050_v23  ;;  %v4117_v22 = vld [vmem:[%s7050_s2 + $0x144] ss:$16 sps:$4 sm:$0xff]   ;;  %v4120_v23 = vld [vmem:[%s7050_s2 + $0x14c] ss:$16 sps:$4 sm:$0xff]  }
  0x64   : > { %843 = vmatprep.mubr.bf16.mxu0 %v5037_v24  ;;  %956 = vmatprep.mubr.bf16.mxu1 %v5037_v24 }
  0x66   : > { %1408 = vmatpush1.bf16.msra.mxu0 %v4045_v25  ;;  %1521 = vmatpush1.bf16.msra.mxu1 %v4048_v26  ;;  %v5207_v25 = vcombine.high %v325_v16, %v326_v17  ;;  %v4115_v26 = vld [vmem:[%s7050_s2 + $0x140] ss:$16 sps:$4 sm:$0xff]   ;;  %v4206_v16 = vld [vmem:[%s7051_s3 + $0x1c4] ss:$8 sps:$4 sm:$0xff]  }
  0x67   : > { %1409 = vmatprep.subr.bf16.mxu0 %v4055_v27  ;;  %1522 = vmatprep.subr.bf16.mxu1 %v4058_v28  ;;  %v4118_v27 = vld [vmem:[%s7050_s2 + $0x148] ss:$16 sps:$4 sm:$0xff]   ;;  %v4125_v28 = vld [vmem:[%s7050_s2 + $0x124] ss:$16 sps:$4 sm:$0xff]  }
  0x68   : > { %v4201_v17 = vld [vmem:[%s7051_s3 + $0xc0] ss:$8 sps:$4 sm:$0xff]  }
  0x69   : > { %844 = vmatmul.mubr.bf16.gmra.mxu0 %v5056_v30  ;;  %957 = vmatmul.mubr.bf16.gmra.mxu1 %v5056_v30 }
  0x6a   : > { %1410 = vmatpush1.bf16.msra.mxu0 %v4053_v32  ;;  %1523 = vmatpush1.bf16.msra.mxu1 %v4056_v33  ;;  %v4123_v32 = vld [vmem:[%s7050_s2 + $0x120] ss:$16 sps:$4 sm:$0xff]   ;;  %v4126_v33 = vld [vmem:[%s7050_s2 + $0x128] ss:$16 sps:$4 sm:$0xff]  }
  0x6b   : > { %1411 = vmatprep.subr.bf16.mxu0 %v4061_v34  ;;  %1524 = vmatprep.subr.bf16.mxu1 %v4064_v35  ;;  %v4131_v34 = vld [vmem:[%s7050_s2 + $0x104] ss:$16 sps:$4 sm:$0xff]   ;;  %v4134_v35 = vld [vmem:[%s7050_s2 + $0x10c] ss:$16 sps:$4 sm:$0xff]  }
  0x6c   : > { %853 = vmatprep.mubr.bf16.mxu0 %v5071_v36  ;;  %966 = vmatprep.mubr.bf16.mxu1 %v5071_v36 }
  0x6e   : > { %1412 = vmatpush1.bf16.msra.mxu0 %v4059_v37  ;;  %1525 = vmatpush1.bf16.msra.mxu1 %v4062_v38  ;;  %v4129_v37 = vld [vmem:[%s7050_s2 + $0x100] ss:$16 sps:$4 sm:$0xff]   ;;  %v4132_v38 = vld [vmem:[%s7050_s2 + $0x108] ss:$16 sps:$4 sm:$0xff]  }
  0x6f   : > { %1413 = vmatprep.subr.bf16.mxu0 %v4069_v39  ;;  %1526 = vmatprep.subr.bf16.mxu1 %v4072_v40  ;;  %v4144_v39 = vld [vmem:[%s7051_s3 + $0x160] ss:$8 sps:$4 sm:$0xff]   ;;  %v4149_v40 = vld [vmem:[%s7051_s3 + $0x54] ss:$8 sps:$4 sm:$0xff]  }
  0x71   : > { %854 = vmatmul.mubr.bf16.gmra.mxu0 %v5095_v43  ;;  %967 = vmatmul.mubr.bf16.gmra.mxu1 %v5095_v43 }
  0x72   : > { %1414 = vmatpush1.bf16.msra.mxu0 %v4067_v41  ;;  %1527 = vmatpush1.bf16.msra.mxu1 %v4070_v42  ;;  %v4152_v41 = vld [vmem:[%s7051_s3 + $0x154] ss:$8 sps:$4 sm:$0xff]   ;;  %v4147_v42 = vld [vmem:[%s7051_s3 + $0x50] ss:$8 sps:$4 sm:$0xff]  }
  0x73   : > { %1415 = vmatprep.subr.bf16.mxu0 %v4075_v46  ;;  %1528 = vmatprep.subr.bf16.mxu1 %v4078_v47  ;;  %v4153_v46 = vld [vmem:[%s7051_s3 + $0x40] ss:$8 sps:$4 sm:$0xff]  }
  0x74   : > { %863 = vmatprep.mubr.bf16.mxu0 %v5111_v51  ;;  %976 = vmatprep.mubr.bf16.mxu1 %v5111_v51  ;;  %v4156_v47 = vld [vmem:[%s7051_s3 + $0x140] ss:$8 sps:$4 sm:$0xff]  }
  0x76   : > { %1416 = vmatpush1.bf16.msra.mxu0 %v4073_v48  ;;  %1529 = vmatpush1.bf16.msra.mxu1 %v4076_v49  ;;  %v4161_v48 = vld [vmem:[%s7051_s3 + $0x34] ss:$8 sps:$4 sm:$0xff]  }
  0x77   : > { %1417 = vmatprep.subr.bf16.mxu0 %v4083_v52  ;;  %1530 = vmatprep.subr.bf16.mxu1 %v4086_v53  ;;  %v4164_v49 = vld [vmem:[%s7051_s3 + $0x134] ss:$8 sps:$4 sm:$0xff]   ;;  %v4162_v52 = vld [vmem:[%s7051_s3 + $0x130] ss:$8 sps:$4 sm:$0xff]   ;;  %v4167_v53 = vld [vmem:[%s7051_s3 + $0x24] ss:$8 sps:$4 sm:$0xff]  }
  0x79   : > { %864 = vmatmul.mubr.bf16.gmra.mxu0 %v5131_v58  ;;  %977 = vmatmul.mubr.bf16.gmra.mxu1 %v5131_v58 }
  0x7a   : > { %1418 = vmatpush2.bf16.msra.mxu0 %v4081_v56  ;;  %1531 = vmatpush2.bf16.msra.mxu1 %v4084_v57  ;;  %v4168_v56 = vld [vmem:[%s7051_s3 + $0x120] ss:$8 sps:$4 sm:$0xff]   ;;  %v4173_v57 = vld [vmem:[%s7051_s3 + $0x14] ss:$8 sps:$4 sm:$0xff]  }
  0x7b   : > { %1419 = vmatprep.subr.bf16.mxu0 %v4089_v59  ;;  %1532 = vmatprep.subr.bf16.mxu1 %v4092_v60  ;;  %v4171_v59 = vld [vmem:[%s7051_s3 + $0x10] ss:$8 sps:$4 sm:$0xff]  }
  0x7c   : > { %873 = vmatprep.mubr.bf16.mxu0 %v5145_v63  ;;  %986 = vmatprep.mubr.bf16.mxu1 %v5145_v63  ;;  %v4174_v60 = vld [vmem:[%s7051_s3 + $0x110] ss:$8 sps:$4 sm:$0xff]  }
  0x7e   : > { %1420 = vmatpush2.bf16.msra.mxu0 %v4087_v61  ;;  %1533 = vmatpush2.bf16.msra.mxu1 %v4090_v62  ;;  %v4179_v61 = vld [vmem:[%s7051_s3 + $0x4] ss:$8 sps:$4 sm:$0xff]  }
  0x7f   : > { %1421 = vmatprep.subr.bf16.mxu0 %v4097_v0  ;;  %1534 = vmatprep.subr.bf16.mxu1 %v4100_v1  ;;  %v4182_v62 = vld [vmem:[%s7051_s3 + $0x104] ss:$8 sps:$4 sm:$0xff]   ;;  %v4180_v0 = vld [vmem:[%s7051_s3 + $0x100] ss:$8 sps:$4 sm:$0xff]   ;;  %v4185_v1 = vld [vmem:[%s7051_s3 + $0xf4] ss:$8 sps:$4 sm:$0xff]  }
  0x81   : > { %874 = vmatmul.mubr.bf16.gmra.mxu0 %v5165_v6  ;;  %987 = vmatmul.mubr.bf16.gmra.mxu1 %v5165_v6 }
  0x82   : > { %1422 = vmatpush2.bf16.msra.mxu0 %v4095_v4  ;;  %1535 = vmatpush2.bf16.msra.mxu1 %v4098_v5  ;;  %v4186_v4 = vld [vmem:[%s7051_s3 + $0x1f0] ss:$8 sps:$4 sm:$0xff]   ;;  %v4191_v5 = vld [vmem:[%s7051_s3 + $0xe4] ss:$8 sps:$4 sm:$0xff]  }
  0x83   : > { %1423 = vmatprep.subr.bf16.mxu0 %v4103_v8  ;;  %1536 = vmatprep.subr.bf16.mxu1 %v4106_v9  ;;  %v4189_v8 = vld [vmem:[%s7051_s3 + $0xe0] ss:$8 sps:$4 sm:$0xff]  }
  0x84   : > { %883 = vmatprep.mubr.bf16.mxu0 %v5179_v13  ;;  %996 = vmatprep.mubr.bf16.mxu1 %v5179_v13  ;;  %v4192_v9 = vld [vmem:[%s7051_s3 + $0x1e0] ss:$8 sps:$4 sm:$0xff]  }
  0x86   : > { %1424 = vmatpush2.bf16.msra.mxu0 %v4101_v10  ;;  %1537 = vmatpush2.bf16.msra.mxu1 %v4104_v11  ;;  %v4197_v10 = vld [vmem:[%s7051_s3 + $0xd4] ss:$8 sps:$4 sm:$0xff]  }
  0x87   : > { %1425 = vmatprep.subr.bf16.mxu0 %v4111_v14  ;;  %1538 = vmatprep.subr.bf16.mxu1 %v4114_v15  ;;  %v4200_v11 = vld [vmem:[%s7051_s3 + $0x1d4] ss:$8 sps:$4 sm:$0xff]   ;;  %v4198_v14 = vld [vmem:[%s7051_s3 + $0x1d0] ss:$8 sps:$4 sm:$0xff]   ;;  %v4203_v15 = vld [vmem:[%s7051_s3 + $0xc4] ss:$8 sps:$4 sm:$0xff]  }
  0x89   : > { %884 = vmatmul.mubr.bf16.gmra.mxu0 %v5193_v19  ;;  %997 = vmatmul.mubr.bf16.gmra.mxu1 %v5193_v19 }
  0x8a   : > { %1426 = vmatpush2.bf16.msra.mxu0 %v4109_v20  ;;  %1539 = vmatpush2.bf16.msra.mxu1 %v4112_v21  ;;  %v4209_v20 = vld [vmem:[%s7051_s3 + $0xb4] ss:$8 sps:$4 sm:$0xff]  }
  0x8b   : > { %1427 = vmatprep.subr.bf16.mxu0 %v4117_v22  ;;  %1540 = vmatprep.subr.bf16.mxu1 %v4120_v23  ;;  %v4212_v21 = vld [vmem:[%s7051_s3 + $0x1b4] ss:$8 sps:$4 sm:$0xff]  }
  0x8c   : > { %893 = vmatprep.mubr.bf16.mxu0 %v5207_v25  ;;  %1006 = vmatprep.mubr.bf16.mxu1 %v5207_v25 }
  0x8e   : > { %1428 = vmatpush2.bf16.msra.mxu0 %v4115_v26  ;;  %1541 = vmatpush2.bf16.msra.mxu1 %v4118_v27  ;;  %v4210_v26 = vld [vmem:[%s7051_s3 + $0x1b0] ss:$8 sps:$4 sm:$0xff]  }
  0x8f   : > { %1429 = vmatprep.subr.bf16.mxu0 %v4125_v28  ;;  %1542 = vmatprep.subr.bf16.mxu1 %v4128_v29 }
  0x91   : > { %894 = vmatmul.mubr.bf16.gmra.mxu0 %v5225_v31  ;;  %1007 = vmatmul.mubr.bf16.gmra.mxu1 %v5225_v31 }
  0x92   : > { %1430 = vmatpush2.bf16.msra.mxu0 %v4123_v32  ;;  %1543 = vmatpush2.bf16.msra.mxu1 %v4126_v33  ;;  %v4215_v32 = vld [vmem:[%s7051_s3 + $0xa4] ss:$8 sps:$4 sm:$0xff]  }
  0x93   : > { %1431 = vmatprep.subr.bf16.mxu0 %v4131_v34  ;;  %1544 = vmatprep.subr.bf16.mxu1 %v4134_v35  ;;  %v4218_v33 = vld [vmem:[%s7051_s3 + $0x1a4] ss:$8 sps:$4 sm:$0xff]   ;;  %v4213_v34 = vld [vmem:[%s7051_s3 + $0xa0] ss:$8 sps:$4 sm:$0xff]  }
  0x94   : > { %1433 = vmatprep.mubr.bf16.mxu0 %v4929_v50  ;;  %1546 = vmatprep.mubr.bf16.mxu1 %v4929_v50  ;;  %v4137_v50 = vld [vmem:[%s7051_s3 + $0x74] ss:$8 sps:$4 sm:$0xff]   ;;  %v4216_v35 = vld [vmem:[%s7051_s3 + $0x1a0] ss:$8 sps:$4 sm:$0xff]  }
  0x96   : > { %1432 = vmatpush2.bf16.msra.mxu0 %v4129_v37  ;;  %1545 = vmatpush2.bf16.msra.mxu1 %v4132_v38 }
  0x97   : > { %2728 = vmatprep.subr.bf16.mxu0 %v4137_v50 }
  0x99   : > { %1434 = vmatmul.mubr.bf16.vlgmr.msra.gmra.mxu0 %v4993_v7  ;;  %1547 = vmatmul.mubr.bf16.vlgmr.msra.gmra.mxu1 %v4993_v7  ;;  %v4140_v7 = vld [vmem:[%s7051_s3 + $0x174] ss:$8 sps:$4 sm:$0xff]  }
  0x9a   : > { %1443 = vmatprep.mubr.bf16.mxu0 %v5003_v12  ;;  %1556 = vmatprep.mubr.bf16.mxu1 %v5003_v12  ;;  %v4135_v12 = vld [vmem:[%s7051_s3 + $0x70] ss:$8 sps:$4 sm:$0xff]  }
  0x9b   : > { %2841 = vmatprep.subr.bf16.mxu1 %v4140_v7  ;;  %2729 = vmatpush1.bf16.msra.mxu0 %v4135_v12  ;;  %v4221_v12 = vld [vmem:[%s7051_s3 + $0x94] ss:$8 sps:$4 sm:$0xff]  }
  0xa1   : > { %1444 = vmatmul.mubr.bf16.gmra.mxu0 %v5022_v18  ;;  %1557 = vmatmul.mubr.bf16.gmra.mxu1 %v5022_v18  ;;  %v4138_v18 = vld [vmem:[%s7051_s3 + $0x170] ss:$8 sps:$4 sm:$0xff]  }
  0xa2   : > { %1453 = vmatprep.mubr.bf16.mxu0 %v5037_v24  ;;  %1566 = vmatprep.mubr.bf16.mxu1 %v5037_v24  ;;  %v4143_v24 = vld [vmem:[%s7051_s3 + $0x64] ss:$8 sps:$4 sm:$0xff]  }
  0xa3   : > { %2842 = vmatpush1.bf16.msra.mxu1 %v4138_v18  ;;  %2730 = vmatprep.subr.bf16.mxu0 %v4143_v24  ;;  %v4224_v18 = vld [vmem:[%s7051_s3 + $0x194] ss:$8 sps:$4 sm:$0xff]  }
  0xa9   : > { %1454 = vmatmul.mubr.bf16.gmra.mxu0 %v5056_v30  ;;  %1567 = vmatmul.mubr.bf16.gmra.mxu1 %v5056_v30  ;;  %v4146_v30 = vld [vmem:[%s7051_s3 + $0x164] ss:$8 sps:$4 sm:$0xff]  }
  0xaa   : > { %1463 = vmatprep.mubr.bf16.mxu0 %v5071_v36  ;;  %1576 = vmatprep.mubr.bf16.mxu1 %v5071_v36  ;;  %v4141_v36 = vld [vmem:[%s7051_s3 + $0x60] ss:$8 sps:$4 sm:$0xff]  }
  0xab   : > { %2843 = vmatprep.subr.bf16.mxu1 %v4146_v30  ;;  %2731 = vmatpush1.bf16.msra.mxu0 %v4141_v36  ;;  %v4219_v36 = vld [vmem:[%s7051_s3 + $0x90] ss:$8 sps:$4 sm:$0xff]  }
  0xac   : > { %2844 = vmatpush1.bf16.msra.mxu1 %v4144_v39  ;;  %2732 = vmatprep.subr.bf16.mxu0 %v4149_v40  ;;  %v4222_v39 = vld [vmem:[%s7051_s3 + $0x190] ss:$8 sps:$4 sm:$0xff]  }
  0xad   : > { %2845 = vmatprep.subr.bf16.mxu1 %v4152_v41 }
  0xaf   : > { %2733 = vmatpush1.bf16.msra.mxu0 %v4147_v42 }
  0xb0   : > { %2734 = vmatprep.subr.bf16.mxu0 %v4155_v44 }
  0xb1   : > { %1464 = vmatmul.mubr.bf16.gmra.mxu0 %v5095_v43  ;;  %1577 = vmatmul.mubr.bf16.gmra.mxu1 %v5095_v43  ;;  %v4150_v43 = vld [vmem:[%s7051_s3 + $0x150] ss:$8 sps:$4 sm:$0xff]  }
  0xb2   : > { %1473 = vmatprep.mubr.bf16.mxu0 %v5111_v51  ;;  %1586 = vmatprep.mubr.bf16.mxu1 %v5111_v51  ;;  %v4159_v51 = vld [vmem:[%s7051_s3 + $0x30] ss:$8 sps:$4 sm:$0xff]  }
  0xb3   : > { %2846 = vmatpush1.bf16.msra.mxu1 %v4150_v43  ;;  %2735 = vmatpush1.bf16.msra.mxu0 %v4153_v46  ;;  %v4227_v46 = vld [vmem:[%s7051_s3 + $0x84] ss:$8 sps:$4 sm:$0xff]  }
  0xb4   : > { %2847 = vmatprep.subr.bf16.mxu1 %v4158_v45  ;;  %2736 = vmatprep.subr.bf16.mxu0 %v4161_v48  ;;  %v4225_v48 = vld [vmem:[%s7051_s3 + $0x80] ss:$8 sps:$4 sm:$0xff]  }
  0xb7   : > { %2848 = vmatpush1.bf16.msra.mxu1 %v4156_v47  ;;  %2737 = vmatpush1.bf16.msra.mxu0 %v4159_v51  ;;  %v4230_v47 = vld [vmem:[%s7051_s3 + $0x184] ss:$8 sps:$4 sm:$0xff]  }
  0xb8   : > { %2849 = vmatprep.subr.bf16.mxu1 %v4164_v49  ;;  %2738 = vmatprep.subr.bf16.mxu0 %v4167_v53  ;;  %v4228_v49 = vld [vmem:[%s7051_s3 + $0x180] ss:$8 sps:$4 sm:$0xff]  }
  0xb9   : > { %1474 = vmatmul.mubr.bf16.gmra.mxu0 %v5131_v58  ;;  %1587 = vmatmul.mubr.bf16.gmra.mxu1 %v5131_v58  ;;  %v4176_v58 = vld [vmem:[%s7051_s3 + $0x114] ss:$8 sps:$4 sm:$0xff]  }
  0xba   : > { %1483 = vmatprep.mubr.bf16.mxu0 %v5145_v63  ;;  %1596 = vmatprep.mubr.bf16.mxu1 %v5145_v63  ;;  %v4177_v63 = vld [vmem:[%s7051_s3] ss:$8 sps:$4 sm:$0xff]  }
  0xbb   : > { %2850 = vmatpush1.bf16.msra.mxu1 %v4162_v52  ;;  %2739 = vmatpush1.bf16.msra.mxu0 %v4165_v55 }
  0xbc   : > { %2851 = vmatprep.subr.bf16.mxu1 %v4170_v54  ;;  %2740 = vmatprep.subr.bf16.mxu0 %v4173_v57 }
  0xbf   : > { %2852 = vmatpush1.bf16.msra.mxu1 %v4168_v56  ;;  %2741 = vmatpush1.bf16.msra.mxu0 %v4171_v59 }
  0xc0   : > { %2853 = vmatprep.subr.bf16.mxu1 %v4176_v58  ;;  %2742 = vmatprep.subr.bf16.mxu0 %v4179_v61 }
  0xc1   : > { %1484 = vmatmul.mubr.bf16.gmra.mxu0 %v5165_v6  ;;  %1597 = vmatmul.mubr.bf16.gmra.mxu1 %v5165_v6  ;;  %v4194_v6 = vld [vmem:[%s7051_s3 + $0x1e4] ss:$8 sps:$4 sm:$0xff]  }
  0xc2   : > { %1493 = vmatprep.mubr.bf16.mxu0 %v5179_v13  ;;  %1606 = vmatprep.mubr.bf16.mxu1 %v5179_v13  ;;  %v4195_v13 = vld [vmem:[%s7051_s3 + $0xd0] ss:$8 sps:$4 sm:$0xff]  }
  0xc3   : > { %2854 = vmatpush1.bf16.msra.mxu1 %v4174_v60  ;;  %2743 = vmatpush1.bf16.msra.mxu0 %v4177_v63 }
  0xc4   : > { %2855 = vmatprep.subr.bf16.mxu1 %v4182_v62  ;;  %2744 = vmatprep.subr.bf16.mxu0 %v4185_v1 }
  0xc7   : > { %2856 = vmatpush1.bf16.msra.mxu1 %v4180_v0  ;;  %2745 = vmatpush2.bf16.msra.mxu0 %v4183_v3 }
  0xc8   : > { %2857 = vmatprep.subr.bf16.mxu1 %v4188_v2  ;;  %2746 = vmatprep.subr.bf16.mxu0 %v4191_v5  ;;  %v1629_v5 = vlaneseq }
  0xc9   : > { %1494 = vmatmul.mubr.bf16.gmra.mxu0 %v5193_v19  ;;  %1607 = vmatmul.mubr.bf16.gmra.mxu1 %v5193_v19  ;;  %v4204_v19 = vld [vmem:[%s7051_s3 + $0x1c0] ss:$8 sps:$4 sm:$0xff]  }
  0xca   : > { %1503 = vmatprep.mubr.bf16.mxu0 %v5207_v25  ;;  %1616 = vmatprep.mubr.bf16.mxu1 %v5207_v25  ;;  %v4207_v25 = vld [vmem:[%s7051_s3 + $0xb0] ss:$8 sps:$4 sm:$0xff]  }
  0xcb   : > { %2858 = vmatpush2.bf16.msra.mxu1 %v4186_v4  ;;  %2747 = vmatpush2.bf16.msra.mxu0 %v4189_v8 }
  0xcc   : > { %2859 = vmatprep.subr.bf16.mxu1 %v4194_v6  ;;  %2748 = vmatprep.subr.bf16.mxu0 %v4197_v10 }
  0xcf   : > { %2860 = vmatpush2.bf16.msra.mxu1 %v4192_v9  ;;  %2749 = vmatpush2.bf16.msra.mxu0 %v4195_v13 }
  0xd0   : > { %2861 = vmatprep.subr.bf16.mxu1 %v4200_v11  ;;  %2750 = vmatprep.subr.bf16.mxu0 %v4203_v15  ;;  %v1630_v11 = vshrl.u32 %v1629_v5, 7 }
  0xd1   : > { %1504 = vmatmul.mubr.bf16.gmra.mxu0 %v5225_v31  ;;  %1617 = vmatmul.mubr.bf16.gmra.mxu1 %v5225_v31 }
  0xd2   : > { %v1643_v5 = vsub.s32 3, %v1630_v11 }
  0xd3   : > { %2862 = vmatpush2.bf16.msra.mxu1 %v4198_v14  ;;  %2751 = vmatpush2.bf16.msra.mxu0 %v4201_v17  ;;  %v5559_v17 = vsub.s32 0, %v1630_v11 }
  0xd4   : > { %2863 = vmatprep.subr.bf16.mxu1 %v4206_v16  ;;  %2752 = vmatprep.subr.bf16.mxu0 %v4209_v20  ;;  %v1627_v20 = vld [vmem:[%s7052_s4] sm:$0xf] }
  0xd5   : > { %7080 = vst [vmem:[#allocation10_spill] sm:$0xff] %v5559_v17 }
  0xd7   : > { %2864 = vmatpush2.bf16.msra.mxu1 %v4204_v19  ;;  %2753 = vmatpush2.bf16.msra.mxu0 %v4207_v25  ;;  %v1639_v19 = vsub.s32 2, %v1630_v11 }
  0xd8   : > { %2865 = vmatprep.subr.bf16.mxu1 %v4212_v21  ;;  %2754 = vmatprep.subr.bf16.mxu0 %v4215_v32 }
  0xdb   : > { %2866 = vmatpush2.bf16.msra.mxu1 %v4210_v26  ;;  %2755 = vmatpush2.bf16.msra.mxu0 %v4213_v34  ;;  %v5568_v26 = vsub.s32 1, %v1630_v11  ;;  %v5575_v34 = vrot.slane %v1627_v20, %v5559_v17 }
  0xdc   : > { %2867 = vmatprep.subr.bf16.mxu1 %v4218_v33  ;;  %2756 = vmatprep.subr.bf16.mxu0 %v4221_v12 }
  0xdd   : > { %7083 = vst [vmem:[#allocation13_spill] sm:$0xff] %v5568_v26 }
  0xdf   : > { %2868 = vmatpush2.bf16.msra.mxu1 %v4216_v35  ;;  %2757 = vmatpush2.bf16.msra.mxu0 %v4219_v36  ;;  %v5577_v35 = vrot.slane %v1627_v20, %v1639_v19  ;;  %v5580_v36 = vrot.slane %v1627_v20, %v5568_v26 }
  0xe0   : > { %2869 = vmatprep.subr.bf16.mxu1 %v4224_v18  ;;  %2758 = vmatprep.subr.bf16.mxu0 %v4227_v46 }
  0xe3   : > { %2870 = vmatpush2.bf16.msra.mxu1 %v4222_v39  ;;  %2759 = vmatpush2.bf16.msra.mxu0 %v4225_v48 }
  0xe4   : > { %2871 = vmatprep.subr.bf16.mxu1 %v4230_v47  ;;  %v1713_v47 = vld [vmem:[%s7053_s5] sm:$0xf] }
  0xe7   : > { %2872 = vmatpush2.bf16.msra.mxu1 %v4228_v49 }
 0x119   : > { %v5429_v22 = vpop.f32.mrf.mxu0  ;;  %v5431_v23 = vpop.f32.mrf.mxu1 }
 0x11b   : > { %v5439_v27 = vpop.f32.mrf.mxu0  ;;  %v5441_v28 = vpop.f32.mrf.mxu1 }
 0x11d   : > { %v5443_v29 = vpop.f32.mrf.mxu0  ;;  %v5445_v31 = vpop.f32.mrf.mxu1 }
 0x11f   : > { %v5459_v37 = vpop.f32.mrf.mxu0  ;;  %v5461_v38 = vpop.f32.mrf.mxu1 }
 0x121   : > { %v5463_v50 = vpop.f32.mrf.mxu0  ;;  %v5465_v7 = vpop.f32.mrf.mxu1 }
 0x123   : > { %v5473_v24 = vpop.f32.mrf.mxu0  ;;  %v5475_v30 = vpop.f32.mrf.mxu1 }
 0x125   : > { %v5483_v40 = vpop.f32.mrf.mxu0  ;;  %v5485_v41 = vpop.f32.mrf.mxu1 }
 0x127   : > { %v5487_v42 = vpop.f32.mrf.mxu0  ;;  %v5489_v43 = vpop.f32.mrf.mxu1 }
 0x129   : > { %v5491_v44 = vpop.f32.mrf.mxu0  ;;  %v5493_v45 = vpop.f32.mrf.mxu1 }
 0x12b   : > { %v5507_v51 = vpop.f32.mrf.mxu0  ;;  %v5509_v52 = vpop.f32.mrf.mxu1 }
 0x12d   : > { %v5511_v53 = vpop.f32.mrf.mxu0  ;;  %v5513_v54 = vpop.f32.mrf.mxu1 }
 0x12f   : > { %v5515_v55 = vpop.f32.mrf.mxu0  ;;  %v5517_v56 = vpop.f32.mrf.mxu1 }
 0x131   : > { %v5519_v57 = vpop.f32.mrf.mxu0  ;;  %v5521_v58 = vpop.f32.mrf.mxu1 }
 0x133   : > { %v5523_v59 = vpop.f32.mrf.mxu0  ;;  %v5525_v60 = vpop.f32.mrf.mxu1 }
 0x135   : > { %v5527_v61 = vpop.f32.mrf.mxu0  ;;  %v5529_v62 = vpop.f32.mrf.mxu1 }
 0x137   : > { %v5531_v63 = vpop.f32.mrf.mxu0  ;;  %v5533_v0 = vpop.f32.mrf.mxu1 }
 0x139   : > { %v5535_v1 = vpop.f32.mrf.mxu0  ;;  %v5537_v2 = vpop.f32.mrf.mxu1 }
 0x13b   : > { %v5539_v3 = vpop.f32.mrf.mxu0  ;;  %v5541_v4 = vpop.f32.mrf.mxu1 }
 0x13d   : > { %v5543_v6 = vpop.f32.mrf.mxu0  ;;  %v5545_v8 = vpop.f32.mrf.mxu1 }
 0x13f   : > { %v5547_v9 = vpop.f32.mrf.mxu0  ;;  %v5549_v10 = vpop.f32.mrf.mxu1 }
 0x141   : > { %v5551_v13 = vpop.f32.mrf.mxu0  ;;  %v5553_v14 = vpop.f32.mrf.mxu1 }
 0x143   : > { %v5555_v15 = vpop.f32.mrf.mxu0  ;;  %v5557_v16 = vpop.f32.mrf.mxu1 }
 0x144   : > { %7079 = vst [vmem:[#allocation9_spill] sm:$0xff] %v5557_v16  ;;  %v5604_v16 = vrot.slane %v1627_v20, %v1643_v5  ;;  %v5625_v20 = vmul.f32 %v5575_v34, %v5429_v22  ;;  %v5643_v22 = vmul.f32 %v5575_v34, %v5443_v29  ;;  %v5665_v29 = vmul.f32 %v5575_v34, %v5463_v50 }
 0x145   : > { %v5564_v21 = vpop.f32.mrf.mxu0  ;;  %v5566_v25 = vpop.f32.mrf.mxu1 }
 0x146   : > { %7081 = vst [vmem:[#allocation11_spill] sm:$0xff] %v5564_v21  ;;  %7082 = vst [vmem:[#allocation12_spill] sm:$0xff] %v5566_v25  ;;  %v1714_v21 = vmul.f32 16.0, %v1713_v47  ;;  %v5683_v50 = vmul.f32 %v5604_v16, %v5475_v30  ;;  %v5703_v30 = vmul.f32 %v5575_v34, %v5491_v44  ;;  %v5725_v44 = vmul.f32 %v5575_v34, %v5511_v53 }
 0x147   : > { %v5570_v32 = vpop.f32.mrf.mxu0  ;;  %v5572_v33 = vpop.f32.mrf.mxu1  ;;  %7093 = vst [vmem:[#allocation23_spill] sm:$0xff] %v5604_v16  ;;  %v5743_v53 = vmul.f32 %v5604_v16, %v5517_v56  ;;  %v5763_v56 = vmul.f32 %v5575_v34, %v5527_v61 }
 0x148   : > { %7084 = vst [vmem:[#allocation14_spill] sm:$0xff] %v5570_v32  ;;  %7085 = vst [vmem:[#allocation15_spill] sm:$0xff] %v5572_v33 }
 0x149   : > { %v885_v12 = vpop.f32.mrf.mxu0  ;;  %v998_v18 = vpop.f32.mrf.mxu1  ;;  %7104 = vst [vmem:[#allocation34_spill] sm:$0xff] %v5743_v53  ;;  %7109 = vst [vmem:[#allocation39_spill] sm:$0xff] %v5763_v56 }
 0x14a   : > { %v5583_v39 = vmul.f32 %v5575_v34, %v885_v12  ;;  %v5586_v46 = vmul.f32 %v5577_v35, %v998_v18 }
 0x14b   : > { %v887_v48 = vpop.f32.mrf.mxu0  ;;  %v5591_v49 = vpop.f32.mrf.mxu1 }
 0x14c   : > { %7086 = vst [vmem:[#allocation16_spill] sm:$0xff] %v5583_v39  ;;  %7087 = vst [vmem:[#allocation17_spill] sm:$0xff] %v5586_v46  ;;  %v5594_v33 = vmul.f32 %v5580_v36, %v887_v48 }
 0x14d   : > { %7088 = vst [vmem:[#allocation18_spill] sm:$0xff] %v5591_v49  ;;  %v889_v32 = vpop.f32.mrf.mxu0  ;;  %v1002_v25 = vpop.f32.mrf.mxu1 }
 0x14e   : > { %7089 = vst [vmem:[#allocation19_spill] sm:$0xff] %v5594_v33  ;;  %v5597_v12 = vmul.f32 %v5575_v34, %v889_v32  ;;  %v5600_v18 = vmul.f32 %v5577_v35, %v1002_v25  ;;  %v5610_v33 = vrot.slane %v1714_v21, %v5559_v17  ;;  %v5618_v25 = vrot.slane %v1714_v21, %v1639_v19 }
 0x14f   : > { %v891_v46 = vpop.f32.mrf.mxu0  ;;  %v5602_v39 = vpop.f32.mrf.mxu1  ;;  %v5639_v19 = vmul.f32 %v5604_v16, %v5441_v28  ;;  %v5661_v28 = vmul.f32 %v5604_v16, %v5461_v38 }
 0x150   : > { %7090 = vst [vmem:[#allocation20_spill] sm:$0xff] %v5597_v12  ;;  %7091 = vst [vmem:[#allocation21_spill] sm:$0xff] %v5600_v18  ;;  %v5607_v49 = vmul.f32 %v5580_v36, %v891_v46  ;;  %v5629_v46 = vmul.f32 %v5577_v35, %v5431_v23 }
 0x151   : > { %7092 = vst [vmem:[#allocation22_spill] sm:$0xff] %v5602_v39  ;;  %v895_v11 = vpop.f32.mrf.mxu0  ;;  %v1008_v48 = vpop.f32.mrf.mxu1  ;;  %v5621_v39 = vrot.slane %v1714_v21, %v5568_v26 }
 0x152   : > { %7094 = vst [vmem:[#allocation24_spill] sm:$0xff] %v5607_v49  ;;  %v5613_v47 = vmul.f32 %v5575_v34, %v895_v11  ;;  %v5616_v32 = vmul.f32 %v5577_v35, %v1008_v48  ;;  %v5633_v11 = vmul.f32 %v5580_v36, %v5439_v27  ;;  %v5653_v27 = vmul.f32 %v5577_v35, %v5445_v31 }
 0x153   : > { %v897_v17 = vpop.f32.mrf.mxu0  ;;  %v1010_v48 = vpop.f32.mrf.mxu1  ;;  %v5673_v31 = vmul.f32 %v5580_v36, %v5473_v24  ;;  %v5695_v24 = vmul.f32 %v5580_v36, %v5487_v42  ;;  %v5713_v42 = vmul.f32 %v5577_v35, %v5493_v45  ;;  %v5733_v45 = vmul.f32 %v5580_v36, %v5515_v55 }
 0x154   : > { %7095 = vst [vmem:[#allocation25_spill] sm:$0xff] %v5613_v47  ;;  %7096 = vst [vmem:[#allocation26_spill] sm:$0xff] %v5616_v32  ;;  %v5635_v32 = vrot.slane %v1714_v21, %v1643_v5  ;;  %v5646_v26 = vmul.f32 %v5580_v36, %v897_v17  ;;  %v5649_v23 = vmul.f32 %v5604_v16, %v1010_v48 }
 0x155   : > { %v5657_v21 = vmul.f32 %v5580_v36, %v5459_v37  ;;  %v899_v17 = vpop.f32.mrf.mxu0  ;;  %v1012_v5 = vpop.f32.mrf.mxu1  ;;  %v5669_v48 = vmul.f32 %v5577_v35, %v5465_v7  ;;  %v5691_v7 = vmul.f32 %v5577_v35, %v5485_v41  ;;  %7103 = vst [vmem:[#allocation33_spill] sm:$0xff] %v5733_v45  ;;  %v5755_v55 = vmul.f32 %v5580_v36, %v5523_v59  ;;  %v7131_v45 = vld [vmem:[#allocation15_spill] sm:$0xff] }
 0x156   : > { %7097 = vst [vmem:[#allocation27_spill] sm:$0xff] %v5646_v26  ;;  %7098 = vst [vmem:[#allocation28_spill] sm:$0xff] %v5649_v23  ;;  %v5676_v37 = vmul.f32 %v5575_v34, %v899_v17  ;;  %v5679_v38 = vmul.f32 %v5577_v35, %v1012_v5  ;;  %v5687_v23 = vmul.f32 %v5575_v34, %v5483_v40 }
 0x157   : > { %v901_v17 = vpop.f32.mrf.mxu0  ;;  %v1014_v26 = vpop.f32.mrf.mxu1  ;;  %v5699_v5 = vmul.f32 %v5604_v16, %v5489_v43  ;;  %v5721_v43 = vmul.f32 %v5604_v16, %v5509_v52  ;;  %7107 = vst [vmem:[#allocation37_spill] sm:$0xff] %v5755_v55  ;;  %v5773_v59 = vmul.f32 %v5580_v36, %v5531_v63  ;;  %v5789_v63 = vmul.f32 %v5604_v16, %v5533_v0 }
 0x158   : > { %7099 = vst [vmem:[#allocation29_spill] sm:$0xff] %v5676_v37  ;;  %7100 = vst [vmem:[#allocation30_spill] sm:$0xff] %v5679_v38  ;;  %v5706_v40 = vmul.f32 %v5580_v36, %v901_v17  ;;  %v5709_v41 = vmul.f32 %v5604_v16, %v1014_v26  ;;  %v5717_v38 = vmul.f32 %v5580_v36, %v5507_v51 }
 0x159   : > { %v1435_v17 = vpop.f32.mrf.mxu0  ;;  %v5729_v26 = vmul.f32 %v5577_v35, %v5513_v54  ;;  %v5751_v54 = vmul.f32 %v5577_v35, %v5521_v58  ;;  %v5769_v58 = vmul.f32 %v5577_v35, %v5529_v62  ;;  %7111 = vst [vmem:[#allocation41_spill] sm:$0xff] %v5773_v59  ;;  %7112 = vst [vmem:[#allocation42_spill] sm:$0xff] %v5789_v63 }
 0x15a   : > { %7101 = vst [vmem:[#allocation31_spill] sm:$0xff] %v5706_v40  ;;  %7102 = vst [vmem:[#allocation32_spill] sm:$0xff] %v5709_v41  ;;  %v1548_v40 = vpop.f32.mrf.mxu1  ;;  %v5736_v51 = vmul.f32 %v5610_v33, %v1435_v17  ;;  %v5747_v41 = vmul.f32 %v5575_v34, %v5519_v57  ;;  %v5805_v63 = vmul.f32 %v5580_v36, %v5539_v3 }
 0x15b   : > { %v5739_v52 = vmul.f32 %v5618_v25, %v1548_v40  ;;  %7106 = vst [vmem:[#allocation36_spill] sm:$0xff] %v5751_v54  ;;  %v1437_v17 = vpop.f32.mrf.mxu0  ;;  %v5759_v40 = vmul.f32 %v5604_v16, %v5525_v60  ;;  %7110 = vst [vmem:[#allocation40_spill] sm:$0xff] %v5769_v58 }
 0x15c   : > { %7105 = vst [vmem:[#allocation35_spill] sm:$0xff] %v5747_v41  ;;  %v1550_v37 = vpop.f32.mrf.mxu1  ;;  %v1800_v57 = vsub.f32 0.0, %v5736_v51  ;;  %v5776_v49 = vmul.f32 %v5621_v39, %v1437_v17  ;;  %v5793_v17 = vmul.f32 %v5575_v34, %v5535_v1  ;;  %7115 = vst [vmem:[#allocation45_spill] sm:$0xff] %v5805_v63 }
 0x15d   : > { %7108 = vst [vmem:[#allocation38_spill] sm:$0xff] %v5759_v40  ;;  %v1802_v47 = vsub.f32 0.0, %v5739_v52  ;;  %v5779_v60 = vmul.f32 %v5635_v32, %v1550_v37  ;;  %v1439_v61 = vpop.f32.mrf.mxu0 }
 0x15e   : > { %v1552_v18 = vpop.f32.mrf.mxu1  ;;  %v1864_v12 = vmul.f32 1.442695, %v1800_v57  ;;  %v5782_v40 = vmul.f32 %v5610_v33, %v1439_v61  ;;  %7113 = vst [vmem:[#allocation43_spill] sm:$0xff] %v5793_v17  ;;  %v1801_v37 = vsub.f32 0.0, %v5776_v49  ;;  %v5799_v61 = vmul.f32 %v5577_v35, %v5537_v2 }
 0x15f   : > { %v1868_v56 = vmul.f32 1.442695, %v1802_v47  ;;  %v5785_v62 = vmul.f32 %v5618_v25, %v1552_v18  ;;  %v1803_v59 = vsub.f32 0.0, %v5779_v60  ;;  %v1441_v57 = vpop.f32.mrf.mxu0 }
 0x160   : > { %v1554_v47 = vpop.f32.mrf.mxu1  ;;  %7114 = vst [vmem:[#allocation44_spill] sm:$0xff] %v5799_v61  ;;  %4231 = vpow2.f32 %v1864_v12  ;;  %v1804_v18 = vsub.f32 0.0, %v5782_v40  ;;  %v1866_v1 = vmul.f32 1.442695, %v1801_v37  ;;  %v5808_v53 = vmul.f32 %v5621_v39, %v1441_v57  ;;  %v7127_v61 = vld [vmem:[#allocation12_spill] sm:$0xff] }
 0x161   : > { %v1806_v0 = vsub.f32 0.0, %v5785_v62  ;;  %4233 = vpow2.f32 %v1868_v56  ;;  %v1870_v17 = vmul.f32 1.442695, %v1803_v59  ;;  %v1445_v58 = vpop.f32.mrf.mxu0  ;;  %v5811_v2 = vmul.f32 %v5635_v32, %v1554_v47 }
 0x162   : > { %v1558_v55 = vpop.f32.mrf.mxu1  ;;  %v1872_v54 = vmul.f32 1.442695, %v1804_v18  ;;  %v5815_v12 = vmul.f32 %v5604_v16, %v5541_v4  ;;  %4235 = vpow2.f32 %v1866_v1  ;;  %v5818_v3 = vmul.f32 %v5610_v33, %v1445_v58 }
 0x163   : > { %v1876_v41 = vmul.f32 1.442695, %v1806_v0  ;;  %v5821_v56 = vmul.f32 %v5618_v25, %v1558_v55  ;;  %v1447_v59 = vpop.f32.mrf.mxu0  ;;  %v5825_v57 = vmul.f32 %v5575_v34, %v5543_v6  ;;  %4237 = vpow2.f32 %v1870_v17 }
 0x164   : > { %7116 = vst [vmem:[#allocation46_spill] sm:$0xff] %v5815_v12  ;;  %v1560_v37 = vpop.f32.mrf.mxu1  ;;  %v1805_v47 = vsub.f32 0.0, %v5808_v53  ;;  %v1807_v18 = vsub.f32 0.0, %v5811_v2  ;;  %v5831_v4 = vmul.f32 %v5577_v35, %v5545_v8  ;;  %v5835_v58 = vmul.f32 %v5580_v36, %v5547_v9 }
 0x165   : > { %7117 = vst [vmem:[#allocation47_spill] sm:$0xff] %v5825_v57  ;;  %4239 = vpow2.f32 %v1872_v54  ;;  %v1808_v55 = vsub.f32 0.0, %v5818_v3  ;;  %v1449_v0 = vpop.f32.mrf.mxu0  ;;  %v1810_v57 = vsub.f32 0.0, %v5821_v56  ;;  %v5841_v12 = vmul.f32 %v5604_v16, %v5549_v10 }
 0x166   : > { %7118 = vst [vmem:[#allocation48_spill] sm:$0xff] %v5831_v4  ;;  %7119 = vst [vmem:[#allocation49_spill] sm:$0xff] %v5835_v58  ;;  %v1562_v1 = vpop.f32.mrf.mxu1  ;;  %4241 = vpow2.f32 %v1876_v41  ;;  %v1874_v6 = vmul.f32 1.442695, %v1805_v47  ;;  %v1878_v17 = vmul.f32 1.442695, %v1807_v18  ;;  %v5844_v4 = vmul.f32 %v5621_v39, %v1447_v59 }
 0x167   : > { %7120 = vst [vmem:[#allocation50_spill] sm:$0xff] %v5841_v12  ;;  %v1880_v8 = vmul.f32 1.442695, %v1808_v55  ;;  %v5847_v9 = vmul.f32 %v5635_v32, %v1560_v37  ;;  %v1451_v54 = vpop.f32.mrf.mxu0  ;;  %v1884_v63 = vmul.f32 1.442695, %v1810_v57  ;;  %v5850_v41 = vmul.f32 %v5610_v33, %v1449_v0 }
 0x168   : > { %v1564_v58 = vpop.f32.mrf.mxu1  ;;  %4243 = vpow2.f32 %v1874_v6  ;;  %v5853_v47 = vmul.f32 %v5618_v25, %v1562_v1  ;;  %v5857_v10 = vmul.f32 %v5575_v34, %v5551_v13  ;;  %v1809_v59 = vsub.f32 0.0, %v5844_v4 }
 0x169   : > { %4245 = vpow2.f32 %v1878_v17  ;;  %v1811_v37 = vsub.f32 0.0, %v5847_v9  ;;  %v5863_v18 = vmul.f32 %v5577_v35, %v5553_v14  ;;  %v5867_v57 = vmul.f32 %v5580_v36, %v5555_v15  ;;  %v1455_v0 = vpop.f32.mrf.mxu0  ;;  %v7125_v14 = vld [vmem:[#allocation11_spill] sm:$0xff] }
 0x16a   : > { %7121 = vst [vmem:[#allocation51_spill] sm:$0xff] %v5857_v10  ;;  %4247 = vpow2.f32 %v1880_v8  ;;  %v1812_v55 = vsub.f32 0.0, %v5850_v41  ;;  %v1882_v13 = vmul.f32 1.442695, %v1809_v59  ;;  %v1814_v6 = vsub.f32 0.0, %v5853_v47  ;;  %v1568_v17 = vpop.f32.mrf.mxu1  ;;  %v7124_v10 = vld [vmem:[#allocation9_spill] sm:$0xff] }
 0x16b   : > { %7122 = vst [vmem:[#allocation52_spill] sm:$0xff] %v5863_v18  ;;  %7123 = vst [vmem:[#allocation53_spill] sm:$0xff] %v5867_v57  ;;  %4249 = vpow2.f32 %v1884_v63  ;;  %v1886_v1 = vmul.f32 1.442695, %v1811_v37  ;;  %v5873_v12 = vmul.f32 %v5604_v16, %v7124_v10  ;;  %v5877_v18 = vmul.f32 %v5575_v34, %v7125_v14  ;;  %v7129_v59 = vld [vmem:[#allocation14_spill] sm:$0xff] }
 0x16c   : > { %v1888_v15 = vmul.f32 1.442695, %v1812_v55  ;;  %v5880_v8 = vmul.f32 %v5621_v39, %v1451_v54  ;;  %v5884_v63 = vmul.f32 %v5577_v35, %v7127_v61  ;;  %v5888_v37 = vmul.f32 %v5580_v36, %v7129_v59 }
 0x16d   : > { %7126 = vst [vmem:[#allocation9_spill] sm:$0xff] %v5877_v18  ;;  %v4232_v57 = vpop.eup %4231  ;;  %v5892_v10 = vmul.f32 %v5604_v16, %v7131_v45  ;;  %4251 = vpow2.f32 %v1882_v13  ;;  %v5896_v54 = vmul.f32 %v5736_v51, %v5625_v20  ;;  %v1892_v55 = vmul.f32 1.442695, %v1814_v6  ;;  %v1457_v18 = vpop.f32.mrf.mxu0 }
 0x16e   : > { %7128 = vst [vmem:[#allocation11_spill] sm:$0xff] %v5884_v63  ;;  %7130 = vst [vmem:[#allocation12_spill] sm:$0xff] %v5888_v37  ;;  %v4234_v34 = vpop.eup %4233  ;;  %v1992_v14 = vadd.f32 1.0, %v4232_v57  ;;  %4253 = vpow2.f32 %v1886_v1  ;;  %v5900_v61 = vmul.f32 %v5739_v52, %v5629_v46  ;;  %v1813_v36 = vsub.f32 0.0, %v5880_v8  ;;  %v1570_v45 = vpop.f32.mrf.mxu1 }
 0x16f   : > { %7132 = vst [vmem:[#allocation14_spill] sm:$0xff] %v5892_v10  ;;  %v1994_v35 = vadd.f32 1.0, %v4234_v34  ;;  %4255 = vpow2.f32 %v1888_v15  ;;  %v4236_v59 = vpop.eup %4235  ;;  %v5905_v57 = vmul.f32 %v5776_v49, %v5633_v11  ;;  %v5909_v20 = vmul.f32 %v5779_v60, %v5639_v19 }
 0x170   : > { %4257 = vrcp.f32 %v1992_v14  ;;  %v5912_v51 = vmul.f32 %v5635_v32, %v1564_v58  ;;  %v4238_v13 = vpop.eup %4237  ;;  %v1993_v46 = vadd.f32 1.0, %v4236_v59  ;;  %v5916_v52 = vmul.f32 %v5782_v40, %v5643_v22  ;;  %v1459_v58 = vpop.f32.mrf.mxu0 }
 0x171   : > { %4259 = vrcp.f32 %v1994_v35  ;;  %v5920_v1 = vmul.f32 %v5785_v62, %v5653_v27  ;;  %v1995_v11 = vadd.f32 1.0, %v4238_v13  ;;  %v5924_v19 = vmul.f32 %v5808_v53, %v5657_v21  ;;  %v1572_v40 = vpop.f32.mrf.mxu1 }
 0x172   : > { %v4240_v49 = vpop.eup %4239  ;;  %4261 = vpow2.f32 %v1892_v55  ;;  %v5927_v60 = vmul.f32 %v5610_v33, %v1455_v0  ;;  %v5931_v22 = vmul.f32 %v5811_v2, %v5661_v28  ;;  %v1890_v27 = vmul.f32 1.442695, %v1813_v36  ;;  %v1461_v36 = vpop.f32.mrf.mxu0 }
 0x173   : > { %v4242_v6 = vpop.eup %4241  ;;  %4263 = vrcp.f32 %v1993_v46  ;;  %v1996_v15 = vadd.f32 1.0, %v4240_v49  ;;  %v1815_v34 = vsub.f32 0.0, %v5912_v51  ;;  %v5935_v21 = vmul.f32 %v5618_v25, %v1568_v17 }
 0x174   : > { %4265 = vrcp.f32 %v1995_v11  ;;  %v1998_v62 = vadd.f32 1.0, %v4242_v6  ;;  %v5939_v0 = vmul.f32 %v5818_v3, %v5665_v29  ;;  %v5943_v14 = vmul.f32 %v5821_v56, %v5669_v48 }
 0x175   : > { %v4244_v53 = vpop.eup %4243  ;;  %4267 = vrcp.f32 %v1996_v15  ;;  %v5947_v28 = vmul.f32 %v5844_v4, %v5673_v31  ;;  %v1816_v17 = vsub.f32 0.0, %v5927_v60  ;;  %v5951_v35 = vmul.f32 %v5621_v39, %v1457_v18  ;;  %v1574_v31 = vpop.f32.mrf.mxu1 }
 0x176   : > { %v4246_v2 = vpop.eup %4245  ;;  %4269 = vrcp.f32 %v1998_v62  ;;  %v1997_v55 = vadd.f32 1.0, %v4244_v53  ;;  %v5955_v3 = vmul.f32 %v5847_v9, %v5683_v50  ;;  %v5958_v48 = vmul.f32 %v5635_v32, %v1570_v45  ;;  %v1465_v15 = vpop.f32.mrf.mxu0 }
 0x177   : > { %v4248_v59 = vpop.eup %4247  ;;  %v1999_v29 = vadd.f32 1.0, %v4246_v2  ;;  %4271 = vpow2.f32 %v1890_v27  ;;  %v1894_v13 = vmul.f32 1.442695, %v1815_v34  ;;  %v1818_v46 = vsub.f32 0.0, %v5935_v21 }
 0x178   : > { %v4250_v56 = vpop.eup %4249  ;;  %4273 = vrcp.f32 %v1997_v55  ;;  %v2000_v4 = vadd.f32 1.0, %v4248_v59  ;;  %v5962_v49 = vmul.f32 %v5610_v33, %v1459_v58  ;;  %v5965_v11 = vmul.f32 %v5618_v25, %v1572_v40  ;;  %v1578_v40 = vpop.f32.mrf.mxu1 }
 0x179   : > { %4275 = vrcp.f32 %v1999_v29  ;;  %v2002_v18 = vadd.f32 1.0, %v4250_v56  ;;  %v5969_v9 = vmul.f32 %v5850_v41, %v5687_v23  ;;  %v1896_v45 = vmul.f32 1.442695, %v1816_v17 }
 0x17a   : > { %v4252_v50 = vpop.eup %4251  ;;  %4277 = vrcp.f32 %v2000_v4  ;;  %v1817_v6 = vsub.f32 0.0, %v5951_v35  ;;  %v1819_v34 = vsub.f32 0.0, %v5958_v48  ;;  %v5974_v58 = vmul.f32 %v5621_v39, %v1461_v36 }
 0x17b   : > { %v4254_v27 = vpop.eup %4253  ;;  %4279 = vrcp.f32 %v2002_v18  ;;  %v2001_v62 = vadd.f32 1.0, %v4252_v50  ;;  %v1900_v55 = vmul.f32 1.442695, %v1818_v46  ;;  %v5977_v23 = vmul.f32 %v5635_v32, %v1574_v31 }
 0x17c   : > { %v4256_v53 = vpop.eup %4255  ;;  %v2003_v2 = vadd.f32 1.0, %v4254_v27  ;;  %4281 = vpow2.f32 %v1894_v13  ;;  %v1820_v59 = vsub.f32 0.0, %v5962_v49  ;;  %v1822_v29 = vsub.f32 0.0, %v5965_v11  ;;  %v1467_v13 = vpop.f32.mrf.mxu0 }
 0x17d   : > { %v4258_v41 = vpop.eup %4257  ;;  %4283 = vrcp.f32 %v2001_v62  ;;  %v2004_v17 = vadd.f32 1.0, %v4256_v53  ;;  %v5983_v36 = vmul.f32 %v5853_v47, %v5691_v7  ;;  %v5987_v4 = vmul.f32 %v5880_v8, %v5695_v24  ;;  %v1580_v62 = vpop.f32.mrf.mxu1 }
 0x17e   : > { %v4260_v56 = vpop.eup %4259  ;;  %4285 = vrcp.f32 %v2003_v2  ;;  %v5990_v31 = vmul.f32 %v5610_v33, %v1465_v15  ;;  %v1898_v18 = vmul.f32 1.442695, %v1817_v6  ;;  %v1902_v50 = vmul.f32 1.442695, %v1819_v34 }
 0x17f   : > { %v4262_v46 = vpop.eup %4261  ;;  %4287 = vrcp.f32 %v2004_v17  ;;  %v1821_v27 = vsub.f32 0.0, %v5974_v58  ;;  %v1823_v7 = vsub.f32 0.0, %v5977_v23  ;;  %v5997_v24 = vmul.f32 %v5618_v25, %v1578_v40  ;;  %v1469_v40 = vpop.f32.mrf.mxu0 }
 0x180   : > { %v5993_v53 = vpop.eup %4263  ;;  %v2006_v2 = vadd.f32 1.0, %v4262_v46  ;;  %4289 = vpow2.f32 %v1896_v45  ;;  %v1904_v8 = vmul.f32 1.442695, %v1820_v59  ;;  %v1908_v15 = vmul.f32 1.442695, %v1822_v29  ;;  %v1582_v29 = vpop.f32.mrf.mxu1 }
 0x181   : > { %v5999_v47 = vpop.eup %4265  ;;  %4291 = vpow2.f32 %v1900_v55  ;;  %v6002_v6 = vmul.f32 %v5621_v39, %v1467_v13  ;;  %v6005_v17 = vmul.f32 %v4258_v41, %v5896_v54  ;;  %v1824_v45 = vsub.f32 0.0, %v5990_v31 }
 0x182   : > { %v4268_v34 = vpop.eup %4267  ;;  %4293 = vrcp.f32 %v2006_v2  ;;  %v6009_v46 = vmul.f32 %v5635_v32, %v1580_v62  ;;  %v1906_v55 = vmul.f32 1.442695, %v1821_v27  ;;  %v1826_v59 = vsub.f32 0.0, %v5997_v24 }
 0x183   : > { %v4270_v16 = vpop.eup %4269  ;;  %v6012_v10 = vmul.f32 %v4268_v34, %v5916_v52  ;;  %4295 = vpow2.f32 %v1898_v18  ;;  %v6016_v54 = vmul.f32 %v4260_v56, %v5900_v61  ;;  %v1910_v62 = vmul.f32 1.442695, %v1823_v7 }
 0x184   : > { %v4272_v13 = vpop.eup %4271  ;;  %v6019_v41 = vmul.f32 %v4270_v16, %v5920_v1  ;;  %4297 = vpow2.f32 %v1902_v50  ;;  %v1825_v18 = vsub.f32 0.0, %v6002_v6  ;;  %v1912_v61 = vmul.f32 1.442695, %v1824_v45  ;;  %v1471_v16 = vpop.f32.mrf.mxu0 }
 0x185   : > { %v4274_v2 = vpop.eup %4273  ;;  %v2005_v52 = vadd.f32 1.0, %v4272_v13  ;;  %4299 = vpow2.f32 %v1904_v8  ;;  %v1827_v56 = vsub.f32 0.0, %v6009_v46  ;;  %v6029_v50 = vmul.f32 %v5912_v51, %v5699_v5  ;;  %v1584_v13 = vpop.f32.mrf.mxu1 }
 0x186   : > { %v4276_v27 = vpop.eup %4275  ;;  %4301 = vpow2.f32 %v1908_v15  ;;  %v1916_v7 = vmul.f32 1.442695, %v1826_v59  ;;  %v6032_v8 = vmul.f32 %v5610_v33, %v1469_v40  ;;  %v6036_v34 = vmul.f32 %v5927_v60, %v5703_v30 }
 0x187   : > { %v4278_v1 = vpop.eup %4277  ;;  %4303 = vrcp.f32 %v2005_v52  ;;  %v6040_v15 = vmul.f32 %v5935_v21, %v5713_v42  ;;  %v6043_v45 = vmul.f32 %v5618_v25, %v1582_v29  ;;  %v6047_v51 = vmul.f32 %v5951_v35, %v5717_v38  ;;  %v1475_v21 = vpop.f32.mrf.mxu0 }
 0x188   : > { %v4280_v37 = vpop.eup %4279  ;;  %4305 = vpow2.f32 %v1906_v55  ;;  %v1914_v40 = vmul.f32 1.442695, %v1825_v18  ;;  %v1828_v59 = vsub.f32 0.0, %v6032_v8  ;;  %v1918_v60 = vmul.f32 1.442695, %v1827_v56  ;;  %v1588_v35 = vpop.f32.mrf.mxu1  ;;  %v7133_v56 = vld [vmem:[#allocation33_spill] sm:$0xff] }
 0x189   : > { %v4282_v5 = vpop.eup %4281  ;;  %4307 = vpow2.f32 %v1910_v62  ;;  %v1830_v42 = vsub.f32 0.0, %v6043_v45  ;;  %v6053_v29 = vmul.f32 %v5958_v48, %v5721_v43  ;;  %v6056_v38 = vmul.f32 %v5621_v39, %v1471_v16 }
 0x18a   : > { %v4284_v52 = vpop.eup %4283  ;;  %v2007_v30 = vadd.f32 1.0, %v4282_v5  ;;  %4309 = vpow2.f32 %v1912_v61  ;;  %v1920_v63 = vmul.f32 1.442695, %v1828_v59  ;;  %v6062_v18 = vmul.f32 %v5962_v49, %v5725_v44  ;;  %v7135_v59 = vld [vmem:[#allocation35_spill] sm:$0xff] }
 0x18b   : > { %v4286_v55 = vpop.eup %4285  ;;  %4311 = vpow2.f32 %v1916_v7  ;;  %v6066_v61 = vmul.f32 %v5965_v11, %v5729_v26  ;;  %v6070_v43 = vmul.f32 %v5974_v58, %v7133_v56  ;;  %v6074_v16 = vmul.f32 %v5993_v53, %v5905_v57  ;;  %v7134_v7 = vld [vmem:[#allocation34_spill] sm:$0xff]  ;;  %v7136_v56 = vld [vmem:[#allocation36_spill] sm:$0xff] }
 0x18c   : > { %v6058_v62 = vpop.eup %4287  ;;  %4313 = vrcp.f32 %v2007_v30  ;;  %v6078_v5 = vmul.f32 %v5977_v23, %v7134_v7  ;;  %v6082_v44 = vmul.f32 %v5990_v31, %v7135_v59  ;;  %v6086_v49 = vmul.f32 %v5999_v47, %v5909_v20  ;;  %v1477_v30 = vpop.f32.mrf.mxu0  ;;  %v7137_v20 = vld [vmem:[#allocation37_spill] sm:$0xff] }
 0x18d   : > { %v4290_v48 = vpop.eup %4289  ;;  %4315 = vpow2.f32 %v1914_v40  ;;  %v1924_v58 = vmul.f32 1.442695, %v1830_v42  ;;  %v6092_v23 = vmul.f32 %v5997_v24, %v7136_v56  ;;  %v1829_v31 = vsub.f32 0.0, %v6056_v38  ;;  %v1590_v40 = vpop.f32.mrf.mxu1 }
 0x18e   : > { %v4292_v26 = vpop.eup %4291  ;;  %v2008_v11 = vadd.f32 1.0, %v4290_v48  ;;  %4317 = vpow2.f32 %v1918_v60  ;;  %v6096_v59 = vmul.f32 %v4274_v2, %v5924_v19  ;;  %v6100_v47 = vmul.f32 %v6002_v6, %v7137_v20  ;;  %v7138_v48 = vld [vmem:[#allocation38_spill] sm:$0xff] }
 0x18f   : > { %v6088_v57 = vpop.eup %4293  ;;  %v2010_v53 = vadd.f32 1.0, %v4292_v26  ;;  %4319 = vpow2.f32 %v1920_v63  ;;  %v6103_v60 = vmul.f32 %v5635_v32, %v1584_v13  ;;  %v6106_v24 = vmul.f32 %v4276_v27, %v5931_v22  ;;  %v1479_v13 = vpop.f32.mrf.mxu0  ;;  %v7142_v27 = vld [vmem:[#allocation39_spill] sm:$0xff] }
 0x190   : > { %v4296_v7 = vpop.eup %4295  ;;  %4321 = vrcp.f32 %v2008_v11  ;;  %v6110_v26 = vmul.f32 %v6009_v46, %v7138_v48  ;;  %v6113_v2 = vmul.f32 %v4278_v1, %v5939_v0  ;;  %v6116_v6 = vmul.f32 %v4280_v37, %v5943_v14  ;;  %v1592_v46 = vpop.f32.mrf.mxu1 }
 0x191   : > { %v4298_v42 = vpop.eup %4297  ;;  %4323 = vrcp.f32 %v2010_v53  ;;  %v2009_v63 = vadd.f32 1.0, %v4296_v7  ;;  %v6120_v53 = vmul.f32 %v6032_v8, %v7142_v27  ;;  %v1922_v7 = vmul.f32 1.442695, %v1829_v31 }
 0x192   : > { %7139 = vst [vmem:[#allocation15_spill] sm:$0xff] %v6110_v26  ;;  %v4300_v19 = vpop.eup %4299  ;;  %7140 = vst [vmem:[#allocation33_spill] sm:$0xff] %v6113_v2  ;;  %v2011_v11 = vadd.f32 1.0, %v4298_v42  ;;  %4325 = vpow2.f32 %v1924_v58  ;;  %v1831_v1 = vsub.f32 0.0, %v6103_v60  ;;  %v6126_v37 = vmul.f32 %v5610_v33, %v1475_v21  ;;  %v7145_v42 = vld [vmem:[#allocation40_spill] sm:$0xff] }
 0x193   : > { %7141 = vst [vmem:[#allocation34_spill] sm:$0xff] %v6116_v6  ;;  %v4302_v56 = vpop.eup %4301  ;;  %4327 = vrcp.f32 %v2009_v63  ;;  %v2012_v22 = vadd.f32 1.0, %v4300_v19  ;;  %7143 = vst [vmem:[#allocation35_spill] sm:$0xff] %v6120_v53  ;;  %v6129_v58 = vmul.f32 %v4284_v52, %v5947_v28  ;;  %v6133_v8 = vmul.f32 %v6043_v45, %v7145_v42 }
 0x194   : > { %v6122_v20 = vpop.eup %4303  ;;  %4329 = vrcp.f32 %v2011_v11  ;;  %v2014_v0 = vadd.f32 1.0, %v4302_v56  ;;  %v6136_v31 = vmul.f32 %v5618_v25, %v1588_v35  ;;  %v6139_v48 = vmul.f32 %v4286_v55, %v5955_v3  ;;  %v1481_v11 = vpop.f32.mrf.mxu0  ;;  %v7148_v56 = vld [vmem:[#allocation41_spill] sm:$0xff] }
 0x195   : > { %v4306_v14 = vpop.eup %4305  ;;  %7144 = vst [vmem:[#allocation36_spill] sm:$0xff] %v6129_v58  ;;  %4331 = vrcp.f32 %v2012_v22  ;;  %7146 = vst [vmem:[#allocation37_spill] sm:$0xff] %v6133_v8  ;;  %v6142_v21 = vmul.f32 %v5621_v39, %v1477_v30  ;;  %v6146_v45 = vmul.f32 %v6056_v38, %v7148_v56  ;;  %v6149_v35 = vmul.f32 %v5635_v32, %v1590_v40  ;;  %v1594_v22 = vpop.f32.mrf.mxu1 }
 0x196   : > { %v4308_v63 = vpop.eup %4307  ;;  %7147 = vst [vmem:[#allocation38_spill] sm:$0xff] %v6139_v48  ;;  %4333 = vrcp.f32 %v2014_v0  ;;  %v2013_v19 = vadd.f32 1.0, %v4306_v14  ;;  %v1926_v55 = vmul.f32 1.442695, %v1831_v1  ;;  %v1832_v0 = vsub.f32 0.0, %v6126_v37 }
 0x197   : > { %v4310_v28 = vpop.eup %4309  ;;  %v2015_v52 = vadd.f32 1.0, %v4308_v63  ;;  %4335 = vpow2.f32 %v1922_v7  ;;  %7149 = vst [vmem:[#allocation39_spill] sm:$0xff] %v6146_v45  ;;  %v1834_v7 = vsub.f32 0.0, %v6136_v31  ;;  %v6156_v42 = vmul.f32 %v5610_v33, %v1479_v13 }
 0x198   : > { %v4312_v27 = vpop.eup %4311  ;;  %4337 = vrcp.f32 %v2013_v19  ;;  %v2016_v3 = vadd.f32 1.0, %v4310_v28  ;;  %v6160_v40 = vmul.f32 %v6058_v62, %v5969_v9  ;;  %v1833_v63 = vsub.f32 0.0, %v6142_v21  ;;  %v1485_v19 = vpop.f32.mrf.mxu0 }
 0x199   : > { %v6152_v30 = vpop.eup %4313  ;;  %4339 = vrcp.f32 %v2015_v52  ;;  %v2018_v14 = vadd.f32 1.0, %v4312_v27  ;;  %v6164_v1 = vmul.f32 %v5618_v25, %v1592_v46  ;;  %v1835_v56 = vsub.f32 0.0, %v6149_v35  ;;  %v1598_v27 = vpop.f32.mrf.mxu1 }
 0x19a   : > { %v4316_v38 = vpop.eup %4315  ;;  %7150 = vst [vmem:[#allocation40_spill] sm:$0xff] %v6160_v40  ;;  %4341 = vrcp.f32 %v2016_v3  ;;  %v6168_v13 = vmul.f32 %v5621_v39, %v1481_v11  ;;  %v1928_v9 = vmul.f32 1.442695, %v1832_v0  ;;  %v6171_v62 = vmul.f32 %v5635_v32, %v1594_v22  ;;  %v7151_v11 = vld [vmem:[#allocation42_spill] sm:$0xff]  ;;  %v1487_v0 = vpop.f32.mrf.mxu0 }
 0x19b   : > { %v4318_v28 = vpop.eup %4317  ;;  %4343 = vrcp.f32 %v2018_v14  ;;  %v2017_v52 = vadd.f32 1.0, %v4316_v38  ;;  %v1932_v8 = vmul.f32 1.442695, %v1834_v7  ;;  %v1836_v14 = vsub.f32 0.0, %v6156_v42  ;;  %v1600_v7 = vpop.f32.mrf.mxu1 }
 0x19c   : > { %v4320_v6 = vpop.eup %4319  ;;  %v2019_v45 = vadd.f32 1.0, %v4318_v28  ;;  %4345 = vpow2.f32 %v1926_v55  ;;  %v6180_v40 = vmul.f32 %v6103_v60, %v7151_v11  ;;  %v1930_v28 = vmul.f32 1.442695, %v1833_v63 }
 0x19d   : > { %v6173_v3 = vpop.eup %4321  ;;  %4347 = vrcp.f32 %v2017_v52  ;;  %v2020_v46 = vadd.f32 1.0, %v4320_v6  ;;  %v1838_v55 = vsub.f32 0.0, %v6164_v1  ;;  %v1934_v2 = vmul.f32 1.442695, %v1835_v56 }
 0x19e   : > { %v6176_v38 = vpop.eup %4323  ;;  %4349 = vrcp.f32 %v2019_v45  ;;  %7152 = vst [vmem:[#allocation41_spill] sm:$0xff] %v6180_v40  ;;  %v1837_v52 = vsub.f32 0.0, %v6168_v13  ;;  %v6185_v6 = vmul.f32 %v5610_v33, %v1485_v19  ;;  %v1839_v60 = vsub.f32 0.0, %v6171_v62 }
 0x19f   : > { %v4326_v22 = vpop.eup %4325  ;;  %4351 = vrcp.f32 %v2020_v46  ;;  %v6191_v63 = vmul.f32 %v5618_v25, %v1598_v27  ;;  %v6197_v56 = vmul.f32 %v6088_v57, %v5983_v36  ;;  %v1936_v46 = vmul.f32 1.442695, %v1836_v14  ;;  %v7156_v57 = vld [vmem:[#allocation44_spill] sm:$0xff] }
 0x1a0   : > { %v6187_v48 = vpop.eup %4327  ;;  %v2022_v45 = vadd.f32 1.0, %v4326_v22  ;;  %4353 = vpow2.f32 %v1928_v9  ;;  %v6200_v19 = vmul.f32 %v5621_v39, %v1487_v0  ;;  %v7154_v9 = vld [vmem:[#allocation43_spill] sm:$0xff]  ;;  %v1940_v27 = vmul.f32 1.442695, %v1838_v55  ;;  %v1489_v0 = vpop.f32.mrf.mxu0 }
 0x1a1   : > { %v6193_v11 = vpop.eup %4329  ;;  %7153 = vst [vmem:[#allocation42_spill] sm:$0xff] %v6197_v56  ;;  %4355 = vpow2.f32 %v1932_v8  ;;  %v6206_v22 = vmul.f32 %v6126_v37, %v7154_v9  ;;  %v1840_v53 = vsub.f32 0.0, %v6185_v6  ;;  %v6213_v36 = vmul.f32 %v6122_v20, %v5987_v4  ;;  %v7158_v9 = vld [vmem:[#allocation45_spill] sm:$0xff] }
 0x1a2   : > { %v6202_v40 = vpop.eup %4331  ;;  %4357 = vrcp.f32 %v2022_v45  ;;  %v6217_v8 = vmul.f32 %v6136_v31, %v7156_v57  ;;  %v1842_v14 = vsub.f32 0.0, %v6191_v63  ;;  %v1602_v45 = vpop.f32.mrf.mxu1  ;;  %v6222_v55 = vmul.f32 %v6142_v21, %v7158_v9 }
 0x1a3   : > { %7155 = vst [vmem:[#allocation43_spill] sm:$0xff] %v6206_v22  ;;  %v6209_v26 = vpop.eup %4333  ;;  %4359 = vpow2.f32 %v1930_v28  ;;  %v1938_v22 = vmul.f32 1.442695, %v1837_v52  ;;  %v1942_v56 = vmul.f32 1.442695, %v1839_v60  ;;  %v1841_v20 = vsub.f32 0.0, %v6200_v19  ;;  %v1491_v9 = vpop.f32.mrf.mxu0 }
 0x1a4   : > { %7157 = vst [vmem:[#allocation44_spill] sm:$0xff] %v6217_v8  ;;  %v4336_v37 = vpop.eup %4335  ;;  %7159 = vst [vmem:[#allocation45_spill] sm:$0xff] %v6222_v55  ;;  %4361 = vpow2.f32 %v1934_v2  ;;  %v6228_v31 = vmul.f32 %v5635_v32, %v1600_v7  ;;  %v1944_v57 = vmul.f32 1.442695, %v1840_v53  ;;  %v6233_v8 = vmul.f32 %v5610_v33, %v1489_v0  ;;  %v7160_v52 = vld [vmem:[#allocation46_spill] sm:$0xff] }
 0x1a5   : > { %v6224_v58 = vpop.eup %4337  ;;  %v2021_v4 = vadd.f32 1.0, %v4336_v37  ;;  %4363 = vpow2.f32 %v1936_v46  ;;  %v6236_v2 = vmul.f32 %v5618_v25, %v1602_v45  ;;  %v6242_v60 = vmul.f32 %v6149_v35, %v7160_v52  ;;  %v7164_v35 = vld [vmem:[#allocation48_spill] sm:$0xff]  ;;  %v7165_v52 = vld [vmem:[#allocation49_spill] sm:$0xff] }
 0x1a6   : > { %v6230_v28 = vpop.eup %4339  ;;  %4365 = vpow2.f32 %v1940_v27  ;;  %v1948_v46 = vmul.f32 1.442695, %v1842_v14  ;;  %v1843_v7 = vsub.f32 0.0, %v6228_v31  ;;  %v6249_v53 = vmul.f32 %v6152_v30, %v6029_v50  ;;  %v7162_v27 = vld [vmem:[#allocation47_spill] sm:$0xff] }
 0x1a7   : > { %v6238_v21 = vpop.eup %4341  ;;  %4367 = vrcp.f32 %v2021_v4  ;;  %7161 = vst [vmem:[#allocation46_spill] sm:$0xff] %v6242_v60  ;;  %v6253_v0 = vmul.f32 %v6156_v42, %v7162_v27  ;;  %v1844_v45 = vsub.f32 0.0, %v6233_v8  ;;  %v6258_v14 = vmul.f32 %v6164_v1, %v7164_v35  ;;  %v1604_v27 = vpop.f32.mrf.mxu1 }
 0x1a8   : > { %v6245_v37 = vpop.eup %4343  ;;  %4369 = vpow2.f32 %v1938_v22  ;;  %v6262_v60 = vmul.f32 %v6168_v13, %v7165_v52  ;;  %v1946_v50 = vmul.f32 1.442695, %v1841_v20  ;;  %v1950_v42 = vmul.f32 1.442695, %v1843_v7 }
 0x1a9   : > { %7163 = vst [vmem:[#allocation47_spill] sm:$0xff] %v6253_v0  ;;  %v4346_v4 = vpop.eup %4345  ;;  %4371 = vpow2.f32 %v1942_v56  ;;  %v1846_v22 = vsub.f32 0.0, %v6236_v2  ;;  %v6271_v1 = vmul.f32 %v6173_v3, %v6036_v34  ;;  %v1952_v35 = vmul.f32 1.442695, %v1844_v45  ;;  %v1495_v3 = vpop.f32.mrf.mxu0 }
 0x1aa   : > { %v6264_v30 = vpop.eup %4347  ;;  %v2023_v55 = vadd.f32 1.0, %v4346_v4  ;;  %4373 = vpow2.f32 %v1944_v57  ;;  %v6274_v13 = vmul.f32 %v5621_v39, %v1491_v9  ;;  %v6280_v20 = vmul.f32 %v6176_v38, %v6040_v15  ;;  %v7166_v57 = vld [vmem:[#allocation50_spill] sm:$0xff]  ;;  %v7167_v15 = vld [vmem:[#allocation51_spill] sm:$0xff]  ;;  %v7168_v4 = vld [vmem:[#allocation52_spill] sm:$0xff] }
 0x1ab   : > { %v6267_v0 = vpop.eup %4349  ;;  %4375 = vpow2.f32 %v1948_v46  ;;  %v6284_v7 = vmul.f32 %v6171_v62, %v7166_v57  ;;  %v2313_v34 = vpack.c.bf16 %v6096_v59, %v6074_v16  ;;  %v6290_v45 = vmul.f32 %v6187_v48, %v6047_v51  ;;  %v1608_v51 = vpop.f32.mrf.mxu1 }
 0x1ac   : > { %v6276_v56 = vpop.eup %4351  ;;  %4377 = vrcp.f32 %v2023_v55  ;;  %v6294_v9 = vmul.f32 %v6193_v11, %v6053_v29  ;;  %v6298_v38 = vmul.f32 %v6185_v6, %v7167_v15  ;;  %v6302_v16 = vmul.f32 %v6191_v63, %v7168_v4  ;;  %v7173_v4 = vld [vmem:[#allocation9_spill] sm:$0xff] }
 0x1ad   : > { %v4354_v46 = vpop.eup %4353  ;;  %4379 = vpow2.f32 %v1946_v50  ;;  %v1956_v59 = vmul.f32 1.442695, %v1846_v22  ;;  %2760 = vmatprep.mubr.bf16.mxu0 %v2313_v34  ;;  %v1845_v29 = vsub.f32 0.0, %v6274_v13  ;;  %v2315_v6 = vpack.c.bf16 %v6106_v24, %v6086_v49 }
 0x1ae   : > { %v4356_v62 = vpop.eup %4355  ;;  %v2024_v55 = vadd.f32 1.0, %v4354_v46  ;;  %4381 = vpow2.f32 %v1950_v42  ;;  %v7169_v11 = vpack.c.bf16 %v6012_v10, %v6005_v17  ;;  %v6314_v63 = vmul.f32 %v6202_v40, %v6062_v18  ;;  %v7170_v17 = vld [vmem:[#allocation53_spill] sm:$0xff] }
 0x1af   : > { %v6304_v48 = vpop.eup %4357  ;;  %v2026_v52 = vadd.f32 1.0, %v4356_v62  ;;  %4383 = vpow2.f32 %v1952_v35  ;;  %v6318_v42 = vmul.f32 %v6209_v26, %v6066_v61  ;;  %v6321_v22 = vmul.f32 %v5635_v32, %v1604_v27  ;;  %v1497_v35 = vpop.f32.mrf.mxu0  ;;  %2873 = vmatprep.mubr.bf16.mxu1 %v2315_v6 }
 0x1b0   : > { %2761 = vmatmul.mubr.bf16.vlgmr.msra.gmra.mxu0 %v7169_v11  ;;  %v4360_v50 = vpop.eup %4359  ;;  %4385 = vrcp.f32 %v2024_v55  ;;  %v6325_v49 = vmul.f32 %v6224_v58, %v6070_v43  ;;  %v6329_v18 = vmul.f32 %v6200_v19, %v7170_v17  ;;  %v6333_v61 = vmul.f32 %v6230_v28, %v6078_v5  ;;  %v1610_v58 = vpop.f32.mrf.mxu1 }
 0x1b1   : > { %v4362_v57 = vpop.eup %4361  ;;  %4387 = vrcp.f32 %v2026_v52  ;;  %v2025_v10 = vadd.f32 1.0, %v4360_v50  ;;  %v6336_v40 = vmul.f32 %v5610_v33, %v1495_v3  ;;  %v7171_v43 = vpack.c.bf16 %v6019_v41, %v6016_v54  ;;  %v1499_v54 = vpop.f32.mrf.mxu0 }
 0x1b2   : > { %v4364_v24 = vpop.eup %4363  ;;  %v2027_v26 = vadd.f32 1.0, %v4362_v57  ;;  %4389 = vpow2.f32 %v1956_v59  ;;  %v1954_v34 = vmul.f32 1.442695, %v1845_v29  ;;  %v6342_v46 = vmul.f32 %v5618_v25, %v1608_v51  ;;  %v1612_v29 = vpop.f32.mrf.mxu1 }
 0x1b3   : > { %2874 = vmatmul.mubr.bf16.vlgmr.msra.gmra.mxu1 %v7171_v43  ;;  %v4366_v27 = vpop.eup %4365  ;;  %4391 = vrcp.f32 %v2025_v10  ;;  %v2028_v19 = vadd.f32 1.0, %v4364_v24  ;;  %v6348_v28 = vmul.f32 %v6228_v31, %v5873_v12  ;;  %v1847_v3 = vsub.f32 0.0, %v6321_v22  ;;  %v1501_v57 = vpop.f32.mrf.mxu0  ;;  %v7176_v24 = vld [vmem:[#allocation11_spill] sm:$0xff] }
 0x1b4   : > { %7172 = vst [vmem:[#allocation48_spill] sm:$0xff] %v6342_v46  ;;  %v6344_v15 = vpop.eup %4367  ;;  %4393 = vrcp.f32 %v2027_v26  ;;  %v2030_v5 = vadd.f32 1.0, %v4366_v27  ;;  %v6353_v62 = vmul.f32 %v6238_v21, %v6082_v44  ;;  %v6357_v55 = vmul.f32 %v6245_v37, %v6092_v23 }
 0x1b5   : > { %v4370_v41 = vpop.eup %4369  ;;  %4395 = vrcp.f32 %v2028_v19  ;;  %v6361_v59 = vmul.f32 %v6233_v8, %v7173_v4  ;;  %v1848_v31 = vsub.f32 0.0, %v6336_v40  ;;  %v6365_v52 = vmul.f32 %v5621_v39, %v1497_v35 }
 0x1b6   : > { %v4372_v51 = vpop.eup %4371  ;;  %4397 = vrcp.f32 %v2030_v5  ;;  %v2029_v12 = vadd.f32 1.0, %v4370_v41  ;;  %v1850_v23 = vsub.f32 0.0, %v6342_v46  ;;  %v6369_v37 = vmul.f32 %v5635_v32, %v1610_v58 }
 0x1b7   : > { %7174 = vst [vmem:[#allocation49_spill] sm:$0xff] %v6365_v52  ;;  %v4374_v44 = vpop.eup %4373  ;;  %v2031_v21 = vadd.f32 1.0, %v4372_v51  ;;  %4399 = vpow2.f32 %v1954_v34  ;;  %v1958_v11 = vmul.f32 1.442695, %v1847_v3  ;;  %v6372_v50 = vmul.f32 %v5610_v33, %v1499_v54  ;;  %v1614_v34 = vpop.f32.mrf.mxu1 }
 0x1b8   : > { %7175 = vst [vmem:[#allocation50_spill] sm:$0xff] %v6369_v37  ;;  %v4376_v6 = vpop.eup %4375  ;;  %4401 = vrcp.f32 %v2029_v12  ;;  %v2032_v8 = vadd.f32 1.0, %v4374_v44  ;;  %v6378_v35 = vmul.f32 %v6264_v30, %v6100_v47  ;;  %v6382_v26 = vmul.f32 %v6236_v2, %v7176_v24  ;;  %v1505_v51 = vpop.f32.mrf.mxu0  ;;  %v7180_v44 = vld [vmem:[#allocation36_spill] sm:$0xff] }
 0x1b9   : > { %v6374_v10 = vpop.eup %4377  ;;  %4403 = vrcp.f32 %v2031_v21  ;;  %v2034_v17 = vadd.f32 1.0, %v4376_v6  ;;  %v1960_v58 = vmul.f32 1.442695, %v1848_v31  ;;  %v1849_v27 = vsub.f32 0.0, %v6365_v52  ;;  %v7181_v6 = vld [vmem:[#allocation15_spill] sm:$0xff]  ;;  %v1618_v24 = vpop.f32.mrf.mxu1 }
 0x1ba   : > { %v4380_v43 = vpop.eup %4379  ;;  %4405 = vrcp.f32 %v2032_v8  ;;  %v6386_v19 = vmul.f32 %v5618_v25, %v1612_v29  ;;  %v1964_v47 = vmul.f32 1.442695, %v1850_v23  ;;  %v1851_v30 = vsub.f32 0.0, %v6369_v37 }
 0x1bb   : > { %v4382_v5 = vpop.eup %4381  ;;  %4407 = vrcp.f32 %v2034_v17  ;;  %v2033_v3 = vadd.f32 1.0, %v4380_v43  ;;  %v1852_v2 = vsub.f32 0.0, %v6372_v50  ;;  %v6391_v4 = vmul.f32 %v5621_v39, %v1501_v57 }
 0x1bc   : > { %7177 = vst [vmem:[#allocation51_spill] sm:$0xff] %v6386_v19  ;;  %v4384_v54 = vpop.eup %4383  ;;  %v2035_v41 = vadd.f32 1.0, %v4382_v5  ;;  %4409 = vpow2.f32 %v1958_v11  ;;  %v6396_v29 = vmul.f32 %v5635_v32, %v1614_v34  ;;  %v2317_v21 = vpack.c.bf16 %v6213_v36, %v7180_v44  ;;  %v7182_v11 = vld [vmem:[#allocation35_spill] sm:$0xff]  ;;  %v7183_v34 = vld [vmem:[#allocation12_spill] sm:$0xff] }
 0x1bd   : > { %7178 = vst [vmem:[#allocation52_spill] sm:$0xff] %v6391_v4  ;;  %v6393_v12 = vpop.eup %4385  ;;  %4411 = vrcp.f32 %v2033_v3  ;;  %v2036_v31 = vadd.f32 1.0, %v4384_v54  ;;  %v6402_v8 = vmul.f32 %v6267_v0, %v7181_v6  ;;  %v6406_v57 = vmul.f32 %v6276_v56, %v7182_v11  ;;  %v7184_v56 = vld [vmem:[#allocation38_spill] sm:$0xff]  ;;  %v1507_v6 = vpop.f32.mrf.mxu0 }
 0x1be   : > { %7179 = vst [vmem:[#allocation53_spill] sm:$0xff] %v6396_v29  ;;  %v4388_v23 = vpop.eup %4387  ;;  %4413 = vrcp.f32 %v2035_v41  ;;  %v1854_v17 = vsub.f32 0.0, %v6386_v19  ;;  %v6411_v5 = vmul.f32 %v6274_v13, %v7183_v34  ;;  %v1962_v36 = vmul.f32 1.442695, %v1849_v27  ;;  %2770 = vmatprep.mubr.bf16.mxu0 %v2317_v21  ;;  %v7187_v21 = vld [vmem:[#allocation33_spill] sm:$0xff] }
 0x1bf   : > { %v4390_v43 = vpop.eup %4389  ;;  %4415 = vrcp.f32 %v2036_v31  ;;  %v1966_v3 = vmul.f32 1.442695, %v1851_v30  ;;  %v1853_v44 = vsub.f32 0.0, %v6391_v4  ;;  %v2319_v41 = vpack.c.bf16 %v6249_v53, %v7184_v56  ;;  %v1620_v53 = vpop.f32.mrf.mxu1  ;;  %v7189_v4 = vld [vmem:[#allocation37_spill] sm:$0xff] }
 0x1c0   : > { %v4392_v54 = vpop.eup %4391  ;;  %v2038_v0 = vadd.f32 1.0, %v4390_v43  ;;  %4417 = vpow2.f32 %v1960_v58  ;;  %v1968_v37 = vmul.f32 1.442695, %v1852_v2  ;;  %v1855_v31 = vsub.f32 0.0, %v6396_v29  ;;  %v7188_v43 = vld [vmem:[#allocation40_spill] sm:$0xff]  ;;  %v7190_v2 = vld [vmem:[#allocation14_spill] sm:$0xff]  ;;  %v1509_v29 = vpop.f32.mrf.mxu0 }
 0x1c1   : > { %v4394_v11 = vpop.eup %4393  ;;  %4419 = vpow2.f32 %v1964_v47  ;;  %v6418_v13 = vmul.f32 %v5610_v33, %v1505_v51  ;;  %v1972_v30 = vmul.f32 1.442695, %v1854_v17  ;;  %2883 = vmatprep.mubr.bf16.mxu1 %v2319_v41  ;;  %v6421_v58 = vmul.f32 %v5618_v25, %v1618_v24  ;;  %v7191_v41 = vld [vmem:[#allocation39_spill] sm:$0xff] }
 0x1c2   : > { %v4396_v27 = vpop.eup %4395  ;;  %4421 = vrcp.f32 %v2038_v0  ;;  %v2316_v34 = vpack.c.bf16 %v7188_v43, %v7187_v21  ;;  %v6427_v47 = vmul.f32 %v6304_v48, %v7189_v4  ;;  %v6431_v51 = vmul.f32 %v6321_v22, %v7190_v2  ;;  %v7192_v22 = vld [vmem:[#allocation34_spill] sm:$0xff] }
 0x1c3   : > { %7185 = vst [vmem:[#allocation9_spill] sm:$0xff] %v6418_v13  ;;  %7186 = vst [vmem:[#allocation11_spill] sm:$0xff] %v6421_v58  ;;  %v4398_v56 = vpop.eup %4397  ;;  %4423 = vpow2.f32 %v1962_v36  ;;  %v1856_v17 = vsub.f32 0.0, %v6418_v13  ;;  %v6436_v24 = vmul.f32 %v6344_v15, %v7191_v41  ;;  %v1970_v21 = vmul.f32 1.442695, %v1853_v44  ;;  %v7193_v2 = vld [vmem:[#allocation42_spill] sm:$0xff]  ;;  %v1622_v44 = vpop.f32.mrf.mxu1 }
 0x1c4   : > { %v4400_v0 = vpop.eup %4399  ;;  %4425 = vpow2.f32 %v1966_v3  ;;  %v1858_v43 = vsub.f32 0.0, %v6421_v58  ;;  %2771 = vmatmul.mubr.bf16.gmra.mxu0 %v2316_v34  ;;  %v1974_v52 = vmul.f32 1.442695, %v1855_v31  ;;  %v2318_v36 = vpack.c.bf16 %v7193_v2, %v7192_v22  ;;  %v7194_v13 = vld [vmem:[#allocation41_spill] sm:$0xff]  ;;  %v7196_v22 = vld [vmem:[#allocation43_spill] sm:$0xff] }
 0x1c5   : > { %v4402_v48 = vpop.eup %4401  ;;  %v2037_v4 = vadd.f32 1.0, %v4400_v0  ;;  %4427 = vpow2.f32 %v1968_v37  ;;  %v6443_v46 = vmul.f32 %v6374_v10, %v7194_v13  ;;  %v1976_v15 = vmul.f32 1.442695, %v1856_v17  ;;  %v7197_v13 = vld [vmem:[#allocation44_spill] sm:$0xff] }
 0x1c6   : > { %v4404_v19 = vpop.eup %4403  ;;  %4429 = vpow2.f32 %v1972_v30  ;;  %v6446_v3 = vmul.f32 %v5621_v39, %v1507_v6  ;;  %v1980_v41 = vmul.f32 1.442695, %v1858_v43  ;;  %2884 = vmatmul.mubr.bf16.gmra.mxu1 %v2318_v36  ;;  %v6449_v37 = vmul.f32 %v5635_v32, %v1620_v53  ;;  %v7198_v43 = vld [vmem:[#allocation45_spill] sm:$0xff]  ;;  %v7199_v53 = vld [vmem:[#allocation46_spill] sm:$0xff] }
 0x1c7   : > { %v4406_v34 = vpop.eup %4405  ;;  %4431 = vrcp.f32 %v2037_v4  ;;  %v6452_v31 = vmul.f32 %v5610_v33, %v1509_v29  ;;  %v6456_v10 = vmul.f32 %v6393_v12, %v7196_v22  ;;  %v6459_v30 = vmul.f32 %v4388_v23, %v7197_v13  ;;  %v1511_v22 = vpop.f32.mrf.mxu0 }
 0x1c8   : > { %7195 = vst [vmem:[#allocation36_spill] sm:$0xff] %v6446_v3  ;;  %v4408_v0 = vpop.eup %4407  ;;  %4433 = vpow2.f32 %v1970_v21  ;;  %v1857_v6 = vsub.f32 0.0, %v6446_v3  ;;  %v6463_v4 = vmul.f32 %v4392_v54, %v7198_v43  ;;  %v6466_v2 = vmul.f32 %v4394_v11, %v7199_v53  ;;  %v1624_v21 = vpop.f32.mrf.mxu1  ;;  %v7200_v3 = vld [vmem:[#allocation47_spill] sm:$0xff] }
 0x1c9   : > { %v4410_v17 = vpop.eup %4409  ;;  %4435 = vpow2.f32 %v1974_v52  ;;  %v1859_v33 = vsub.f32 0.0, %v6449_v37  ;;  %v1860_v23 = vsub.f32 0.0, %v6452_v31  ;;  %v6473_v58 = vmul.f32 %v4396_v27, %v7200_v3 }
 0x1ca   : > { %v4412_v29 = vpop.eup %4411  ;;  %v2039_v36 = vadd.f32 1.0, %v4410_v17  ;;  %4437 = vpow2.f32 %v1976_v15  ;;  %v1978_v12 = vmul.f32 1.442695, %v1857_v6  ;;  %v6476_v54 = vmul.f32 %v4398_v56, %v6258_v14 }
 0x1cb   : > { %v6470_v13 = vpop.eup %4413  ;;  %4439 = vpow2.f32 %v1980_v41  ;;  %v1982_v52 = vmul.f32 1.442695, %v1859_v33  ;;  %v6479_v43 = vmul.f32 %v4402_v48, %v6262_v60  ;;  %v1984_v15 = vmul.f32 1.442695, %v1860_v23 }
 0x1cc   : > { %v4416_v11 = vpop.eup %4415  ;;  %4441 = vrcp.f32 %v2039_v36  ;;  %v6482_v6 = vmul.f32 %v5618_v25, %v1622_v44  ;;  %v6485_v53 = vmul.f32 %v4404_v19, %v6284_v7  ;;  %v6488_v27 = vmul.f32 %v5621_v39, %v1511_v22 }
 0x1cd   : > { %v4418_v17 = vpop.eup %4417  ;;  %4443 = vpow2.f32 %v1978_v12  ;;  %v6491_v14 = vmul.f32 %v5635_v32, %v1624_v21  ;;  %v6494_v60 = vmul.f32 %v4406_v34, %v6298_v38  ;;  %v6498_v44 = vmul.f32 %v4408_v0, %v6302_v16 }
 0x1ce   : > { %v4420_v56 = vpop.eup %4419  ;;  %v2040_v48 = vadd.f32 1.0, %v4418_v17  ;;  %4445 = vpow2.f32 %v1982_v52  ;;  %v1862_v25 = vsub.f32 0.0, %v6482_v6  ;;  %v1861_v39 = vsub.f32 0.0, %v6488_v27 }
 0x1cf   : > { %v4422_v3 = vpop.eup %4421  ;;  %v2042_v7 = vadd.f32 1.0, %v4420_v56  ;;  %4447 = vpow2.f32 %v1984_v15  ;;  %v6502_v32 = vmul.f32 %v4412_v29, %v6329_v18  ;;  %v6505_v41 = vmul.f32 %v4416_v11, %v6361_v59 }
 0x1d0   : > { %v4424_v19 = vpop.eup %4423  ;;  %4449 = vrcp.f32 %v2040_v48  ;;  %v1988_v38 = vmul.f32 1.442695, %v1862_v25  ;;  %v6508_v33 = vmul.f32 %v4422_v3, %v6382_v26  ;;  %v1863_v0 = vsub.f32 0.0, %v6491_v14 }
 0x1d1   : > { %v4426_v34 = vpop.eup %4425  ;;  %4451 = vrcp.f32 %v2042_v7  ;;  %v2041_v16 = vadd.f32 1.0, %v4424_v19  ;;  %v1986_v23 = vmul.f32 1.442695, %v1861_v39  ;;  %v2321_v18 = vpack.c.bf16 %v6325_v49, %v6290_v45 }
 0x1d2   : > { %v4428_v36 = vpop.eup %4427  ;;  %v2043_v12 = vadd.f32 1.0, %v4426_v34  ;;  %4453 = vpow2.f32 %v1988_v38  ;;  %v2323_v22 = vpack.c.bf16 %v6333_v61, %v6294_v9  ;;  %v2320_v26 = vpack.c.bf16 %v6314_v63, %v6271_v1 }
 0x1d3   : > { %v4430_v29 = vpop.eup %4429  ;;  %4455 = vrcp.f32 %v2041_v16  ;;  %v2044_v59 = vadd.f32 1.0, %v4428_v36  ;;  %2780 = vmatprep.mubr.bf16.mxu0 %v2321_v18  ;;  %v2322_v11 = vpack.c.bf16 %v6318_v42, %v6280_v20  ;;  %v2325_v15 = vpack.c.bf16 %v6436_v24, %v6378_v35  ;;  %v7204_v36 = vld [vmem:[#allocation23_spill] sm:$0xff]  ;;  %v7206_v18 = vld [vmem:[#allocation48_spill] sm:$0xff] }
 0x1d4   : > { %v4432_v21 = vpop.eup %4431  ;;  %4457 = vrcp.f32 %v2043_v12  ;;  %v2046_v52 = vadd.f32 1.0, %v4430_v29  ;;  %2893 = vmatprep.mubr.bf16.mxu1 %v2323_v22  ;;  %2781 = vmatmul.mubr.bf16.gmra.mxu0 %v2320_v26  ;;  %v2327_v1 = vpack.c.bf16 %v6443_v46, %v6402_v8  ;;  %v2324_v9 = vpack.c.bf16 %v6406_v57, %v6353_v62  ;;  %v7208_v22 = vld [vmem:[#allocation51_spill] sm:$0xff] }
 0x1d5   : > { %v4434_v45 = vpop.eup %4433  ;;  %v6522_v49 = vmul.f32 %v4432_v21, %v6411_v5  ;;  %4459 = vrcp.f32 %v2044_v59  ;;  %2894 = vmatmul.mubr.bf16.gmra.mxu1 %v2322_v11  ;;  %2790 = vmatprep.mubr.bf16.mxu0 %v2325_v15  ;;  %v2326_v20 = vpack.c.bf16 %v6427_v47, %v6357_v55  ;;  %v2329_v42 = vpack.c.bf16 %v6479_v43, %v6463_v4  ;;  %v7207_v59 = vld [vmem:[#allocation21_spill] sm:$0xff]  ;;  %v7210_v15 = vld [vmem:[#allocation19_spill] sm:$0xff] }
 0x1d6   : > { %v4436_v63 = vpop.eup %4435  ;;  %4461 = vrcp.f32 %v2046_v52  ;;  %v2045_v61 = vadd.f32 1.0, %v4434_v45  ;;  %2903 = vmatprep.mubr.bf16.mxu1 %v2327_v1  ;;  %v2331_v46 = vpack.c.bf16 %v6485_v53, %v6466_v2  ;;  %v2328_v62 = vpack.c.bf16 %v6473_v58, %v6456_v10  ;;  %v7209_v52 = vld [vmem:[#allocation22_spill] sm:$0xff]  ;;  %v7211_v45 = vld [vmem:[#allocation49_spill] sm:$0xff] }
 0x1d7   : > { %v4438_v35 = vpop.eup %4437  ;;  %v2047_v5 = vadd.f32 1.0, %v4436_v63  ;;  %4463 = vpow2.f32 %v1986_v23  ;;  %v1990_v57 = vmul.f32 1.442695, %v1863_v0  ;;  %v2330_v24 = vpack.c.bf16 %v6476_v54, %v6459_v30  ;;  %v7203_v0 = vld [vmem:[#allocation18_spill] sm:$0xff]  ;;  %v7205_v23 = vld [vmem:[#allocation17_spill] sm:$0xff] }
 0x1d8   : > { %v4440_v8 = vpop.eup %4439  ;;  %4465 = vrcp.f32 %v2045_v61  ;;  %v2333_v55 = vpack.c.bf16 %v6522_v49, %v6502_v32  ;;  %v2048_v4 = vadd.f32 1.0, %v4438_v35  ;;  %v2332_v43 = vpack.c.bf16 %v6505_v41, %v6494_v60  ;;  %v7202_v32 = vld [vmem:[#allocation20_spill] sm:$0xff]  ;;  %v7212_v63 = vld [vmem:[#allocation50_spill] sm:$0xff]  ;;  %v7222_v60 = vld [vmem:[#allocation27_spill] sm:$0xff] }
 0x1d9   : > { %v4442_v47 = vpop.eup %4441  ;;  %4467 = vrcp.f32 %v2047_v5  ;;  %v2334_v2 = vpack.c.bf16 %v6508_v33, %v6498_v44  ;;  %v2291_v58 = vmul.f32 %v6470_v13, %v6348_v28  ;;  %v2050_v54 = vadd.f32 1.0, %v4440_v8  ;;  %v7214_v35 = vld [vmem:[#allocation52_spill] sm:$0xff]  ;;  %v7215_v8 = vld [vmem:[#allocation53_spill] sm:$0xff] }
 0x1da   : > { %v4444_v17 = vpop.eup %4443  ;;  %v2295_v10 = vmul.f32 %v4442_v47, %v6431_v51  ;;  %4469 = vpow2.f32 %v1990_v57  ;;  %v7201_v51 = vld [vmem:[#allocation16_spill] sm:$0xff]  ;;  %v2236_v38 = vmul.f32 %v6372_v50, %v7202_v32  ;;  %v1700_v12 = vmul.f32 %v7204_v36, %v7203_v0  ;;  %v7216_v32 = vld [vmem:[#allocation25_spill] sm:$0xff] }
 0x1db   : > { %v4446_v53 = vpop.eup %4445  ;;  %4471 = vrcp.f32 %v2048_v4  ;;  %v2232_v19 = vmul.f32 %v6336_v40, %v7201_v51  ;;  %v2049_v34 = vadd.f32 1.0, %v4444_v17  ;;  %v2234_v29 = vmul.f32 %v7206_v18, %v7205_v23  ;;  %v7223_v41 = vld [vmem:[#allocation36_spill] sm:$0xff] }
 0x1dc   : > { %v4448_v30 = vpop.eup %4447  ;;  %v2335_v56 = vpack.c.bf16 %v2295_v10, %v2291_v58  ;;  %2791 = vmatmul.mubr.bf16.gmra.mxu0 %v2324_v9  ;;  %v2238_v26 = vmul.f32 %v7208_v22, %v7207_v59  ;;  %v1704_v11 = vmul.f32 %v7204_v36, %v7209_v52  ;;  %v2233_v50 = vmul.f32 %v7211_v45, %v7210_v15  ;;  %v7221_v36 = vld [vmem:[#allocation30_spill] sm:$0xff]  ;;  %v7226_v15 = vld [vmem:[#allocation32_spill] sm:$0xff] }
 0x1dd   : > { %v4450_v48 = vpop.eup %4449  ;;  %v2052_v25 = vadd.f32 1.0, %v4448_v30  ;;  %2904 = vmatmul.mubr.bf16.gmra.mxu1 %v2326_v20  ;;  %2800 = vmatprep.mubr.bf16.mxu0 %v2329_v42  ;;  %v2235_v61 = vmul.f32 %v7212_v63, %v1700_v12  ;;  %v7213_v42 = vld [vmem:[#allocation24_spill] sm:$0xff]  ;;  %v2051_v30 = vadd.f32 1.0, %v4446_v53  ;;  %v2246_v12 = vmul.f32 %v6482_v6, %v7221_v36 }
 0x1de   : > { %v4452_v3 = vpop.eup %4451  ;;  %2913 = vmatprep.mubr.bf16.mxu1 %v2331_v46  ;;  %v2296_v40 = vmul.f32 %v4450_v48, %v2232_v19  ;;  %v2237_v5 = vmul.f32 %v7214_v35, %v7213_v42  ;;  %v2239_v57 = vmul.f32 %v7215_v8, %v1704_v11  ;;  %v2247_v45 = vmul.f32 %v6491_v14, %v7226_v15 }
 0x1df   : > { %v4454_v7 = vpop.eup %4453  ;;  %4473 = vrcp.f32 %v2052_v25  ;;  %v2298_v9 = vmul.f32 %v4452_v3, %v2234_v29 }
 0x1e0   : > { %v4456_v39 = vpop.eup %4455  ;;  %4475 = vrcp.f32 %v2050_v54  ;;  %v2054_v28 = vadd.f32 1.0, %v4454_v7 }
 0x1e1   : > { %v4458_v13 = vpop.eup %4457  ;;  %v2297_v58 = vmul.f32 %v4456_v39, %v2233_v50 }
 0x1e2   : > { %v4460_v16 = vpop.eup %4459  ;;  %4477 = vrcp.f32 %v2054_v28  ;;  %v2299_v48 = vmul.f32 %v4458_v13, %v2235_v61 }
 0x1e3   : > { %v4462_v21 = vpop.eup %4461  ;;  %v2300_v49 = vmul.f32 %v4460_v16, %v2236_v38  ;;  %4479 = vrcp.f32 %v2049_v34  ;;  %v7218_v34 = vld [vmem:[#allocation29_spill] sm:$0xff]  ;;  %v7220_v16 = vld [vmem:[#allocation11_spill] sm:$0xff] }
 0x1e4   : > { %v4464_v1 = vpop.eup %4463  ;;  %v2302_v20 = vmul.f32 %v4462_v21, %v2238_v26  ;;  %2801 = vmatmul.mubr.bf16.gmra.mxu0 %v2328_v62  ;;  %v7217_v62 = vld [vmem:[#allocation9_spill] sm:$0xff]  ;;  %v2244_v39 = vmul.f32 %v6452_v31, %v7218_v34  ;;  %v7224_v26 = vld [vmem:[#allocation31_spill] sm:$0xff] }
 0x1e5   : > { %v4466_v46 = vpop.eup %4465  ;;  %v2053_v47 = vadd.f32 1.0, %v4464_v1  ;;  %v2336_v4 = vpack.c.bf16 %v2300_v49, %v2296_v40  ;;  %2914 = vmatmul.mubr.bf16.gmra.mxu1 %v2330_v24  ;;  %2810 = vmatprep.mubr.bf16.mxu0 %v2333_v55  ;;  %v2240_v38 = vmul.f32 %v7217_v62, %v7216_v32  ;;  %v2245_v21 = vmul.f32 %v6488_v27, %v7224_v26 }
 0x1e6   : > { %v4468_v17 = vpop.eup %4467  ;;  %v2301_v10 = vmul.f32 %v4466_v46, %v2237_v5  ;;  %v2338_v54 = vpack.c.bf16 %v2302_v20, %v2298_v9  ;;  %2923 = vmatprep.mubr.bf16.mxu1 %v2335_v56  ;;  %v7219_v56 = vld [vmem:[#allocation26_spill] sm:$0xff] }
 0x1e7   : > { %v2303_v25 = vmul.f32 %v4468_v17, %v2239_v57  ;;  %4481 = vrcp.f32 %v2053_v47  ;;  %v4470_v7 = vpop.eup %4469  ;;  %v2242_v0 = vmul.f32 %v7220_v16, %v7219_v56 }
 0x1e8   : > { %v2337_v3 = vpack.c.bf16 %v2301_v10, %v2297_v58  ;;  %v4472_v51 = vpop.eup %4471  ;;  %4483 = vrcp.f32 %v2051_v30  ;;  %v2055_v19 = vadd.f32 1.0, %v4470_v7 }
 0x1e9   : > { %v2339_v28 = vpack.c.bf16 %v2303_v25, %v2299_v48  ;;  %v2304_v55 = vmul.f32 %v4472_v51, %v2240_v38 }
 0x1ea   : > { %4485 = vrcp.f32 %v2055_v19 }
 0x1ec   : > { %v4474_v53 = vpop.eup %4473  ;;  %2811 = vmatmul.mubr.bf16.gmra.mxu0 %v2332_v43  ;;  %v2241_v43 = vmul.f32 %v7223_v41, %v7222_v60 }
 0x1ed   : > { %v4476_v24 = vpop.eup %4475  ;;  %v2308_v13 = vmul.f32 %v4474_v53, %v2244_v39  ;;  %2924 = vmatmul.mubr.bf16.gmra.mxu1 %v2334_v2  ;;  %2820 = vmatprep.mubr.bf16.mxu0 %v2337_v3  ;;  %v7225_v2 = vld [vmem:[#allocation28_spill] sm:$0xff] }
 0x1ee   : > { %2933 = vmatprep.mubr.bf16.mxu1 %v2339_v28  ;;  %v2306_v18 = vmul.f32 %v4476_v24, %v2242_v0  ;;  %v2243_v40 = vmul.f32 %v6449_v37, %v7225_v2 }
 0x1ef   : > { %v4478_v31 = vpop.eup %4477  ;;  %v2340_v23 = vpack.c.bf16 %v2308_v13, %v2304_v55 }
 0x1f0   : > { %v2310_v29 = vmul.f32 %v4478_v31, %v2246_v12  ;;  %v4480_v59 = vpop.eup %4479 }
 0x1f1   : > { %v2305_v6 = vmul.f32 %v4480_v59, %v2241_v43 }
 0x1f2   : > { %v2342_v22 = vpack.c.bf16 %v2310_v29, %v2306_v18 }
 0x1f4   : > { %v4482_v52 = vpop.eup %4481  ;;  %2821 = vmatmul.mubr.bf16.gmra.mxu0 %v2336_v4 }
 0x1f5   : > { %v2309_v11 = vmul.f32 %v4482_v52, %v2245_v21  ;;  %2934 = vmatmul.mubr.bf16.gmra.mxu1 %v2338_v54  ;;  %v4484_v44 = vpop.eup %4483 }
 0x1f6   : > { %v2307_v49 = vmul.f32 %v4484_v44, %v2243_v40 }
 0x1f7   : > { %v2341_v33 = vpack.c.bf16 %v2309_v11, %v2305_v6  ;;  %v4486_v50 = vpop.eup %4485 }
 0x1f8   : > { %v2311_v1 = vmul.f32 %v4486_v50, %v2247_v45 }
 0x1f9   : > { %2830 = vmatprep.mubr.bf16.mxu0 %v2341_v33 }
 0x1fa   : > { %v2343_v9 = vpack.c.bf16 %v2311_v1, %v2307_v49 }
 0x1fc   : > { %2831 = vmatmul.mubr.bf16.gmra.mxu0 %v2340_v23  ;;  %2943 = vmatprep.mubr.bf16.mxu1 %v2343_v9 }
 0x1fd   : > { %2944 = vmatmul.mubr.bf16.gmra.mxu1 %v2342_v22 }
 0x270   : > { %v2762_v27 = vpop.f32.mrf.mxu0 }
 0x272   : > { %v2764_v63 = vpop.f32.mrf.mxu0 }
 0x273   : > { %v2875_v61 = vpop.f32.mrf.mxu1 }
 0x274   : > { %v6587_v20 = vadd.f32 %v2875_v61, %v2762_v27  ;;  %v2766_v42 = vpop.f32.mrf.mxu0 }
 0x275   : > { %v2877_v35 = vpop.f32.mrf.mxu1 }
 0x276   : > { %v6589_v5 = vadd.f32 %v2877_v35, %v2764_v63  ;;  %v2768_v46 = vpop.f32.mrf.mxu0  ;;  %v2954_v8 = vmul.f32 %v6587_v20, %v6587_v20 }
 0x277   : > { %v2879_v37 = vpop.f32.mrf.mxu1 }
 0x278   : > { %v6591_v14 = vadd.f32 %v2879_v37, %v2766_v42  ;;  %v2955_v57 = vmul.f32 %v6589_v5, %v6589_v5 }
 0x279   : > { %v2881_v47 = vpop.f32.mrf.mxu1 }
 0x27a   : > { %v6597_v4 = vadd.f32 %v2881_v47, %v2768_v46  ;;  %v2986_v17 = vadd.f32 %v2955_v57, %v2954_v8  ;;  %v2956_v58 = vmul.f32 %v6591_v14, %v6591_v14 }
 0x27c   : > { %v2957_v10 = vmul.f32 %v6597_v4, %v6597_v4  ;;  %2987 = vadd.xlane.f32.xlu0 %v2986_v17 }
 0x27e   : > { %v2989_v30 = vadd.f32 %v2957_v10, %v2956_v58 }
 0x280   : > { %2990 = vadd.xlane.f32.xlu0 %v2989_v30 }
 0x284   : > { %v2772_v54 = vpop.f32.mrf.mxu0 }
 0x286   : > { %v2774_v48 = vpop.f32.mrf.mxu0  ;;  %v2885_v25 = vpop.f32.mrf.mxu1 }
 0x287   : > { %v6603_v3 = vadd.f32 %v2885_v25, %v2772_v54 }
 0x288   : > { %v2776_v7 = vpop.f32.mrf.mxu0  ;;  %v2887_v28 = vpop.f32.mrf.mxu1 }
 0x289   : > { %v6605_v51 = vadd.f32 %v2887_v28, %v2774_v48  ;;  %v2958_v38 = vmul.f32 %v6603_v3, %v6603_v3 }
 0x28a   : > { %v2889_v19 = vpop.f32.mrf.mxu1  ;;  %v2778_v32 = vpop.f32.mrf.mxu0 }
 0x28b   : > { %v6607_v62 = vadd.f32 %v2889_v19, %v2776_v7  ;;  %v2959_v34 = vmul.f32 %v6605_v51, %v6605_v51 }
 0x28c   : > { %v2891_v39 = vpop.f32.mrf.mxu1 }
 0x28d   : > { %v6613_v53 = vadd.f32 %v2891_v39, %v2778_v32  ;;  %v2992_v24 = vadd.f32 %v2959_v34, %v2958_v38  ;;  %v2960_v55 = vmul.f32 %v6607_v62, %v6607_v62 }
 0x28f   : > { %v2961_v13 = vmul.f32 %v6613_v53, %v6613_v53  ;;  %2993 = vadd.xlane.f32.xlu1 %v2992_v24 }
 0x291   : > { %v2995_v56 = vadd.f32 %v2961_v13, %v2960_v55 }
 0x293   : > { %2996 = vadd.xlane.f32.xlu1 %v2995_v56 }
 0x294   : > { %v2782_v16 = vpop.f32.mrf.mxu0 }
 0x295   : > { %v2895_v0 = vpop.f32.mrf.mxu1 }
 0x296   : > { %v6619_v36 = vadd.f32 %v2895_v0, %v2782_v16  ;;  %v2784_v12 = vpop.f32.mrf.mxu0 }
 0x297   : > { %v2897_v31 = vpop.f32.mrf.mxu1 }
 0x298   : > { %v6621_v23 = vadd.f32 %v2897_v31, %v2784_v12  ;;  %v2786_v18 = vpop.f32.mrf.mxu0  ;;  %v2962_v59 = vmul.f32 %v6619_v36, %v6619_v36 }
 0x299   : > { %v2899_v29 = vpop.f32.mrf.mxu1 }
 0x29a   : > { %v2963_v22 = vmul.f32 %v6621_v23, %v6621_v23  ;;  %v6627_v60 = vadd.f32 %v2899_v29, %v2786_v18  ;;  %v2788_v41 = vpop.f32.mrf.mxu0 }
 0x29b   : > { %v2901_v43 = vpop.f32.mrf.mxu1 }
 0x29c   : > { %v6629_v26 = vadd.f32 %v2901_v43, %v2788_v41  ;;  %v2792_v21 = vpop.f32.mrf.mxu0  ;;  %v2998_v52 = vadd.f32 %v2963_v22, %v2962_v59  ;;  %v2964_v11 = vmul.f32 %v6627_v60, %v6627_v60 }
 0x29d   : > { %v2905_v6 = vpop.f32.mrf.mxu1 }
 0x29e   : > { %v2965_v44 = vmul.f32 %v6629_v26, %v6629_v26  ;;  %v6635_v33 = vadd.f32 %v2905_v6, %v2792_v21  ;;  %2999 = vadd.xlane.f32.xlu0 %v2998_v52  ;;  %v2794_v2 = vpop.f32.mrf.mxu0 }
 0x29f   : > { %v2907_v40 = vpop.f32.mrf.mxu1 }
 0x2a0   : > { %v6637_v15 = vadd.f32 %v2907_v40, %v2794_v2  ;;  %v2796_v45 = vpop.f32.mrf.mxu0  ;;  %v3001_v50 = vadd.f32 %v2965_v44, %v2964_v11  ;;  %v2966_v1 = vmul.f32 %v6635_v33, %v6635_v33 }
 0x2a1   : > { %v2909_v49 = vpop.f32.mrf.mxu1 }
 0x2a2   : > { %v2967_v9 = vmul.f32 %v6637_v15, %v6637_v15  ;;  %v6643_v27 = vadd.f32 %v2909_v49, %v2796_v45  ;;  %3002 = vadd.xlane.f32.xlu1 %v3001_v50  ;;  %v2798_v63 = vpop.f32.mrf.mxu0 }
 0x2a3   : > { %v2911_v61 = vpop.f32.mrf.mxu1 }
 0x2a4   : > { %v6645_v42 = vadd.f32 %v2911_v61, %v2798_v63  ;;  %v2802_v35 = vpop.f32.mrf.mxu0  ;;  %v3004_v37 = vadd.f32 %v2967_v9, %v2966_v1  ;;  %v2968_v8 = vmul.f32 %v6643_v27, %v6643_v27 }
 0x2a5   : > { %v2915_v46 = vpop.f32.mrf.mxu1 }
 0x2a6   : > { %v2969_v57 = vmul.f32 %v6645_v42, %v6645_v42  ;;  %v6651_v47 = vadd.f32 %v2915_v46, %v2802_v35  ;;  %3005 = vadd.xlane.f32.xlu0 %v3004_v37  ;;  %v2804_v17 = vpop.f32.mrf.mxu0 }
 0x2a7   : > { %v2917_v58 = vpop.f32.mrf.mxu1 }
 0x2a8   : > { %v6653_v10 = vadd.f32 %v2917_v58, %v2804_v17  ;;  %v2806_v30 = vpop.f32.mrf.mxu0  ;;  %v3007_v54 = vadd.f32 %v2969_v57, %v2968_v8  ;;  %v2970_v25 = vmul.f32 %v6651_v47, %v6651_v47 }
 0x2a9   : > { %v2919_v48 = vpop.f32.mrf.mxu1 }
 0x2aa   : > { %v2971_v7 = vmul.f32 %v6653_v10, %v6653_v10  ;;  %v6659_v28 = vadd.f32 %v2919_v48, %v2806_v30  ;;  %3008 = vadd.xlane.f32.xlu1 %v3007_v54  ;;  %v2808_v19 = vpop.f32.mrf.mxu0 }
 0x2ab   : > { %v2921_v32 = vpop.f32.mrf.mxu1 }
 0x2ac   : > { %v6661_v38 = vadd.f32 %v2921_v32, %v2808_v19  ;;  %v2812_v34 = vpop.f32.mrf.mxu0  ;;  %v3010_v39 = vadd.f32 %v2971_v7, %v2970_v25  ;;  %v2972_v55 = vmul.f32 %v6659_v28, %v6659_v28 }
 0x2ad   : > { %v2925_v24 = vpop.f32.mrf.mxu1 }
 0x2ae   : > { %v2973_v13 = vmul.f32 %v6661_v38, %v6661_v38  ;;  %v6667_v56 = vadd.f32 %v2925_v24, %v2812_v34  ;;  %3011 = vadd.xlane.f32.xlu0 %v3010_v39  ;;  %v2814_v16 = vpop.f32.mrf.mxu0 }
 0x2af   : > { %v2927_v0 = vpop.f32.mrf.mxu1 }
 0x2b0   : > { %v6669_v12 = vadd.f32 %v2927_v0, %v2814_v16  ;;  %v2816_v31 = vpop.f32.mrf.mxu0  ;;  %v3013_v18 = vadd.f32 %v2973_v13, %v2972_v55  ;;  %v2974_v59 = vmul.f32 %v6667_v56, %v6667_v56 }
 0x2b1   : > { %v2929_v29 = vpop.f32.mrf.mxu1 }
 0x2b2   : > { %v2975_v22 = vmul.f32 %v6669_v12, %v6669_v12  ;;  %v6675_v41 = vadd.f32 %v2929_v29, %v2816_v31  ;;  %3014 = vadd.xlane.f32.xlu1 %v3013_v18  ;;  %v2818_v43 = vpop.f32.mrf.mxu0 }
 0x2b3   : > { %v2931_v21 = vpop.f32.mrf.mxu1 }
 0x2b4   : > { %v6677_v52 = vadd.f32 %v2931_v21, %v2818_v43  ;;  %v2822_v6 = vpop.f32.mrf.mxu0  ;;  %v3016_v11 = vadd.f32 %v2975_v22, %v2974_v59  ;;  %v2976_v2 = vmul.f32 %v6675_v41, %v6675_v41 }
 0x2b5   : > { %v2935_v44 = vpop.f32.mrf.mxu1 }
 0x2b6   : > { %v2977_v40 = vmul.f32 %v6677_v52, %v6677_v52  ;;  %v6683_v45 = vadd.f32 %v2935_v44, %v2822_v6  ;;  %3017 = vadd.xlane.f32.xlu0 %v3016_v11  ;;  %v2824_v50 = vpop.f32.mrf.mxu0 }
 0x2b7   : > { %v2937_v49 = vpop.f32.mrf.mxu1 }
 0x2b8   : > { %v6685_v1 = vadd.f32 %v2937_v49, %v2824_v50  ;;  %v2826_v9 = vpop.f32.mrf.mxu0  ;;  %v3019_v63 = vadd.f32 %v2977_v40, %v2976_v2  ;;  %v2978_v35 = vmul.f32 %v6683_v45, %v6683_v45  ;;  %v3130_v40 = vld [vmem:[%s7054_s6] sm:$0x3] }
 0x2b9   : > { %v2939_v61 = vpop.f32.mrf.mxu1  ;;  %v4551_v50 = vld [vmem:[%s4913_s29] sm:$0xff] }
 0x2ba   : > { %v2979_v37 = vmul.f32 %v6685_v1, %v6685_v1  ;;  %v6691_v46 = vadd.f32 %v2939_v61, %v2826_v9  ;;  %3020 = vadd.xlane.f32.xlu1 %v3019_v63  ;;  %v2828_v8 = vpop.f32.mrf.mxu0  ;;  %v3098_v49 = vunpack.c.l.bf16 %v4551_v50  ;;  %v3099_v9 = vunpack.c.h.bf16 %v4551_v50 }
 0x2bb   : > { %v2941_v57 = vpop.f32.mrf.mxu1 }
 0x2bc   : > { %v6693_v17 = vadd.f32 %v2941_v57, %v2828_v8  ;;  %v2832_v58 = vpop.f32.mrf.mxu0  ;;  %v3022_v30 = vadd.f32 %v2979_v37, %v2978_v35  ;;  %v2980_v54 = vmul.f32 %v6691_v46, %v6691_v46  ;;  %v7227_v37 = vld [vmem:[#allocation10_spill] sm:$0xff]  ;;  %v7228_v57 = vld [vmem:[#allocation13_spill] sm:$0xff] }
 0x2bd   : > { %v2945_v25 = vpop.f32.mrf.mxu1  ;;  %v6722_v8 = vrot.slane %v3130_v40, %v7227_v37 }
 0x2be   : > { %v2981_v48 = vmul.f32 %v6693_v17, %v6693_v17  ;;  %3023 = vadd.xlane.f32.xlu0 %v3022_v30  ;;  %v2834_v7 = vpop.f32.mrf.mxu0  ;;  %v6699_v19 = vadd.f32 %v2945_v25, %v2832_v58  ;;  %v6725_v58 = vrot.slane %v3130_v40, %v7228_v57 }
 0x2bf   : > { %v2947_v32 = vpop.f32.mrf.mxu1 }
 0x2c0   : > { %v2836_v34 = vpop.f32.mrf.mxu0  ;;  %v3025_v39 = vadd.f32 %v2981_v48, %v2980_v54  ;;  %v6701_v24 = vadd.f32 %v2947_v32, %v2834_v7  ;;  %v2982_v16 = vmul.f32 %v6699_v19, %v6699_v19  ;;  %v4552_v48 = vld [vmem:[%s4913_s29 + $0x8] sm:$0xff] }
 0x2c1   : > { %v2949_v55 = vpop.f32.mrf.mxu1  ;;  %v3100_v25 = vunpack.c.l.bf16 %v4552_v48  ;;  %v3101_v7 = vunpack.c.h.bf16 %v4552_v48 }
 0x2c2   : > { %3026 = vadd.xlane.f32.xlu1 %v3025_v39  ;;  %v2838_v13 = vpop.f32.mrf.mxu0  ;;  %v2983_v0 = vmul.f32 %v6701_v24, %v6701_v24  ;;  %v6707_v31 = vadd.f32 %v2949_v55, %v2836_v34 }
 0x2c3   : > { %v2951_v18 = vpop.f32.mrf.mxu1 }
 0x2c4   : > { %v6709_v29 = vadd.f32 %v2951_v18, %v2838_v13  ;;  %v3028_v59 = vadd.f32 %v2983_v0, %v2982_v16  ;;  %v2984_v22 = vmul.f32 %v6707_v31, %v6707_v31 }
 0x2c6   : > { %v2985_v43 = vmul.f32 %v6709_v29, %v6709_v29  ;;  %3029 = vadd.xlane.f32.xlu0 %v3028_v59 }
 0x2c8   : > { %v3031_v21 = vadd.f32 %v2985_v43, %v2984_v22 }
 0x2ca   : > { %3032 = vadd.xlane.f32.xlu1 %v3031_v21 }
 0x305   : > { %v2988_v6 = vpop.xlane.xlu0 %2987 }
 0x306   : > { %v3034_v11 = vmax.f32 %v2988_v6, 1e-12 }
 0x308   : > { %4487 = vrsqrt.f32 %v3034_v11 }
 0x309   : > { %v2991_v44 = vpop.xlane.xlu0 %2990 }
 0x30a   : > { %v3035_v2 = vmax.f32 %v2991_v44, 1e-12 }
 0x30c   : > { %4489 = vrsqrt.f32 %v3035_v2 }
 0x315   : > { %v4488_v63 = vpop.eup %4487 }
 0x316   : > { %v3066_v61 = vmul.f32 %v4488_v63, %v6587_v20  ;;  %v3067_v35 = vmul.f32 %v4488_v63, %v6589_v5  ;;  %v4553_v63 = vld [vmem:[%s4913_s29 + $0x10] sm:$0xff] }
 0x318   : > { %v3131_v30 = vsub.f32 %v3066_v61, %v3098_v49  ;;  %v3132_v54 = vsub.f32 %v3067_v35, %v3099_v9  ;;  %v2994_v34 = vpop.xlane.xlu1 %2993  ;;  %v3102_v61 = vunpack.c.l.bf16 %v4553_v63  ;;  %v3103_v35 = vunpack.c.h.bf16 %v4553_v63 }
 0x319   : > { %v4490_v32 = vpop.eup %4489  ;;  %v3036_v13 = vmax.f32 %v2994_v34, 1e-12 }
 0x31a   : > { %v3174_v39 = vmul.f32 %v6722_v8, %v3131_v30  ;;  %v3175_v55 = vmul.f32 %v6725_v58, %v3132_v54  ;;  %v3068_v20 = vmul.f32 %v4490_v32, %v6591_v14  ;;  %v3069_v5 = vmul.f32 %v4490_v32, %v6597_v4  ;;  %v4554_v32 = vld [vmem:[%s4913_s29 + $0x18] sm:$0xff] }
 0x31b   : > { %4491 = vrsqrt.f32 %v3036_v13  ;;  %v3104_v34 = vunpack.c.l.bf16 %v4554_v32 }
 0x31c   : > { %v6732_v16 = vadd.f32 %v3174_v39, %v3098_v49  ;;  %v6734_v0 = vadd.f32 %v3175_v55, %v3099_v9  ;;  %v3133_v18 = vsub.f32 %v3068_v20, %v3100_v25  ;;  %v3134_v59 = vsub.f32 %v3069_v5, %v3101_v7  ;;  %v2997_v22 = vpop.xlane.xlu1 %2996 }
 0x31d   : > { %v3037_v6 = vmax.f32 %v2997_v22, 1e-12  ;;  %v3105_v39 = vunpack.c.h.bf16 %v4554_v32 }
 0x31e   : > { %v3238_v43 = vmul.f32 %v6732_v16, %v6732_v16  ;;  %v3239_v21 = vmul.f32 %v6734_v0, %v6734_v0  ;;  %v3176_v14 = vmul.f32 %v6722_v8, %v3133_v18  ;;  %v3177_v4 = vmul.f32 %v6725_v58, %v3134_v59 }
 0x31f   : > { %4493 = vrsqrt.f32 %v3037_v6 }
 0x320   : > { %v3270_v11 = vadd.f32 %v3239_v21, %v3238_v43  ;;  %v6742_v44 = vadd.f32 %v3176_v14, %v3100_v25  ;;  %v6744_v2 = vadd.f32 %v3177_v4, %v3101_v7 }
 0x322   : > { %3271 = vadd.xlane.f32.xlu0 %v3270_v11  ;;  %v3240_v40 = vmul.f32 %v6742_v44, %v6742_v44  ;;  %v3241_v50 = vmul.f32 %v6744_v2, %v6744_v2 }
 0x324   : > { %v3273_v49 = vadd.f32 %v3241_v50, %v3240_v40 }
 0x326   : > { %3274 = vadd.xlane.f32.xlu1 %v3273_v49 }
 0x327   : > { %v3000_v9 = vpop.xlane.xlu0 %2999 }
 0x328   : > { %v4492_v37 = vpop.eup %4491  ;;  %v3038_v57 = vmax.f32 %v3000_v9, 1e-12 }
 0x329   : > { %v3070_v30 = vmul.f32 %v4492_v37, %v6603_v3  ;;  %v3071_v54 = vmul.f32 %v4492_v37, %v6605_v51 }
 0x32a   : > { %4495 = vrsqrt.f32 %v3038_v57 }
 0x32b   : > { %v3003_v48 = vpop.xlane.xlu1 %3002  ;;  %v3135_v25 = vsub.f32 %v3070_v30, %v3102_v61  ;;  %v3136_v7 = vsub.f32 %v3071_v54, %v3103_v35 }
 0x32c   : > { %v4494_v55 = vpop.eup %4493  ;;  %v3039_v20 = vmax.f32 %v3003_v48, 1e-12 }
 0x32d   : > { %v3178_v5 = vmul.f32 %v6722_v8, %v3135_v25  ;;  %v3179_v13 = vmul.f32 %v6725_v58, %v3136_v7  ;;  %v3072_v18 = vmul.f32 %v4494_v55, %v6607_v62  ;;  %v3073_v59 = vmul.f32 %v4494_v55, %v6613_v53  ;;  %v4556_v55 = vld [vmem:[%s4913_s29 + $0x28] sm:$0xff] }
 0x32e   : > { %4497 = vrsqrt.f32 %v3039_v20  ;;  %v3108_v20 = vunpack.c.l.bf16 %v4556_v55 }
 0x32f   : > { %v3006_v3 = vpop.xlane.xlu0 %3005  ;;  %v6758_v51 = vadd.f32 %v3178_v5, %v3102_v61  ;;  %v6760_v22 = vadd.f32 %v3179_v13, %v3103_v35  ;;  %v3137_v43 = vsub.f32 %v3072_v18, %v3104_v34  ;;  %v3138_v21 = vsub.f32 %v3073_v59, %v3105_v39  ;;  %v4555_v35 = vld [vmem:[%s4913_s29 + $0x20] sm:$0xff] }
 0x330   : > { %v3040_v14 = vmax.f32 %v3006_v3, 1e-12  ;;  %v3106_v37 = vunpack.c.l.bf16 %v4555_v35  ;;  %v3107_v57 = vunpack.c.h.bf16 %v4555_v35  ;;  %v3109_v18 = vunpack.c.h.bf16 %v4556_v55 }
 0x331   : > { %v3242_v4 = vmul.f32 %v6758_v51, %v6758_v51  ;;  %v3243_v6 = vmul.f32 %v6760_v22, %v6760_v22  ;;  %v3180_v62 = vmul.f32 %v6722_v8, %v3137_v43  ;;  %v3181_v53 = vmul.f32 %v6725_v58, %v3138_v21 }
 0x332   : > { %4499 = vrsqrt.f32 %v3040_v14 }
 0x333   : > { %v3009_v11 = vpop.xlane.xlu1 %3008  ;;  %v3276_v40 = vadd.f32 %v3243_v6, %v3242_v4  ;;  %v6768_v50 = vadd.f32 %v3180_v62, %v3104_v34  ;;  %v6770_v49 = vadd.f32 %v3181_v53, %v3105_v39 }
 0x334   : > { %v3041_v9 = vmax.f32 %v3009_v11, 1e-12  ;;  %v4557_v11 = vld [vmem:[%s4913_s29 + $0x30] sm:$0xff] }
 0x335   : > { %3277 = vadd.xlane.f32.xlu0 %v3276_v40  ;;  %v3244_v63 = vmul.f32 %v6768_v50, %v6768_v50  ;;  %v3245_v61 = vmul.f32 %v6770_v49, %v6770_v49  ;;  %v3110_v40 = vunpack.c.l.bf16 %v4557_v11 }
 0x336   : > { %4501 = vrsqrt.f32 %v3041_v9  ;;  %v3111_v9 = vunpack.c.h.bf16 %v4557_v11 }
 0x337   : > { %v4496_v30 = vpop.eup %4495  ;;  %v3012_v54 = vpop.xlane.xlu0 %3011  ;;  %v3279_v48 = vadd.f32 %v3245_v61, %v3244_v63 }
 0x338   : > { %v3042_v25 = vmax.f32 %v3012_v54, 1e-12  ;;  %v3074_v7 = vmul.f32 %v4496_v30, %v6619_v36  ;;  %v3075_v32 = vmul.f32 %v4496_v30, %v6621_v23  ;;  %v4558_v30 = vld [vmem:[%s4913_s29 + $0x38] sm:$0xff] }
 0x339   : > { %3280 = vadd.xlane.f32.xlu1 %v3279_v48  ;;  %v3112_v54 = vunpack.c.l.bf16 %v4558_v30 }
 0x33a   : > { %4503 = vrsqrt.f32 %v3042_v25  ;;  %v3139_v34 = vsub.f32 %v3074_v7, %v3106_v37  ;;  %v3140_v39 = vsub.f32 %v3075_v32, %v3107_v57  ;;  %v3113_v7 = vunpack.c.h.bf16 %v4558_v30 }
 0x33b   : > { %v4498_v5 = vpop.eup %4497  ;;  %v3015_v13 = vpop.xlane.xlu1 %3014 }
 0x33c   : > { %v3043_v59 = vmax.f32 %v3015_v13, 1e-12  ;;  %v3182_v3 = vmul.f32 %v6722_v8, %v3139_v34  ;;  %v3183_v43 = vmul.f32 %v6725_v58, %v3140_v39  ;;  %v3076_v21 = vmul.f32 %v4498_v5, %v6627_v60 }
 0x33d   : > { %v3077_v36 = vmul.f32 %v4498_v5, %v6629_v26 }
 0x33e   : > { %4505 = vrsqrt.f32 %v3043_v59  ;;  %v6784_v23 = vadd.f32 %v3182_v3, %v3106_v37  ;;  %v6786_v14 = vadd.f32 %v3183_v43, %v3107_v57  ;;  %v3141_v4 = vsub.f32 %v3076_v21, %v3108_v20 }
 0x33f   : > { %v4500_v6 = vpop.eup %4499  ;;  %v3018_v62 = vpop.xlane.xlu0 %3017  ;;  %v3142_v53 = vsub.f32 %v3077_v36, %v3109_v18  ;;  %v4559_v36 = vld [vmem:[%s4913_s29 + $0x40] sm:$0xff] }
 0x340   : > { %v3044_v63 = vmax.f32 %v3018_v62, 1e-12  ;;  %v3246_v61 = vmul.f32 %v6784_v23, %v6784_v23  ;;  %v3247_v60 = vmul.f32 %v6786_v14, %v6786_v14  ;;  %v3184_v26 = vmul.f32 %v6722_v8, %v3141_v4 }
 0x341   : > { %v3185_v35 = vmul.f32 %v6725_v58, %v3142_v53  ;;  %v3078_v37 = vmul.f32 %v4500_v6, %v6635_v33  ;;  %v3079_v57 = vmul.f32 %v4500_v6, %v6637_v15  ;;  %v3114_v4 = vunpack.c.l.bf16 %v4559_v36 }
 0x342   : > { %4507 = vrsqrt.f32 %v3044_v63  ;;  %v3282_v48 = vadd.f32 %v3247_v60, %v3246_v61  ;;  %v6798_v25 = vadd.f32 %v3184_v26, %v3108_v20 }
 0x343   : > { %v4502_v32 = vpop.eup %4501  ;;  %v3021_v34 = vpop.xlane.xlu1 %3020  ;;  %v6800_v39 = vadd.f32 %v3185_v35, %v3109_v18  ;;  %v3143_v55 = vsub.f32 %v3078_v37, %v3110_v40  ;;  %v3144_v5 = vsub.f32 %v3079_v57, %v3111_v9 }
 0x344   : > { %v3045_v13 = vmax.f32 %v3021_v34, 1e-12  ;;  %3283 = vadd.xlane.f32.xlu0 %v3282_v48  ;;  %v3248_v33 = vmul.f32 %v6798_v25, %v6798_v25  ;;  %v3080_v15 = vmul.f32 %v4502_v32, %v6643_v27  ;;  %v3081_v59 = vmul.f32 %v4502_v32, %v6645_v42 }
 0x345   : > { %v3249_v20 = vmul.f32 %v6800_v39, %v6800_v39  ;;  %v3186_v3 = vmul.f32 %v6722_v8, %v3143_v55  ;;  %v3187_v43 = vmul.f32 %v6725_v58, %v3144_v5  ;;  %v3115_v42 = vunpack.c.h.bf16 %v4559_v36  ;;  %v4560_v55 = vld [vmem:[%s4913_s29 + $0x48] sm:$0xff] }
 0x346   : > { %4509 = vrsqrt.f32 %v3045_v13  ;;  %v3145_v18 = vsub.f32 %v3080_v15, %v3112_v54  ;;  %v3146_v21 = vsub.f32 %v3081_v59, %v3113_v7  ;;  %v3116_v5 = vunpack.c.l.bf16 %v4560_v55 }
 0x347   : > { %v4504_v6 = vpop.eup %4503  ;;  %v3024_v62 = vpop.xlane.xlu0 %3023  ;;  %v3285_v53 = vadd.f32 %v3249_v20, %v3248_v33  ;;  %v6811_v11 = vadd.f32 %v3186_v3, %v3110_v40  ;;  %v6813_v27 = vadd.f32 %v3187_v43, %v3111_v9  ;;  %v3117_v13 = vunpack.c.h.bf16 %v4560_v55  ;;  %v4561_v3 = vld [vmem:[%s4913_s29 + $0x50] sm:$0xff] }
 0x348   : > { %v3046_v63 = vmax.f32 %v3024_v62, 1e-12  ;;  %v3188_v61 = vmul.f32 %v6722_v8, %v3145_v18  ;;  %v3189_v60 = vmul.f32 %v6725_v58, %v3146_v21  ;;  %v3082_v26 = vmul.f32 %v4504_v6, %v6651_v47 }
 0x349   : > { %3286 = vadd.xlane.f32.xlu1 %v3285_v53  ;;  %v3250_v35 = vmul.f32 %v6811_v11, %v6811_v11  ;;  %v3251_v37 = vmul.f32 %v6813_v27, %v6813_v27  ;;  %v3083_v40 = vmul.f32 %v4504_v6, %v6653_v10  ;;  %v3118_v43 = vunpack.c.l.bf16 %v4561_v3 }
 0x34a   : > { %4511 = vrsqrt.f32 %v3046_v63  ;;  %v6823_v9 = vadd.f32 %v3188_v61, %v3112_v54  ;;  %v6825_v57 = vadd.f32 %v3189_v60, %v3113_v7  ;;  %v3147_v30 = vsub.f32 %v3082_v26, %v3114_v4 }
 0x34b   : > { %v4506_v48 = vpop.eup %4505  ;;  %v3027_v32 = vpop.xlane.xlu1 %3026  ;;  %v3288_v34 = vadd.f32 %v3251_v37, %v3250_v35  ;;  %v3148_v47 = vsub.f32 %v3083_v40, %v3115_v42  ;;  %v3119_v36 = vunpack.c.h.bf16 %v4561_v3 }
 0x34c   : > { %v3047_v33 = vmax.f32 %v3027_v32, 1e-12  ;;  %v3252_v15 = vmul.f32 %v6823_v9, %v6823_v9  ;;  %v3253_v10 = vmul.f32 %v6825_v57, %v6825_v57  ;;  %v3190_v54 = vmul.f32 %v6722_v8, %v3147_v30  ;;  %v4562_v30 = vld [vmem:[%s4913_s29 + $0x58] sm:$0xff] }
 0x34d   : > { %3289 = vadd.xlane.f32.xlu0 %v3288_v34  ;;  %v3191_v7 = vmul.f32 %v6725_v58, %v3148_v47  ;;  %v3084_v59 = vmul.f32 %v4506_v48, %v6659_v28  ;;  %v3085_v20 = vmul.f32 %v4506_v48, %v6661_v38  ;;  %v3120_v48 = vunpack.c.l.bf16 %v4562_v30 }
 0x34e   : > { %4513 = vrsqrt.f32 %v3047_v33  ;;  %v3291_v18 = vadd.f32 %v3253_v10, %v3252_v15  ;;  %v6837_v21 = vadd.f32 %v3190_v54, %v3114_v4  ;;  %v3121_v32 = vunpack.c.h.bf16 %v4562_v30 }
 0x34f   : > { %v4508_v6 = vpop.eup %4507  ;;  %v6839_v62 = vadd.f32 %v3191_v7, %v3115_v42  ;;  %v3149_v53 = vsub.f32 %v3084_v59, %v3116_v5  ;;  %v3150_v63 = vsub.f32 %v3085_v20, %v3117_v13  ;;  %v3030_v61 = vpop.xlane.xlu0 %3029 }
 0x350   : > { %3292 = vadd.xlane.f32.xlu1 %v3291_v18  ;;  %v3254_v28 = vmul.f32 %v6837_v21, %v6837_v21  ;;  %v3086_v38 = vmul.f32 %v4508_v6, %v6667_v56  ;;  %v3087_v60 = vmul.f32 %v4508_v6, %v6669_v12  ;;  %v3048_v26 = vmax.f32 %v3030_v61, 1e-12 }
 0x351   : > { %v3255_v4 = vmul.f32 %v6839_v62, %v6839_v62  ;;  %v3192_v35 = vmul.f32 %v6722_v8, %v3149_v53  ;;  %v3193_v42 = vmul.f32 %v6725_v58, %v3150_v63  ;;  %v4563_v53 = vld [vmem:[%s4913_s29 + $0x60] sm:$0xff] }
 0x352   : > { %v3151_v37 = vsub.f32 %v3086_v38, %v3118_v43  ;;  %v3152_v40 = vsub.f32 %v3087_v60, %v3119_v36  ;;  %4515 = vrsqrt.f32 %v3048_v26  ;;  %v3123_v63 = vunpack.c.h.bf16 %v4563_v53  ;;  %v4564_v26 = vld [vmem:[%s4913_s29 + $0x68] sm:$0xff] }
 0x353   : > { %v4510_v34 = vpop.eup %4509  ;;  %v3294_v47 = vadd.f32 %v3255_v4, %v3254_v28  ;;  %v6850_v55 = vadd.f32 %v3192_v35, %v3116_v5  ;;  %v6852_v56 = vadd.f32 %v3193_v42, %v3117_v13  ;;  %v3033_v12 = vpop.xlane.xlu1 %3032  ;;  %v3124_v4 = vunpack.c.l.bf16 %v4564_v26 }
 0x354   : > { %v3194_v33 = vmul.f32 %v6722_v8, %v3151_v37  ;;  %v3195_v15 = vmul.f32 %v6725_v58, %v3152_v40  ;;  %v3088_v10 = vmul.f32 %v4510_v34, %v6675_v41  ;;  %v3089_v54 = vmul.f32 %v4510_v34, %v6677_v52 }
 0x355   : > { %v3049_v7 = vmax.f32 %v3033_v12, 1e-12  ;;  %3295 = vadd.xlane.f32.xlu0 %v3294_v47  ;;  %v3256_v59 = vmul.f32 %v6850_v55, %v6850_v55  ;;  %v3257_v5 = vmul.f32 %v6852_v56, %v6852_v56  ;;  %v3122_v52 = vunpack.c.l.bf16 %v4563_v53 }
 0x356   : > { %v6862_v13 = vadd.f32 %v3194_v33, %v3118_v43  ;;  %v6864_v20 = vadd.f32 %v3195_v15, %v3119_v36  ;;  %v3153_v3 = vsub.f32 %v3088_v10, %v3120_v48  ;;  %v3154_v18 = vsub.f32 %v3089_v54, %v3121_v32 }
 0x357   : > { %v4512_v6 = vpop.eup %4511  ;;  %4517 = vrsqrt.f32 %v3049_v7  ;;  %v3297_v41 = vadd.f32 %v3257_v5, %v3256_v59  ;;  %v3125_v40 = vunpack.c.h.bf16 %v4564_v26  ;;  %v4565_v5 = vld [vmem:[%s4913_s29 + $0x70] sm:$0xff] }
 0x358   : > { %v3258_v61 = vmul.f32 %v6862_v13, %v6862_v13  ;;  %v3259_v28 = vmul.f32 %v6864_v20, %v6864_v20  ;;  %v3196_v43 = vmul.f32 %v6722_v8, %v3153_v3  ;;  %v3197_v36 = vmul.f32 %v6725_v58, %v3154_v18 }
 0x359   : > { %3298 = vadd.xlane.f32.xlu1 %v3297_v41  ;;  %v3090_v38 = vmul.f32 %v4512_v6, %v6683_v45  ;;  %v3091_v60 = vmul.f32 %v4512_v6, %v6685_v1  ;;  %v3126_v3 = vunpack.c.l.bf16 %v4565_v5  ;;  %v3127_v18 = vunpack.c.h.bf16 %v4565_v5 }
 0x35a   : > { %v3300_v35 = vadd.f32 %v3259_v28, %v3258_v61  ;;  %v6876_v42 = vadd.f32 %v3196_v43, %v3120_v48  ;;  %v6878_v37 = vadd.f32 %v3197_v36, %v3121_v32  ;;  %v4566_v43 = vld [vmem:[%s4913_s29 + $0x78] sm:$0xff]  ;;  %s296_s29 = sand.u32 1, %s4635_s25  }
 0x35b   : > { %v4514_v30 = vpop.eup %4513  ;;  %v3155_v34 = vsub.f32 %v3090_v38, %v3122_v52  ;;  %v3156_v47 = vsub.f32 %v3091_v60, %v3123_v63  ;;  %v3128_v36 = vunpack.c.l.bf16 %v4566_v43  ;;  %s3601_s16 = sshll.u32 %s296_s29, 7  ;;  %s6997_s13 = scalar_lea.sflag [#allocation3], %s296_s29 }
 0x35c   : > { %3301 = vadd.xlane.f32.xlu0 %v3300_v35  ;;  %v3260_v12 = vmul.f32 %v6876_v42, %v6876_v42  ;;  %v3261_v45 = vmul.f32 %v6878_v37, %v6878_v37  ;;  %v3092_v1 = vmul.f32 %v4514_v30, %v6691_v46  ;;  %v3093_v33 = vmul.f32 %v4514_v30, %v6693_v17  ;;  %s6937_s17 = scalar_lea.vmem [#allocation2], %s3601_s16 }
 0x35d   : > { %v3198_v48 = vmul.f32 %v6722_v8, %v3155_v34  ;;  %v3199_v32 = vmul.f32 %v6725_v58, %v3156_v47  ;;  %v3129_v35 = vunpack.c.h.bf16 %v4566_v43  ;;  %s3511_s21 = sshll.u32 %s6937_s17, 4  ;;  %s6992_s21 = int_to_ptr.vmem [resolvable:$true] %s3511_s21 }
 0x35e   : > { %v3303_v15 = vadd.f32 %v3261_v45, %v3260_v12  ;;  %v3157_v10 = vsub.f32 %v3092_v1, %v3124_v4  ;;  %v3158_v54 = vsub.f32 %v3093_v33, %v3125_v40  ;;  %s4567_s9 = scalar_lea.vmem %s6992_s21, 2048  ;;  %p4574_p4 = scmp.lt.s32.totalorder %s6992_s21, %s4572_s30 }
 0x35f   : > { %v6888_v7 = vadd.f32 %v3198_v48, %v3122_v52  ;;  %v6890_v59 = vadd.f32 %v3199_v32, %v3123_v63  ;;  %v4516_v6 = vpop.eup %4515  ;;  %p4568_p0 = scmp.ne.s32.totalorder %s6992_s21, %s4567_s9  ;;  %p4575_p5 = scmp.lt.s32.totalorder %s4573_s12, %s4567_s9 }
 0x360   : > { %3304 = vadd.xlane.f32.xlu1 %v3303_v15  ;;  %v3200_v46 = vmul.f32 %v6722_v8, %v3157_v10  ;;  %v3201_v17 = vmul.f32 %v6725_v58, %v3158_v54  ;;  %v3094_v52 = vmul.f32 %v4516_v6, %v6699_v19  ;;  %v3095_v63 = vmul.f32 %v4516_v6, %v6701_v24 }
 0x361   : > { %v3262_v41 = vmul.f32 %v6888_v7, %v6888_v7  ;;  %v3263_v53 = vmul.f32 %v6890_v59, %v6890_v59  ;;  %p4569_p1 = pnand %p4568_p0, %p4755_p3  ;;  %p4576_p6 = por %p4575_p5, %p4574_p4 }
 0x362   : > { %v6901_v61 = vadd.f32 %v3200_v46, %v3124_v4  ;;  %v6903_v28 = vadd.f32 %v3201_v17, %v3125_v40  ;;  %v3159_v60 = vsub.f32 %v3094_v52, %v3126_v3  ;;  %v3160_v26 = vsub.f32 %v3095_v63, %v3127_v18 }
 0x363   : > { %v3306_v38 = vadd.f32 %v3263_v53, %v3262_v41  ;;  %p4570_p2 = pneg %p4569_p1 }
 0x364   : > { %v4518_v30 = vpop.eup %4517  ;;  %v3264_v34 = vmul.f32 %v6901_v61, %v6901_v61  ;;  %v3265_v47 = vmul.f32 %v6903_v28, %v6903_v28  ;;  %v3202_v19 = vmul.f32 %v6722_v8, %v3159_v60  ;;  %v3203_v24 = vmul.f32 %v6725_v58, %v3160_v26 }
 0x365   : > { %3307 = vadd.xlane.f32.xlu0 %v3306_v38  ;;  %v3096_v4 = vmul.f32 %v4518_v30, %v6707_v31  ;;  %v3097_v40 = vmul.f32 %v4518_v30, %v6709_v29  ;;  %p4577_p7 = pnand %p4576_p6, %p4570_p2 }
 0x366   : > { %v3309_v12 = vadd.f32 %v3265_v47, %v3264_v34  ;;  %v6914_v45 = vadd.f32 %v3202_v19, %v3126_v3  ;;  %v6916_v1 = vadd.f32 %v3203_v24, %v3127_v18 }
 0x367   : > { %v3161_v33 = vsub.f32 %v3096_v4, %v3128_v36  ;;  %v3162_v48 = vsub.f32 %v3097_v40, %v3129_v35 }
 0x368   : > { %3310 = vadd.xlane.f32.xlu1 %v3309_v12  ;;  %v3266_v32 = vmul.f32 %v6914_v45, %v6914_v45  ;;  %v3267_v15 = vmul.f32 %v6916_v1, %v6916_v1 }
 0x369   : > { %v3204_v10 = vmul.f32 %v6722_v8, %v3161_v33  ;;  %v3205_v31 = vmul.f32 %v6725_v58, %v3162_v48 }
 0x36a   : > { %v3312_v29 = vadd.f32 %v3267_v15, %v3266_v32 }
 0x36b   : > { %v6924_v54 = vadd.f32 %v3204_v10, %v3128_v36  ;;  %v6926_v5 = vadd.f32 %v3205_v31, %v3129_v35 }
 0x36c   : > { %3313 = vadd.xlane.f32.xlu0 %v3312_v29 }
 0x36d   : > { %v3268_v3 = vmul.f32 %v6924_v54, %v6924_v54  ;;  %v3269_v18 = vmul.f32 %v6926_v5, %v6926_v5 }
 0x36f   : > { %v3315_v6 = vadd.f32 %v3269_v18, %v3268_v3 }
 0x371   : > { %3316 = vadd.xlane.f32.xlu1 %v3315_v6 }
 0x3ab   : > { %v3272_v46 = vpop.xlane.xlu0 %3271 }
 0x3ac   : > { %v3318_v8 = vmax.f32 %v3272_v46, 1e-12 }
 0x3ae   : > { %4519 = vrsqrt.f32 %v3318_v8 }
 0x3af   : > { %v3275_v17 = vpop.xlane.xlu1 %3274 }
 0x3b0   : > { %v3319_v58 = vmax.f32 %v3275_v17, 1e-12 }
 0x3b2   : > { %4521 = vrsqrt.f32 %v3319_v58 }
 0x3bb   : > { %v4520_v41 = vpop.eup %4519 }
 0x3bc   : > { %v3350_v53 = vmul.f32 %v4520_v41, %v6732_v16  ;;  %v3351_v52 = vmul.f32 %v4520_v41, %v6734_v0 }
 0x3be   : > { %v3837_v63 = vpack.c.bf16 %v3351_v52, %v3350_v53  ;;  %v3278_v60 = vpop.xlane.xlu0 %3277 }
 0x3bf   : > { %v4522_v43 = vpop.eup %4521  ;;  %v3320_v26 = vmax.f32 %v3278_v60, 1e-12 }
 0x3c0   : > { %3478 = vst [vmem:[%s6937_s17] sm:$0xff] %v3837_v63  ;;  %v3352_v36 = vmul.f32 %v4522_v43, %v6742_v44  ;;  %v3353_v38 = vmul.f32 %v4522_v43, %v6744_v2 }
 0x3c1   : > { %4523 = vrsqrt.f32 %v3320_v26 }
 0x3c2   : > { %v3838_v35 = vpack.c.bf16 %v3353_v38, %v3352_v36  ;;  %v3281_v16 = vpop.xlane.xlu1 %3280 }
 0x3c3   : > { %v3321_v30 = vmax.f32 %v3281_v16, 1e-12 }
 0x3c4   : > { %3479 = vst [vmem:[%s6937_s17 + $0x8] sm:$0xff] %v3838_v35 }
 0x3c5   : > { %4525 = vrsqrt.f32 %v3321_v30 }
 0x3cd   : > { %v3284_v0 = vpop.xlane.xlu0 %3283 }
 0x3ce   : > { %v4524_v34 = vpop.eup %4523  ;;  %v3322_v47 = vmax.f32 %v3284_v0, 1e-12 }
 0x3cf   : > { %v3354_v19 = vmul.f32 %v4524_v34, %v6758_v51  ;;  %v3355_v24 = vmul.f32 %v4524_v34, %v6760_v22 }
 0x3d0   : > { %4527 = vrsqrt.f32 %v3322_v47 }
 0x3d1   : > { %v3839_v44 = vpack.c.bf16 %v3355_v24, %v3354_v19 }
 0x3d2   : > { %v4526_v2 = vpop.eup %4525  ;;  %v3287_v4 = vpop.xlane.xlu1 %3286 }
 0x3d3   : > { %3480 = vst [vmem:[%s6937_s17 + $0x10] sm:$0xff] %v3839_v44  ;;  %v3356_v40 = vmul.f32 %v4526_v2, %v6768_v50  ;;  %v3357_v12 = vmul.f32 %v4526_v2, %v6770_v49  ;;  %v3323_v33 = vmax.f32 %v3287_v4, 1e-12 }
 0x3d5   : > { %v3840_v48 = vpack.c.bf16 %v3357_v12, %v3356_v40  ;;  %4529 = vrsqrt.f32 %v3323_v33 }
 0x3d6   : > { %v3290_v32 = vpop.xlane.xlu0 %3289 }
 0x3d7   : > { %3481 = vst [vmem:[%s6937_s17 + $0x18] sm:$0xff] %v3840_v48  ;;  %v3324_v15 = vmax.f32 %v3290_v32, 1e-12 }
 0x3d9   : > { %4531 = vrsqrt.f32 %v3324_v15  ;;  %v3293_v51 = vpop.xlane.xlu1 %3292 }
 0x3da   : > { %v3325_v10 = vmax.f32 %v3293_v51, 1e-12 }
 0x3dc   : > { %4533 = vrsqrt.f32 %v3325_v10 }
 0x3dd   : > { %v4528_v22 = vpop.eup %4527 }
 0x3de   : > { %v3358_v31 = vmul.f32 %v4528_v22, %v6784_v23  ;;  %v3359_v29 = vmul.f32 %v4528_v22, %v6786_v14  ;;  %v3296_v50 = vpop.xlane.xlu0 %3295 }
 0x3df   : > { %v3326_v3 = vmax.f32 %v3296_v50, 1e-12 }
 0x3e0   : > { %v3841_v49 = vpack.c.bf16 %v3359_v29, %v3358_v31 }
 0x3e1   : > { %4535 = vrsqrt.f32 %v3326_v3 }
 0x3e2   : > { %v4530_v18 = vpop.eup %4529  ;;  %3482 = vst [vmem:[%s6937_s17 + $0x20] sm:$0xff] %v3841_v49  ;;  %v3299_v6 = vpop.xlane.xlu1 %3298 }
 0x3e3   : > { %v3360_v46 = vmul.f32 %v4530_v18, %v6798_v25  ;;  %v3361_v8 = vmul.f32 %v4530_v18, %v6800_v39  ;;  %v3327_v17 = vmax.f32 %v3299_v6, 1e-12 }
 0x3e5   : > { %v3842_v58 = vpack.c.bf16 %v3361_v8, %v3360_v46  ;;  %4537 = vrsqrt.f32 %v3327_v17  ;;  %v3302_v41 = vpop.xlane.xlu0 %3301 }
 0x3e6   : > { %v4532_v23 = vpop.eup %4531  ;;  %v3328_v14 = vmax.f32 %v3302_v41, 1e-12 }
 0x3e7   : > { %3483 = vst [vmem:[%s6937_s17 + $0x28] sm:$0xff] %v3842_v58  ;;  %v3362_v53 = vmul.f32 %v4532_v23, %v6811_v11  ;;  %v3363_v52 = vmul.f32 %v4532_v23, %v6813_v27 }
 0x3e8   : > { %4539 = vrsqrt.f32 %v3328_v14 }
 0x3e9   : > { %v4534_v63 = vpop.eup %4533  ;;  %v3843_v43 = vpack.c.bf16 %v3363_v52, %v3362_v53  ;;  %v3305_v36 = vpop.xlane.xlu1 %3304 }
 0x3ea   : > { %v3364_v25 = vmul.f32 %v4534_v63, %v6823_v9  ;;  %v3365_v39 = vmul.f32 %v4534_v63, %v6825_v57  ;;  %v3329_v38 = vmax.f32 %v3305_v36, 1e-12 }
 0x3eb   : > { %3484 = vst [vmem:[%s6937_s17 + $0x30] sm:$0xff] %v3843_v43 }
 0x3ec   : > { %v3844_v60 = vpack.c.bf16 %v3365_v39, %v3364_v25  ;;  %4541 = vrsqrt.f32 %v3329_v38 }
 0x3ee   : > { %v4536_v26 = vpop.eup %4535  ;;  %3485 = vst [vmem:[%s6937_s17 + $0x38] sm:$0xff] %v3844_v60  ;;  %v3308_v35 = vpop.xlane.xlu0 %3307 }
 0x3ef   : > { %v3366_v11 = vmul.f32 %v4536_v26, %v6837_v21  ;;  %v3367_v27 = vmul.f32 %v4536_v26, %v6839_v62  ;;  %v3330_v16 = vmax.f32 %v3308_v35, 1e-12 }
 0x3f1   : > { %v3845_v30 = vpack.c.bf16 %v3367_v27, %v3366_v11  ;;  %4543 = vrsqrt.f32 %v3330_v16  ;;  %v3311_v0 = vpop.xlane.xlu1 %3310 }
 0x3f2   : > { %v4538_v9 = vpop.eup %4537  ;;  %v3331_v57 = vmax.f32 %v3311_v0, 1e-12 }
 0x3f3   : > { %3486 = vst [vmem:[%s6937_s17 + $0x40] sm:$0xff] %v3845_v30  ;;  %v3368_v34 = vmul.f32 %v4538_v9, %v6850_v55  ;;  %v3369_v47 = vmul.f32 %v4538_v9, %v6852_v56 }
 0x3f4   : > { %4545 = vrsqrt.f32 %v3331_v57 }
 0x3f5   : > { %v4540_v19 = vpop.eup %4539  ;;  %v3846_v24 = vpack.c.bf16 %v3369_v47, %v3368_v34  ;;  %v3314_v44 = vpop.xlane.xlu0 %3313 }
 0x3f6   : > { %v3370_v21 = vmul.f32 %v4540_v19, %v6862_v13  ;;  %v3371_v62 = vmul.f32 %v4540_v19, %v6864_v20  ;;  %v3332_v2 = vmax.f32 %v3314_v44, 1e-12 }
 0x3f7   : > { %3487 = vst [vmem:[%s6937_s17 + $0x48] sm:$0xff] %v3846_v24 }
 0x3f8   : > { %v3847_v4 = vpack.c.bf16 %v3371_v62, %v3370_v21  ;;  %4547 = vrsqrt.f32 %v3332_v2 }
 0x3f9   : > { %v4542_v40 = vpop.eup %4541 }
 0x3fa   : > { %3488 = vst [vmem:[%s6937_s17 + $0x50] sm:$0xff] %v3847_v4  ;;  %v3372_v55 = vmul.f32 %v4542_v40, %v6876_v42  ;;  %v3373_v56 = vmul.f32 %v4542_v40, %v6878_v37  ;;  %v3317_v12 = vpop.xlane.xlu1 %3316 }
 0x3fb   : > { %v3333_v33 = vmax.f32 %v3317_v12, 1e-12 }
 0x3fc   : > { %v3848_v13 = vpack.c.bf16 %v3373_v56, %v3372_v55 }
 0x3fd   : > { %4549 = vrsqrt.f32 %v3333_v33 }
 0x3fe   : > { %v4544_v20 = vpop.eup %4543  ;;  %3489 = vst [vmem:[%s6937_s17 + $0x58] sm:$0xff] %v3848_v13 }
 0x3ff   : > { %v3374_v48 = vmul.f32 %v4544_v20, %v6888_v7  ;;  %v3375_v32 = vmul.f32 %v4544_v20, %v6890_v59 }
 0x401   : > { %v4546_v15 = vpop.eup %4545  ;;  %v3849_v51 = vpack.c.bf16 %v3375_v32, %v3374_v48 }
 0x402   : > { %v3376_v42 = vmul.f32 %v4546_v15, %v6901_v61  ;;  %v3377_v10 = vmul.f32 %v4546_v15, %v6903_v28 }
 0x403   : > { %3490 = vst [vmem:[%s6937_s17 + $0x60] sm:$0xff] %v3849_v51 }
 0x404   : > { %v3850_v37 = vpack.c.bf16 %v3377_v10, %v3376_v42 }
 0x405   : > { %v4548_v22 = vpop.eup %4547 }
 0x406   : > { %3491 = vst [vmem:[%s6937_s17 + $0x68] sm:$0xff] %v3850_v37  ;;  %v3378_v7 = vmul.f32 %v4548_v22, %v6914_v45  ;;  %v3379_v59 = vmul.f32 %v4548_v22, %v6916_v1 }
 0x408   : > { %v3851_v31 = vpack.c.bf16 %v3379_v59, %v3378_v7 }
 0x40a   : > { %v4550_v61 = vpop.eup %4549  ;;  %3492 = vst [vmem:[%s6937_s17 + $0x70] sm:$0xff] %v3851_v31 }
 0x40b   : > { %v3380_v28 = vmul.f32 %v4550_v61, %v6924_v54  ;;  %v3381_v29 = vmul.f32 %v4550_v61, %v6926_v5 }
 0x40d   : > { %v3852_v45 = vpack.c.bf16 %v3381_v29, %v3380_v28 }
 0x40f   : > { %3493 = vst [vmem:[%s6937_s17 + $0x78] sm:$0xff] %v3852_v45 }
 0x410   : > { %4580 = shalt.err (!%p4577_p7)
}
 0x411   : > { %s4581_s29 = scalar_lea.hbm %s6990_s23, 2048  ;;  %s4585_s18 = scalar_lea.hbm %s7055_s7, 8192 }
 0x412   : > { %p4582_p9 = scmp.ne.s32.totalorder %s6990_s23, %s4581_s29  ;;  %p4586_p12 = scmp.lt.s32.totalorder %s6990_s23, %s7055_s7 }
 0x413   : > { %p4587_p13 = scmp.lt.s32.totalorder %s4585_s18, %s4581_s29 }
 0x414   : > { %p4583_p10 = pnand %p4582_p9, %p4755_p3 }
 0x415   : > { %p4588_p0 = por %p4587_p13, %p4586_p12 }
 0x416   : > { %p4584_p11 = pneg %p4583_p10 }
 0x418   : > { %p4589_p1 = pnand %p4588_p0, %p4584_p11 }
 0x41a   : > { %4592 = shalt.err (!%p4589_p1)
}
 0x41b   : > { %s4662_s10 = smov 128   ;;  %s4663_s27 = smov 8  }
 0x41c   : > { %3854 = dma.vmem_to_hbm [thread:$0]  (%p4755_p3), %s6992_s21, 2048, %s6990_s23, %s6997_s13, %s4662_s10, %s4662_s10, %s4663_s27  }
 0x41d PF: > { %p3860_p2 = scmp.ge.s32.totalorder %s4659_s8, 2  ;;  %s3526_s28 = sand.u32 1, %s4631_s24  }
 0x41e   : > { %s3527_s9 = scalar_lea.sflag [#allocation3], %s3526_s28 }
 0x41f   : > { %p3857_p4 = pnand %p3860_p2, %p4764_p8 }
 0x421   : > { %p3858_p5 = pneg %p3857_p4 }
 0x423   : > { %4626 = dma.done.wait (%p3858_p5), %s3527_s9, 2048  }
 0x424   : > { %4628 = vsyncadd (%p3858_p5), %s3527_s9, 4294965248  ;;  %s20_s8 = sadd.s32 1, %s4659_s8   ;;  %s7229_s27 = sld [smem:[#allocation5_spill]] }
 0x425   : > { %p17_p6 = scmp.ge.s32.totalorder %s20_s8, 6   ;;  %s7230_s28 = sld [smem:[#allocation6_spill]] }
 0x426   : > { %s7231_s29 = sld [smem:[#allocation7_spill]]  ;;  %s7233_s24 = smov %s4635_s25 }
 0x427   : > { %s7232_s30 = sld [smem:[#allocation8_spill]]  ;;  %s7234_s25 = smov %s4639_s26 }
 0x428   : > { %s7235_s26 = smov %s4773_s19  ;;  %19 = sbr.rel (!%p17_p6) target bundleno = 5 (0x5), region = 83 }
 0x42d   :  { %3532 = vsyncpa [#allocation3], 1 }
 0x42e   :  { %3534 = vsyncpa [#allocation3 + $0x1], 1 }

</bundles_post_ra>
